<compile_context>
chip_gen: v7x
topology: tpu7x:2x2x1
jax: 0.10.0
libtpu: 0.0.40
codegen_flags: <defaults>
</compile_context>

<pallas_src>
import jax
import jax.numpy as jnp
from jax.experimental import pallas as pl
from jax.experimental.pallas import tpu as pltpu

IMG = 28
PATCH = 7
GRID = IMG // PATCH                 # 4
NUM_PATCHES = GRID * GRID           # 16  == num_hidden in the PyTorch module
PATCH_DIM = PATCH * PATCH           # 49  == num_inputs in the PyTorch module
FLAT = NUM_PATCHES * PATCH_DIM      # 784 == flattened (pixel-in-patch, patch) width
OUT_PAD = 128                       # lane-dense padded output width (real logits = 49)
NUM_BIAS_ROWS = 3
DEFAULT_BATCH_TILE = 1024
VMEM_LIMIT_BYTES = 32 * 1024 * 1024  # covers v5e's smaller 16 MiB scoped default
COMPUTE_DTYPE = jnp.bfloat16
# TODO(synk): num_outputs is declared in Net.__init__ but never used in forward(); omitted.


def _net_kernel(x_ref, g1_ref, m12_ref, c_ref, b_ref, out_ref):
    """Three bf16 matmuls (f32 accumulate) over the flat 784-wide representation."""
    # backbone_mlp1.0 (+ Stem permutation folded into g1), batch folded into M.
    h = jnp.dot(x_ref[...], g1_ref[...], preferred_element_type=jnp.float32)
    h = jnp.maximum(h + b_ref[0:1, :], 0.0)                       # ReLU (mlp1.1), f32
    # Fused backbone_mlp1.2 @ backbone_mlp2.0 (exact: no ReLU between them).
    h = jnp.dot(h.astype(COMPUTE_DTYPE), m12_ref[...],
                preferred_element_type=jnp.float32)
    h = jnp.maximum(h + b_ref[1:2, :], 0.0)                       # ReLU (mlp2.1), f32
    # backbone_mlp2.2 with the Classifier mean folded in; lane-dense (TB, 128) store.
    out_ref[...] = (jnp.dot(h.astype(COMPUTE_DTYPE), c_ref[...],
                            preferred_element_type=jnp.float32)
                    + b_ref[2:3, :OUT_PAD])


def _flatten_params(params):
    """Build dense 784-wide layer matrices (stem, mlp1.2@mlp2.0 fusion, mean folded)."""
    w1a, b1a, w1b, b1b, w2a, b2a, w2b, b2b = [p.astype(jnp.float32) for p in params]

    eye_c = jnp.eye(PATCH_DIM, dtype=jnp.float32)       # identity over the 49 pixels
    eye_p = jnp.eye(NUM_PATCHES, dtype=jnp.float32)     # identity over the 16 patches

    # backbone_mlp1.0 acting on the patch axis: kron(I_49, W1a^T)  (784, 784)
    m1a = jnp.kron(eye_c, w1a.T)

    # Stem == fixed permutation of the 784 image pixels; fold it into the first matrix.
    q = jnp.arange(IMG * IMG)
    r, s = q // IMG, q % IMG
    perm = (((r % PATCH) * PATCH + (s % PATCH)) * NUM_PATCHES
            + ((r // PATCH) * GRID + (s // PATCH)))     # image pixel q -> flat (c, p) index
    g1 = m1a[perm, :]                                   # == P @ m1a

    # Exact fusion of backbone_mlp1.2 and backbone_mlp2.0 (no ReLU in between):
    #   kron(I_49, W1b^T) @ kron(W2a^T, I_16) = kron(W2a^T, W1b^T)
    m12 = jnp.kron(w2a.T, w1b.T)                        # (784, 784)
    m2a = jnp.kron(w2a.T, eye_p)                        # only used to fold the biases
    b12 = jnp.tile(b1b, PATCH_DIM) @ m2a + jnp.repeat(b2a, NUM_PATCHES)

    # Last Linear with the Classifier mean over the 16 patches folded in, padded to 128.
    c = jnp.kron(w2b.T / NUM_PATCHES, jnp.ones((NUM_PATCHES, 1), jnp.float32))  # (784, 49)
    c = jnp.pad(c, ((0, 0), (0, OUT_PAD - PATCH_DIM)))                          # (784, 128)

    biases = jnp.stack([
        jnp.tile(b1a, PATCH_DIM),                       # b1a[p] at flat index c*16 + p
        b12,                                            # fused mlp1.2 / mlp2.0 bias
        jnp.pad(b2b, (0, FLAT - PATCH_DIM)),            # kernel reads the first 128 lanes
    ])                                                  # (3, 784) f32: bias-adds stay f32

    cd = COMPUTE_DTYPE
    return g1.astype(cd), m12.astype(cd), c.astype(cd), biases


def _round_up(x, m):
    return ((x + m - 1) // m) * m


def _pick_batch_tile(batch, batch_tile):
    tb = min(batch_tile, batch)
    # Keep >= 2 batch tiles whenever the batch allows, so the "parallel" grid axis can
    # be split across v7x's two TensorCores (each TC holds its own ~3 MiB weight copy).
    if batch >= 16:
        tb = min(tb, pl.cdiv(batch, 2))
    # Multiple of 8 sublanes: no masked sublane loads / ragged MXU M tiles for small B.
    return _round_up(tb, 8)


def _make_in_specs(tb, single_buffer_weights):
    const_map = lambda i: (0, 0)
    weight_kwargs = {}
    if single_buffer_weights and hasattr(pl, "Buffered"):
        # Constant-index operands are never re-fetched across grid steps; single-buffer
        # them instead of the default double-buffering (saves ~2.7 MiB of bf16 weights).
        weight_kwargs = dict(pipeline_mode=pl.Buffered(1))
    return [
        pl.BlockSpec((tb, FLAT), lambda i: (i, 0)),                       # batch slab
        pl.BlockSpec((FLAT, FLAT), const_map, **weight_kwargs),           # g1 (stem+mlp1.0)
        pl.BlockSpec((FLAT, FLAT), const_map, **weight_kwargs),           # m12 (mlp1.2@mlp2.0)
        pl.BlockSpec((FLAT, OUT_PAD), const_map, **weight_kwargs),        # c (mlp2.2 + mean)
        pl.BlockSpec((NUM_BIAS_ROWS, FLAT), const_map, **weight_kwargs),  # packed biases
    ]


def net_forward(x, params, *, batch_tile=DEFAULT_BATCH_TILE):
    B = x.shape[0]
    x_flat = x.reshape(B, IMG * IMG).astype(COMPUTE_DTYPE)   # raw pixels; stem is in g1
    g1, m12, c, biases = _flatten_params(params)

    tb = _pick_batch_tile(B, batch_tile)
    b_pad = _round_up(B, tb)
    if b_pad != B:
        x_flat = jnp.pad(x_flat, ((0, b_pad - B), (0, 0)))

    def run(single_buffer_weights):
        grid_spec = pltpu.PrefetchScalarGridSpec(
            num_scalar_prefetch=0,
            grid=(b_pad // tb,),
            in_specs=_make_in_specs(tb, single_buffer_weights),
            out_specs=pl.BlockSpec((tb, OUT_PAD), lambda i: (i, 0)),
        )
        return pl.pallas_call(
            _net_kernel,
            out_shape=jax.ShapeDtypeStruct((b_pad, OUT_PAD), jnp.float32),
            grid_spec=grid_spec,
            compiler_params=pltpu.CompilerParams(
                dimension_semantics=("parallel",),
                vmem_limit_bytes=VMEM_LIMIT_BYTES,
            ),
        )(x_flat, g1, m12, c, biases)

    try:
        out = run(single_buffer_weights=True)
    except Exception:
        # Fallback for JAX builds without pipeline_mode support on TPU pallas_call;
        # identical kernel, weights just use the default double-buffering.
        out = run(single_buffer_weights=False)

    return out[:B, :PATCH_DIM]


def init_params(key):
    """Deterministic init mimicking nn.Linear's U(-1/sqrt(fan_in), 1/sqrt(fan_in))."""
    def linear(kw, kb, fan_in, fan_out):
        bound = 1.0 / float(fan_in) ** 0.5
        w = jax.random.uniform(kw, (fan_out, fan_in), jnp.float32, -bound, bound)
        b = jax.random.uniform(kb, (fan_out,), jnp.float32, -bound, bound)
        return w, b

    ks = jax.random.split(key, 8)
    w1a, b1a = linear(ks[0], ks[1], NUM_PATCHES, NUM_PATCHES)   # Linear(num_hidden, num_hidden)
    w1b, b1b = linear(ks[2], ks[3], NUM_PATCHES, NUM_PATCHES)
    w2a, b2a = linear(ks[4], ks[5], PATCH_DIM, PATCH_DIM)       # Linear(num_inputs, num_inputs)
    w2b, b2b = linear(ks[6], ks[7], PATCH_DIM, PATCH_DIM)
    return (w1a, b1a, w1b, b1b, w2a, b2a, w2b, b2b)


def stem(x):
    """PyTorch Stem: (B,1,28,28) -> (B, 16, 49) via non-overlapping 7x7 patches."""
    B = x.shape[0]
    xp = x.reshape(B, 1, GRID, PATCH, GRID, PATCH)
    xp = xp.transpose(0, 1, 2, 4, 3, 5)              # (B,1,pi,pj,ri,cj)
    return xp.reshape(B, NUM_PATCHES, PATCH_DIM)


def net_reference(x, params):
    """Pure-JAX f32 reference mirroring the PyTorch forward, for a correctness check."""
    w1a, b1a, w1b, b1b, w2a, b2a, w2b, b2b = params
    xp = stem(x).astype(jnp.float32)                 # (B, 16, 49)
    xt = jnp.swapaxes(xp, 1, 2)                      # (B, 49, 16)
    h = jnp.maximum(xt @ w1a.T + b1a, 0.0)
    xt = h @ w1b.T + b1b
    xp = jnp.swapaxes(xt, 1, 2)                      # (B, 16, 49)
    h = jnp.maximum(xp @ w2a.T + b2a, 0.0)
    xp = h @ w2b.T + b2b
    return jnp.mean(xp, axis=1)                      # (B, 49)


if __name__ == "__main__":
    key = jax.random.PRNGKey(0)
    k_x, k_p = jax.random.split(key)
    x = jax.random.normal(k_x, (2, 1, 28, 28), jnp.float32)   # NCHW, FashionMNIST-sized
    params = init_params(k_p)

    out = jax.block_until_ready(net_forward(x, params))
    ref = net_reference(x, params)

    assert out.shape == (2, PATCH_DIM)
    max_err = float(jnp.max(jnp.abs(out - ref)))
    # bf16 operands / f32 accumulation vs the pure-f32 reference.
    assert jnp.allclose(out, ref, atol=5e-3, rtol=5e-3), max_err
    print("KERNEL_OK")
</pallas_src>

<mosaic_0001>
module attributes {stable_mosaic.version = 11 : i64} {
  func.func @_net_kernel(%arg0: i32, %arg1: memref<8x784xbf16, #tpu.memory_space<vmem>>, %arg2: memref<784x784xbf16, #tpu.memory_space<vmem>>, %arg3: memref<784x784xbf16, #tpu.memory_space<vmem>>, %arg4: memref<784x128xbf16, #tpu.memory_space<vmem>>, %arg5: memref<3x784xf32, #tpu.memory_space<vmem>>, %arg6: memref<8x128xf32, #tpu.memory_space<vmem>>) attributes {dimension_semantics = [#tpu.dimension_semantics<parallel>], iteration_bounds = array<i64: 1>, scalar_prefetch = 0 : i64, scratch_operands = 0 : i64, tpu.core_type = #tpu.core_type<tc>, window_params = [{transform_indices = @transform_0, window_bounds = array<i64: 8, 784>}, {pipeline_mode = #tpu.pipeline_mode<synchronous>, transform_indices = @transform_1, window_bounds = array<i64: 784, 784>}, {pipeline_mode = #tpu.pipeline_mode<synchronous>, transform_indices = @transform_2, window_bounds = array<i64: 784, 784>}, {pipeline_mode = #tpu.pipeline_mode<synchronous>, transform_indices = @transform_3, window_bounds = array<i64: 784, 128>}, {pipeline_mode = #tpu.pipeline_mode<synchronous>, transform_indices = @transform_4, window_bounds = array<i64: 3, 784>}, {transform_indices = @transform_5, window_bounds = array<i64: 8, 128>}]} {
    %c0 = arith.constant 0 : index
    %c0_0 = arith.constant 0 : index
    %0 = vector.load %arg1[%c0, %c0_0] : memref<8x784xbf16, #tpu.memory_space<vmem>>, vector<8x784xbf16>
    %c0_1 = arith.constant 0 : index
    %c0_2 = arith.constant 0 : index
    %1 = vector.load %arg2[%c0_1, %c0_2] : memref<784x784xbf16, #tpu.memory_space<vmem>>, vector<784x784xbf16>
    %cst = arith.constant dense<0.000000e+00> : vector<8x784xf32>
    %2 = tpu.matmul %0, %1, %cst {dimension_numbers = #tpu.dot_dimension_numbers<[1], [0], [0], [1], [0, 0, 1, 1], [], []>} : vector<8x784xbf16>, vector<784x784xbf16>, vector<8x784xf32> -> vector<8x784xf32>
    %c0_3 = arith.constant 0 : index
    %c0_4 = arith.constant 0 : index
    %3 = vector.load %arg5[%c0_3, %c0_4] : memref<3x784xf32, #tpu.memory_space<vmem>>, vector<1x784xf32>
    %4 = vector.broadcast %3 : vector<1x784xf32> to vector<8x784xf32>
    %5 = arith.addf %2, %4 : vector<8x784xf32>
    %cst_5 = arith.constant 0.000000e+00 : f32
    %6 = vector.broadcast %cst_5 : f32 to vector<8x784xf32>
    %7 = arith.maximumf %5, %6 : vector<8x784xf32>
    %8 = arith.truncf %7 : vector<8x784xf32> to vector<8x784xbf16>
    %c0_6 = arith.constant 0 : index
    %c0_7 = arith.constant 0 : index
    %9 = vector.load %arg3[%c0_6, %c0_7] : memref<784x784xbf16, #tpu.memory_space<vmem>>, vector<784x784xbf16>
    %cst_8 = arith.constant dense<0.000000e+00> : vector<8x784xf32>
    %10 = tpu.matmul %8, %9, %cst_8 {dimension_numbers = #tpu.dot_dimension_numbers<[1], [0], [0], [1], [0, 0, 1, 1], [], []>} : vector<8x784xbf16>, vector<784x784xbf16>, vector<8x784xf32> -> vector<8x784xf32>
    %c1 = arith.constant 1 : index
    %c0_9 = arith.constant 0 : index
    %11 = vector.load %arg5[%c1, %c0_9] : memref<3x784xf32, #tpu.memory_space<vmem>>, vector<1x784xf32>
    %12 = vector.broadcast %11 : vector<1x784xf32> to vector<8x784xf32>
    %13 = arith.addf %10, %12 : vector<8x784xf32>
    %cst_10 = arith.constant 0.000000e+00 : f32
    %14 = vector.broadcast %cst_10 : f32 to vector<8x784xf32>
    %15 = arith.maximumf %13, %14 : vector<8x784xf32>
    %16 = arith.truncf %15 : vector<8x784xf32> to vector<8x784xbf16>
    %c0_11 = arith.constant 0 : index
    %c0_12 = arith.constant 0 : index
    %17 = vector.load %arg4[%c0_11, %c0_12] : memref<784x128xbf16, #tpu.memory_space<vmem>>, vector<784x128xbf16>
    %cst_13 = arith.constant dense<0.000000e+00> : vector<8x128xf32>
    %18 = tpu.matmul %16, %17, %cst_13 {dimension_numbers = #tpu.dot_dimension_numbers<[1], [0], [0], [1], [0, 0, 1, 1], [], []>} : vector<8x784xbf16>, vector<784x128xbf16>, vector<8x128xf32> -> vector<8x128xf32>
    %c2 = arith.constant 2 : index
    %c0_14 = arith.constant 0 : index
    %19 = vector.load %arg5[%c2, %c0_14] : memref<3x784xf32, #tpu.memory_space<vmem>>, vector<1x128xf32>
    %20 = vector.broadcast %19 : vector<1x128xf32> to vector<8x128xf32>
    %21 = arith.addf %18, %20 : vector<8x128xf32>
    %c0_15 = arith.constant 0 : index
    %c0_16 = arith.constant 0 : index
    %22 = vector.load %arg6[%c0_15, %c0_16] : memref<8x128xf32, #tpu.memory_space<vmem>>, vector<8x128xf32>
    tpu.vector_store %arg6[%c0_15, %c0_16], %21 {strides = array<i32>} : memref<8x128xf32, #tpu.memory_space<vmem>>, vector<8x128xf32>,
    return
  }
  func.func @transform_0(%arg0: i32) -> (i32, i32) {
    %c0_i32 = arith.constant 0 : i32
    %c0_i32_0 = arith.constant 0 : i32
    return %arg0, %c0_i32 : i32, i32
  }
  func.func @transform_1(%arg0: i32) -> (i32, i32) {
    %c0_i32 = arith.constant 0 : i32
    %c0_i32_0 = arith.constant 0 : i32
    %c0_i32_1 = arith.constant 0 : i32
    return %c0_i32, %c0_i32_0 : i32, i32
  }
  func.func @transform_2(%arg0: i32) -> (i32, i32) {
    %c0_i32 = arith.constant 0 : i32
    %c0_i32_0 = arith.constant 0 : i32
    %c0_i32_1 = arith.constant 0 : i32
    return %c0_i32, %c0_i32_0 : i32, i32
  }
  func.func @transform_3(%arg0: i32) -> (i32, i32) {
    %c0_i32 = arith.constant 0 : i32
    %c0_i32_0 = arith.constant 0 : i32
    %c0_i32_1 = arith.constant 0 : i32
    return %c0_i32, %c0_i32_0 : i32, i32
  }
  func.func @transform_4(%arg0: i32) -> (i32, i32) {
    %c0_i32 = arith.constant 0 : i32
    %c0_i32_0 = arith.constant 0 : i32
    %c0_i32_1 = arith.constant 0 : i32
    return %c0_i32, %c0_i32_0 : i32, i32
  }
  func.func @transform_5(%arg0: i32) -> (i32, i32) {
    %c0_i32 = arith.constant 0 : i32
    %c0_i32_0 = arith.constant 0 : i32
    return %arg0, %c0_i32 : i32, i32
  }
}

module attributes {stable_mosaic.version = 11 : i64} {
  func.func @_net_kernel(%arg0: i32, %arg1: memref<8x784xbf16, #tpu.memory_space<vmem>>, %arg2: memref<784x784xbf16, #tpu.memory_space<vmem>>, %arg3: memref<784x784xbf16, #tpu.memory_space<vmem>>, %arg4: memref<784x128xbf16, #tpu.memory_space<vmem>>, %arg5: memref<3x784xf32, #tpu.memory_space<vmem>>, %arg6: memref<8x128xf32, #tpu.memory_space<vmem>>) attributes {dimension_semantics = [#tpu.dimension_semantics<parallel>], iteration_bounds = array<i64: 1>, scalar_prefetch = 0 : i64, scratch_operands = 0 : i64, tpu.core_type = #tpu.core_type<tc>, window_params = [{transform_indices = @transform_0, window_bounds = array<i64: 8, 784>}, {pipeline_mode = #tpu.pipeline_mode<synchronous>, transform_indices = @transform_1, window_bounds = array<i64: 784, 784>}, {pipeline_mode = #tpu.pipeline_mode<synchronous>, transform_indices = @transform_2, window_bounds = array<i64: 784, 784>}, {pipeline_mode = #tpu.pipeline_mode<synchronous>, transform_indices = @transform_3, window_bounds = array<i64: 784, 128>}, {pipeline_mode = #tpu.pipeline_mode<synchronous>, transform_indices = @transform_4, window_bounds = array<i64: 3, 784>}, {transform_indices = @transform_5, window_bounds = array<i64: 8, 128>}]} {
    %c0 = arith.constant 0 : index
    %c0_0 = arith.constant 0 : index
    %0 = vector.load %arg1[%c0, %c0_0] : memref<8x784xbf16, #tpu.memory_space<vmem>>, vector<8x784xbf16>
    %c0_1 = arith.constant 0 : index
    %c0_2 = arith.constant 0 : index
    %1 = vector.load %arg2[%c0_1, %c0_2] : memref<784x784xbf16, #tpu.memory_space<vmem>>, vector<784x784xbf16>
    %cst = arith.constant dense<0.000000e+00> : vector<8x784xf32>
    %2 = tpu.matmul %0, %1, %cst {dimension_numbers = #tpu.dot_dimension_numbers<[1], [0], [0], [1], [0, 0, 1, 1], [], []>} : vector<8x784xbf16>, vector<784x784xbf16>, vector<8x784xf32> -> vector<8x784xf32>
    %c0_3 = arith.constant 0 : index
    %c0_4 = arith.constant 0 : index
    %3 = vector.load %arg5[%c0_3, %c0_4] : memref<3x784xf32, #tpu.memory_space<vmem>>, vector<1x784xf32>
    %4 = vector.broadcast %3 : vector<1x784xf32> to vector<8x784xf32>
    %5 = arith.addf %2, %4 : vector<8x784xf32>
    %cst_5 = arith.constant 0.000000e+00 : f32
    %6 = vector.broadcast %cst_5 : f32 to vector<8x784xf32>
    %7 = arith.maximumf %5, %6 : vector<8x784xf32>
    %8 = arith.truncf %7 : vector<8x784xf32> to vector<8x784xbf16>
    %c0_6 = arith.constant 0 : index
    %c0_7 = arith.constant 0 : index
    %9 = vector.load %arg3[%c0_6, %c0_7] : memref<784x784xbf16, #tpu.memory_space<vmem>>, vector<784x784xbf16>
    %cst_8 = arith.constant dense<0.000000e+00> : vector<8x784xf32>
    %10 = tpu.matmul %8, %9, %cst_8 {dimension_numbers = #tpu.dot_dimension_numbers<[1], [0], [0], [1], [0, 0, 1, 1], [], []>} : vector<8x784xbf16>, vector<784x784xbf16>, vector<8x784xf32> -> vector<8x784xf32>
    %c1 = arith.constant 1 : index
    %c0_9 = arith.constant 0 : index
    %11 = vector.load %arg5[%c1, %c0_9] : memref<3x784xf32, #tpu.memory_space<vmem>>, vector<1x784xf32>
    %12 = vector.broadcast %11 : vector<1x784xf32> to vector<8x784xf32>
    %13 = arith.addf %10, %12 : vector<8x784xf32>
    %cst_10 = arith.constant 0.000000e+00 : f32
    %14 = vector.broadcast %cst_10 : f32 to vector<8x784xf32>
    %15 = arith.maximumf %13, %14 : vector<8x784xf32>
    %16 = arith.truncf %15 : vector<8x784xf32> to vector<8x784xbf16>
    %c0_11 = arith.constant 0 : index
    %c0_12 = arith.constant 0 : index
    %17 = vector.load %arg4[%c0_11, %c0_12] : memref<784x128xbf16, #tpu.memory_space<vmem>>, vector<784x128xbf16>
    %cst_13 = arith.constant dense<0.000000e+00> : vector<8x128xf32>
    %18 = tpu.matmul %16, %17, %cst_13 {dimension_numbers = #tpu.dot_dimension_numbers<[1], [0], [0], [1], [0, 0, 1, 1], [], []>} : vector<8x784xbf16>, vector<784x128xbf16>, vector<8x128xf32> -> vector<8x128xf32>
    %c2 = arith.constant 2 : index
    %c0_14 = arith.constant 0 : index
    %19 = vector.load %arg5[%c2, %c0_14] : memref<3x784xf32, #tpu.memory_space<vmem>>, vector<1x128xf32>
    %20 = vector.broadcast %19 : vector<1x128xf32> to vector<8x128xf32>
    %21 = arith.addf %18, %20 : vector<8x128xf32>
    %c0_15 = arith.constant 0 : index
    %c0_16 = arith.constant 0 : index
    %22 = vector.load %arg6[%c0_15, %c0_16] : memref<8x128xf32, #tpu.memory_space<vmem>>, vector<8x128xf32>
    tpu.vector_store %arg6[%c0_15, %c0_16], %21 {strides = array<i32>} : memref<8x128xf32, #tpu.memory_space<vmem>>, vector<8x128xf32>,
    return
  }
  func.func @transform_0(%arg0: i32) -> (i32, i32) {
    %c0_i32 = arith.constant 0 : i32
    %c0_i32_0 = arith.constant 0 : i32
    return %arg0, %c0_i32 : i32, i32
  }
  func.func @transform_1(%arg0: i32) -> (i32, i32) {
    %c0_i32 = arith.constant 0 : i32
    %c0_i32_0 = arith.constant 0 : i32
    %c0_i32_1 = arith.constant 0 : i32
    return %c0_i32, %c0_i32_0 : i32, i32
  }
  func.func @transform_2(%arg0: i32) -> (i32, i32) {
    %c0_i32 = arith.constant 0 : i32
    %c0_i32_0 = arith.constant 0 : i32
    %c0_i32_1 = arith.constant 0 : i32
    return %c0_i32, %c0_i32_0 : i32, i32
  }
  func.func @transform_3(%arg0: i32) -> (i32, i32) {
    %c0_i32 = arith.constant 0 : i32
    %c0_i32_0 = arith.constant 0 : i32
    %c0_i32_1 = arith.constant 0 : i32
    return %c0_i32, %c0_i32_0 : i32, i32
  }
  func.func @transform_4(%arg0: i32) -> (i32, i32) {
    %c0_i32 = arith.constant 0 : i32
    %c0_i32_0 = arith.constant 0 : i32
    %c0_i32_1 = arith.constant 0 : i32
    return %c0_i32, %c0_i32_0 : i32, i32
  }
  func.func @transform_5(%arg0: i32) -> (i32, i32) {
    %c0_i32 = arith.constant 0 : i32
    %c0_i32_0 = arith.constant 0 : i32
    return %arg0, %c0_i32 : i32, i32
  }
}

</mosaic_0001>

<bundles_post_ra>
// kernel: tpu_custom_call.1
= control target key start
LH: loop header
LB: loop body
LE: loop exit
PB: predicated region body
PF: predicated region fallthrough
CT: control target
= control target key end

     0   :  { %10 = vsyncpa [#allocation3], 0  ;;  %s8987_s0 = inlined_call_operand.hbm [shape: bf16[8,784], index: 0, kind: input, shape index: {}]   ;;  %s8988_s1 = inlined_call_operand.hbm [shape: bf16[784,784], index: 1, kind: input, shape index: {}]   ;;  %s8989_s2 = inlined_call_operand.hbm [shape: bf16[784,784], index: 2, kind: input, shape index: {}]   ;;  %s8990_s3 = inlined_call_operand.hbm [shape: bf16[784,128], index: 3, kind: input, shape index: {}]   ;;  %s8991_s4 = inlined_call_operand.hbm [shape: f32[3,784], index: 4, kind: input, shape index: {}]   ;;  %s8992_s5 = inlined_call_operand.hbm [shape: f32[8,128], index: 5, kind: output, shape index: {}]  }
   0x1   :  { %11 = vsyncpa [#allocation6], 0 }
   0x2   :  { %12 = vsyncpa [#allocation9], 0 }
   0x3   :  { %13 = vsyncpa [#allocation4], 0  ;;  %s8663_s18 = smov [#allocation5]   ;;  %s8523_s22 = scalar_lea.hbm %s8988_s1, 43904 }
   0x4   :  { %s29_s19 = sshll.u32 %s8663_s18, 4  ;;  %p8524_p0 = scmp.ne.s32.totalorder %s8988_s1, %s8523_s22  ;;  %s30_s19 = int_to_ptr.vmem [resolvable:$true] %s29_s19 }
   0x5   :  { %p8527_p1 = scmp.lt.u32.totalorder %s8523_s22, %s8988_s1 }
   0x7   :  { %p8529_p2 = pnand %p8527_p1, %p8524_p0 }
   0x9   :  { %8532 = shalt.err (!%p8529_p2)
}
   0xa   :  { %s8533_s27 = scalar_lea.vmem %s30_s19, 43904  ;;  %p8538_p4 = scmp.lt.s32.totalorder %s30_s19, %s30_s19 }
   0xb   :  { %p8534_p3 = scmp.ne.s32.totalorder %s30_s19, %s8533_s27  ;;  %p8539_p5 = scmp.lt.s32.totalorder %s8533_s27, %s8533_s27 }
   0xd   :  { %p8540_p6 = por %p8539_p5, %p8538_p4 }
   0xf   :  { %p8541_p7 = pnand %p8540_p6, %p8534_p3 }
  0x11   :  { %8544 = shalt.err (!%p8541_p7)
}
  0x12   :  { %s8664_s28 = smov 448   ;;  %s8665_s29 = smov 28  }
  0x13   :  { %35 = dma.hbm_to_vmem [thread:$0]  %s8988_s1, 43904, %s30_s19, [#allocation6], %s8664_s28, %s8664_s28, %s8665_s29  }
  0x14   :  { %s8666_s7 = smov [#allocation8]   ;;  %s8545_s11 = scalar_lea.hbm %s8990_s3, 6272 }
  0x15   :  { %s53_s8 = sshll.u32 %s8666_s7, 4  ;;  %p8546_p8 = scmp.ne.s32.totalorder %s8990_s3, %s8545_s11  ;;  %s54_s8 = int_to_ptr.vmem [resolvable:$true] %s53_s8 }
  0x16   :  { %p8549_p9 = scmp.lt.u32.totalorder %s8545_s11, %s8990_s3 }
  0x18   :  { %p8551_p10 = pnand %p8549_p9, %p8546_p8 }
  0x1a   :  { %8554 = shalt.err (!%p8551_p10)
}
  0x1b   :  { %s8555_s16 = scalar_lea.vmem %s54_s8, 6272  ;;  %p8560_p12 = scmp.lt.s32.totalorder %s54_s8, %s54_s8 }
  0x1c   :  { %p8556_p11 = scmp.ne.s32.totalorder %s54_s8, %s8555_s16  ;;  %p8561_p13 = scmp.lt.s32.totalorder %s8555_s16, %s8555_s16 }
  0x1e   :  { %p8562_p0 = por %p8561_p13, %p8560_p12 }
  0x20   :  { %p8563_p1 = pnand %p8562_p0, %p8556_p11 }
  0x22   :  { %8566 = shalt.err (!%p8563_p1)
}
  0x23   :  { %s8667_s1 = smov 64   ;;  %s8668_s17 = smov 4  }
  0x24   :  { %59 = dma.hbm_to_vmem [thread:$0]  %s8990_s3, 6272, %s54_s8, [#allocation9], %s8667_s1, %s8667_s1, %s8668_s17  }
  0x25   :  { %s8669_s20 = smov [#allocation2]   ;;  %s8670_s22 = smov [#allocation7]  }
  0x26   :  { %s20_s21 = sshll.u32 %s8669_s20, 4  ;;  %s41_s23 = sshll.u32 %s8670_s22, 4  ;;  %s21_s21 = int_to_ptr.vmem [resolvable:$true] %s20_s21  ;;  %s8733_s23 = int_to_ptr.vmem [resolvable:$true] %s41_s23 }
  0x27   :  { %s8567_s26 = scalar_lea.hbm %s8987_s0, 448 }
  0x28   :  { %p8568_p2 = scmp.ne.s32.totalorder %s8987_s0, %s8567_s26  ;;  %p8571_p3 = scmp.lt.u32.totalorder %s8567_s26, %s8987_s0 }
  0x2a   :  { %p8573_p4 = pnand %p8571_p3, %p8568_p2 }
  0x2c   :  { %8576 = shalt.err (!%p8573_p4)
}
  0x2d   :  { %s8577_s3 = scalar_lea.vmem %s21_s21, 448  ;;  %p8582_p6 = scmp.lt.s32.totalorder %s21_s21, %s21_s21 }
  0x2e   :  { %p8578_p5 = scmp.ne.s32.totalorder %s21_s21, %s8577_s3  ;;  %p8583_p7 = scmp.lt.s32.totalorder %s8577_s3, %s8577_s3 }
  0x30   :  { %p8584_p8 = por %p8583_p7, %p8582_p6 }
  0x32   :  { %p8585_p9 = pnand %p8584_p8, %p8578_p5 }
  0x34   :  { %8588 = shalt.err (!%p8585_p9)
}
  0x35   :  { %23 = dma.hbm_to_vmem [thread:$0]  %s8987_s0, 448, %s21_s21, [#allocation3]  }
  0x36   :  { %s8589_s12 = scalar_lea.hbm %s8989_s2, 43904 }
  0x37   :  { %p8590_p10 = scmp.ne.s32.totalorder %s8989_s2, %s8589_s12  ;;  %p8593_p11 = scmp.lt.u32.totalorder %s8589_s12, %s8989_s2 }
  0x39   :  { %p8595_p12 = pnand %p8593_p11, %p8590_p10 }
  0x3b   :  { %8598 = shalt.err (!%p8595_p12)
}
  0x3c   :  { %s8599_s1 = scalar_lea.vmem %s8733_s23, 43904  ;;  %p8604_p0 = scmp.lt.s32.totalorder %s8733_s23, %s8733_s23 }
  0x3d   :  { %p8600_p13 = scmp.ne.s32.totalorder %s8733_s23, %s8599_s1  ;;  %p8605_p1 = scmp.lt.s32.totalorder %s8599_s1, %s8599_s1 }
  0x3f   :  { %p8606_p2 = por %p8605_p1, %p8604_p0 }
  0x41   :  { %p8607_p3 = pnand %p8606_p2, %p8600_p13 }
  0x43   :  { %8610 = shalt.err (!%p8607_p3)
}
  0x44   :  { %47 = dma.hbm_to_vmem [thread:$0]  %s8989_s2, 43904, %s8733_s23, [#allocation6], %s8664_s28, %s8664_s28, %s8665_s29  }
  0x45   :  { %s8671_s18 = smov [#allocation10]   ;;  %s8611_s22 = scalar_lea.hbm %s8991_s4, 448 }
  0x46   :  { %s66_s19 = sshll.u32 %s8671_s18, 4  ;;  %p8612_p4 = scmp.ne.s32.totalorder %s8991_s4, %s8611_s22  ;;  %s67_s19 = int_to_ptr.vmem [resolvable:$true] %s66_s19 }
  0x47   :  { %p8615_p5 = scmp.lt.u32.totalorder %s8611_s22, %s8991_s4 }
  0x49   :  { %p8617_p6 = pnand %p8615_p5, %p8612_p4 }
  0x4b   :  { %8620 = shalt.err (!%p8617_p6)
}
  0x4c   :  { %s8621_s30 = scalar_lea.vmem %s67_s19, 448  ;;  %p8626_p8 = scmp.lt.s32.totalorder %s67_s19, %s67_s19 }
  0x4d   :  { %p8622_p7 = scmp.ne.s32.totalorder %s67_s19, %s8621_s30  ;;  %p8627_p9 = scmp.lt.s32.totalorder %s8621_s30, %s8621_s30 }
  0x4f   :  { %p8628_p10 = por %p8627_p9, %p8626_p8 }
  0x51   :  { %p8629_p11 = pnand %p8628_p10, %p8622_p7 }
  0x53   :  { %8632 = shalt.err (!%p8629_p11)
}
  0x54   :  { %69 = dma.hbm_to_vmem [thread:$0]  %s8991_s4, 448, %s67_s19, [#allocation9]  }
  0x55   :  { %8655 = dma.done.wait [#allocation3], 448  }
  0x56   :  { %8656 = vsyncadd [#allocation3], 4294966848 }
  0x57   :  { %8657 = dma.done.wait [#allocation6], 87808  }
  0x58   :  { %8658 = vsyncadd [#allocation6], 4294879488 }
  0x59   :  { %8659 = dma.done.wait [#allocation9], 6720  }
  0x5a   :  { %8660 = vsyncadd [#allocation9], 4294960576  ;;  %v8672_v0 = vmov 0   ;;  %v7485_v1 = vld [vmem:[#allocation5 + $0x4] ss:$28 sps:$4 sm:$0xff]   ;;  %vm2307_vm0 = vcmask 130048  }
  0x5b   :  { %2466 = vmatprep.mubr.bf16.mxu1 %v8672_v0  ;;  %v7487_v2 = vld [vmem:[#allocation5 + $0xa84] ss:$28 sps:$4 sm:$0xff]   ;;  %2311 = vmatprep.subr.bf16.mxu0 %v7485_v1  ;;  %v7491_v5 = vld [vmem:[#allocation5 + $0x3c] ss:$28 sps:$4 sm:$0xff]   ;;  %v7495_v7 = vld [vmem:[#allocation5 + $0xc] ss:$28 sps:$4 sm:$0xff]  }
  0x5c   :  { %v7489_v3 = vld [vmem:[#allocation5] ss:$28 sps:$4 sm:$0xff]   ;;  %2434 = vmatprep.subr.bf16.mxu1 %v7487_v2  ;;  %v7493_v6 = vld [vmem:[#allocation5 + $0x8] ss:$28 sps:$4 sm:$0xff]   ;;  %v7496_v8 = vld [vmem:[#allocation5 + $0x38] ss:$28 sps:$4 sm:$0xff]  }
  0x5d   :  { %v7490_v4 = vld [vmem:[#allocation5 + $0xa80] ss:$28 sps:$4 sm:$0xff]   ;;  %2312 = vmatpush1.bf16.msra.mxu0 %v7489_v3  ;;  %v7498_v10 = vld [vmem:[#allocation5 + $0x74] ss:$28 sps:$4 sm:$0xff]   ;;  %v7504_v14 = vld [vmem:[#allocation5 + $0xac] ss:$28 sps:$4 sm:$0xff]  }
  0x5e   :  { %2435 = vmatpush1.bf16.msra.mxu1 %v7490_v4  ;;  %2313 = vmatprep.subr.bf16.mxu0 %v7491_v5  ;;  %v7497_v9 = vld [vmem:[#allocation2 + $0x18] ss:$0 sps:$4 sm:$0xff]   ;;  %v7502_v12 = vld [vmem:[#allocation5 + $0x44] ss:$28 sps:$4 sm:$0xff]   ;;  %v7503_v13 = vld [vmem:[#allocation5 + $0x70] ss:$28 sps:$4 sm:$0xff]  }
  0x5f   :  { %2475 = vmatprep.subr.bf16.mxu1 %v7495_v7  ;;  %v7500_v11 = vld [vmem:[#allocation5 + $0x40] ss:$28 sps:$4 sm:$0xff]   ;;  %v7506_v16 = vld [vmem:[#allocation5 + $0x78] ss:$28 sps:$4 sm:$0xff]   ;;  %v7509_v17 = vld [vmem:[#allocation5 + $0xa8] ss:$28 sps:$4 sm:$0xff]  }
  0x60   :  { %v7508_v15 = vld [vmem:[#allocation5 + $0x7c] ss:$28 sps:$4 sm:$0xff]   ;;  %v7510_v18 = vld [vmem:[#allocation5 + $0xe4] ss:$28 sps:$4 sm:$0xff]   ;;  %v7514_v19 = vld [vmem:[#allocation5 + $0xb4] ss:$28 sps:$4 sm:$0xff]  }
  0x61   :  { %6768 = vmatmul.mubr.msk.bf16.vlgmr.msra.gmra.mrb[0].mxu1 %vm2307_vm0, %v7497_v9  ;;  %2314 = vmatpush1.bf16.msra.mxu0 %v7496_v8  ;;  %v7512_v20 = vld [vmem:[#allocation5 + $0xb0] ss:$28 sps:$4 sm:$0xff]   ;;  %v7515_v21 = vld [vmem:[#allocation5 + $0xe0] ss:$28 sps:$4 sm:$0xff]   ;;  %v7518_v24 = vld [vmem:[#allocation5 + $0xe8] ss:$28 sps:$4 sm:$0xff]  }
  0x62   :  { %2476 = vmatpush1.bf16.msra.mxu1 %v7493_v6  ;;  %2315 = vmatprep.subr.bf16.mxu0 %v7498_v10  ;;  %v7516_v22 = vld [vmem:[#allocation5 + $0x11c] ss:$28 sps:$4 sm:$0xff]   ;;  %v7520_v23 = vld [vmem:[#allocation5 + $0xec] ss:$28 sps:$4 sm:$0xff]   ;;  %v7522_v26 = vld [vmem:[#allocation5 + $0x154] ss:$28 sps:$4 sm:$0xff]  }
  0x63   :  { %2477 = vmatprep.subr.bf16.mxu1 %v7502_v12  ;;  %v7521_v25 = vld [vmem:[#allocation5 + $0x118] ss:$28 sps:$4 sm:$0xff]   ;;  %v7526_v27 = vld [vmem:[#allocation5 + $0x124] ss:$28 sps:$4 sm:$0xff]   ;;  %v7527_v29 = vld [vmem:[#allocation5 + $0x150] ss:$28 sps:$4 sm:$0xff]  }
  0x64   :  { %v7524_v28 = vld [vmem:[#allocation5 + $0x120] ss:$28 sps:$4 sm:$0xff]   ;;  %v7528_v30 = vld [vmem:[#allocation5 + $0x18c] ss:$28 sps:$4 sm:$0xff]   ;;  %v7530_v32 = vld [vmem:[#allocation5 + $0x158] ss:$28 sps:$4 sm:$0xff]  }
  0x65   :  { %2316 = vmatpush1.bf16.msra.mxu0 %v7503_v13  ;;  %v7532_v31 = vld [vmem:[#allocation5 + $0x15c] ss:$28 sps:$4 sm:$0xff]   ;;  %v7533_v33 = vld [vmem:[#allocation5 + $0x188] ss:$28 sps:$4 sm:$0xff]   ;;  %v7538_v35 = vld [vmem:[#allocation5 + $0x194] ss:$28 sps:$4 sm:$0xff]  }
  0x66   :  { %2478 = vmatpush1.bf16.msra.mxu1 %v7500_v11  ;;  %2317 = vmatprep.subr.bf16.mxu0 %v7504_v14  ;;  %v7534_v34 = vld [vmem:[#allocation5 + $0x1c4] ss:$28 sps:$4 sm:$0xff]   ;;  %v7536_v36 = vld [vmem:[#allocation5 + $0x190] ss:$28 sps:$4 sm:$0xff]   ;;  %v7540_v38 = vld [vmem:[#allocation5 + $0x1fc] ss:$28 sps:$4 sm:$0xff]  }
  0x67   :  { %2479 = vmatprep.subr.bf16.mxu1 %v7508_v15  ;;  %v7539_v37 = vld [vmem:[#allocation5 + $0x1c0] ss:$28 sps:$4 sm:$0xff]   ;;  %v7544_v39 = vld [vmem:[#allocation5 + $0x1cc] ss:$28 sps:$4 sm:$0xff]   ;;  %v7545_v41 = vld [vmem:[#allocation5 + $0x1f8] ss:$28 sps:$4 sm:$0xff]  }
  0x68   :  { %v7542_v40 = vld [vmem:[#allocation5 + $0x1c8] ss:$28 sps:$4 sm:$0xff]   ;;  %v7546_v42 = vld [vmem:[#allocation5 + $0x234] ss:$28 sps:$4 sm:$0xff]   ;;  %v7548_v44 = vld [vmem:[#allocation5 + $0x200] ss:$28 sps:$4 sm:$0xff]  }
  0x69   :  { %2318 = vmatpush1.bf16.msra.mxu0 %v7509_v17  ;;  %v7550_v43 = vld [vmem:[#allocation5 + $0x204] ss:$28 sps:$4 sm:$0xff]   ;;  %v7551_v45 = vld [vmem:[#allocation5 + $0x230] ss:$28 sps:$4 sm:$0xff]   ;;  %v7556_v47 = vld [vmem:[#allocation5 + $0x23c] ss:$28 sps:$4 sm:$0xff]  }
  0x6a   :  { %2480 = vmatpush1.bf16.msra.mxu1 %v7506_v16  ;;  %2319 = vmatprep.subr.bf16.mxu0 %v7510_v18  ;;  %v7552_v46 = vld [vmem:[#allocation5 + $0x26c] ss:$28 sps:$4 sm:$0xff]   ;;  %v7554_v48 = vld [vmem:[#allocation5 + $0x238] ss:$28 sps:$4 sm:$0xff]   ;;  %v7558_v51 = vld [vmem:[#allocation5 + $0x2a4] ss:$28 sps:$4 sm:$0xff]  }
  0x6b   :  { %2481 = vmatprep.subr.bf16.mxu1 %v7514_v19  ;;  %v86_v49 = vld [vmem:[#allocation2] sm:$0xff]  ;;  %v7562_v53 = vld [vmem:[#allocation5 + $0x274] ss:$28 sps:$4 sm:$0xff]   ;;  %v7563_v55 = vld [vmem:[#allocation5 + $0x2a0] ss:$28 sps:$4 sm:$0xff]   ;;  %vm8674_vm1 = vmmov 0  }
  0x6c   :  { %v7557_v50 = vld [vmem:[#allocation5 + $0x268] ss:$28 sps:$4 sm:$0xff]   ;;  %v8781_v52 = vcombine.high %v86_v49, %v86_v49  ;;  %v7560_v54 = vld [vmem:[#allocation5 + $0x270] ss:$28 sps:$4 sm:$0xff]   ;;  %v7564_v56 = vld [vmem:[#allocation5 + $0x2dc] ss:$28 sps:$4 sm:$0xff]   ;;  %v8785_v8 = vcombine.low %v86_v49, %v86_v49 }
  0x6d   :  { %2320 = vmatpush1.bf16.msra.mxu0 %v7515_v21  ;;  %v7568_v57 = vld [vmem:[#allocation5 + $0x2ac] ss:$28 sps:$4 sm:$0xff]   ;;  %v7569_v59 = vld [vmem:[#allocation5 + $0x2d8] ss:$28 sps:$4 sm:$0xff]   ;;  %v7574_v61 = vld [vmem:[#allocation5 + $0x2e4] ss:$28 sps:$4 sm:$0xff]  }
  0x6e   :  { %2482 = vmatpush1.bf16.msra.mxu1 %v7512_v20  ;;  %2321 = vmatprep.subr.bf16.mxu0 %v7516_v22  ;;  %v7566_v58 = vld [vmem:[#allocation5 + $0x2a8] ss:$28 sps:$4 sm:$0xff]   ;;  %v7570_v60 = vld [vmem:[#allocation5 + $0x314] ss:$28 sps:$4 sm:$0xff]   ;;  %v7572_v62 = vld [vmem:[#allocation5 + $0x2e0] ss:$28 sps:$4 sm:$0xff]  }
  0x6f   :  { %2483 = vmatprep.subr.bf16.mxu1 %v7520_v23  ;;  %2343 = vmatprep.mubr.bf16.mxu0 %v8781_v52  ;;  %v7575_v63 = vld [vmem:[#allocation5 + $0x310] ss:$28 sps:$4 sm:$0xff]   ;;  %v7580_v2 = vld [vmem:[#allocation5 + $0x31c] ss:$28 sps:$4 sm:$0xff]   ;;  %v7581_v4 = vld [vmem:[#allocation5 + $0x348] ss:$28 sps:$4 sm:$0xff]  }
  0x70   :  { %2507 = vmatprep.mubr.bf16.mxu1 %v8781_v52  ;;  %v7576_v1 = vld [vmem:[#allocation5 + $0x34c] ss:$28 sps:$4 sm:$0xff]   ;;  %v7578_v3 = vld [vmem:[#allocation5 + $0x318] ss:$28 sps:$4 sm:$0xff]   ;;  %v7585_v5 = vld [vmem:[#allocation5 + $0x384] ss:$28 sps:$4 sm:$0xff]  }
  0x71   :  { %2322 = vmatpush1.bf16.msra.mxu0 %v7521_v25  ;;  %v7588_v6 = vld [vmem:[#allocation5 + $0x354] ss:$28 sps:$4 sm:$0xff]   ;;  %v7583_v7 = vld [vmem:[#allocation5 + $0x380] ss:$28 sps:$4 sm:$0xff]   ;;  %v7595_v11 = vld [vmem:[#allocation5 + $0x38c] ss:$28 sps:$4 sm:$0xff]  }
  0x72   :  { %2484 = vmatpush1.bf16.msra.mxu1 %v7518_v24  ;;  %2323 = vmatprep.subr.bf16.mxu0 %v7522_v26  ;;  %v7586_v9 = vld [vmem:[#allocation5 + $0x350] ss:$28 sps:$4 sm:$0xff]   ;;  %v7592_v10 = vld [vmem:[#allocation5 + $0x3bc] ss:$28 sps:$4 sm:$0xff]   ;;  %v7593_v13 = vld [vmem:[#allocation5 + $0x388] ss:$28 sps:$4 sm:$0xff]  }
  0x73   :  { %2485 = vmatprep.subr.bf16.mxu1 %v7526_v27  ;;  %v7590_v12 = vld [vmem:[#allocation5 + $0x3b8] ss:$28 sps:$4 sm:$0xff]   ;;  %v7601_v15 = vld [vmem:[#allocation5 + $0x3c4] ss:$28 sps:$4 sm:$0xff]   ;;  %v7596_v16 = vld [vmem:[#allocation5 + $0x3f0] ss:$28 sps:$4 sm:$0xff]  }
  0x74   :  { %v7598_v14 = vld [vmem:[#allocation5 + $0x3f4] ss:$28 sps:$4 sm:$0xff]   ;;  %v7599_v17 = vld [vmem:[#allocation5 + $0x3c0] ss:$28 sps:$4 sm:$0xff]   ;;  %v7604_v18 = vld [vmem:[#allocation5 + $0x42c] ss:$28 sps:$4 sm:$0xff]  }
  0x75   :  { %2324 = vmatpush1.bf16.msra.mxu0 %v7527_v29  ;;  %v7607_v19 = vld [vmem:[#allocation5 + $0x3fc] ss:$28 sps:$4 sm:$0xff]   ;;  %v7602_v20 = vld [vmem:[#allocation5 + $0x428] ss:$28 sps:$4 sm:$0xff]   ;;  %v7613_v23 = vld [vmem:[#allocation5 + $0x434] ss:$28 sps:$4 sm:$0xff]  }
  0x76   :  { %2486 = vmatpush1.bf16.msra.mxu1 %v7524_v28  ;;  %2325 = vmatprep.subr.bf16.mxu0 %v7528_v30  ;;  %v7605_v21 = vld [vmem:[#allocation5 + $0x3f8] ss:$28 sps:$4 sm:$0xff]   ;;  %v7610_v22 = vld [vmem:[#allocation5 + $0x464] ss:$28 sps:$4 sm:$0xff]   ;;  %v7611_v25 = vld [vmem:[#allocation5 + $0x430] ss:$28 sps:$4 sm:$0xff]  }
  0x77   :  { %2487 = vmatprep.subr.bf16.mxu1 %v7532_v31  ;;  %v7608_v24 = vld [vmem:[#allocation5 + $0x460] ss:$28 sps:$4 sm:$0xff]   ;;  %v7619_v27 = vld [vmem:[#allocation5 + $0x46c] ss:$28 sps:$4 sm:$0xff]   ;;  %v7614_v28 = vld [vmem:[#allocation5 + $0x498] ss:$28 sps:$4 sm:$0xff]  }
  0x78   :  { %v7616_v26 = vld [vmem:[#allocation5 + $0x49c] ss:$28 sps:$4 sm:$0xff]   ;;  %v7617_v29 = vld [vmem:[#allocation5 + $0x468] ss:$28 sps:$4 sm:$0xff]   ;;  %v7622_v30 = vld [vmem:[#allocation5 + $0x4d4] ss:$28 sps:$4 sm:$0xff]  }
  0x79   :  { %2326 = vmatpush1.bf16.msra.mxu0 %v7533_v33  ;;  %v7625_v31 = vld [vmem:[#allocation5 + $0x4a4] ss:$28 sps:$4 sm:$0xff]   ;;  %v7620_v33 = vld [vmem:[#allocation5 + $0x4d0] ss:$28 sps:$4 sm:$0xff]   ;;  %s8675_s4 = smov [#allocation11]  }
  0x7a   :  { %2488 = vmatpush1.bf16.msra.mxu1 %v7530_v32  ;;  %2327 = vmatprep.subr.bf16.mxu0 %v7534_v34  ;;  %v8789_v32 = vld [vmem:[#allocation2 + $0x8] sm:$0xff]  ;;  %v7623_v34 = vld [vmem:[#allocation5 + $0x4a0] ss:$28 sps:$4 sm:$0xff]   ;;  %s6407_s29 = sshll.u32 %s8675_s4, 4  ;;  %s6408_s29 = int_to_ptr.vmem [resolvable:$true] %s6407_s29 }
  0x7b   :  { %2489 = vmatprep.subr.bf16.mxu1 %v7538_v35  ;;  %v8793_v35 = vcombine.high %v8789_v32, %v8789_v32  ;;  %v7649_v49 = vld [vmem:[#allocation5 + $0x584] ss:$28 sps:$4 sm:$0xff]   ;;  %s8633_s23 = scalar_lea.vmem %s6408_s29, 128  ;;  %p8638_p13 = scmp.lt.s32.totalorder %s6408_s29, %s6408_s29 }
  0x7c   :  { %p8634_p12 = scmp.ne.s32.totalorder %s6408_s29, %s8633_s23  ;;  %p8639_p0 = scmp.lt.s32.totalorder %s8633_s23, %s8633_s23 }
  0x7d   :  { %2328 = vmatpush1.bf16.msra.mxu0 %v7539_v37  ;;  %v7631_v37 = vld [vmem:[#allocation5 + $0x4dc] ss:$28 sps:$4 sm:$0xff]  }
  0x7e   :  { %2490 = vmatpush1.bf16.msra.mxu1 %v7536_v36  ;;  %2329 = vmatprep.subr.bf16.mxu0 %v7540_v38  ;;  %v7628_v36 = vld [vmem:[#allocation5 + $0x50c] ss:$28 sps:$4 sm:$0xff]   ;;  %p8640_p1 = por %p8639_p0, %p8638_p13 }
  0x7f   :  { %2491 = vmatprep.subr.bf16.mxu1 %v7544_v39  ;;  %v7626_v38 = vld [vmem:[#allocation5 + $0x508] ss:$28 sps:$4 sm:$0xff]   ;;  %v7629_v39 = vld [vmem:[#allocation5 + $0x4d8] ss:$28 sps:$4 sm:$0xff]  }
  0x80   :  { %p8641_p2 = pnand %p8640_p1, %p8634_p12 }
  0x81   :  { %2330 = vmatpush1.bf16.msra.mxu0 %v7545_v41  ;;  %v7637_v41 = vld [vmem:[#allocation5 + $0x514] ss:$28 sps:$4 sm:$0xff]  }
  0x82   :  { %2492 = vmatpush1.bf16.msra.mxu1 %v7542_v40  ;;  %2331 = vmatprep.subr.bf16.mxu0 %v7546_v42  ;;  %v7634_v40 = vld [vmem:[#allocation5 + $0x544] ss:$28 sps:$4 sm:$0xff]  }
  0x83   :  { %2493 = vmatprep.subr.bf16.mxu1 %v7550_v43  ;;  %v7632_v42 = vld [vmem:[#allocation5 + $0x540] ss:$28 sps:$4 sm:$0xff]   ;;  %v7635_v43 = vld [vmem:[#allocation5 + $0x510] ss:$28 sps:$4 sm:$0xff]  }
  0x85   :  { %2332 = vmatpush1.bf16.msra.mxu0 %v7551_v45  ;;  %v7643_v45 = vld [vmem:[#allocation5 + $0x54c] ss:$28 sps:$4 sm:$0xff]  }
  0x86   :  { %2494 = vmatpush1.bf16.msra.mxu1 %v7548_v44  ;;  %2333 = vmatprep.subr.bf16.mxu0 %v7552_v46  ;;  %v7640_v44 = vld [vmem:[#allocation5 + $0x57c] ss:$28 sps:$4 sm:$0xff]  }
  0x87   :  { %2495 = vmatprep.subr.bf16.mxu1 %v7556_v47  ;;  %v7638_v46 = vld [vmem:[#allocation5 + $0x578] ss:$28 sps:$4 sm:$0xff]   ;;  %v7641_v47 = vld [vmem:[#allocation5 + $0x548] ss:$28 sps:$4 sm:$0xff]  }
  0x89   :  { %2334 = vmatpush1.bf16.msra.mxu0 %v7557_v50  ;;  %v7644_v50 = vld [vmem:[#allocation5 + $0x5b0] ss:$28 sps:$4 sm:$0xff]  }
  0x8a   :  { %2496 = vmatpush1.bf16.msra.mxu1 %v7554_v48  ;;  %2335 = vmatprep.subr.bf16.mxu0 %v7558_v51  ;;  %v7646_v48 = vld [vmem:[#allocation5 + $0x5b4] ss:$28 sps:$4 sm:$0xff]   ;;  %v7647_v51 = vld [vmem:[#allocation5 + $0x580] ss:$28 sps:$4 sm:$0xff]  }
  0x8b   :  { %2497 = vmatprep.subr.bf16.mxu1 %v7562_v53  ;;  %v7652_v53 = vld [vmem:[#allocation5 + $0x5ec] ss:$28 sps:$4 sm:$0xff]  }
  0x8d   :  { %2336 = vmatpush1.bf16.msra.mxu0 %v7563_v55  ;;  %v7650_v55 = vld [vmem:[#allocation5 + $0x5e8] ss:$28 sps:$4 sm:$0xff]  }
  0x8e   :  { %2498 = vmatpush1.bf16.msra.mxu1 %v7560_v54  ;;  %2337 = vmatprep.subr.bf16.mxu0 %v7564_v56  ;;  %v7655_v54 = vld [vmem:[#allocation5 + $0x5bc] ss:$28 sps:$4 sm:$0xff]  }
  0x8f   :  { %2499 = vmatprep.subr.bf16.mxu1 %v7568_v57  ;;  %v7653_v56 = vld [vmem:[#allocation5 + $0x5b8] ss:$28 sps:$4 sm:$0xff]   ;;  %v7658_v57 = vld [vmem:[#allocation5 + $0x624] ss:$28 sps:$4 sm:$0xff]  }
  0x91   :  { %2338 = vmatpush1.bf16.msra.mxu0 %v7569_v59  ;;  %v7656_v59 = vld [vmem:[#allocation5 + $0x620] ss:$28 sps:$4 sm:$0xff]  }
  0x92   :  { %2500 = vmatpush1.bf16.msra.mxu1 %v7566_v58  ;;  %2339 = vmatprep.subr.bf16.mxu0 %v7570_v60  ;;  %v7661_v58 = vld [vmem:[#allocation5 + $0x5f4] ss:$28 sps:$4 sm:$0xff]  }
  0x93   :  { %2501 = vmatprep.subr.bf16.mxu1 %v7574_v61  ;;  %v7659_v60 = vld [vmem:[#allocation5 + $0x5f0] ss:$28 sps:$4 sm:$0xff]   ;;  %v7664_v61 = vld [vmem:[#allocation5 + $0x65c] ss:$28 sps:$4 sm:$0xff]  }
  0x95   :  { %2340 = vmatpush1.bf16.msra.mxu0 %v7575_v63  ;;  %v7662_v63 = vld [vmem:[#allocation5 + $0x658] ss:$28 sps:$4 sm:$0xff]  }
  0x96   :  { %2502 = vmatpush1.bf16.msra.mxu1 %v7572_v62  ;;  %2341 = vmatprep.subr.bf16.mxu0 %v7576_v1  ;;  %v7667_v62 = vld [vmem:[#allocation5 + $0x62c] ss:$28 sps:$4 sm:$0xff]  }
  0x97   :  { %2503 = vmatprep.subr.bf16.mxu1 %v7580_v2  ;;  %v7665_v1 = vld [vmem:[#allocation5 + $0x628] ss:$28 sps:$4 sm:$0xff]   ;;  %v7670_v2 = vld [vmem:[#allocation5 + $0x694] ss:$28 sps:$4 sm:$0xff]  }
  0x99   :  { %2342 = vmatpush1.bf16.msra.mxu0 %v7581_v4  ;;  %v7668_v4 = vld [vmem:[#allocation5 + $0x690] ss:$28 sps:$4 sm:$0xff]  }
  0x9a   :  { %2504 = vmatpush1.bf16.msra.mxu1 %v7578_v3  ;;  %2352 = vmatprep.subr.bf16.mxu0 %v7585_v5  ;;  %v7673_v3 = vld [vmem:[#allocation5 + $0x664] ss:$28 sps:$4 sm:$0xff]  }
  0x9b   :  { %2505 = vmatprep.subr.bf16.mxu1 %v7588_v6  ;;  %v7671_v5 = vld [vmem:[#allocation5 + $0x660] ss:$28 sps:$4 sm:$0xff]   ;;  %v7676_v6 = vld [vmem:[#allocation5 + $0x6cc] ss:$28 sps:$4 sm:$0xff]  }
  0x9c   :  { %2344 = vmatmul.mubr.bf16.vlgmr.msra.gmra.mrb[0].mxu0 %v8785_v8 }
  0x9d   :  { %2353 = vmatpush1.bf16.msra.mxu0 %v7583_v7  ;;  %2384 = vmatprep.mubr.bf16.mxu0 %v8793_v35  ;;  %v7679_v7 = vld [vmem:[#allocation5 + $0x69c] ss:$28 sps:$4 sm:$0xff]  }
  0x9e   :  { %2506 = vmatpush1.bf16.msra.mxu1 %v7586_v9  ;;  %2354 = vmatprep.subr.bf16.mxu0 %v7592_v10  ;;  %v7674_v9 = vld [vmem:[#allocation5 + $0x6c8] ss:$28 sps:$4 sm:$0xff]   ;;  %v7677_v10 = vld [vmem:[#allocation5 + $0x698] ss:$28 sps:$4 sm:$0xff]  }
  0x9f   :  { %2516 = vmatprep.subr.bf16.mxu1 %v7595_v11  ;;  %v7683_v11 = vld [vmem:[#allocation5 + $0x704] ss:$28 sps:$4 sm:$0xff]  }
  0xa1   :  { %2508 = vmatmul.mubr.bf16.vlgmr.msra.gmra.mrb[4].mxu1 %v8785_v8  ;;  %2355 = vmatpush1.bf16.msra.mxu0 %v7590_v12  ;;  %v7686_v12 = vld [vmem:[#allocation5 + $0x6d4] ss:$28 sps:$4 sm:$0xff]  }
  0xa2   :  { %2517 = vmatpush1.bf16.msra.mxu1 %v7593_v13  ;;  %2356 = vmatprep.subr.bf16.mxu0 %v7598_v14  ;;  %v7681_v13 = vld [vmem:[#allocation5 + $0x700] ss:$28 sps:$4 sm:$0xff]   ;;  %v7684_v14 = vld [vmem:[#allocation5 + $0x6d0] ss:$28 sps:$4 sm:$0xff]  }
  0xa3   :  { %2518 = vmatprep.subr.bf16.mxu1 %v7601_v15  ;;  %2548 = vmatprep.mubr.bf16.mxu1 %v8793_v35  ;;  %v8799_v15 = vcombine.low %v8789_v32, %v8789_v32  ;;  %v7706_v32 = vld [vmem:[#allocation5 + $0x7e0] ss:$28 sps:$4 sm:$0xff]  }
  0xa5   :  { %2357 = vmatpush1.bf16.msra.mxu0 %v7596_v16  ;;  %v7690_v16 = vld [vmem:[#allocation5 + $0x73c] ss:$28 sps:$4 sm:$0xff]  }
  0xa6   :  { %2519 = vmatpush1.bf16.msra.mxu1 %v7599_v17  ;;  %2358 = vmatprep.subr.bf16.mxu0 %v7604_v18  ;;  %v7693_v17 = vld [vmem:[#allocation5 + $0x70c] ss:$28 sps:$4 sm:$0xff]   ;;  %v8801_v18 = vld [vmem:[#allocation2 + $0x10] sm:$0xff] }
  0xa7   :  { %2520 = vmatprep.subr.bf16.mxu1 %v7607_v19  ;;  %v8805_v19 = vcombine.high %v8801_v18, %v8801_v18 }
  0xa9   :  { %2359 = vmatpush1.bf16.msra.mxu0 %v7602_v20  ;;  %v7688_v20 = vld [vmem:[#allocation5 + $0x738] ss:$28 sps:$4 sm:$0xff]  }
  0xaa   :  { %2521 = vmatpush1.bf16.msra.mxu1 %v7605_v21  ;;  %2360 = vmatprep.subr.bf16.mxu0 %v7610_v22  ;;  %v7691_v21 = vld [vmem:[#allocation5 + $0x708] ss:$28 sps:$4 sm:$0xff]   ;;  %v7696_v22 = vld [vmem:[#allocation5 + $0x774] ss:$28 sps:$4 sm:$0xff]  }
  0xab   :  { %2522 = vmatprep.subr.bf16.mxu1 %v7613_v23  ;;  %v7699_v23 = vld [vmem:[#allocation5 + $0x744] ss:$28 sps:$4 sm:$0xff]  }
  0xad   :  { %2361 = vmatpush1.bf16.msra.mxu0 %v7608_v24  ;;  %v7694_v24 = vld [vmem:[#allocation5 + $0x770] ss:$28 sps:$4 sm:$0xff]  }
  0xae   :  { %2523 = vmatpush1.bf16.msra.mxu1 %v7611_v25  ;;  %2362 = vmatprep.subr.bf16.mxu0 %v7616_v26  ;;  %v7697_v25 = vld [vmem:[#allocation5 + $0x740] ss:$28 sps:$4 sm:$0xff]   ;;  %v7702_v26 = vld [vmem:[#allocation5 + $0x7ac] ss:$28 sps:$4 sm:$0xff]  }
  0xaf   :  { %2524 = vmatprep.subr.bf16.mxu1 %v7619_v27  ;;  %v7705_v27 = vld [vmem:[#allocation5 + $0x77c] ss:$28 sps:$4 sm:$0xff]  }
  0xb1   :  { %2363 = vmatpush1.bf16.msra.mxu0 %v7614_v28  ;;  %v7700_v28 = vld [vmem:[#allocation5 + $0x7a8] ss:$28 sps:$4 sm:$0xff]  }
  0xb2   :  { %2525 = vmatpush1.bf16.msra.mxu1 %v7617_v29  ;;  %2364 = vmatprep.subr.bf16.mxu0 %v7622_v30  ;;  %v7703_v29 = vld [vmem:[#allocation5 + $0x778] ss:$28 sps:$4 sm:$0xff]   ;;  %v7708_v30 = vld [vmem:[#allocation5 + $0x7e4] ss:$28 sps:$4 sm:$0xff]  }
  0xb3   :  { %2526 = vmatprep.subr.bf16.mxu1 %v7625_v31  ;;  %v7711_v31 = vld [vmem:[#allocation5 + $0x7b4] ss:$28 sps:$4 sm:$0xff]  }
  0xb5   :  { %2365 = vmatpush1.bf16.msra.mxu0 %v7620_v33  ;;  %v7709_v33 = vld [vmem:[#allocation5 + $0x7b0] ss:$28 sps:$4 sm:$0xff]  }
  0xb6   :  { %2527 = vmatpush1.bf16.msra.mxu1 %v7623_v34  ;;  %2366 = vmatprep.subr.bf16.mxu0 %v7628_v36  ;;  %v7714_v34 = vld [vmem:[#allocation5 + $0x81c] ss:$28 sps:$4 sm:$0xff]   ;;  %v7717_v36 = vld [vmem:[#allocation5 + $0x7ec] ss:$28 sps:$4 sm:$0xff]  }
  0xb7   :  { %2528 = vmatprep.subr.bf16.mxu1 %v7631_v37  ;;  %v7712_v37 = vld [vmem:[#allocation5 + $0x818] ss:$28 sps:$4 sm:$0xff]  }
  0xb9   :  { %2367 = vmatpush1.bf16.msra.mxu0 %v7626_v38  ;;  %v7715_v38 = vld [vmem:[#allocation5 + $0x7e8] ss:$28 sps:$4 sm:$0xff]  }
  0xba   :  { %2529 = vmatpush1.bf16.msra.mxu1 %v7629_v39  ;;  %2368 = vmatprep.subr.bf16.mxu0 %v7634_v40  ;;  %v7720_v39 = vld [vmem:[#allocation5 + $0x854] ss:$28 sps:$4 sm:$0xff]   ;;  %v7723_v40 = vld [vmem:[#allocation5 + $0x824] ss:$28 sps:$4 sm:$0xff]  }
  0xbb   :  { %2530 = vmatprep.subr.bf16.mxu1 %v7637_v41  ;;  %v7718_v41 = vld [vmem:[#allocation5 + $0x850] ss:$28 sps:$4 sm:$0xff]  }
  0xbd   :  { %2369 = vmatpush1.bf16.msra.mxu0 %v7632_v42  ;;  %v7721_v42 = vld [vmem:[#allocation5 + $0x820] ss:$28 sps:$4 sm:$0xff]  }
  0xbe   :  { %2531 = vmatpush1.bf16.msra.mxu1 %v7635_v43  ;;  %2370 = vmatprep.subr.bf16.mxu0 %v7640_v44  ;;  %v7726_v43 = vld [vmem:[#allocation5 + $0x88c] ss:$28 sps:$4 sm:$0xff]   ;;  %v7729_v44 = vld [vmem:[#allocation5 + $0x85c] ss:$28 sps:$4 sm:$0xff]  }
  0xbf   :  { %2532 = vmatprep.subr.bf16.mxu1 %v7643_v45  ;;  %v7724_v45 = vld [vmem:[#allocation5 + $0x888] ss:$28 sps:$4 sm:$0xff]  }
  0xc1   :  { %2371 = vmatpush1.bf16.msra.mxu0 %v7638_v46  ;;  %v7727_v46 = vld [vmem:[#allocation5 + $0x858] ss:$28 sps:$4 sm:$0xff]  }
  0xc2   :  { %2533 = vmatpush1.bf16.msra.mxu1 %v7641_v47  ;;  %2372 = vmatprep.subr.bf16.mxu0 %v7646_v48  ;;  %v7732_v47 = vld [vmem:[#allocation5 + $0x8c4] ss:$28 sps:$4 sm:$0xff]   ;;  %v7735_v48 = vld [vmem:[#allocation5 + $0x894] ss:$28 sps:$4 sm:$0xff]  }
  0xc3   :  { %2534 = vmatprep.subr.bf16.mxu1 %v7649_v49  ;;  %v7730_v49 = vld [vmem:[#allocation5 + $0x8c0] ss:$28 sps:$4 sm:$0xff]  }
  0xc5   :  { %2373 = vmatpush1.bf16.msra.mxu0 %v7644_v50  ;;  %v7733_v50 = vld [vmem:[#allocation5 + $0x890] ss:$28 sps:$4 sm:$0xff]  }
  0xc6   :  { %2535 = vmatpush1.bf16.msra.mxu1 %v7647_v51  ;;  %2374 = vmatprep.subr.bf16.mxu0 %v7652_v53  ;;  %v7738_v51 = vld [vmem:[#allocation5 + $0x8fc] ss:$28 sps:$4 sm:$0xff]   ;;  %v7741_v53 = vld [vmem:[#allocation5 + $0x8cc] ss:$28 sps:$4 sm:$0xff]  }
  0xc7   :  { %2536 = vmatprep.subr.bf16.mxu1 %v7655_v54  ;;  %v7736_v54 = vld [vmem:[#allocation5 + $0x8f8] ss:$28 sps:$4 sm:$0xff]  }
  0xc9   :  { %2375 = vmatpush1.bf16.msra.mxu0 %v7650_v55  ;;  %v7739_v55 = vld [vmem:[#allocation5 + $0x8c8] ss:$28 sps:$4 sm:$0xff]  }
  0xca   :  { %2537 = vmatpush1.bf16.msra.mxu1 %v7653_v56  ;;  %2376 = vmatprep.subr.bf16.mxu0 %v7658_v57  ;;  %v7744_v56 = vld [vmem:[#allocation5 + $0x934] ss:$28 sps:$4 sm:$0xff]   ;;  %v7747_v57 = vld [vmem:[#allocation5 + $0x904] ss:$28 sps:$4 sm:$0xff]  }
  0xcb   :  { %2538 = vmatprep.subr.bf16.mxu1 %v7661_v58  ;;  %v7742_v58 = vld [vmem:[#allocation5 + $0x930] ss:$28 sps:$4 sm:$0xff]  }
  0xcd   :  { %2377 = vmatpush1.bf16.msra.mxu0 %v7656_v59  ;;  %v7745_v59 = vld [vmem:[#allocation5 + $0x900] ss:$28 sps:$4 sm:$0xff]  }
  0xce   :  { %2539 = vmatpush1.bf16.msra.mxu1 %v7659_v60  ;;  %2378 = vmatprep.subr.bf16.mxu0 %v7664_v61  ;;  %v7750_v60 = vld [vmem:[#allocation5 + $0x96c] ss:$28 sps:$4 sm:$0xff]   ;;  %v7753_v61 = vld [vmem:[#allocation5 + $0x93c] ss:$28 sps:$4 sm:$0xff]  }
  0xcf   :  { %2540 = vmatprep.subr.bf16.mxu1 %v7667_v62  ;;  %v7748_v62 = vld [vmem:[#allocation5 + $0x968] ss:$28 sps:$4 sm:$0xff]  }
  0xd1   :  { %2379 = vmatpush1.bf16.msra.mxu0 %v7662_v63  ;;  %v7751_v63 = vld [vmem:[#allocation5 + $0x938] ss:$28 sps:$4 sm:$0xff]  }
  0xd2   :  { %2541 = vmatpush1.bf16.msra.mxu1 %v7665_v1  ;;  %2380 = vmatprep.subr.bf16.mxu0 %v7670_v2  ;;  %v7756_v1 = vld [vmem:[#allocation5 + $0x9a4] ss:$28 sps:$4 sm:$0xff]   ;;  %v7759_v2 = vld [vmem:[#allocation5 + $0x974] ss:$28 sps:$4 sm:$0xff]  }
  0xd3   :  { %2542 = vmatprep.subr.bf16.mxu1 %v7673_v3  ;;  %v7754_v3 = vld [vmem:[#allocation5 + $0x9a0] ss:$28 sps:$4 sm:$0xff]  }
  0xd5   :  { %2381 = vmatpush1.bf16.msra.mxu0 %v7668_v4  ;;  %v7757_v4 = vld [vmem:[#allocation5 + $0x970] ss:$28 sps:$4 sm:$0xff]  }
  0xd6   :  { %2543 = vmatpush1.bf16.msra.mxu1 %v7671_v5  ;;  %2382 = vmatprep.subr.bf16.mxu0 %v7676_v6  ;;  %v7762_v5 = vld [vmem:[#allocation5 + $0x9dc] ss:$28 sps:$4 sm:$0xff]   ;;  %v7765_v6 = vld [vmem:[#allocation5 + $0x9ac] ss:$28 sps:$4 sm:$0xff]  }
  0xd7   :  { %2544 = vmatprep.subr.bf16.mxu1 %v7679_v7  ;;  %v7760_v7 = vld [vmem:[#allocation5 + $0x9d8] ss:$28 sps:$4 sm:$0xff]  }
  0xd9   :  { %2383 = vmatpush1.bf16.msra.mxu0 %v7674_v9  ;;  %v7763_v9 = vld [vmem:[#allocation5 + $0x9a8] ss:$28 sps:$4 sm:$0xff]  }
  0xda   :  { %2545 = vmatpush1.bf16.msra.mxu1 %v7677_v10  ;;  %2393 = vmatprep.subr.bf16.mxu0 %v7683_v11  ;;  %v7768_v10 = vld [vmem:[#allocation5 + $0xa14] ss:$28 sps:$4 sm:$0xff]   ;;  %v7771_v11 = vld [vmem:[#allocation5 + $0x9e4] ss:$28 sps:$4 sm:$0xff]  }
  0xdb   :  { %2546 = vmatprep.subr.bf16.mxu1 %v7686_v12  ;;  %v7766_v12 = vld [vmem:[#allocation5 + $0xa10] ss:$28 sps:$4 sm:$0xff]  }
  0xdc   :  { %2385 = vmatmul.mubr.bf16.vlgmr.msra.gmra.mrb[0].mxu0 %v8799_v15 }
  0xdd   :  { %2394 = vmatpush1.bf16.msra.mxu0 %v7681_v13  ;;  %2425 = vmatprep.mubr.bf16.mxu0 %v8805_v19  ;;  %v7769_v13 = vld [vmem:[#allocation5 + $0x9e0] ss:$28 sps:$4 sm:$0xff]  }
  0xde   :  { %2547 = vmatpush1.bf16.msra.mxu1 %v7684_v14  ;;  %2395 = vmatprep.subr.bf16.mxu0 %v7690_v16  ;;  %v7774_v14 = vld [vmem:[#allocation5 + $0xa4c] ss:$28 sps:$4 sm:$0xff]   ;;  %v7777_v16 = vld [vmem:[#allocation5 + $0xa1c] ss:$28 sps:$4 sm:$0xff]  }
  0xdf   :  { %2557 = vmatprep.subr.bf16.mxu1 %v7693_v17  ;;  %v7772_v17 = vld [vmem:[#allocation5 + $0xa48] ss:$28 sps:$4 sm:$0xff]  }
  0xe1   :  { %2549 = vmatmul.mubr.bf16.vlgmr.msra.gmra.mrb[4].mxu1 %v8799_v15  ;;  %2396 = vmatpush1.bf16.msra.mxu0 %v7688_v20  ;;  %v7775_v20 = vld [vmem:[#allocation5 + $0xa18] ss:$28 sps:$4 sm:$0xff]  }
  0xe2   :  { %2558 = vmatpush1.bf16.msra.mxu1 %v7691_v21  ;;  %2397 = vmatprep.subr.bf16.mxu0 %v7696_v22  ;;  %v7782_v21 = vld [vmem:[#allocation5 + $0xa54] ss:$28 sps:$4 sm:$0xff]  }
  0xe3   :  { %2559 = vmatprep.subr.bf16.mxu1 %v7699_v23  ;;  %2589 = vmatprep.mubr.bf16.mxu1 %v8805_v19  ;;  %v7785_v22 = vld [vmem:[#allocation5 + $0x14] ss:$28 sps:$4 sm:$0xff]   ;;  %v8813_v23 = vcombine.low %v8801_v18, %v8801_v18  ;;  %v7789_v18 = vld [vmem:[#allocation5 + $0x80] ss:$28 sps:$4 sm:$0xff]  }
  0xe5   :  { %2398 = vmatpush1.bf16.msra.mxu0 %v7694_v24  ;;  %v7780_v24 = vld [vmem:[#allocation5 + $0xa50] ss:$28 sps:$4 sm:$0xff]  }
  0xe6   :  { %2560 = vmatpush1.bf16.msra.mxu1 %v7697_v25  ;;  %2399 = vmatprep.subr.bf16.mxu0 %v7702_v26  ;;  %v7783_v25 = vld [vmem:[#allocation5 + $0x10] ss:$28 sps:$4 sm:$0xff]  }
  0xe7   :  { %2561 = vmatprep.subr.bf16.mxu1 %v7705_v27  ;;  %v7788_v26 = vld [vmem:[#allocation5 + $0x4c] ss:$28 sps:$4 sm:$0xff]  }
  0xe8   :  { %v7794_v27 = vld [vmem:[#allocation5 + $0xa8c] ss:$28 sps:$4 sm:$0xff]  }
  0xe9   :  { %2400 = vmatpush1.bf16.msra.mxu0 %v7700_v28  ;;  %v7786_v28 = vld [vmem:[#allocation5 + $0x48] ss:$28 sps:$4 sm:$0xff]  }
  0xea   :  { %2562 = vmatpush1.bf16.msra.mxu1 %v7703_v29  ;;  %2401 = vmatprep.subr.bf16.mxu0 %v7708_v30  ;;  %v7792_v29 = vld [vmem:[#allocation5 + $0xa88] ss:$28 sps:$4 sm:$0xff]  }
  0xeb   :  { %2563 = vmatprep.subr.bf16.mxu1 %v7711_v31  ;;  %v7791_v30 = vld [vmem:[#allocation5 + $0x84] ss:$28 sps:$4 sm:$0xff]   ;;  %v7818_v31 = vld [vmem:[#allocation5 + $0xa94] ss:$28 sps:$4 sm:$0xff]  }
  0xed   :  { %2402 = vmatpush1.bf16.msra.mxu0 %v7706_v32  ;;  %v7797_v32 = vld [vmem:[#allocation5 + $0xbc] ss:$28 sps:$4 sm:$0xff]  }
  0xee   :  { %2564 = vmatpush1.bf16.msra.mxu1 %v7709_v33  ;;  %2403 = vmatprep.subr.bf16.mxu0 %v7714_v34  ;;  %v7795_v33 = vld [vmem:[#allocation5 + $0xb8] ss:$28 sps:$4 sm:$0xff]  }
  0xef   :  { %2565 = vmatprep.subr.bf16.mxu1 %v7717_v36  ;;  %v7800_v34 = vld [vmem:[#allocation5 + $0xf4] ss:$28 sps:$4 sm:$0xff]  }
  0xf0   :  { %v7798_v36 = vld [vmem:[#allocation5 + $0xf0] ss:$28 sps:$4 sm:$0xff]  }
  0xf1   :  { %2404 = vmatpush1.bf16.msra.mxu0 %v7712_v37  ;;  %v7816_v37 = vld [vmem:[#allocation5 + $0xa90] ss:$28 sps:$4 sm:$0xff]  }
  0xf2   :  { %2566 = vmatpush1.bf16.msra.mxu1 %v7715_v38  ;;  %2405 = vmatprep.subr.bf16.mxu0 %v7720_v39  ;;  %v7803_v38 = vld [vmem:[#allocation5 + $0x12c] ss:$28 sps:$4 sm:$0xff]   ;;  %v7822_v39 = vld [vmem:[#allocation5 + $0x1d8] ss:$28 sps:$4 sm:$0xff]  }
  0xf3   :  { %2567 = vmatprep.subr.bf16.mxu1 %v7723_v40  ;;  %v8819_v40 = vld [vmem:[#allocation2 + $0x18] ss:$0 sps:$4 sm:$0xff]  }
  0xf5   :  { %2406 = vmatpush1.bf16.msra.mxu0 %v7718_v41  ;;  %v7801_v41 = vld [vmem:[#allocation5 + $0x128] ss:$28 sps:$4 sm:$0xff]  }
  0xf6   :  { %2568 = vmatpush1.bf16.msra.mxu1 %v7721_v42  ;;  %2407 = vmatprep.subr.bf16.mxu0 %v7726_v43  ;;  %v7806_v42 = vld [vmem:[#allocation5 + $0x164] ss:$28 sps:$4 sm:$0xff]  }
  0xf7   :  { %2569 = vmatprep.subr.bf16.mxu1 %v7729_v44  ;;  %v7804_v43 = vld [vmem:[#allocation5 + $0x160] ss:$28 sps:$4 sm:$0xff]  }
  0xf8   :  { %v7809_v44 = vld [vmem:[#allocation5 + $0x19c] ss:$28 sps:$4 sm:$0xff]  }
  0xf9   :  { %2408 = vmatpush1.bf16.msra.mxu0 %v7724_v45  ;;  %v7823_v45 = vld [vmem:[#allocation5 + $0x18] ss:$28 sps:$4 sm:$0xff]  }
  0xfa   :  { %2570 = vmatpush1.bf16.msra.mxu1 %v7727_v46  ;;  %2409 = vmatprep.subr.bf16.mxu0 %v7732_v47  ;;  %v7827_v46 = vld [vmem:[#allocation5 + $0x210] ss:$28 sps:$4 sm:$0xff]   ;;  %v7807_v47 = vld [vmem:[#allocation5 + $0x198] ss:$28 sps:$4 sm:$0xff]  }
  0xfb   :  { %2571 = vmatprep.subr.bf16.mxu1 %v7735_v48 }
  0xfd   :  { %2410 = vmatpush1.bf16.msra.mxu0 %v7730_v49  ;;  %v7828_v49 = vld [vmem:[#allocation5 + $0x50] ss:$28 sps:$4 sm:$0xff]  }
  0xfe   :  { %2572 = vmatpush1.bf16.msra.mxu1 %v7733_v50  ;;  %2411 = vmatprep.subr.bf16.mxu0 %v7738_v51 }
  0xff   :  { %2573 = vmatprep.subr.bf16.mxu1 %v7741_v53  ;;  %v7812_v53 = vld [vmem:[#allocation5 + $0x1d4] ss:$28 sps:$4 sm:$0xff]  }
 0x101   :  { %2412 = vmatpush1.bf16.msra.mxu0 %v7736_v54  ;;  %v7832_v54 = vld [vmem:[#allocation5 + $0x248] ss:$28 sps:$4 sm:$0xff]  }
 0x102   :  { %2574 = vmatpush1.bf16.msra.mxu1 %v7739_v55  ;;  %2413 = vmatprep.subr.bf16.mxu0 %v7744_v56  ;;  %v7810_v56 = vld [vmem:[#allocation5 + $0x1d0] ss:$28 sps:$4 sm:$0xff]  }
 0x103   :  { %2575 = vmatprep.subr.bf16.mxu1 %v7747_v57  ;;  %v7815_v57 = vld [vmem:[#allocation5 + $0x20c] ss:$28 sps:$4 sm:$0xff]  }
 0x105   :  { %2414 = vmatpush1.bf16.msra.mxu0 %v7742_v58  ;;  %v7833_v58 = vld [vmem:[#allocation5 + $0x88] ss:$28 sps:$4 sm:$0xff]  }
 0x106   :  { %2576 = vmatpush1.bf16.msra.mxu1 %v7745_v59  ;;  %2415 = vmatprep.subr.bf16.mxu0 %v7750_v60  ;;  %v7837_v59 = vld [vmem:[#allocation5 + $0x280] ss:$28 sps:$4 sm:$0xff]   ;;  %v7813_v60 = vld [vmem:[#allocation5 + $0x208] ss:$28 sps:$4 sm:$0xff]  }
 0x107   :  { %2577 = vmatprep.subr.bf16.mxu1 %v7753_v61  ;;  %v7838_v61 = vld [vmem:[#allocation5 + $0xc0] ss:$28 sps:$4 sm:$0xff]  }
 0x109   :  { %2416 = vmatpush1.bf16.msra.mxu0 %v7748_v62  ;;  %v7821_v62 = vld [vmem:[#allocation5 + $0x244] ss:$28 sps:$4 sm:$0xff]  }
 0x10a   :  { %2578 = vmatpush1.bf16.msra.mxu1 %v7751_v63  ;;  %2417 = vmatprep.subr.bf16.mxu0 %v7756_v1  ;;  %v7842_v63 = vld [vmem:[#allocation5 + $0x2b8] ss:$28 sps:$4 sm:$0xff]   ;;  %v7819_v1 = vld [vmem:[#allocation5 + $0x240] ss:$28 sps:$4 sm:$0xff]  }
 0x10b   :  { %2579 = vmatprep.subr.bf16.mxu1 %v7759_v2  ;;  %v7826_v2 = vld [vmem:[#allocation5 + $0x27c] ss:$28 sps:$4 sm:$0xff]  }
 0x10d   :  { %2418 = vmatpush1.bf16.msra.mxu0 %v7754_v3  ;;  %v7847_v3 = vld [vmem:[#allocation5 + $0x2f0] ss:$28 sps:$4 sm:$0xff]  }
 0x10e   :  { %2580 = vmatpush1.bf16.msra.mxu1 %v7757_v4  ;;  %2419 = vmatprep.subr.bf16.mxu0 %v7762_v5  ;;  %v7824_v4 = vld [vmem:[#allocation5 + $0x278] ss:$28 sps:$4 sm:$0xff]  }
 0x10f   :  { %2581 = vmatprep.subr.bf16.mxu1 %v7765_v6  ;;  %v7831_v5 = vld [vmem:[#allocation5 + $0x2b4] ss:$28 sps:$4 sm:$0xff]  }
 0x110   :  { %v7848_v6 = vld [vmem:[#allocation5 + $0x130] ss:$28 sps:$4 sm:$0xff]  }
 0x111   :  { %2420 = vmatpush1.bf16.msra.mxu0 %v7760_v7  ;;  %v7852_v7 = vld [vmem:[#allocation5 + $0x328] ss:$28 sps:$4 sm:$0xff]  }
 0x112   :  { %2582 = vmatpush1.bf16.msra.mxu1 %v7763_v9  ;;  %2421 = vmatprep.subr.bf16.mxu0 %v7768_v10  ;;  %v7829_v9 = vld [vmem:[#allocation5 + $0x2b0] ss:$28 sps:$4 sm:$0xff]  }
 0x113   :  { %2583 = vmatprep.subr.bf16.mxu1 %v7771_v11  ;;  %v7836_v10 = vld [vmem:[#allocation5 + $0x2ec] ss:$28 sps:$4 sm:$0xff]  }
 0x114   :  { %v7853_v11 = vld [vmem:[#allocation5 + $0x168] ss:$28 sps:$4 sm:$0xff]  }
 0x115   :  { %2422 = vmatpush1.bf16.msra.mxu0 %v7766_v12  ;;  %v7857_v12 = vld [vmem:[#allocation5 + $0x360] ss:$28 sps:$4 sm:$0xff]  }
 0x116   :  { %2584 = vmatpush1.bf16.msra.mxu1 %v7769_v13  ;;  %2423 = vmatprep.subr.bf16.mxu0 %v7774_v14  ;;  %v7834_v13 = vld [vmem:[#allocation5 + $0x2e8] ss:$28 sps:$4 sm:$0xff]  }
 0x117   :  { %2585 = vmatprep.subr.bf16.mxu1 %v7777_v16  ;;  %v7841_v14 = vld [vmem:[#allocation5 + $0x324] ss:$28 sps:$4 sm:$0xff]  }
 0x118   :  { %v7858_v16 = vld [vmem:[#allocation5 + $0x1a0] ss:$28 sps:$4 sm:$0xff]  }
 0x119   :  { %2424 = vmatpush1.bf16.msra.mxu0 %v7772_v17  ;;  %v7862_v17 = vld [vmem:[#allocation5 + $0x558] ss:$28 sps:$4 sm:$0xff]  }
 0x11a   :  { %2586 = vmatpush1.bf16.msra.mxu1 %v7775_v20  ;;  %2639 = vmatprep.subr.bf16.mxu0 %v7785_v22  ;;  %v7839_v20 = vld [vmem:[#allocation5 + $0x320] ss:$28 sps:$4 sm:$0xff]   ;;  %v7863_v22 = vld [vmem:[#allocation5 + $0x398] ss:$28 sps:$4 sm:$0xff]  }
 0x11b   :  { %2587 = vmatprep.subr.bf16.mxu1 %v7782_v21  ;;  %v7846_v21 = vld [vmem:[#allocation5 + $0x35c] ss:$28 sps:$4 sm:$0xff]  }
 0x11c   :  { %2426 = vmatmul.mubr.bf16.vlgmr.msra.gmra.mrb[0].mxu0 %v8813_v23 }
 0x11d   :  { %2640 = vmatpush1.bf16.msra.mxu0 %v7783_v25  ;;  %2671 = vmatprep.mubr.bf16.mxu0 %v8781_v52  ;;  %v7844_v25 = vld [vmem:[#allocation5 + $0x358] ss:$28 sps:$4 sm:$0xff]  }
 0x11e   :  { %2588 = vmatpush1.bf16.msra.mxu1 %v7780_v24  ;;  %2641 = vmatprep.subr.bf16.mxu0 %v7788_v26  ;;  %v7867_v24 = vld [vmem:[#allocation5 + $0x590] ss:$28 sps:$4 sm:$0xff]  }
 0x11f   :  { %2598 = vmatprep.subr.bf16.mxu1 %v7794_v27  ;;  %v7851_v26 = vld [vmem:[#allocation5 + $0x394] ss:$28 sps:$4 sm:$0xff]  }
 0x120   :  { %v7868_v27 = vld [vmem:[#allocation5 + $0x3d0] ss:$28 sps:$4 sm:$0xff]  }
 0x121   :  { %2590 = vmatmul.mubr.bf16.vlgmr.msra.gmra.mrb[4].mxu1 %v8813_v23  ;;  %2642 = vmatpush1.bf16.msra.mxu0 %v7786_v28  ;;  %v7872_v28 = vld [vmem:[#allocation5 + $0x5c8] ss:$28 sps:$4 sm:$0xff]  }
 0x122   :  { %2599 = vmatpush1.bf16.msra.mxu1 %v7792_v29  ;;  %2643 = vmatprep.subr.bf16.mxu0 %v7791_v30  ;;  %v7849_v29 = vld [vmem:[#allocation5 + $0x390] ss:$28 sps:$4 sm:$0xff]  }
 0x123   :  { %2630 = vmatprep.mubr.bf16.mxu1 %v8672_v0  ;;  %2762 = vmatprep.subr.bf16.mxu1 %v7818_v31  ;;  %v7856_v30 = vld [vmem:[#allocation5 + $0x3cc] ss:$28 sps:$4 sm:$0xff]  }
 0x124   :  { %v7873_v31 = vld [vmem:[#allocation5 + $0x408] ss:$28 sps:$4 sm:$0xff]  }
 0x125   :  { %2644 = vmatpush1.bf16.msra.mxu0 %v7789_v18  ;;  %v7877_v18 = vld [vmem:[#allocation5 + $0x600] ss:$28 sps:$4 sm:$0xff]  }
 0x126   :  { %2645 = vmatprep.subr.bf16.mxu0 %v7797_v32  ;;  %v7854_v32 = vld [vmem:[#allocation5 + $0x3c8] ss:$28 sps:$4 sm:$0xff]  }
 0x129   :  { %2646 = vmatpush1.bf16.msra.mxu0 %v7795_v33  ;;  %v7861_v33 = vld [vmem:[#allocation5 + $0x404] ss:$28 sps:$4 sm:$0xff]  }
 0x12a   :  { %2647 = vmatprep.subr.bf16.mxu0 %v7800_v34  ;;  %v7878_v34 = vld [vmem:[#allocation5 + $0x440] ss:$28 sps:$4 sm:$0xff]  }
 0x12d   :  { %6769 = vmatmul.mubr.msk.bf16.vlgmr.msra.gmra.mrb[4].mxu1 %vm2307_vm0, %v8819_v40  ;;  %2648 = vmatpush1.bf16.msra.mxu0 %v7798_v36  ;;  %v7882_v36 = vld [vmem:[#allocation5 + $0x638] ss:$28 sps:$4 sm:$0xff]  }
 0x12e   :  { %2763 = vmatpush1.bf16.msra.mxu1 %v7816_v37  ;;  %2649 = vmatprep.subr.bf16.mxu0 %v7803_v38  ;;  %v7859_v37 = vld [vmem:[#allocation5 + $0x400] ss:$28 sps:$4 sm:$0xff]  }
 0x12f   :  { %2794 = vmatprep.mubr.bf16.mxu1 %v8672_v0  ;;  %7170 = vmatprep.subr.bf16.mxu1 %v7822_v39  ;;  %v7866_v38 = vld [vmem:[#allocation5 + $0x43c] ss:$28 sps:$4 sm:$0xff]  }
 0x130   :  { %v7883_v39 = vld [vmem:[#allocation5 + $0x478] ss:$28 sps:$4 sm:$0xff]  }
 0x131   :  { %2650 = vmatpush1.bf16.msra.mxu0 %v7801_v41  ;;  %v7887_v41 = vld [vmem:[#allocation5 + $0x670] ss:$28 sps:$4 sm:$0xff]  }
 0x132   :  { %2651 = vmatprep.subr.bf16.mxu0 %v7806_v42  ;;  %v7888_v42 = vld [vmem:[#allocation5 + $0x4b0] ss:$28 sps:$4 sm:$0xff]  }
 0x134   :  { %v8824_v48 = vpop.f32.mrb[0].mxu1 }
 0x135   :  { %6770 = vmatmul.mubr.msk.bf16.vlgmr.msra.gmra.mrb[8].mxu1 %vm2307_vm0, %v8819_v40  ;;  %v8828_v50 = vpop.f32.mrb[1].mxu1  ;;  %2652 = vmatpush1.bf16.msra.mxu0 %v7804_v43  ;;  %v7871_v43 = vld [vmem:[#allocation5 + $0x474] ss:$28 sps:$4 sm:$0xff]  }
 0x136   :  { %7171 = vmatpush3.bf16.msra.mxu1 %v7823_v45  ;;  %v2472_v51 = vpop.f32.mrb[2].mxu1  ;;  %2653 = vmatprep.subr.bf16.mxu0 %v7809_v44  ;;  %v7892_v44 = vld [vmem:[#allocation5 + $0x6a8] ss:$28 sps:$4 sm:$0xff]   ;;  %v7869_v45 = vld [vmem:[#allocation5 + $0x470] ss:$28 sps:$4 sm:$0xff]  }
 0x137   :  { %7172 = vmatprep.subr.bf16.mxu1 %v7827_v46  ;;  %v2473_v55 = vpop.f32.mrb[3].mxu1  ;;  %2835 = vmatprep.mubr.bf16.mxu1 %v8781_v52  ;;  %v7843_v52 = vld [vmem:[#allocation5 + $0xf8] ss:$28 sps:$4 sm:$0xff]   ;;  %v7876_v46 = vld [vmem:[#allocation5 + $0x4ac] ss:$28 sps:$4 sm:$0xff]  }
 0x138   :  { %v7881_v51 = vld [vmem:[#allocation5 + $0x4e4] ss:$28 sps:$4 sm:$0xff]  }
 0x139   :  { %2654 = vmatpush1.bf16.msra.mxu0 %v7807_v47  ;;  %v7897_v47 = vld [vmem:[#allocation5 + $0x6e0] ss:$28 sps:$4 sm:$0xff]  }
 0x13a   :  { %7173 = vmatpush3.bf16.msra.mxu1 %v7828_v49  ;;  %2655 = vmatprep.subr.bf16.mxu0 %v7812_v53  ;;  %v7874_v49 = vld [vmem:[#allocation5 + $0x4a8] ss:$28 sps:$4 sm:$0xff]   ;;  %v7898_v53 = vld [vmem:[#allocation5 + $0x520] ss:$28 sps:$4 sm:$0xff]  }
 0x13b   :  { %7174 = vmatprep.subr.bf16.mxu1 %v7832_v54  ;;  %v7902_v54 = vld [vmem:[#allocation5 + $0x8d8] ss:$28 sps:$4 sm:$0xff]   ;;  %v7879_v55 = vld [vmem:[#allocation5 + $0x4e0] ss:$28 sps:$4 sm:$0xff]  }
 0x13d   :  { %2656 = vmatpush1.bf16.msra.mxu0 %v7810_v56  ;;  %v7886_v56 = vld [vmem:[#allocation5 + $0x51c] ss:$28 sps:$4 sm:$0xff]  }
 0x13e   :  { %7175 = vmatpush3.bf16.msra.mxu1 %v7833_v58  ;;  %2657 = vmatprep.subr.bf16.mxu0 %v7815_v57  ;;  %v7903_v57 = vld [vmem:[#allocation5 + $0x718] ss:$28 sps:$4 sm:$0xff]   ;;  %v7907_v58 = vld [vmem:[#allocation5 + $0x910] ss:$28 sps:$4 sm:$0xff]  }
 0x13f   :  { %7176 = vmatprep.subr.bf16.mxu1 %v7837_v59  ;;  %v7884_v59 = vld [vmem:[#allocation5 + $0x518] ss:$28 sps:$4 sm:$0xff]  }
 0x141   :  { %2658 = vmatpush1.bf16.msra.mxu0 %v7813_v60  ;;  %v7891_v60 = vld [vmem:[#allocation5 + $0x554] ss:$28 sps:$4 sm:$0xff]  }
 0x142   :  { %7177 = vmatpush3.bf16.msra.mxu1 %v7838_v61  ;;  %2659 = vmatprep.subr.bf16.mxu0 %v7821_v62  ;;  %v7908_v61 = vld [vmem:[#allocation5 + $0x750] ss:$28 sps:$4 sm:$0xff]   ;;  %v7912_v62 = vld [vmem:[#allocation5 + $0x948] ss:$28 sps:$4 sm:$0xff]  }
 0x143   :  { %7178 = vmatprep.subr.bf16.mxu1 %v7842_v63  ;;  %v7889_v63 = vld [vmem:[#allocation5 + $0x550] ss:$28 sps:$4 sm:$0xff]  }
 0x145   :  { %2660 = vmatpush1.bf16.msra.mxu0 %v7819_v1  ;;  %v7913_v1 = vld [vmem:[#allocation5 + $0x788] ss:$28 sps:$4 sm:$0xff]  }
 0x146   :  { %7179 = vmatpush3.bf16.msra.mxu1 %v7843_v52  ;;  %2661 = vmatprep.subr.bf16.mxu0 %v7826_v2  ;;  %v7896_v2 = vld [vmem:[#allocation5 + $0x58c] ss:$28 sps:$4 sm:$0xff]   ;;  %v7917_v52 = vld [vmem:[#allocation5 + $0x980] ss:$28 sps:$4 sm:$0xff]  }
 0x147   :  { %7180 = vmatprep.subr.bf16.mxu1 %v7847_v3  ;;  %v7894_v3 = vld [vmem:[#allocation5 + $0x588] ss:$28 sps:$4 sm:$0xff]  }
 0x149   :  { %2662 = vmatpush1.bf16.msra.mxu0 %v7824_v4  ;;  %v7918_v4 = vld [vmem:[#allocation5 + $0x7c0] ss:$28 sps:$4 sm:$0xff]  }
 0x14a   :  { %7181 = vmatpush3.bf16.msra.mxu1 %v7848_v6  ;;  %2663 = vmatprep.subr.bf16.mxu0 %v7831_v5  ;;  %v7901_v5 = vld [vmem:[#allocation5 + $0x5c4] ss:$28 sps:$4 sm:$0xff]   ;;  %v7922_v6 = vld [vmem:[#allocation5 + $0x9b8] ss:$28 sps:$4 sm:$0xff]  }
 0x14b   :  { %7182 = vmatprep.subr.bf16.mxu1 %v7852_v7  ;;  %v7899_v7 = vld [vmem:[#allocation5 + $0x5c0] ss:$28 sps:$4 sm:$0xff]  }
 0x14d   :  { %2664 = vmatpush1.bf16.msra.mxu0 %v7829_v9  ;;  %v7906_v9 = vld [vmem:[#allocation5 + $0x5fc] ss:$28 sps:$4 sm:$0xff]  }
 0x14e   :  { %7183 = vmatpush3.bf16.msra.mxu1 %v7853_v11  ;;  %2665 = vmatprep.subr.bf16.mxu0 %v7836_v10  ;;  %v7923_v10 = vld [vmem:[#allocation5 + $0x7f8] ss:$28 sps:$4 sm:$0xff]   ;;  %v7927_v11 = vld [vmem:[#allocation5 + $0x9f0] ss:$28 sps:$4 sm:$0xff]  }
 0x14f   :  { %7184 = vmatprep.subr.bf16.mxu1 %v7857_v12  ;;  %v7904_v12 = vld [vmem:[#allocation5 + $0x5f8] ss:$28 sps:$4 sm:$0xff]  }
 0x151   :  { %2666 = vmatpush1.bf16.msra.mxu0 %v7834_v13  ;;  %v7911_v13 = vld [vmem:[#allocation5 + $0x634] ss:$28 sps:$4 sm:$0xff]  }
 0x152   :  { %7185 = vmatpush3.bf16.msra.mxu1 %v7858_v16  ;;  %2667 = vmatprep.subr.bf16.mxu0 %v7841_v14  ;;  %v7928_v14 = vld [vmem:[#allocation5 + $0x830] ss:$28 sps:$4 sm:$0xff]   ;;  %v7932_v16 = vld [vmem:[#allocation5 + $0xa28] ss:$28 sps:$4 sm:$0xff]  }
 0x153   :  { %7192 = vmatprep.subr.bf16.mxu1 %v7862_v17  ;;  %v7909_v17 = vld [vmem:[#allocation5 + $0x630] ss:$28 sps:$4 sm:$0xff]  }
 0x155   :  { %2836 = vmatmul.mubr.bf16.vlgmr.msra.gmra.mrb[12].mxu1 %v8785_v8  ;;  %2668 = vmatpush1.bf16.msra.mxu0 %v7839_v20  ;;  %v7933_v20 = vld [vmem:[#allocation5 + $0x868] ss:$28 sps:$4 sm:$0xff]  }
 0x156   :  { %7193 = vmatpush3.bf16.msra.mxu1 %v7863_v22  ;;  %2669 = vmatprep.subr.bf16.mxu0 %v7846_v21  ;;  %v7916_v21 = vld [vmem:[#allocation5 + $0x66c] ss:$28 sps:$4 sm:$0xff]   ;;  %v7937_v22 = vld [vmem:[#allocation5 + $0xa60] ss:$28 sps:$4 sm:$0xff]  }
 0x157   :  { %7194 = vmatprep.subr.bf16.mxu1 %v7867_v24  ;;  %2875 = vmatprep.mubr.bf16.mxu1 %v8793_v35  ;;  %v7914_v24 = vld [vmem:[#allocation5 + $0x668] ss:$28 sps:$4 sm:$0xff]  }
 0x159   :  { %2670 = vmatpush1.bf16.msra.mxu0 %v7844_v25  ;;  %v7921_v25 = vld [vmem:[#allocation5 + $0x6a4] ss:$28 sps:$4 sm:$0xff]  }
 0x15a   :  { %7195 = vmatpush3.bf16.msra.mxu1 %v7868_v27  ;;  %2680 = vmatprep.subr.bf16.mxu0 %v7851_v26  ;;  %v7938_v26 = vld [vmem:[#allocation5 + $0x8a0] ss:$28 sps:$4 sm:$0xff]  }
 0x15b   :  { %7196 = vmatprep.subr.bf16.mxu1 %v7872_v28  ;;  %v7919_v27 = vld [vmem:[#allocation5 + $0x6a0] ss:$28 sps:$4 sm:$0xff]  }
 0x15c   :  { %2672 = vmatmul.mubr.bf16.vlgmr.msra.gmra.mrb[4].mxu0 %v8785_v8  ;;  %v7864_v8 = vld [vmem:[#allocation5 + $0x438] ss:$28 sps:$4 sm:$0xff]  }
 0x15d   :  { %2681 = vmatpush1.bf16.msra.mxu0 %v7849_v29  ;;  %2712 = vmatprep.mubr.bf16.mxu0 %v8793_v35  ;;  %v7893_v35 = vld [vmem:[#allocation5 + $0x4e8] ss:$28 sps:$4 sm:$0xff]   ;;  %v7926_v28 = vld [vmem:[#allocation5 + $0x6dc] ss:$28 sps:$4 sm:$0xff]  }
 0x15e   :  { %7197 = vmatpush3.bf16.msra.mxu1 %v7873_v31  ;;  %2682 = vmatprep.subr.bf16.mxu0 %v7856_v30  ;;  %v7945_v29 = vld [vmem:[#allocation5 + $0xa98] ss:$28 sps:$4 sm:$0xff]   ;;  %v8673_v30 = vmov 0.0  }
 0x15f   :  { %7198 = vmatprep.subr.bf16.mxu1 %v7877_v18  ;;  %v7924_v31 = vld [vmem:[#allocation5 + $0x6d8] ss:$28 sps:$4 sm:$0xff]  }
 0x160   :  { %v7960_v18 = vld [vmem:[#allocation7 + $0x4] ss:$28 sps:$4 sm:$0xff]  }
 0x161   :  { %2683 = vmatpush1.bf16.msra.mxu0 %v7854_v32  ;;  %v7931_v32 = vld [vmem:[#allocation5 + $0x714] ss:$28 sps:$4 sm:$0xff]  }
 0x162   :  { %7199 = vmatpush3.bf16.msra.mxu1 %v7878_v34  ;;  %2684 = vmatprep.subr.bf16.mxu0 %v7861_v33  ;;  %v7929_v33 = vld [vmem:[#allocation5 + $0x710] ss:$28 sps:$4 sm:$0xff]   ;;  %v7958_v34 = vld [vmem:[#allocation7] ss:$28 sps:$4 sm:$0xff]  }
 0x163   :  { %7200 = vmatprep.subr.bf16.mxu1 %v7882_v36  ;;  %v7936_v36 = vld [vmem:[#allocation5 + $0x74c] ss:$28 sps:$4 sm:$0xff]  }
 0x165   :  { %2685 = vmatpush1.bf16.msra.mxu0 %v7859_v37  ;;  %v7966_v37 = vld [vmem:[#allocation7 + $0x3c] ss:$28 sps:$4 sm:$0xff]  }
 0x166   :  { %7201 = vmatpush3.bf16.msra.mxu1 %v7883_v39  ;;  %2686 = vmatprep.subr.bf16.mxu0 %v7866_v38  ;;  %v7934_v38 = vld [vmem:[#allocation5 + $0x748] ss:$28 sps:$4 sm:$0xff]  }
 0x167   :  { %7202 = vmatprep.subr.bf16.mxu1 %v7887_v41  ;;  %v7941_v39 = vld [vmem:[#allocation5 + $0x784] ss:$28 sps:$4 sm:$0xff]   ;;  %v7964_v41 = vld [vmem:[#allocation7 + $0x38] ss:$28 sps:$4 sm:$0xff]  }
 0x169   :  { %2687 = vmatpush1.bf16.msra.mxu0 %v7864_v8  ;;  %v7972_v8 = vld [vmem:[#allocation7 + $0x74] ss:$28 sps:$4 sm:$0xff]  }
 0x16a   :  { %7203 = vmatpush3.bf16.msra.mxu1 %v7888_v42  ;;  %2688 = vmatprep.subr.bf16.mxu0 %v7871_v43  ;;  %v7939_v42 = vld [vmem:[#allocation5 + $0x780] ss:$28 sps:$4 sm:$0xff]   ;;  %v7970_v43 = vld [vmem:[#allocation7 + $0x70] ss:$28 sps:$4 sm:$0xff]  }
 0x16b   :  { %7204 = vmatprep.subr.bf16.mxu1 %v7892_v44  ;;  %v7944_v44 = vld [vmem:[#allocation5 + $0x7bc] ss:$28 sps:$4 sm:$0xff]  }
 0x16d   :  { %2689 = vmatpush1.bf16.msra.mxu0 %v7869_v45  ;;  %v7978_v45 = vld [vmem:[#allocation7 + $0xac] ss:$28 sps:$4 sm:$0xff]  }
 0x16e   :  { %7205 = vmatpush3.bf16.msra.mxu1 %v7893_v35  ;;  %2690 = vmatprep.subr.bf16.mxu0 %v7876_v46  ;;  %v7976_v35 = vld [vmem:[#allocation7 + $0xa8] ss:$28 sps:$4 sm:$0xff]   ;;  %v7948_v46 = vld [vmem:[#allocation5 + $0x7f4] ss:$28 sps:$4 sm:$0xff]  }
 0x16f   :  { %7206 = vmatprep.subr.bf16.mxu1 %v7897_v47  ;;  %v7946_v47 = vld [vmem:[#allocation5 + $0x7f0] ss:$28 sps:$4 sm:$0xff]  }
 0x171   :  { %2691 = vmatpush1.bf16.msra.mxu0 %v7874_v49  ;;  %v7982_v49 = vld [vmem:[#allocation7 + $0xe0] ss:$28 sps:$4 sm:$0xff]  }
 0x172   :  { %7207 = vmatpush3.bf16.msra.mxu1 %v7898_v53  ;;  %2692 = vmatprep.subr.bf16.mxu0 %v7881_v51  ;;  %v7951_v51 = vld [vmem:[#allocation5 + $0x82c] ss:$28 sps:$4 sm:$0xff]   ;;  %v7990_v53 = vld [vmem:[#allocation7 + $0x11c] ss:$28 sps:$4 sm:$0xff]  }
 0x173   :  { %7214 = vmatprep.subr.bf16.mxu1 %v7902_v54  ;;  %v7988_v54 = vld [vmem:[#allocation7 + $0x118] ss:$28 sps:$4 sm:$0xff]  }
 0x175   :  { %2876 = vmatmul.mubr.bf16.vlgmr.msra.gmra.mrb[16].mxu1 %v8799_v15  ;;  %2693 = vmatpush1.bf16.msra.mxu0 %v7879_v55  ;;  %v7954_v55 = vld [vmem:[#allocation5 + $0x864] ss:$28 sps:$4 sm:$0xff]  }
 0x176   :  { %7215 = vmatpush3.bf16.msra.mxu1 %v7903_v57  ;;  %2694 = vmatprep.subr.bf16.mxu0 %v7886_v56  ;;  %v7996_v56 = vld [vmem:[#allocation7 + $0x154] ss:$28 sps:$4 sm:$0xff]   ;;  %v7952_v57 = vld [vmem:[#allocation5 + $0x860] ss:$28 sps:$4 sm:$0xff]  }
 0x177   :  { %7216 = vmatprep.subr.bf16.mxu1 %v7907_v58  ;;  %2915 = vmatprep.mubr.bf16.mxu1 %v8805_v19  ;;  %v7994_v58 = vld [vmem:[#allocation7 + $0x150] ss:$28 sps:$4 sm:$0xff]  }
 0x179   :  { %2695 = vmatpush1.bf16.msra.mxu0 %v7884_v59  ;;  %v7957_v59 = vld [vmem:[#allocation5 + $0x89c] ss:$28 sps:$4 sm:$0xff]  }
 0x17a   :  { %7217 = vmatpush3.bf16.msra.mxu1 %v7908_v61  ;;  %2696 = vmatprep.subr.bf16.mxu0 %v7891_v60  ;;  %v8002_v60 = vld [vmem:[#allocation7 + $0x18c] ss:$28 sps:$4 sm:$0xff]   ;;  %v7955_v61 = vld [vmem:[#allocation5 + $0x898] ss:$28 sps:$4 sm:$0xff]  }
 0x17b   :  { %7218 = vmatprep.subr.bf16.mxu1 %v7912_v62  ;;  %v8000_v62 = vld [vmem:[#allocation7 + $0x188] ss:$28 sps:$4 sm:$0xff]  }
 0x17d   :  { %2697 = vmatpush1.bf16.msra.mxu0 %v7889_v63  ;;  %v7963_v63 = vld [vmem:[#allocation5 + $0x8d4] ss:$28 sps:$4 sm:$0xff]  }
 0x17e   :  { %7219 = vmatpush3.bf16.msra.mxu1 %v7913_v1  ;;  %2698 = vmatprep.subr.bf16.mxu0 %v7896_v2  ;;  %v8008_v1 = vld [vmem:[#allocation7 + $0x1c4] ss:$28 sps:$4 sm:$0xff]   ;;  %v7961_v2 = vld [vmem:[#allocation5 + $0x8d0] ss:$28 sps:$4 sm:$0xff]  }
 0x17f   :  { %7220 = vmatprep.subr.bf16.mxu1 %v7917_v52  ;;  %v8006_v52 = vld [vmem:[#allocation7 + $0x1c0] ss:$28 sps:$4 sm:$0xff]  }
 0x181   :  { %2699 = vmatpush1.bf16.msra.mxu0 %v7894_v3  ;;  %v7969_v3 = vld [vmem:[#allocation5 + $0x90c] ss:$28 sps:$4 sm:$0xff]  }
 0x182   :  { %7221 = vmatpush3.bf16.msra.mxu1 %v7918_v4  ;;  %2700 = vmatprep.subr.bf16.mxu0 %v7901_v5  ;;  %v8014_v4 = vld [vmem:[#allocation7 + $0x1fc] ss:$28 sps:$4 sm:$0xff]   ;;  %v7967_v5 = vld [vmem:[#allocation5 + $0x908] ss:$28 sps:$4 sm:$0xff]  }
 0x183   :  { %7222 = vmatprep.subr.bf16.mxu1 %v7922_v6  ;;  %v7975_v6 = vld [vmem:[#allocation5 + $0x944] ss:$28 sps:$4 sm:$0xff]  }
 0x185   :  { %2701 = vmatpush1.bf16.msra.mxu0 %v7899_v7  ;;  %v8012_v7 = vld [vmem:[#allocation7 + $0x1f8] ss:$28 sps:$4 sm:$0xff]  }
 0x186   :  { %7223 = vmatpush3.bf16.msra.mxu1 %v7923_v10  ;;  %2702 = vmatprep.subr.bf16.mxu0 %v7906_v9  ;;  %v8020_v9 = vld [vmem:[#allocation7 + $0x234] ss:$28 sps:$4 sm:$0xff]   ;;  %v7973_v10 = vld [vmem:[#allocation5 + $0x940] ss:$28 sps:$4 sm:$0xff]  }
 0x187   :  { %7224 = vmatprep.subr.bf16.mxu1 %v7927_v11  ;;  %v7981_v11 = vld [vmem:[#allocation5 + $0x97c] ss:$28 sps:$4 sm:$0xff]  }
 0x189   :  { %2703 = vmatpush1.bf16.msra.mxu0 %v7904_v12  ;;  %v8018_v12 = vld [vmem:[#allocation7 + $0x230] ss:$28 sps:$4 sm:$0xff]  }
 0x18a   :  { %7225 = vmatpush3.bf16.msra.mxu1 %v7928_v14  ;;  %2704 = vmatprep.subr.bf16.mxu0 %v7911_v13  ;;  %v8026_v13 = vld [vmem:[#allocation7 + $0x26c] ss:$28 sps:$4 sm:$0xff]   ;;  %v7979_v14 = vld [vmem:[#allocation5 + $0x978] ss:$28 sps:$4 sm:$0xff]  }
 0x18b   :  { %7226 = vmatprep.subr.bf16.mxu1 %v7932_v16  ;;  %v7987_v16 = vld [vmem:[#allocation5 + $0x9b4] ss:$28 sps:$4 sm:$0xff]  }
 0x18d   :  { %2705 = vmatpush1.bf16.msra.mxu0 %v7909_v17  ;;  %v8024_v17 = vld [vmem:[#allocation7 + $0x268] ss:$28 sps:$4 sm:$0xff]  }
 0x18e   :  { %7227 = vmatpush3.bf16.msra.mxu1 %v7933_v20  ;;  %2706 = vmatprep.subr.bf16.mxu0 %v7916_v21  ;;  %v8032_v20 = vld [vmem:[#allocation7 + $0x2a4] ss:$28 sps:$4 sm:$0xff]   ;;  %v7985_v21 = vld [vmem:[#allocation5 + $0x9b0] ss:$28 sps:$4 sm:$0xff]  }
 0x18f   :  { %7228 = vmatprep.subr.bf16.mxu1 %v7937_v22  ;;  %v7993_v22 = vld [vmem:[#allocation5 + $0x9ec] ss:$28 sps:$4 sm:$0xff]  }
 0x191   :  { %2707 = vmatpush1.bf16.msra.mxu0 %v7914_v24  ;;  %v8030_v24 = vld [vmem:[#allocation7 + $0x2a0] ss:$28 sps:$4 sm:$0xff]  }
 0x192   :  { %7229 = vmatpush3.bf16.msra.mxu1 %v7938_v26  ;;  %2708 = vmatprep.subr.bf16.mxu0 %v7921_v25  ;;  %v8038_v25 = vld [vmem:[#allocation7 + $0x2dc] ss:$28 sps:$4 sm:$0xff]   ;;  %v7991_v26 = vld [vmem:[#allocation5 + $0x9e8] ss:$28 sps:$4 sm:$0xff]  }
 0x193   :  { %7374 = vmatprep.subr.bf16.mxu1 %v8673_v30 }
 0x195   :  { %2916 = vmatmul.mubr.bf16.vlgmr.msra.gmra.mrb[20].mxu1 %v8813_v23  ;;  %2709 = vmatpush1.bf16.msra.mxu0 %v7919_v27  ;;  %v7999_v27 = vld [vmem:[#allocation5 + $0xa24] ss:$28 sps:$4 sm:$0xff]  }
 0x196   :  { %7375 = vmatpush3.bf16.msra.mxu1 %v7945_v29  ;;  %2710 = vmatprep.subr.bf16.mxu0 %v7926_v28  ;;  %v8036_v28 = vld [vmem:[#allocation7 + $0x2d8] ss:$28 sps:$4 sm:$0xff]  }
 0x197   :  { %7376 = vmatprep.mubr.msk.bf16.mxu1 %vm8674_vm1, %v8673_v30  ;;  %5174 = vmatprep.subr.bf16.mxu1 %v7960_v18  ;;  %v8044_v29 = vld [vmem:[#allocation7 + $0x314] ss:$28 sps:$4 sm:$0xff]   ;;  %v8005_v18 = vld [vmem:[#allocation5 + $0xa5c] ss:$28 sps:$4 sm:$0xff]  }
 0x199   :  { %2711 = vmatpush1.bf16.msra.mxu0 %v7924_v31  ;;  %v7997_v31 = vld [vmem:[#allocation5 + $0xa20] ss:$28 sps:$4 sm:$0xff]  }
 0x19a   :  { %2721 = vmatprep.subr.bf16.mxu0 %v7931_v32  ;;  %v8042_v32 = vld [vmem:[#allocation7 + $0x310] ss:$28 sps:$4 sm:$0xff]  }
 0x19c   :  { %2713 = vmatmul.mubr.bf16.vlgmr.msra.gmra.mrb[4].mxu0 %v8799_v15  ;;  %v7942_v15 = vld [vmem:[#allocation5 + $0x7b8] ss:$28 sps:$4 sm:$0xff]  }
 0x19d   :  { %7377 = vmatmul.mubr.msk.bf16.vlgmr.msra.gmra.mrb[24].mxu1 %vm2307_vm0, %v8819_v40  ;;  %2722 = vmatpush1.bf16.msra.mxu0 %v7929_v33  ;;  %v7984_v40 = vld [vmem:[#allocation7 + $0xe4] ss:$28 sps:$4 sm:$0xff]   ;;  %v8050_v33 = vld [vmem:[#allocation7 + $0x34c] ss:$28 sps:$4 sm:$0xff]  }
 0x19e   :  { %5175 = vmatpush1.bf16.msra.mxu1 %v7958_v34  ;;  %2723 = vmatprep.subr.bf16.mxu0 %v7936_v36  ;;  %v8003_v34 = vld [vmem:[#allocation5 + $0xa58] ss:$28 sps:$4 sm:$0xff]   ;;  %v8011_v36 = vld [vmem:[#allocation7 + $0xc] ss:$28 sps:$4 sm:$0xff]  }
 0x19f   :  { %5176 = vmatprep.subr.bf16.mxu1 %v7966_v37  ;;  %2753 = vmatprep.mubr.bf16.mxu0 %v8805_v19  ;;  %v7949_v19 = vld [vmem:[#allocation5 + $0x828] ss:$28 sps:$4 sm:$0xff]   ;;  %v8048_v37 = vld [vmem:[#allocation7 + $0x348] ss:$28 sps:$4 sm:$0xff]  }
 0x1a1   :  { %2724 = vmatpush1.bf16.msra.mxu0 %v7934_v38  ;;  %v8056_v38 = vld [vmem:[#allocation7 + $0x384] ss:$28 sps:$4 sm:$0xff]  }
 0x1a2   :  { %5177 = vmatpush1.bf16.msra.mxu1 %v7964_v41  ;;  %2725 = vmatprep.subr.bf16.mxu0 %v7941_v39  ;;  %v8009_v39 = vld [vmem:[#allocation7 + $0x8] ss:$28 sps:$4 sm:$0xff]  }
 0x1a3   :  { %5178 = vmatprep.subr.bf16.mxu1 %v7972_v8  ;;  %v8017_v41 = vld [vmem:[#allocation7 + $0x44] ss:$28 sps:$4 sm:$0xff]  }
 0x1a4   :  { %v8015_v8 = vld [vmem:[#allocation7 + $0x40] ss:$28 sps:$4 sm:$0xff]  }
 0x1a5   :  { %2726 = vmatpush1.bf16.msra.mxu0 %v7939_v42  ;;  %v8023_v42 = vld [vmem:[#allocation7 + $0x7c] ss:$28 sps:$4 sm:$0xff]  }
 0x1a6   :  { %5179 = vmatpush1.bf16.msra.mxu1 %v7970_v43  ;;  %2727 = vmatprep.subr.bf16.mxu0 %v7944_v44  ;;  %v8021_v43 = vld [vmem:[#allocation7 + $0x78] ss:$28 sps:$4 sm:$0xff]   ;;  %v484_v44 = vlaneseq }
 0x1a7   :  { %5180 = vmatprep.subr.bf16.mxu1 %v7978_v45  ;;  %v8029_v45 = vld [vmem:[#allocation7 + $0xb4] ss:$28 sps:$4 sm:$0xff]  }
 0x1a9   :  { %2728 = vmatpush1.bf16.msra.mxu0 %v7942_v15  ;;  %v8027_v15 = vld [vmem:[#allocation7 + $0xb0] ss:$28 sps:$4 sm:$0xff]  }
 0x1aa   :  { %5181 = vmatpush1.bf16.msra.mxu1 %v7976_v35  ;;  %2729 = vmatprep.subr.bf16.mxu0 %v7948_v46  ;;  %v8846_v35 = vshrl.u32 %v484_v44, 7  ;;  %v8035_v46 = vld [vmem:[#allocation7 + $0xec] ss:$28 sps:$4 sm:$0xff]   ;;  %v8089_v44 = vld [vmem:[#allocation7 + $0x2e4] ss:$28 sps:$4 sm:$0xff]  }
 0x1ab   :  { %5182 = vmatprep.subr.bf16.mxu1 %v7984_v40 }
 0x1ac   :  { %v486_v40 = vsub.s32 0, %v8846_v35 }
 0x1ad   :  { %2730 = vmatpush1.bf16.msra.mxu0 %v7946_v47  ;;  %v8033_v47 = vld [vmem:[#allocation7 + $0xe8] ss:$28 sps:$4 sm:$0xff]  }
 0x1ae   :  { %5183 = vmatpush1.bf16.msra.mxu1 %v7982_v49  ;;  %2731 = vmatprep.subr.bf16.mxu0 %v7951_v51  ;;  %v490_v49 = vsub.s32 1, %v8846_v35  ;;  %v8041_v51 = vld [vmem:[#allocation7 + $0x124] ss:$28 sps:$4 sm:$0xff]  }
 0x1af   :  { %5184 = vmatprep.subr.bf16.mxu1 %v7990_v53  ;;  %v8039_v53 = vld [vmem:[#allocation7 + $0x120] ss:$28 sps:$4 sm:$0xff]  }
 0x1b1   :  { %2732 = vmatpush1.bf16.msra.mxu0 %v7949_v19 }
 0x1b2   :  { %5185 = vmatpush1.bf16.msra.mxu1 %v7988_v54  ;;  %2733 = vmatprep.subr.bf16.mxu0 %v7954_v55  ;;  %v8047_v54 = vld [vmem:[#allocation7 + $0x15c] ss:$28 sps:$4 sm:$0xff]  }
 0x1b3   :  { %5186 = vmatprep.subr.bf16.mxu1 %v7996_v56 }
 0x1b5   :  { %2734 = vmatpush1.bf16.msra.mxu0 %v7952_v57  ;;  %v8045_v57 = vld [vmem:[#allocation7 + $0x158] ss:$28 sps:$4 sm:$0xff]  }
 0x1b6   :  { %5187 = vmatpush1.bf16.msra.mxu1 %v7994_v58  ;;  %2735 = vmatprep.subr.bf16.mxu0 %v7957_v59 }
 0x1b7   :  { %5188 = vmatprep.subr.bf16.mxu1 %v8002_v60  ;;  %v8053_v60 = vld [vmem:[#allocation7 + $0x194] ss:$28 sps:$4 sm:$0xff]  }
 0x1b9   :  { %2736 = vmatpush1.bf16.msra.mxu0 %v7955_v61 }
 0x1ba   :  { %5189 = vmatpush1.bf16.msra.mxu1 %v8000_v62  ;;  %2737 = vmatprep.subr.bf16.mxu0 %v7963_v63 }
 0x1bb   :  { %5190 = vmatprep.subr.bf16.mxu1 %v8008_v1 }
 0x1bd   :  { %2738 = vmatpush1.bf16.msra.mxu0 %v7961_v2 }
 0x1be   :  { %5191 = vmatpush1.bf16.msra.mxu1 %v8006_v52  ;;  %2739 = vmatprep.subr.bf16.mxu0 %v7969_v3 }
 0x1bf   :  { %5192 = vmatprep.subr.bf16.mxu1 %v8014_v4  ;;  %v8051_v4 = vld [vmem:[#allocation7 + $0x190] ss:$28 sps:$4 sm:$0xff]  }
 0x1c1   :  { %2740 = vmatpush1.bf16.msra.mxu0 %v7967_v5 }
 0x1c2   :  { %5193 = vmatpush1.bf16.msra.mxu1 %v8012_v7  ;;  %2741 = vmatprep.subr.bf16.mxu0 %v7975_v6  ;;  %v8054_v6 = vld [vmem:[#allocation7 + $0x380] ss:$28 sps:$4 sm:$0xff]   ;;  %v8059_v7 = vld [vmem:[#allocation7 + $0x1cc] ss:$28 sps:$4 sm:$0xff]  }
 0x1c3   :  { %5194 = vmatprep.subr.bf16.mxu1 %v8020_v9 }
 0x1c5   :  { %2742 = vmatpush1.bf16.msra.mxu0 %v7973_v10  ;;  %v8062_v10 = vld [vmem:[#allocation7 + $0x3bc] ss:$28 sps:$4 sm:$0xff]  }
 0x1c6   :  { %5195 = vmatpush1.bf16.msra.mxu1 %v8018_v12  ;;  %2743 = vmatprep.subr.bf16.mxu0 %v7981_v11  ;;  %v498_v11 = vsub.s32 3, %v8846_v35  ;;  %v8060_v12 = vld [vmem:[#allocation7 + $0x3b8] ss:$28 sps:$4 sm:$0xff]  }
 0x1c7   :  { %5196 = vmatprep.subr.bf16.mxu1 %v8026_v13  ;;  %v8068_v13 = vld [vmem:[#allocation7 + $0x3f4] ss:$28 sps:$4 sm:$0xff]  }
 0x1c9   :  { %2744 = vmatpush1.bf16.msra.mxu0 %v7979_v14 }
 0x1ca   :  { %5197 = vmatpush1.bf16.msra.mxu1 %v8024_v17  ;;  %2745 = vmatprep.subr.bf16.mxu0 %v7987_v16  ;;  %v8063_v16 = vld [vmem:[#allocation7 + $0x200] ss:$28 sps:$4 sm:$0xff]   ;;  %v8066_v17 = vld [vmem:[#allocation7 + $0x3f0] ss:$28 sps:$4 sm:$0xff]  }
 0x1cb   :  { %5198 = vmatprep.subr.bf16.mxu1 %v8032_v20  ;;  %v8071_v20 = vld [vmem:[#allocation7 + $0x23c] ss:$28 sps:$4 sm:$0xff]  }
 0x1cd   :  { %2746 = vmatpush1.bf16.msra.mxu0 %v7985_v21 }
 0x1ce   :  { %5199 = vmatpush1.bf16.msra.mxu1 %v8030_v24  ;;  %2747 = vmatprep.subr.bf16.mxu0 %v7993_v22  ;;  %v8074_v22 = vld [vmem:[#allocation7 + $0x42c] ss:$28 sps:$4 sm:$0xff]  }
 0x1cf   :  { %5200 = vmatprep.subr.bf16.mxu1 %v8038_v25 }
 0x1d1   :  { %2748 = vmatpush1.bf16.msra.mxu0 %v7991_v26 }
 0x1d2   :  { %5201 = vmatpush1.bf16.msra.mxu1 %v8036_v28  ;;  %2749 = vmatprep.subr.bf16.mxu0 %v7999_v27  ;;  %v8069_v27 = vld [vmem:[#allocation7 + $0x238] ss:$28 sps:$4 sm:$0xff]   ;;  %v8072_v28 = vld [vmem:[#allocation7 + $0x428] ss:$28 sps:$4 sm:$0xff]  }
 0x1d3   :  { %5202 = vmatprep.subr.bf16.mxu1 %v8044_v29 }
 0x1d5   :  { %2750 = vmatpush1.bf16.msra.mxu0 %v7997_v31  ;;  %v8077_v31 = vld [vmem:[#allocation7 + $0x274] ss:$28 sps:$4 sm:$0xff]  }
 0x1d6   :  { %5203 = vmatpush1.bf16.msra.mxu1 %v8042_v32  ;;  %2751 = vmatprep.subr.bf16.mxu0 %v8005_v18  ;;  %v8080_v18 = vld [vmem:[#allocation7 + $0x464] ss:$28 sps:$4 sm:$0xff]  }
 0x1d7   :  { %5204 = vmatprep.subr.bf16.mxu1 %v8050_v33 }
 0x1d9   :  { %2752 = vmatpush1.bf16.msra.mxu0 %v8003_v34  ;;  %v8075_v34 = vld [vmem:[#allocation7 + $0x270] ss:$28 sps:$4 sm:$0xff]  }
 0x1da   :  { %5205 = vmatpush1.bf16.msra.mxu1 %v8048_v37  ;;  %5338 = vmatprep.subr.bf16.mxu0 %v8011_v36  ;;  %v8078_v36 = vld [vmem:[#allocation7 + $0x460] ss:$28 sps:$4 sm:$0xff]   ;;  %v8083_v37 = vld [vmem:[#allocation7 + $0x2ac] ss:$28 sps:$4 sm:$0xff]  }
 0x1db   :  { %5215 = vmatprep.subr.bf16.mxu1 %v8056_v38  ;;  %v8086_v38 = vld [vmem:[#allocation7 + $0x49c] ss:$28 sps:$4 sm:$0xff]  }
 0x1dc   :  { %2754 = vmatmul.mubr.bf16.vlgmr.msra.gmra.mrb[4].mxu0 %v8813_v23  ;;  %v8849_v23 = vld [vmem:[#allocation10] ss:$4 sm:$0x7f] }
 0x1dd   :  { %5339 = vmatpush1.bf16.msra.mxu0 %v8009_v39  ;;  %v487_v19 = vrot.slane %v8849_v23, %v486_v40  ;;  %v491_v55 = vrot.slane %v8849_v23, %v490_v49  ;;  %v499_v14 = vrot.slane %v8849_v23, %v498_v11 }
 0x1de   :  { %5340 = vmatprep.subr.bf16.mxu0 %v8017_v41 }
 0x1e1   :  { %5341 = vmatpush1.bf16.msra.mxu0 %v8015_v8  ;;  %v8081_v8 = vld [vmem:[#allocation7 + $0x2a8] ss:$28 sps:$4 sm:$0xff]  }
 0x1e2   :  { %5342 = vmatprep.subr.bf16.mxu0 %v8023_v42  ;;  %v8084_v42 = vld [vmem:[#allocation7 + $0x498] ss:$28 sps:$4 sm:$0xff]  }
 0x1e5   :  { %5343 = vmatpush1.bf16.msra.mxu0 %v8021_v43 }
 0x1e6   :  { %5344 = vmatprep.subr.bf16.mxu0 %v8029_v45  ;;  %v8092_v45 = vld [vmem:[#allocation7 + $0x4d4] ss:$28 sps:$4 sm:$0xff]  }
 0x1e9   :  { %5345 = vmatpush1.bf16.msra.mxu0 %v8027_v15 }
 0x1ea   :  { %5346 = vmatprep.subr.bf16.mxu0 %v8035_v46  ;;  %v8087_v46 = vld [vmem:[#allocation7 + $0x2e0] ss:$28 sps:$4 sm:$0xff]  }
 0x1ed   :  { %5347 = vmatpush1.bf16.msra.mxu0 %v8033_v47  ;;  %v8090_v47 = vld [vmem:[#allocation7 + $0x4d0] ss:$28 sps:$4 sm:$0xff]  }
 0x1ee   :  { %5348 = vmatprep.subr.bf16.mxu0 %v8041_v51  ;;  %v8095_v51 = vld [vmem:[#allocation7 + $0x31c] ss:$28 sps:$4 sm:$0xff]  }
 0x1ef   :  { %v2427_v56 = vpop.f32.mrb[0].mxu0 }
 0x1f0   :  { %v7392_v58 = vadd.f32 %v2427_v56, %v487_v19  ;;  %v2429_v59 = vpop.f32.mrb[1].mxu0  ;;  %v8093_v19 = vld [vmem:[#allocation7 + $0x318] ss:$28 sps:$4 sm:$0xff]   ;;  %v8104_v56 = vld [vmem:[#allocation7 + $0x544] ss:$28 sps:$4 sm:$0xff]  }
 0x1f1   :  { %v7394_v61 = vadd.f32 %v2429_v59, %v491_v55  ;;  %v2431_v62 = vpop.f32.mrb[2].mxu0  ;;  %5349 = vmatpush1.bf16.msra.mxu0 %v8039_v53  ;;  %v8098_v53 = vld [vmem:[#allocation7 + $0x50c] ss:$28 sps:$4 sm:$0xff]   ;;  %v8102_v59 = vld [vmem:[#allocation7 + $0x540] ss:$28 sps:$4 sm:$0xff]  }
 0x1f2   :  { %v7393_v63 = vadd.f32 %v7392_v58, %v8824_v48  ;;  %v2432_v1 = vpop.f32.mrb[3].mxu0  ;;  %5350 = vmatprep.subr.bf16.mxu0 %v8047_v54  ;;  %v8057_v48 = vld [vmem:[#allocation7 + $0x1c8] ss:$28 sps:$4 sm:$0xff]   ;;  %v8101_v54 = vld [vmem:[#allocation7 + $0x354] ss:$28 sps:$4 sm:$0xff]  }
 0x1f3   :  { %v7395_v2 = vadd.f32 %v7394_v61, %v8828_v50  ;;  %v8065_v50 = vld [vmem:[#allocation7 + $0x204] ss:$28 sps:$4 sm:$0xff]   ;;  %v8107_v58 = vld [vmem:[#allocation7 + $0x38c] ss:$28 sps:$4 sm:$0xff]   ;;  %v8116_v1 = vld [vmem:[#allocation7 + $0x5b4] ss:$28 sps:$4 sm:$0xff]  }
 0x1f4   :  { %v2963_v52 = vmax.f32 %v7393_v63, 0.0  ;;  %v8096_v55 = vld [vmem:[#allocation7 + $0x508] ss:$28 sps:$4 sm:$0xff]   ;;  %v8108_v63 = vld [vmem:[#allocation7 + $0x578] ss:$28 sps:$4 sm:$0xff]  }
 0x1f5   :  { %v2964_v3 = vmax.f32 %v7395_v2, 0.0  ;;  %5351 = vmatpush1.bf16.msra.mxu0 %v8045_v57  ;;  %v8099_v57 = vld [vmem:[#allocation7 + $0x350] ss:$28 sps:$4 sm:$0xff]   ;;  %v8105_v61 = vld [vmem:[#allocation7 + $0x388] ss:$28 sps:$4 sm:$0xff]  }
 0x1f6   :  { %5352 = vmatprep.subr.bf16.mxu0 %v8053_v60  ;;  %v8862_v9 = vpack.c.bf16 %v2963_v52, %v2963_v52  ;;  %v8110_v60 = vld [vmem:[#allocation7 + $0x57c] ss:$28 sps:$4 sm:$0xff]   ;;  %v8113_v62 = vld [vmem:[#allocation7 + $0x3c4] ss:$28 sps:$4 sm:$0xff]  }
 0x1f7   :  { %v8860_v5 = vpack.c.bf16 %v2964_v3, %v2964_v3  ;;  %v8111_v2 = vld [vmem:[#allocation7 + $0x3c0] ss:$28 sps:$4 sm:$0xff]   ;;  %v8114_v3 = vld [vmem:[#allocation7 + $0x5b0] ss:$28 sps:$4 sm:$0xff]  }
 0x1f8   :  { %v8119_v52 = vld [vmem:[#allocation7 + $0x3fc] ss:$28 sps:$4 sm:$0xff]  }
 0x1f9   :  { %5206 = vmatprep.mubr.bf16.mxu1 %v8860_v5  ;;  %5353 = vmatpush1.bf16.msra.mxu0 %v8051_v4  ;;  %v8122_v4 = vld [vmem:[#allocation7 + $0x5ec] ss:$28 sps:$4 sm:$0xff]  }
 0x1fa   :  { %5370 = vmatprep.mubr.bf16.mxu0 %v8860_v5  ;;  %5207 = vmatmul.mubr.bf16.vlgmr.msra.gmra.mrb[28].mxu1 %v8862_v9 }
 0x1fb   :  { %5216 = vmatpush1.bf16.msra.mxu1 %v8054_v6  ;;  %5354 = vmatprep.subr.bf16.mxu0 %v8059_v7  ;;  %v8117_v6 = vld [vmem:[#allocation7 + $0x3f8] ss:$28 sps:$4 sm:$0xff]  }
 0x1fc   :  { %5217 = vmatprep.subr.bf16.mxu1 %v8062_v10  ;;  %v8125_v7 = vld [vmem:[#allocation7 + $0x434] ss:$28 sps:$4 sm:$0xff]   ;;  %v8120_v10 = vld [vmem:[#allocation7 + $0x5e8] ss:$28 sps:$4 sm:$0xff]  }
 0x1fd   :  { %5355 = vmatpush1.bf16.msra.mxu0 %v8057_v48  ;;  %v8128_v48 = vld [vmem:[#allocation7 + $0x624] ss:$28 sps:$4 sm:$0xff]  }
 0x1fe   :  { %5356 = vmatprep.subr.bf16.mxu0 %v8065_v50  ;;  %v8123_v50 = vld [vmem:[#allocation7 + $0x430] ss:$28 sps:$4 sm:$0xff]  }
 0x1ff   :  { %5218 = vmatpush1.bf16.msra.mxu1 %v8060_v12  ;;  %v8131_v12 = vld [vmem:[#allocation7 + $0x46c] ss:$28 sps:$4 sm:$0xff]  }
 0x200   :  { %v8871_v21 = vpop.f32.mrb[4].mxu1  ;;  %5219 = vmatprep.subr.bf16.mxu1 %v8068_v13  ;;  %v8126_v13 = vld [vmem:[#allocation7 + $0x620] ss:$28 sps:$4 sm:$0xff]  }
 0x201   :  { %v2634_v24 = vpop.f32.mrb[5].mxu1  ;;  %5357 = vmatpush1.bf16.msra.mxu0 %v8063_v16  ;;  %v8129_v16 = vld [vmem:[#allocation7 + $0x468] ss:$28 sps:$4 sm:$0xff]  }
 0x202   :  { %v7397_v25 = vadd.f32 %v2634_v24, %v499_v14  ;;  %v2636_v26 = vpop.f32.mrb[6].mxu1  ;;  %5358 = vmatprep.subr.bf16.mxu0 %v8071_v20  ;;  %v8134_v14 = vld [vmem:[#allocation7 + $0x65c] ss:$28 sps:$4 sm:$0xff]   ;;  %v494_v20 = vsub.s32 2, %v8846_v35 }
 0x203   :  { %v2637_v29 = vpop.f32.mrb[7].mxu1  ;;  %5220 = vmatpush1.bf16.msra.mxu1 %v8066_v17 }
 0x204   :  { %v2966_v32 = vmax.f32 %v7397_v25, 0.0  ;;  %5221 = vmatprep.subr.bf16.mxu1 %v8074_v22  ;;  %v8137_v22 = vld [vmem:[#allocation7 + $0x4a4] ss:$28 sps:$4 sm:$0xff]   ;;  %v8132_v25 = vld [vmem:[#allocation7 + $0x658] ss:$28 sps:$4 sm:$0xff]  }
 0x205   :  { %5359 = vmatpush1.bf16.msra.mxu0 %v8069_v27 }
 0x206   :  { %v8873_v33 = vpack.c.bf16 %v2966_v32, %v2966_v32  ;;  %5360 = vmatprep.subr.bf16.mxu0 %v8077_v31  ;;  %v8135_v31 = vld [vmem:[#allocation7 + $0x4a0] ss:$28 sps:$4 sm:$0xff]  }
 0x207   :  { %5222 = vmatpush1.bf16.msra.mxu1 %v8072_v28  ;;  %v8140_v28 = vld [vmem:[#allocation7 + $0x694] ss:$28 sps:$4 sm:$0xff]   ;;  %v8143_v32 = vld [vmem:[#allocation7 + $0x4dc] ss:$28 sps:$4 sm:$0xff]  }
 0x208   :  { %5247 = vmatprep.mubr.bf16.mxu1 %v8873_v33  ;;  %v8876_v39 = vpop.f32.mrb[8].mxu1  ;;  %5223 = vmatprep.subr.bf16.mxu1 %v8080_v18  ;;  %v495_v18 = vrot.slane %v8849_v23, %v494_v20 }
 0x209   :  { %v8878_v41 = vpop.f32.mrb[9].mxu1  ;;  %5361 = vmatpush1.bf16.msra.mxu0 %v8075_v34  ;;  %v8138_v34 = vld [vmem:[#allocation7 + $0x690] ss:$28 sps:$4 sm:$0xff]  }
 0x20a   :  { %v2800_v43 = vpop.f32.mrb[10].mxu1  ;;  %5362 = vmatprep.subr.bf16.mxu0 %v8083_v37  ;;  %v7396_v37 = vadd.f32 %v8871_v21, %v495_v18  ;;  %v8182_v21 = vld [vmem:[#allocation7 + $0x73c] ss:$28 sps:$4 sm:$0xff]   ;;  %v8171_v18 = vld [vmem:[#allocation7 + $0x6d0] ss:$28 sps:$4 sm:$0xff]  }
 0x20b   :  { %v2801_v15 = vpop.f32.mrb[11].mxu1  ;;  %5224 = vmatpush1.bf16.msra.mxu1 %v8078_v36  ;;  %v8146_v36 = vld [vmem:[#allocation7 + $0x6cc] ss:$28 sps:$4 sm:$0xff]  }
 0x20c   :  { %5225 = vmatprep.subr.bf16.mxu1 %v8086_v38  ;;  %v8141_v38 = vld [vmem:[#allocation7 + $0x4d8] ss:$28 sps:$4 sm:$0xff]   ;;  %v2965_v43 = vmax.f32 %v7396_v37, 0.0  ;;  %v8152_v15 = vld [vmem:[#allocation7 + $0x54c] ss:$28 sps:$4 sm:$0xff]  }
 0x20d   :  { %5363 = vmatpush1.bf16.msra.mxu0 %v8081_v8  ;;  %v8144_v8 = vld [vmem:[#allocation7 + $0x6c8] ss:$28 sps:$4 sm:$0xff]  }
 0x20e   :  { %5364 = vmatprep.subr.bf16.mxu0 %v8089_v44  ;;  %v8176_v44 = vld [vmem:[#allocation7 + $0x704] ss:$28 sps:$4 sm:$0xff]  }
 0x20f   :  { %5226 = vmatpush1.bf16.msra.mxu1 %v8084_v42  ;;  %v8149_v42 = vld [vmem:[#allocation7 + $0x514] ss:$28 sps:$4 sm:$0xff]   ;;  %v8177_v37 = vld [vmem:[#allocation7 + $0x708] ss:$28 sps:$4 sm:$0xff]  }
 0x210   :  { %5227 = vmatprep.subr.bf16.mxu1 %v8092_v45  ;;  %v8147_v45 = vld [vmem:[#allocation7 + $0x510] ss:$28 sps:$4 sm:$0xff]  }
 0x211   :  { %5365 = vmatpush1.bf16.msra.mxu0 %v8087_v46  ;;  %v8174_v46 = vld [vmem:[#allocation7 + $0x700] ss:$28 sps:$4 sm:$0xff]  }
 0x212   :  { %5366 = vmatprep.subr.bf16.mxu0 %v8095_v51  ;;  %v8150_v51 = vld [vmem:[#allocation7 + $0x548] ss:$28 sps:$4 sm:$0xff]  }
 0x213   :  { %5228 = vmatpush1.bf16.msra.mxu1 %v8090_v47  ;;  %v8889_v47 = vpack.c.bf16 %v2965_v43, %v2965_v43  ;;  %v8183_v43 = vld [vmem:[#allocation7 + $0x740] ss:$28 sps:$4 sm:$0xff]  }
 0x214   :  { %5229 = vmatprep.subr.bf16.mxu1 %v8098_v53  ;;  %v8155_v53 = vld [vmem:[#allocation7 + $0x584] ss:$28 sps:$4 sm:$0xff]  }
 0x215   :  { %5367 = vmatpush1.bf16.msra.mxu0 %v8093_v19  ;;  %v8180_v19 = vld [vmem:[#allocation7 + $0x738] ss:$28 sps:$4 sm:$0xff]  }
 0x216   :  { %5368 = vmatprep.subr.bf16.mxu0 %v8101_v54  ;;  %v8188_v54 = vld [vmem:[#allocation7 + $0x774] ss:$28 sps:$4 sm:$0xff]  }
 0x217   :  { %5230 = vmatpush1.bf16.msra.mxu1 %v8096_v55  ;;  %v8153_v55 = vld [vmem:[#allocation7 + $0x580] ss:$28 sps:$4 sm:$0xff]  }
 0x218   :  { %5231 = vmatprep.subr.bf16.mxu1 %v8104_v56  ;;  %v8158_v56 = vld [vmem:[#allocation7 + $0x5bc] ss:$28 sps:$4 sm:$0xff]  }
 0x219   :  { %5369 = vmatpush1.bf16.msra.mxu0 %v8099_v57  ;;  %v510_v57 = vsub.s32 6, %v8846_v35 }
 0x21a   :  { %5379 = vmatprep.subr.bf16.mxu0 %v8107_v58  ;;  %v8186_v58 = vld [vmem:[#allocation7 + $0x770] ss:$28 sps:$4 sm:$0xff]  }
 0x21b   :  { %5232 = vmatpush1.bf16.msra.mxu1 %v8102_v59  ;;  %v8194_v59 = vld [vmem:[#allocation7 + $0x7ac] ss:$28 sps:$4 sm:$0xff]  }
 0x21c   :  { %5371 = vmatmul.mubr.bf16.vlgmr.msra.gmra.mrb[8].mxu0 %v8862_v9  ;;  %5233 = vmatprep.subr.bf16.mxu1 %v8110_v60  ;;  %v8156_v60 = vld [vmem:[#allocation7 + $0x5b8] ss:$28 sps:$4 sm:$0xff]  }
 0x21d   :  { %5380 = vmatpush1.bf16.msra.mxu0 %v8105_v61  ;;  %5411 = vmatprep.mubr.bf16.mxu0 %v8873_v33  ;;  %v8161_v61 = vld [vmem:[#allocation7 + $0x5f4] ss:$28 sps:$4 sm:$0xff]  }
 0x21e   :  { %5381 = vmatprep.subr.bf16.mxu0 %v8113_v62  ;;  %v511_v62 = vrot.slane %v8849_v23, %v510_v57 }
 0x21f   :  { %5234 = vmatpush1.bf16.msra.mxu1 %v8108_v63  ;;  %v8192_v63 = vld [vmem:[#allocation7 + $0x7a8] ss:$28 sps:$4 sm:$0xff]  }
 0x220   :  { %5235 = vmatprep.subr.bf16.mxu1 %v8116_v1  ;;  %v8200_v1 = vld [vmem:[#allocation7 + $0x7e4] ss:$28 sps:$4 sm:$0xff]  }
 0x221   :  { %5382 = vmatpush1.bf16.msra.mxu0 %v8111_v2  ;;  %v8159_v2 = vld [vmem:[#allocation7 + $0x5f0] ss:$28 sps:$4 sm:$0xff]  }
 0x222   :  { %5383 = vmatprep.subr.bf16.mxu0 %v8119_v52  ;;  %v8164_v52 = vld [vmem:[#allocation7 + $0x62c] ss:$28 sps:$4 sm:$0xff]  }
 0x223   :  { %5236 = vmatpush1.bf16.msra.mxu1 %v8114_v3 }
 0x224   :  { %5237 = vmatprep.subr.bf16.mxu1 %v8122_v4 }
 0x225   :  { %5384 = vmatpush1.bf16.msra.mxu0 %v8117_v6  ;;  %v8198_v6 = vld [vmem:[#allocation7 + $0x7e0] ss:$28 sps:$4 sm:$0xff]  }
 0x226   :  { %5385 = vmatprep.subr.bf16.mxu0 %v8125_v7 }
 0x227   :  { %5238 = vmatpush1.bf16.msra.mxu1 %v8120_v10  ;;  %v8206_v10 = vld [vmem:[#allocation7 + $0x81c] ss:$28 sps:$4 sm:$0xff]  }
 0x228   :  { %v7186_v17 = vpop.f32.mrb[12].mxu1  ;;  %5239 = vmatprep.subr.bf16.mxu1 %v8128_v48  ;;  %v8162_v48 = vld [vmem:[#allocation7 + $0x628] ss:$28 sps:$4 sm:$0xff]  }
 0x229   :  { %v7187_v24 = vpop.f32.mrb[13].mxu1  ;;  %5386 = vmatpush1.bf16.msra.mxu0 %v8123_v50 }
 0x22a   :  { %v8883_v26 = vadd.f32 %v7187_v24, %v7186_v17  ;;  %v7189_v27 = vpop.f32.mrb[14].mxu1  ;;  %5387 = vmatprep.subr.bf16.mxu0 %v8131_v12  ;;  %v8167_v12 = vld [vmem:[#allocation7 + $0x664] ss:$28 sps:$4 sm:$0xff]   ;;  %v8212_v17 = vld [vmem:[#allocation7 + $0x854] ss:$28 sps:$4 sm:$0xff]  }
 0x22b   :  { %v7190_v29 = vpop.f32.mrb[15].mxu1  ;;  %5240 = vmatpush1.bf16.msra.mxu1 %v8126_v13  ;;  %v8170_v24 = vld [vmem:[#allocation7 + $0x69c] ss:$28 sps:$4 sm:$0xff]  }
 0x22c   :  { %5241 = vmatprep.subr.bf16.mxu1 %v8134_v14  ;;  %v2838_v3 = vadd.f32 %v8883_v26, %v511_v62  ;;  %v8218_v26 = vld [vmem:[#allocation7 + $0x88c] ss:$28 sps:$4 sm:$0xff]   ;;  %v8168_v27 = vld [vmem:[#allocation7 + $0x698] ss:$28 sps:$4 sm:$0xff]  }
 0x22d   :  { %5388 = vmatpush1.bf16.msra.mxu0 %v8129_v16  ;;  %v8204_v16 = vld [vmem:[#allocation7 + $0x818] ss:$28 sps:$4 sm:$0xff]   ;;  %v8216_v29 = vld [vmem:[#allocation7 + $0x888] ss:$28 sps:$4 sm:$0xff]  }
 0x22e   :  { %5389 = vmatprep.subr.bf16.mxu0 %v8137_v22  ;;  %v8165_v22 = vld [vmem:[#allocation7 + $0x660] ss:$28 sps:$4 sm:$0xff]   ;;  %v8201_v62 = vld [vmem:[#allocation7 + $0x7e8] ss:$28 sps:$4 sm:$0xff]  }
 0x22f   :  { %5242 = vmatpush1.bf16.msra.mxu1 %v8132_v25  ;;  %v8210_v25 = vld [vmem:[#allocation7 + $0x850] ss:$28 sps:$4 sm:$0xff]  }
 0x230   :  { %5243 = vmatprep.subr.bf16.mxu1 %v8140_v28  ;;  %v8173_v28 = vld [vmem:[#allocation7 + $0x6d4] ss:$28 sps:$4 sm:$0xff]  }
 0x231   :  { %5390 = vmatpush1.bf16.msra.mxu0 %v8135_v31  ;;  %v8224_v31 = vld [vmem:[#allocation7 + $0x8c4] ss:$28 sps:$4 sm:$0xff]  }
 0x232   :  { %5391 = vmatprep.subr.bf16.mxu0 %v8143_v32  ;;  %v8179_v32 = vld [vmem:[#allocation7 + $0x70c] ss:$28 sps:$4 sm:$0xff]  }
 0x233   :  { %5244 = vmatpush1.bf16.msra.mxu1 %v8138_v34  ;;  %v8222_v34 = vld [vmem:[#allocation7 + $0x8c0] ss:$28 sps:$4 sm:$0xff]  }
 0x234   :  { %5245 = vmatprep.subr.bf16.mxu1 %v8146_v36  ;;  %v8230_v36 = vld [vmem:[#allocation7 + $0x8fc] ss:$28 sps:$4 sm:$0xff]  }
 0x235   :  { %5392 = vmatpush1.bf16.msra.mxu0 %v8141_v38  ;;  %v8185_v38 = vld [vmem:[#allocation7 + $0x744] ss:$28 sps:$4 sm:$0xff]  }
 0x236   :  { %5393 = vmatprep.subr.bf16.mxu0 %v8149_v42  ;;  %v8236_v42 = vld [vmem:[#allocation7 + $0x934] ss:$28 sps:$4 sm:$0xff]  }
 0x237   :  { %5246 = vmatpush1.bf16.msra.mxu1 %v8144_v8  ;;  %v8228_v8 = vld [vmem:[#allocation7 + $0x8f8] ss:$28 sps:$4 sm:$0xff]  }
 0x238   :  { %5256 = vmatprep.subr.bf16.mxu1 %v8176_v44  ;;  %v8191_v44 = vld [vmem:[#allocation7 + $0x77c] ss:$28 sps:$4 sm:$0xff]  }
 0x239   :  { %5394 = vmatpush1.bf16.msra.mxu0 %v8147_v45  ;;  %v8234_v45 = vld [vmem:[#allocation7 + $0x930] ss:$28 sps:$4 sm:$0xff]  }
 0x23a   :  { %5248 = vmatmul.mubr.bf16.vlgmr.msra.gmra.mrb[28].mxu1 %v8889_v47  ;;  %5395 = vmatprep.subr.bf16.mxu0 %v8152_v15  ;;  %v8242_v15 = vld [vmem:[#allocation7 + $0x96c] ss:$28 sps:$4 sm:$0xff]  }
 0x23b   :  { %5257 = vmatpush1.bf16.msra.mxu1 %v8174_v46  ;;  %v8189_v46 = vld [vmem:[#allocation7 + $0x778] ss:$28 sps:$4 sm:$0xff]  }
 0x23c   :  { %5258 = vmatprep.subr.bf16.mxu1 %v8182_v21  ;;  %v8197_v21 = vld [vmem:[#allocation7 + $0x7b4] ss:$28 sps:$4 sm:$0xff]  }
 0x23d   :  { %5396 = vmatpush1.bf16.msra.mxu0 %v8150_v51  ;;  %v8240_v51 = vld [vmem:[#allocation7 + $0x968] ss:$28 sps:$4 sm:$0xff]  }
 0x23e   :  { %5397 = vmatprep.subr.bf16.mxu0 %v8155_v53  ;;  %v8248_v53 = vld [vmem:[#allocation7 + $0x9a4] ss:$28 sps:$4 sm:$0xff]  }
 0x23f   :  { %5259 = vmatpush1.bf16.msra.mxu1 %v8180_v19  ;;  %v8195_v19 = vld [vmem:[#allocation7 + $0x7b0] ss:$28 sps:$4 sm:$0xff]  }
 0x240   :  { %5260 = vmatprep.subr.bf16.mxu1 %v8188_v54  ;;  %v8203_v54 = vld [vmem:[#allocation7 + $0x7ec] ss:$28 sps:$4 sm:$0xff]  }
 0x241   :  { %5398 = vmatpush1.bf16.msra.mxu0 %v8153_v55 }
 0x242   :  { %5399 = vmatprep.subr.bf16.mxu0 %v8158_v56  ;;  %v8246_v56 = vld [vmem:[#allocation7 + $0x9a0] ss:$28 sps:$4 sm:$0xff]  }
 0x243   :  { %5261 = vmatpush1.bf16.msra.mxu1 %v8186_v58 }
 0x244   :  { %5262 = vmatprep.subr.bf16.mxu1 %v8194_v59  ;;  %v8254_v59 = vld [vmem:[#allocation7 + $0x9dc] ss:$28 sps:$4 sm:$0xff]  }
 0x245   :  { %5400 = vmatpush1.bf16.msra.mxu0 %v8156_v60 }
 0x246   :  { %5401 = vmatprep.subr.bf16.mxu0 %v8161_v61 }
 0x247   :  { %5263 = vmatpush1.bf16.msra.mxu1 %v8192_v63 }
 0x248   :  { %v7208_v4 = vpop.f32.mrb[16].mxu1  ;;  %5264 = vmatprep.subr.bf16.mxu1 %v8200_v1  ;;  %v8209_v1 = vld [vmem:[#allocation7 + $0x824] ss:$28 sps:$4 sm:$0xff]  }
 0x249   :  { %v7209_v7 = vpop.f32.mrb[17].mxu1  ;;  %5402 = vmatpush1.bf16.msra.mxu0 %v8159_v2 }
 0x24a   :  { %v7210_v50 = vadd.f32 %v7209_v7, %v7208_v4  ;;  %v7211_v23 = vpop.f32.mrb[18].mxu1  ;;  %5403 = vmatprep.subr.bf16.mxu0 %v8164_v52  ;;  %v8252_v52 = vld [vmem:[#allocation7 + $0x9d8] ss:$28 sps:$4 sm:$0xff]   ;;  %v8207_v4 = vld [vmem:[#allocation7 + $0x820] ss:$28 sps:$4 sm:$0xff]  }
 0x24b   :  { %v7212_v13 = vpop.f32.mrb[19].mxu1  ;;  %5265 = vmatpush1.bf16.msra.mxu1 %v8198_v6  ;;  %v8215_v6 = vld [vmem:[#allocation7 + $0x85c] ss:$28 sps:$4 sm:$0xff]  }
 0x24c   :  { %v8897_v14 = vadd.f32 %v7210_v50, %v2838_v3  ;;  %5266 = vmatprep.subr.bf16.mxu1 %v8206_v10  ;;  %v8260_v3 = vld [vmem:[#allocation7 + $0xa14] ss:$28 sps:$4 sm:$0xff]   ;;  %v8266_v50 = vld [vmem:[#allocation7 + $0xa4c] ss:$28 sps:$4 sm:$0xff]  }
 0x24d   :  { %5404 = vmatpush1.bf16.msra.mxu0 %v8162_v48  ;;  %v8258_v10 = vld [vmem:[#allocation7 + $0xa10] ss:$28 sps:$4 sm:$0xff]  }
 0x24e   :  { %5405 = vmatprep.subr.bf16.mxu0 %v8167_v12  ;;  %v8213_v12 = vld [vmem:[#allocation7 + $0x858] ss:$28 sps:$4 sm:$0xff]  }
 0x24f   :  { %5267 = vmatpush1.bf16.msra.mxu1 %v8204_v16 }
 0x250   :  { %5268 = vmatprep.subr.bf16.mxu1 %v8212_v17  ;;  %v8264_v17 = vld [vmem:[#allocation7 + $0xa48] ss:$28 sps:$4 sm:$0xff]  }
 0x251   :  { %5406 = vmatpush1.bf16.msra.mxu0 %v8165_v22  ;;  %v8272_v22 = vld [vmem:[#allocation7 + $0xa84] ss:$28 sps:$4 sm:$0xff]  }
 0x252   :  { %5407 = vmatprep.subr.bf16.mxu0 %v8170_v24  ;;  %v8219_v24 = vld [vmem:[#allocation7 + $0x890] ss:$28 sps:$4 sm:$0xff]  }
 0x253   :  { %5269 = vmatpush1.bf16.msra.mxu1 %v8210_v25  ;;  %v8227_v25 = vld [vmem:[#allocation7 + $0x8cc] ss:$28 sps:$4 sm:$0xff]  }
 0x254   :  { %5270 = vmatprep.subr.bf16.mxu1 %v8218_v26  ;;  %v8225_v26 = vld [vmem:[#allocation7 + $0x8c8] ss:$28 sps:$4 sm:$0xff]  }
 0x255   :  { %5408 = vmatpush1.bf16.msra.mxu0 %v8168_v27  ;;  %v8233_v27 = vld [vmem:[#allocation7 + $0x904] ss:$28 sps:$4 sm:$0xff]  }
 0x256   :  { %5409 = vmatprep.subr.bf16.mxu0 %v8173_v28  ;;  %v8231_v28 = vld [vmem:[#allocation7 + $0x900] ss:$28 sps:$4 sm:$0xff]  }
 0x257   :  { %5271 = vmatpush1.bf16.msra.mxu1 %v8216_v29  ;;  %v8239_v29 = vld [vmem:[#allocation7 + $0x93c] ss:$28 sps:$4 sm:$0xff]  }
 0x258   :  { %5272 = vmatprep.subr.bf16.mxu1 %v8224_v31  ;;  %v8237_v31 = vld [vmem:[#allocation7 + $0x938] ss:$28 sps:$4 sm:$0xff]  }
 0x259   :  { %5410 = vmatpush1.bf16.msra.mxu0 %v8171_v18  ;;  %v8245_v18 = vld [vmem:[#allocation7 + $0x974] ss:$28 sps:$4 sm:$0xff]  }
 0x25a   :  { %5420 = vmatprep.subr.bf16.mxu0 %v8179_v32  ;;  %v8243_v32 = vld [vmem:[#allocation7 + $0x970] ss:$28 sps:$4 sm:$0xff]  }
 0x25b   :  { %5273 = vmatpush1.bf16.msra.mxu1 %v8222_v34  ;;  %v8251_v34 = vld [vmem:[#allocation7 + $0x9ac] ss:$28 sps:$4 sm:$0xff]  }
 0x25c   :  { %5412 = vmatmul.mubr.bf16.vlgmr.msra.gmra.mrb[8].mxu0 %v8889_v47  ;;  %5274 = vmatprep.subr.bf16.mxu1 %v8230_v36  ;;  %v8249_v36 = vld [vmem:[#allocation7 + $0x9a8] ss:$28 sps:$4 sm:$0xff]  }
 0x25d   :  { %5421 = vmatpush1.bf16.msra.mxu0 %v8177_v37  ;;  %v8257_v37 = vld [vmem:[#allocation7 + $0x9e4] ss:$28 sps:$4 sm:$0xff]  }
 0x25e   :  { %5422 = vmatprep.subr.bf16.mxu0 %v8185_v38  ;;  %v8255_v38 = vld [vmem:[#allocation7 + $0x9e0] ss:$28 sps:$4 sm:$0xff]  }
 0x25f   :  { %5275 = vmatpush1.bf16.msra.mxu1 %v8228_v8  ;;  %v8263_v8 = vld [vmem:[#allocation7 + $0xa1c] ss:$28 sps:$4 sm:$0xff]  }
 0x260   :  { %5276 = vmatprep.subr.bf16.mxu1 %v8236_v42  ;;  %v8261_v42 = vld [vmem:[#allocation7 + $0xa18] ss:$28 sps:$4 sm:$0xff]  }
 0x261   :  { %5423 = vmatpush1.bf16.msra.mxu0 %v8183_v43  ;;  %v8269_v43 = vld [vmem:[#allocation7 + $0xa54] ss:$28 sps:$4 sm:$0xff]  }
 0x262   :  { %5424 = vmatprep.subr.bf16.mxu0 %v8191_v44  ;;  %v8267_v44 = vld [vmem:[#allocation7 + $0xa50] ss:$28 sps:$4 sm:$0xff]  }
 0x263   :  { %5277 = vmatpush1.bf16.msra.mxu1 %v8234_v45  ;;  %v8275_v45 = vld [vmem:[#allocation7 + $0xa8c] ss:$28 sps:$4 sm:$0xff]  }
 0x264   :  { %5278 = vmatprep.subr.bf16.mxu1 %v8242_v15  ;;  %v502_v15 = vsub.s32 4, %v8846_v35 }
 0x265   :  { %5425 = vmatpush1.bf16.msra.mxu0 %v8189_v46  ;;  %v506_v46 = vsub.s32 5, %v8846_v35  ;;  %v7119_v35 = vld [vmem:[#allocation10 + $0x2] ss:$0 sm:$0xff] }
 0x266   :  { %5426 = vmatprep.subr.bf16.mxu0 %v8197_v21  ;;  %v8522_v21 = vld [vmem:[#allocation10] ss:$4 sm:$0x7f] }
 0x267   :  { %5279 = vmatpush1.bf16.msra.mxu1 %v8240_v51  ;;  %v503_v51 = vrot.slane %v8522_v21, %v502_v15 }
 0x268   :  { %v7230_v55 = vpop.f32.mrb[20].mxu1  ;;  %5280 = vmatprep.subr.bf16.mxu1 %v8248_v53  ;;  %v507_v53 = vrot.slane %v8522_v21, %v506_v46  ;;  %v8318_v21 = vld [vmem:[#allocation7 + $0x1d4] ss:$28 sps:$4 sm:$0xff]  }
 0x269   :  { %v7231_v58 = vpop.f32.mrb[21].mxu1  ;;  %5427 = vmatpush1.bf16.msra.mxu0 %v8195_v19 }
 0x26a   :  { %v7232_v60 = vadd.f32 %v7231_v58, %v7230_v55  ;;  %v7233_v61 = vpop.f32.mrb[22].mxu1  ;;  %5428 = vmatprep.subr.bf16.mxu0 %v8203_v54 }
 0x26b   :  { %v7234_v63 = vpop.f32.mrb[23].mxu1  ;;  %5281 = vmatpush1.bf16.msra.mxu1 %v8246_v56 }
 0x26c   :  { %v2918_v2 = vadd.f32 %v7232_v60, %v8897_v14  ;;  %5282 = vmatprep.subr.bf16.mxu1 %v8254_v59  ;;  %v8221_v14 = vld [vmem:[#allocation7 + $0x894] ss:$28 sps:$4 sm:$0xff]  }
 0x26d   :  { %5429 = vmatpush1.bf16.msra.mxu0 %v8201_v62 }
 0x26e   :  { %5430 = vmatprep.subr.bf16.mxu0 %v8209_v1 }
 0x26f   :  { %5283 = vmatpush1.bf16.msra.mxu1 %v8252_v52  ;;  %v8273_v52 = vld [vmem:[#allocation7 + $0xa88] ss:$28 sps:$4 sm:$0xff]  }
 0x270   :  { %v2957_v7 = vpop.f32.mrb[24].mxu1  ;;  %5284 = vmatprep.subr.bf16.mxu1 %v8260_v3 }
 0x271   :  { %v8901_v48 = vadd.f32 %v2957_v7, %v2918_v2  ;;  %v7378_v23 = vpop.f32.mrb[25].mxu1  ;;  %5431 = vmatpush1.bf16.msra.mxu0 %v8207_v4  ;;  %v8270_v2 = vld [vmem:[#allocation7 + $0xa80] ss:$28 sps:$4 sm:$0xff]   ;;  %v8278_v4 = vld [vmem:[#allocation7 + $0x14] ss:$28 sps:$4 sm:$0xff]  }
 0x272   :  { %v2960_v13 = vpop.f32.mrb[26].mxu1  ;;  %5432 = vmatprep.subr.bf16.mxu0 %v8215_v6  ;;  %v8279_v6 = vld [vmem:[#allocation7 + $0x1d8] ss:$28 sps:$4 sm:$0xff]   ;;  %v8284_v23 = vld [vmem:[#allocation7 + $0x210] ss:$28 sps:$4 sm:$0xff]  }
 0x273   :  { %v7379_v16 = vpop.f32.mrb[27].mxu1  ;;  %5285 = vmatpush1.bf16.msra.mxu1 %v8258_v10  ;;  %v8280_v7 = vld [vmem:[#allocation7 + $0x18] ss:$28 sps:$4 sm:$0xff]   ;;  %v8285_v13 = vld [vmem:[#allocation7 + $0x50] ss:$28 sps:$4 sm:$0xff]  }
 0x274   :  { %5286 = vmatprep.subr.bf16.mxu1 %v8266_v50  ;;  %v8283_v50 = vld [vmem:[#allocation7 + $0x4c] ss:$28 sps:$4 sm:$0xff]   ;;  %v8286_v16 = vld [vmem:[#allocation7 + $0x80] ss:$28 sps:$4 sm:$0xff]  }
 0x275   :  { %5433 = vmatpush1.bf16.msra.mxu0 %v8213_v12  ;;  %v8281_v12 = vld [vmem:[#allocation7 + $0x48] ss:$28 sps:$4 sm:$0xff]  }
 0x276   :  { %5434 = vmatprep.subr.bf16.mxu0 %v8221_v14  ;;  %v8289_v14 = vld [vmem:[#allocation7 + $0x248] ss:$28 sps:$4 sm:$0xff]  }
 0x277   :  { %5287 = vmatpush1.bf16.msra.mxu1 %v8264_v17  ;;  %v8290_v17 = vld [vmem:[#allocation7 + $0x88] ss:$28 sps:$4 sm:$0xff]  }
 0x278   :  { %5297 = vmatprep.subr.bf16.mxu1 %v8272_v22  ;;  %v8293_v22 = vld [vmem:[#allocation7 + $0xbc] ss:$28 sps:$4 sm:$0xff]  }
 0x279   :  { %5435 = vmatpush1.bf16.msra.mxu0 %v8219_v24  ;;  %v8294_v24 = vld [vmem:[#allocation7 + $0x280] ss:$28 sps:$4 sm:$0xff]  }
 0x27a   :  { %5436 = vmatprep.subr.bf16.mxu0 %v8227_v25  ;;  %v8291_v25 = vld [vmem:[#allocation7 + $0xb8] ss:$28 sps:$4 sm:$0xff]  }
 0x27d   :  { %5437 = vmatpush1.bf16.msra.mxu0 %v8225_v26  ;;  %v8295_v26 = vld [vmem:[#allocation7 + $0xc0] ss:$28 sps:$4 sm:$0xff]  }
 0x27e   :  { %5438 = vmatprep.subr.bf16.mxu0 %v8233_v27  ;;  %v8298_v27 = vld [vmem:[#allocation7 + $0xf4] ss:$28 sps:$4 sm:$0xff]  }
 0x281   :  { %5439 = vmatpush1.bf16.msra.mxu0 %v8231_v28  ;;  %v8296_v28 = vld [vmem:[#allocation7 + $0xf0] ss:$28 sps:$4 sm:$0xff]  }
 0x282   :  { %5440 = vmatprep.subr.bf16.mxu0 %v8239_v29  ;;  %v8300_v29 = vld [vmem:[#allocation7 + $0xf8] ss:$28 sps:$4 sm:$0xff]  }
 0x285   :  { %5441 = vmatpush1.bf16.msra.mxu0 %v8237_v31  ;;  %v8303_v31 = vld [vmem:[#allocation7 + $0x12c] ss:$28 sps:$4 sm:$0xff]  }
 0x286   :  { %5442 = vmatprep.subr.bf16.mxu0 %v8245_v18  ;;  %v8304_v18 = vld [vmem:[#allocation7 + $0x2f0] ss:$28 sps:$4 sm:$0xff]  }
 0x289   :  { %5443 = vmatpush1.bf16.msra.mxu0 %v8243_v32  ;;  %v8301_v32 = vld [vmem:[#allocation7 + $0x128] ss:$28 sps:$4 sm:$0xff]  }
 0x28a   :  { %5444 = vmatprep.subr.bf16.mxu0 %v8251_v34  ;;  %v8305_v34 = vld [vmem:[#allocation7 + $0x130] ss:$28 sps:$4 sm:$0xff]  }
 0x28d   :  { %5445 = vmatpush1.bf16.msra.mxu0 %v8249_v36  ;;  %v8308_v36 = vld [vmem:[#allocation7 + $0x164] ss:$28 sps:$4 sm:$0xff]  }
 0x28e   :  { %5446 = vmatprep.subr.bf16.mxu0 %v8257_v37  ;;  %v8309_v37 = vld [vmem:[#allocation7 + $0x328] ss:$28 sps:$4 sm:$0xff]  }
 0x291   :  { %5447 = vmatpush1.bf16.msra.mxu0 %v8255_v38  ;;  %v8306_v38 = vld [vmem:[#allocation7 + $0x160] ss:$28 sps:$4 sm:$0xff]  }
 0x292   :  { %5448 = vmatprep.subr.bf16.mxu0 %v8263_v8  ;;  %v8310_v8 = vld [vmem:[#allocation7 + $0x168] ss:$28 sps:$4 sm:$0xff]  }
 0x295   :  { %5449 = vmatpush1.bf16.msra.mxu0 %v8261_v42  ;;  %v8313_v42 = vld [vmem:[#allocation7 + $0x19c] ss:$28 sps:$4 sm:$0xff]  }
 0x296   :  { %5450 = vmatprep.subr.bf16.mxu0 %v8269_v43  ;;  %v8314_v43 = vld [vmem:[#allocation7 + $0x360] ss:$28 sps:$4 sm:$0xff]  }
 0x299   :  { %5451 = vmatpush1.bf16.msra.mxu0 %v8267_v44  ;;  %v8311_v44 = vld [vmem:[#allocation7 + $0x198] ss:$28 sps:$4 sm:$0xff]  }
 0x29a   :  { %5461 = vmatprep.subr.bf16.mxu0 %v8275_v45  ;;  %v8315_v45 = vld [vmem:[#allocation7 + $0x1a0] ss:$28 sps:$4 sm:$0xff]  }
 0x2af   :  { %v2755_v19 = vpop.f32.mrb[4].mxu0 }
 0x2b0   :  { %v7398_v54 = vadd.f32 %v2755_v19, %v503_v51  ;;  %v2757_v55 = vpop.f32.mrb[5].mxu0  ;;  %v8319_v51 = vld [vmem:[#allocation7 + $0x558] ss:$28 sps:$4 sm:$0xff]  }
 0x2b1   :  { %v7400_v56 = vadd.f32 %v2757_v55, %v507_v53  ;;  %v2759_v58 = vpop.f32.mrb[6].mxu0  ;;  %v8316_v53 = vld [vmem:[#allocation7 + $0x1d0] ss:$28 sps:$4 sm:$0xff]   ;;  %v8320_v19 = vld [vmem:[#allocation7 + $0x398] ss:$28 sps:$4 sm:$0xff]  }
 0x2b2   :  { %v7399_v59 = vadd.f32 %v7398_v54, %v8876_v39  ;;  %v2760_v60 = vpop.f32.mrb[7].mxu0  ;;  %v2969_v39 = vmax.f32 %v8901_v48, 0.0  ;;  %v8288_v48 = vld [vmem:[#allocation7 + $0x84] ss:$28 sps:$4 sm:$0xff]   ;;  %v8323_v54 = vld [vmem:[#allocation7 + $0x20c] ss:$28 sps:$4 sm:$0xff]  }
 0x2b3   :  { %v7401_v61 = vadd.f32 %v7400_v56, %v8878_v41  ;;  %v8276_v41 = vld [vmem:[#allocation7 + $0x10] ss:$28 sps:$4 sm:$0xff]   ;;  %v8321_v56 = vld [vmem:[#allocation7 + $0x208] ss:$28 sps:$4 sm:$0xff]  }
 0x2b4   :  { %v2967_v62 = vmax.f32 %v7399_v59, 0.0  ;;  %v8922_v10 = vpack.c.bf16 %v2969_v39, %v2969_v39  ;;  %v8324_v55 = vld [vmem:[#allocation7 + $0x590] ss:$28 sps:$4 sm:$0xff]   ;;  %v8328_v59 = vld [vmem:[#allocation7 + $0x244] ss:$28 sps:$4 sm:$0xff]  }
 0x2b5   :  { %v2968_v63 = vmax.f32 %v7401_v61, 0.0  ;;  %v8325_v58 = vld [vmem:[#allocation7 + $0x3d0] ss:$28 sps:$4 sm:$0xff]   ;;  %v8329_v60 = vld [vmem:[#allocation7 + $0x5c8] ss:$28 sps:$4 sm:$0xff]  }
 0x2b6   :  { %v8913_v3 = vpack.c.bf16 %v2967_v62, %v2967_v62  ;;  %v8326_v61 = vld [vmem:[#allocation7 + $0x240] ss:$28 sps:$4 sm:$0xff]   ;;  %v8330_v62 = vld [vmem:[#allocation7 + $0x408] ss:$28 sps:$4 sm:$0xff]   ;;  %v8339_v39 = vld [vmem:[#allocation7 + $0x638] ss:$28 sps:$4 sm:$0xff]  }
 0x2b7   :  { %v8911_v1 = vpack.c.bf16 %v2968_v63, %v2968_v63  ;;  %v8333_v63 = vld [vmem:[#allocation7 + $0x27c] ss:$28 sps:$4 sm:$0xff]  }
 0x2b9   :  { %5288 = vmatprep.mubr.bf16.mxu1 %v8911_v1  ;;  %5452 = vmatprep.mubr.bf16.mxu0 %v8911_v1 }
 0x2ba   :  { %5289 = vmatmul.mubr.bf16.vlgmr.msra.gmra.mrb[28].mxu1 %v8913_v3  ;;  %5453 = vmatmul.mubr.bf16.vlgmr.msra.gmra.mrb[8].mxu0 %v8913_v3 }
 0x2bb   :  { %5298 = vmatpush1.bf16.msra.mxu1 %v8270_v2  ;;  %5462 = vmatpush1.bf16.msra.mxu0 %v8273_v52  ;;  %v8334_v2 = vld [vmem:[#allocation7 + $0x600] ss:$28 sps:$4 sm:$0xff]   ;;  %v8331_v52 = vld [vmem:[#allocation7 + $0x278] ss:$28 sps:$4 sm:$0xff]  }
 0x2bc   :  { %5329 = vmatprep.mubr.bf16.mxu1 %v8672_v0  ;;  %5493 = vmatprep.mubr.bf16.mxu0 %v8672_v0 }
 0x2bd   :  { %5502 = vmatprep.subr.bf16.mxu1 %v8278_v4  ;;  %7238 = vmatprep.subr.bf16.mxu0 %v8279_v6  ;;  %v8335_v4 = vld [vmem:[#allocation7 + $0x440] ss:$28 sps:$4 sm:$0xff]   ;;  %v8338_v6 = vld [vmem:[#allocation7 + $0x2b4] ss:$28 sps:$4 sm:$0xff]  }
 0x2c6   :  { %7115 = vmatmul.mubr.msk.bf16.vlgmr.msra.gmra.mrb[28].mxu1 %vm2307_vm0, %v8922_v10  ;;  %7116 = vmatmul.mubr.msk.bf16.vlgmr.msra.gmra.mrb[8].mxu0 %vm2307_vm0, %v8922_v10 }
 0x2c7   :  { %5503 = vmatpush1.bf16.msra.mxu1 %v8276_v41  ;;  %7239 = vmatpush3.bf16.msra.mxu0 %v8280_v7  ;;  %v8336_v41 = vld [vmem:[#allocation7 + $0x2b0] ss:$28 sps:$4 sm:$0xff]   ;;  %v8340_v7 = vld [vmem:[#allocation7 + $0x478] ss:$28 sps:$4 sm:$0xff]  }
 0x2c8   :  { %5534 = vmatprep.mubr.bf16.mxu1 %v8860_v5  ;;  %5698 = vmatprep.mubr.bf16.mxu0 %v8860_v5  ;;  %v8299_v5 = vld [vmem:[#allocation7 + $0x2b8] ss:$28 sps:$4 sm:$0xff]  }
 0x2c9   :  { %5504 = vmatprep.subr.bf16.mxu1 %v8283_v50  ;;  %7240 = vmatprep.subr.bf16.mxu0 %v8284_v23  ;;  %v8343_v50 = vld [vmem:[#allocation7 + $0x2ec] ss:$28 sps:$4 sm:$0xff]  }
 0x2ca   :  { %v8344_v23 = vld [vmem:[#allocation7 + $0x670] ss:$28 sps:$4 sm:$0xff]  }
 0x2cb   :  { %5505 = vmatpush1.bf16.msra.mxu1 %v8281_v12  ;;  %7241 = vmatpush3.bf16.msra.mxu0 %v8285_v13  ;;  %v8341_v12 = vld [vmem:[#allocation7 + $0x2e8] ss:$28 sps:$4 sm:$0xff]   ;;  %v8345_v13 = vld [vmem:[#allocation7 + $0x4b0] ss:$28 sps:$4 sm:$0xff]  }
 0x2cc   :  { %5506 = vmatprep.subr.bf16.mxu1 %v8288_v48  ;;  %7242 = vmatprep.subr.bf16.mxu0 %v8289_v14  ;;  %v8348_v48 = vld [vmem:[#allocation7 + $0x324] ss:$28 sps:$4 sm:$0xff]  }
 0x2cd   :  { %v8349_v14 = vld [vmem:[#allocation7 + $0x6a8] ss:$28 sps:$4 sm:$0xff]  }
 0x2cf   :  { %5507 = vmatpush1.bf16.msra.mxu1 %v8286_v16  ;;  %7243 = vmatpush3.bf16.msra.mxu0 %v8290_v17  ;;  %v8346_v16 = vld [vmem:[#allocation7 + $0x320] ss:$28 sps:$4 sm:$0xff]   ;;  %v8350_v17 = vld [vmem:[#allocation7 + $0x4e8] ss:$28 sps:$4 sm:$0xff]  }
 0x2d0   :  { %5508 = vmatprep.subr.bf16.mxu1 %v8293_v22  ;;  %7244 = vmatprep.subr.bf16.mxu0 %v8294_v24  ;;  %v8353_v22 = vld [vmem:[#allocation7 + $0x35c] ss:$28 sps:$4 sm:$0xff]  }
 0x2d1   :  { %v8354_v24 = vld [vmem:[#allocation7 + $0x6e0] ss:$28 sps:$4 sm:$0xff]  }
 0x2d3   :  { %5509 = vmatpush1.bf16.msra.mxu1 %v8291_v25  ;;  %7245 = vmatpush3.bf16.msra.mxu0 %v8295_v26  ;;  %v8351_v25 = vld [vmem:[#allocation7 + $0x358] ss:$28 sps:$4 sm:$0xff]   ;;  %v8355_v26 = vld [vmem:[#allocation7 + $0x520] ss:$28 sps:$4 sm:$0xff]  }
 0x2d4   :  { %5510 = vmatprep.subr.bf16.mxu1 %v8298_v27  ;;  %7246 = vmatprep.subr.bf16.mxu0 %v8299_v5  ;;  %v8358_v27 = vld [vmem:[#allocation7 + $0x394] ss:$28 sps:$4 sm:$0xff]  }
 0x2d5   :  { %v8359_v5 = vld [vmem:[#allocation7 + $0x8d8] ss:$28 sps:$4 sm:$0xff]  }
 0x2d7   :  { %5511 = vmatpush1.bf16.msra.mxu1 %v8296_v28  ;;  %7247 = vmatpush3.bf16.msra.mxu0 %v8300_v29  ;;  %v8356_v28 = vld [vmem:[#allocation7 + $0x390] ss:$28 sps:$4 sm:$0xff]   ;;  %v8360_v29 = vld [vmem:[#allocation7 + $0x718] ss:$28 sps:$4 sm:$0xff]  }
 0x2d8   :  { %5512 = vmatprep.subr.bf16.mxu1 %v8303_v31  ;;  %7248 = vmatprep.subr.bf16.mxu0 %v8304_v18  ;;  %v8363_v31 = vld [vmem:[#allocation7 + $0x3cc] ss:$28 sps:$4 sm:$0xff]  }
 0x2d9   :  { %v8364_v18 = vld [vmem:[#allocation7 + $0x910] ss:$28 sps:$4 sm:$0xff]  }
 0x2db   :  { %5513 = vmatpush1.bf16.msra.mxu1 %v8301_v32  ;;  %7249 = vmatpush3.bf16.msra.mxu0 %v8305_v34  ;;  %v8361_v32 = vld [vmem:[#allocation7 + $0x3c8] ss:$28 sps:$4 sm:$0xff]   ;;  %v8365_v34 = vld [vmem:[#allocation7 + $0x750] ss:$28 sps:$4 sm:$0xff]  }
 0x2dc   :  { %5514 = vmatprep.subr.bf16.mxu1 %v8308_v36  ;;  %7250 = vmatprep.subr.bf16.mxu0 %v8309_v37  ;;  %v8368_v36 = vld [vmem:[#allocation7 + $0x404] ss:$28 sps:$4 sm:$0xff]  }
 0x2dd   :  { %v8369_v37 = vld [vmem:[#allocation7 + $0x948] ss:$28 sps:$4 sm:$0xff]  }
 0x2df   :  { %5515 = vmatpush1.bf16.msra.mxu1 %v8306_v38  ;;  %7251 = vmatpush3.bf16.msra.mxu0 %v8310_v8  ;;  %v8366_v38 = vld [vmem:[#allocation7 + $0x400] ss:$28 sps:$4 sm:$0xff]   ;;  %v8370_v8 = vld [vmem:[#allocation7 + $0x788] ss:$28 sps:$4 sm:$0xff]  }
 0x2e0   :  { %5516 = vmatprep.subr.bf16.mxu1 %v8313_v42  ;;  %7252 = vmatprep.subr.bf16.mxu0 %v8314_v43  ;;  %v8374_v42 = vld [vmem:[#allocation7 + $0x980] ss:$28 sps:$4 sm:$0xff]   ;;  %v8371_v43 = vld [vmem:[#allocation7 + $0x438] ss:$28 sps:$4 sm:$0xff]  }
 0x2e3   :  { %5517 = vmatpush1.bf16.msra.mxu1 %v8311_v44  ;;  %7253 = vmatpush3.bf16.msra.mxu0 %v8315_v45  ;;  %v8378_v44 = vld [vmem:[#allocation7 + $0x474] ss:$28 sps:$4 sm:$0xff]  }
 0x2e4   :  { %5518 = vmatprep.subr.bf16.mxu1 %v8318_v21  ;;  %7260 = vmatprep.subr.bf16.mxu0 %v8319_v51  ;;  %v8379_v45 = vld [vmem:[#allocation7 + $0x9b8] ss:$28 sps:$4 sm:$0xff]   ;;  %v8376_v21 = vld [vmem:[#allocation7 + $0x470] ss:$28 sps:$4 sm:$0xff]  }
 0x2e5   :  { %v8380_v51 = vld [vmem:[#allocation7 + $0x7f8] ss:$28 sps:$4 sm:$0xff]  }
 0x2e6   :  { %5699 = vmatmul.mubr.bf16.vlgmr.msra.gmra.mrb[12].mxu0 %v8862_v9 }
 0x2e7   :  { %5519 = vmatpush1.bf16.msra.mxu1 %v8316_v53  ;;  %7261 = vmatpush3.bf16.msra.mxu0 %v8320_v19  ;;  %v8383_v53 = vld [vmem:[#allocation7 + $0x4ac] ss:$28 sps:$4 sm:$0xff]  }
 0x2e8   :  { %5738 = vmatprep.mubr.bf16.mxu0 %v8873_v33  ;;  %5520 = vmatprep.subr.bf16.mxu1 %v8323_v54  ;;  %v8384_v19 = vld [vmem:[#allocation7 + $0x9f0] ss:$28 sps:$4 sm:$0xff]   ;;  %v8381_v54 = vld [vmem:[#allocation7 + $0x4a8] ss:$28 sps:$4 sm:$0xff]  }
 0x2e9   :  { %7262 = vmatprep.subr.bf16.mxu0 %v8324_v55  ;;  %v8385_v55 = vld [vmem:[#allocation7 + $0x830] ss:$28 sps:$4 sm:$0xff]  }
 0x2eb   :  { %5521 = vmatpush1.bf16.msra.mxu1 %v8321_v56  ;;  %7263 = vmatpush3.bf16.msra.mxu0 %v8325_v58  ;;  %v8388_v56 = vld [vmem:[#allocation7 + $0x4e4] ss:$28 sps:$4 sm:$0xff]  }
 0x2ec   :  { %5522 = vmatprep.subr.bf16.mxu1 %v8328_v59  ;;  %7264 = vmatprep.subr.bf16.mxu0 %v8329_v60  ;;  %v8389_v58 = vld [vmem:[#allocation7 + $0xa28] ss:$28 sps:$4 sm:$0xff]   ;;  %v8386_v59 = vld [vmem:[#allocation7 + $0x4e0] ss:$28 sps:$4 sm:$0xff]  }
 0x2ed   :  { %v8390_v60 = vld [vmem:[#allocation7 + $0x868] ss:$28 sps:$4 sm:$0xff]  }
 0x2ef   :  { %5523 = vmatpush1.bf16.msra.mxu1 %v8326_v61  ;;  %7265 = vmatpush3.bf16.msra.mxu0 %v8330_v62  ;;  %v8393_v61 = vld [vmem:[#allocation7 + $0x51c] ss:$28 sps:$4 sm:$0xff]  }
 0x2f0   :  { %5524 = vmatprep.subr.bf16.mxu1 %v8333_v63  ;;  %7266 = vmatprep.subr.bf16.mxu0 %v8334_v2  ;;  %v8394_v62 = vld [vmem:[#allocation7 + $0xa60] ss:$28 sps:$4 sm:$0xff]   ;;  %v8391_v63 = vld [vmem:[#allocation7 + $0x518] ss:$28 sps:$4 sm:$0xff]  }
 0x2f1   :  { %v8395_v2 = vld [vmem:[#allocation7 + $0x8a0] ss:$28 sps:$4 sm:$0xff]  }
 0x2f3   :  { %5525 = vmatpush1.bf16.msra.mxu1 %v8331_v52  ;;  %7267 = vmatpush3.bf16.msra.mxu0 %v8335_v4  ;;  %v8398_v52 = vld [vmem:[#allocation7 + $0x554] ss:$28 sps:$4 sm:$0xff]  }
 0x2f4   :  { %5526 = vmatprep.subr.bf16.mxu1 %v8338_v6  ;;  %7268 = vmatprep.subr.bf16.mxu0 %v8339_v39  ;;  %v8396_v4 = vld [vmem:[#allocation7 + $0x550] ss:$28 sps:$4 sm:$0xff]   ;;  %v8402_v39 = vld [vmem:[#allocation7 + $0xa98] ss:$28 sps:$4 sm:$0xff]  }
 0x2f5   :  { %v8401_v6 = vld [vmem:[#allocation7 + $0x58c] ss:$28 sps:$4 sm:$0xff]  }
 0x2f7   :  { %5527 = vmatpush1.bf16.msra.mxu1 %v8336_v41  ;;  %7269 = vmatpush3.bf16.msra.mxu0 %v8340_v7  ;;  %v8469_v41 = vld [vmem:[#allocation8 + $0x40] sm:$0xff]   ;;  %v8399_v7 = vld [vmem:[#allocation7 + $0x588] ss:$28 sps:$4 sm:$0xff]  }
 0x2f8   :  { %5528 = vmatprep.subr.bf16.mxu1 %v8343_v50  ;;  %7270 = vmatprep.subr.bf16.mxu0 %v8344_v23  ;;  %v8405_v50 = vld [vmem:[#allocation7 + $0x5c4] ss:$28 sps:$4 sm:$0xff]  }
 0x2f9   :  { %v8403_v23 = vld [vmem:[#allocation7 + $0x5c0] ss:$28 sps:$4 sm:$0xff]  }
 0x2fb   :  { %5529 = vmatpush1.bf16.msra.mxu1 %v8341_v12  ;;  %7271 = vmatpush3.bf16.msra.mxu0 %v8345_v13  ;;  %v8408_v12 = vld [vmem:[#allocation7 + $0x5fc] ss:$28 sps:$4 sm:$0xff]  }
 0x2fc   :  { %5530 = vmatprep.subr.bf16.mxu1 %v8348_v48  ;;  %7272 = vmatprep.subr.bf16.mxu0 %v8349_v14  ;;  %v8470_v13 = vld [vmem:[#allocation8] sm:$0xff]   ;;  %v8474_v48 = vld [vmem:[#allocation8 + $0x48] sm:$0xff]  }
 0x2fd   :  { %v8406_v14 = vld [vmem:[#allocation7 + $0x5f8] ss:$28 sps:$4 sm:$0xff]  }
 0x2ff   :  { %5531 = vmatpush1.bf16.msra.mxu1 %v8346_v16  ;;  %7273 = vmatpush3.bf16.msra.mxu0 %v8350_v17  ;;  %v8411_v16 = vld [vmem:[#allocation7 + $0x634] ss:$28 sps:$4 sm:$0xff]   ;;  %v8475_v17 = vld [vmem:[#allocation8 + $0x8] sm:$0xff]  }
 0x300   :  { %5532 = vmatprep.subr.bf16.mxu1 %v8353_v22  ;;  %7274 = vmatprep.subr.bf16.mxu0 %v8354_v24  ;;  %v8476_v22 = vld [vmem:[#allocation8 + $0x50] sm:$0xff]  }
 0x301   :  { %v8409_v24 = vld [vmem:[#allocation7 + $0x630] ss:$28 sps:$4 sm:$0xff]  }
 0x303   :  { %5533 = vmatpush1.bf16.msra.mxu1 %v8351_v25  ;;  %7275 = vmatpush3.bf16.msra.mxu0 %v8355_v26  ;;  %v8414_v25 = vld [vmem:[#allocation7 + $0x66c] ss:$28 sps:$4 sm:$0xff]  }
 0x304   :  { %5543 = vmatprep.subr.bf16.mxu1 %v8358_v27  ;;  %7282 = vmatprep.subr.bf16.mxu0 %v8359_v5  ;;  %v8477_v26 = vld [vmem:[#allocation8 + $0x10] sm:$0xff]   ;;  %v8478_v27 = vld [vmem:[#allocation8 + $0x58] sm:$0xff]  }
 0x305   :  { %v8412_v5 = vld [vmem:[#allocation7 + $0x668] ss:$28 sps:$4 sm:$0xff]  }
 0x306   :  { %5535 = vmatmul.mubr.bf16.vlgmr.msra.gmra.mrb[32].mxu1 %v8862_v9  ;;  %5739 = vmatmul.mubr.bf16.vlgmr.msra.gmra.mrb[16].mxu0 %v8889_v47  ;;  %v8373_v9 = vld [vmem:[#allocation7 + $0x43c] ss:$28 sps:$4 sm:$0xff]  }
 0x307   :  { %5544 = vmatpush1.bf16.msra.mxu1 %v8356_v28  ;;  %5575 = vmatprep.mubr.bf16.mxu1 %v8873_v33  ;;  %v8375_v33 = vld [vmem:[#allocation7 + $0x7c0] ss:$28 sps:$4 sm:$0xff]  }
 0x308   :  { %7283 = vmatpush3.bf16.msra.mxu0 %v8360_v29  ;;  %5778 = vmatprep.mubr.bf16.mxu0 %v8911_v1  ;;  %v8417_v28 = vld [vmem:[#allocation7 + $0x6a4] ss:$28 sps:$4 sm:$0xff]   ;;  %v8479_v29 = vld [vmem:[#allocation8 + $0x18] sm:$0xff]  }
 0x309   :  { %5545 = vmatprep.subr.bf16.mxu1 %v8363_v31  ;;  %7284 = vmatprep.subr.bf16.mxu0 %v8364_v18  ;;  %v8482_v31 = vld [vmem:[#allocation8 + $0x60] sm:$0xff]  }
 0x30a   :  { %v8415_v18 = vld [vmem:[#allocation7 + $0x6a0] ss:$28 sps:$4 sm:$0xff]  }
 0x30b   :  { %5546 = vmatpush1.bf16.msra.mxu1 %v8361_v32  ;;  %v8420_v32 = vld [vmem:[#allocation7 + $0x6dc] ss:$28 sps:$4 sm:$0xff]  }
 0x30c   :  { %7285 = vmatpush3.bf16.msra.mxu0 %v8365_v34  ;;  %5547 = vmatprep.subr.bf16.mxu1 %v8368_v36  ;;  %v8483_v34 = vld [vmem:[#allocation8 + $0x20] sm:$0xff]   ;;  %v8486_v36 = vld [vmem:[#allocation8 + $0x68] sm:$0xff]  }
 0x30d   :  { %7286 = vmatprep.subr.bf16.mxu0 %v8369_v37  ;;  %v8418_v37 = vld [vmem:[#allocation7 + $0x6d8] ss:$28 sps:$4 sm:$0xff]  }
 0x30f   :  { %5548 = vmatpush1.bf16.msra.mxu1 %v8366_v38  ;;  %v8423_v38 = vld [vmem:[#allocation7 + $0x714] ss:$28 sps:$4 sm:$0xff]  }
 0x310   :  { %7287 = vmatpush3.bf16.msra.mxu0 %v8370_v8  ;;  %5549 = vmatprep.subr.bf16.mxu1 %v8373_v9  ;;  %v8487_v8 = vld [vmem:[#allocation8 + $0x28] sm:$0xff]   ;;  %v8490_v9 = vld [vmem:[#allocation8 + $0x70] sm:$0xff]  }
 0x311   :  { %7288 = vmatprep.subr.bf16.mxu0 %v8374_v42  ;;  %v8421_v42 = vld [vmem:[#allocation7 + $0x710] ss:$28 sps:$4 sm:$0xff]  }
 0x313   :  { %5550 = vmatpush1.bf16.msra.mxu1 %v8371_v43  ;;  %v8426_v43 = vld [vmem:[#allocation7 + $0x74c] ss:$28 sps:$4 sm:$0xff]  }
 0x314   :  { %7289 = vmatpush3.bf16.msra.mxu0 %v8375_v33  ;;  %5551 = vmatprep.subr.bf16.mxu1 %v8378_v44  ;;  %v8491_v33 = vld [vmem:[#allocation8 + $0x30] sm:$0xff]   ;;  %v8494_v44 = vld [vmem:[#allocation8 + $0x78] sm:$0xff]  }
 0x315   :  { %7290 = vmatprep.subr.bf16.mxu0 %v8379_v45  ;;  %v8424_v45 = vld [vmem:[#allocation7 + $0x748] ss:$28 sps:$4 sm:$0xff]  }
 0x317   :  { %5552 = vmatpush1.bf16.msra.mxu1 %v8376_v21  ;;  %v8429_v21 = vld [vmem:[#allocation7 + $0x784] ss:$28 sps:$4 sm:$0xff]  }
 0x318   :  { %7291 = vmatpush3.bf16.msra.mxu0 %v8380_v51  ;;  %5553 = vmatprep.subr.bf16.mxu1 %v8383_v53  ;;  %v8495_v51 = vld [vmem:[#allocation8 + $0x38] sm:$0xff]   ;;  %v8427_v53 = vld [vmem:[#allocation7 + $0x780] ss:$28 sps:$4 sm:$0xff]  }
 0x319   :  { %7292 = vmatprep.subr.bf16.mxu0 %v8384_v19  ;;  %v8432_v19 = vld [vmem:[#allocation7 + $0x7bc] ss:$28 sps:$4 sm:$0xff]  }
 0x31b   :  { %5554 = vmatpush1.bf16.msra.mxu1 %v8381_v54  ;;  %v8430_v54 = vld [vmem:[#allocation7 + $0x7b8] ss:$28 sps:$4 sm:$0xff]  }
 0x31c   :  { %7293 = vmatpush3.bf16.msra.mxu0 %v8385_v55  ;;  %5555 = vmatprep.subr.bf16.mxu1 %v8388_v56  ;;  %v8435_v55 = vld [vmem:[#allocation7 + $0x7f4] ss:$28 sps:$4 sm:$0xff]   ;;  %v8438_v56 = vld [vmem:[#allocation7 + $0x82c] ss:$28 sps:$4 sm:$0xff]  }
 0x31d   :  { %7294 = vmatprep.subr.bf16.mxu0 %v8389_v58  ;;  %v8441_v58 = vld [vmem:[#allocation7 + $0x864] ss:$28 sps:$4 sm:$0xff]  }
 0x31f   :  { %5556 = vmatpush1.bf16.msra.mxu1 %v8386_v59  ;;  %v8439_v59 = vld [vmem:[#allocation7 + $0x860] ss:$28 sps:$4 sm:$0xff]  }
 0x320   :  { %7295 = vmatpush3.bf16.msra.mxu0 %v8390_v60  ;;  %5557 = vmatprep.subr.bf16.mxu1 %v8393_v61  ;;  %v8444_v60 = vld [vmem:[#allocation7 + $0x89c] ss:$28 sps:$4 sm:$0xff]  }
 0x321   :  { %7296 = vmatprep.subr.bf16.mxu0 %v8394_v62  ;;  %v8442_v61 = vld [vmem:[#allocation7 + $0x898] ss:$28 sps:$4 sm:$0xff]  }
 0x322   :  { %v8447_v62 = vld [vmem:[#allocation7 + $0x8d4] ss:$28 sps:$4 sm:$0xff]  }
 0x323   :  { %5558 = vmatpush1.bf16.msra.mxu1 %v8391_v63  ;;  %v8445_v63 = vld [vmem:[#allocation7 + $0x8d0] ss:$28 sps:$4 sm:$0xff]  }
 0x324   :  { %7297 = vmatpush3.bf16.msra.mxu0 %v8395_v2  ;;  %5559 = vmatprep.subr.bf16.mxu1 %v8398_v52  ;;  %v8450_v2 = vld [vmem:[#allocation7 + $0x90c] ss:$28 sps:$4 sm:$0xff]  }
 0x325   :  { %7380 = vmatprep.subr.bf16.mxu0 %v8673_v30  ;;  %v8448_v52 = vld [vmem:[#allocation7 + $0x908] ss:$28 sps:$4 sm:$0xff]  }
 0x327   :  { %5779 = vmatmul.mubr.bf16.vlgmr.msra.gmra.mrb[20].mxu0 %v8913_v3  ;;  %5560 = vmatpush1.bf16.msra.mxu1 %v8396_v4  ;;  %v8453_v4 = vld [vmem:[#allocation7 + $0x944] ss:$28 sps:$4 sm:$0xff]  }
 0x328   :  { %5561 = vmatprep.subr.bf16.mxu1 %v8401_v6  ;;  %7381 = vmatpush3.bf16.msra.mxu0 %v8402_v39  ;;  %v8451_v6 = vld [vmem:[#allocation7 + $0x940] ss:$28 sps:$4 sm:$0xff]  }
 0x329   :  { %7382 = vmatprep.mubr.msk.bf16.mxu0 %vm8674_vm1, %v8673_v30  ;;  %7306 = vmatprep.subr.bf16.mxu0 %v8469_v41  ;;  %v8456_v39 = vld [vmem:[#allocation7 + $0x97c] ss:$28 sps:$4 sm:$0xff]  }
 0x32a   :  { %v8454_v41 = vld [vmem:[#allocation7 + $0x978] ss:$28 sps:$4 sm:$0xff]  }
 0x32b   :  { %5562 = vmatpush1.bf16.msra.mxu1 %v8399_v7  ;;  %v8459_v7 = vld [vmem:[#allocation7 + $0x9b4] ss:$28 sps:$4 sm:$0xff]  }
 0x32c   :  { %5563 = vmatprep.subr.bf16.mxu1 %v8405_v50  ;;  %v8457_v50 = vld [vmem:[#allocation7 + $0x9b0] ss:$28 sps:$4 sm:$0xff]  }
 0x32f   :  { %7383 = vmatmul.mubr.msk.bf16.vlgmr.msra.gmra.mrb[24].mxu0 %vm2307_vm0, %v8922_v10  ;;  %5564 = vmatpush1.bf16.msra.mxu1 %v8403_v23  ;;  %v8462_v23 = vld [vmem:[#allocation7 + $0x9ec] ss:$28 sps:$4 sm:$0xff]  }
 0x330   :  { %5565 = vmatprep.subr.bf16.mxu1 %v8408_v12  ;;  %7307 = vmatpush3.bf16.msra.mxu0 %v8470_v13  ;;  %v8460_v12 = vld [vmem:[#allocation7 + $0x9e8] ss:$28 sps:$4 sm:$0xff]  }
 0x331   :  { %7308 = vmatprep.subr.bf16.mxu0 %v8474_v48  ;;  %v8465_v13 = vld [vmem:[#allocation7 + $0xa24] ss:$28 sps:$4 sm:$0xff]  }
 0x332   :  { %v8463_v48 = vld [vmem:[#allocation7 + $0xa20] ss:$28 sps:$4 sm:$0xff]  }
 0x333   :  { %5566 = vmatpush1.bf16.msra.mxu1 %v8406_v14  ;;  %v8468_v14 = vld [vmem:[#allocation7 + $0xa5c] ss:$28 sps:$4 sm:$0xff]  }
 0x334   :  { %5567 = vmatprep.subr.bf16.mxu1 %v8411_v16  ;;  %7309 = vmatpush3.bf16.msra.mxu0 %v8475_v17  ;;  %v8466_v16 = vld [vmem:[#allocation7 + $0xa58] ss:$28 sps:$4 sm:$0xff]  }
 0x335   :  { %7310 = vmatprep.subr.bf16.mxu0 %v8476_v22  ;;  %v8473_v17 = vld [vmem:[#allocation7 + $0xa94] ss:$28 sps:$4 sm:$0xff]  }
 0x336   :  { %v8471_v22 = vld [vmem:[#allocation7 + $0xa90] ss:$28 sps:$4 sm:$0xff]  }
 0x337   :  { %5568 = vmatpush1.bf16.msra.mxu1 %v8409_v24  ;;  %v8480_v24 = vld [vmem:[#allocation8 + $0xc0] sm:$0xff]  }
 0x338   :  { %5569 = vmatprep.subr.bf16.mxu1 %v8414_v25  ;;  %7311 = vmatpush3.bf16.msra.mxu0 %v8477_v26  ;;  %v8505_v25 = vld [vmem:[#allocation8 + $0x140] sm:$0xff]  }
 0x339   :  { %7312 = vmatprep.subr.bf16.mxu0 %v8478_v27  ;;  %v8481_v26 = vld [vmem:[#allocation8 + $0x80] sm:$0xff]   ;;  %v8484_v27 = vld [vmem:[#allocation8 + $0xc8] sm:$0xff]  }
 0x33b   :  { %5570 = vmatpush1.bf16.msra.mxu1 %v8412_v5  ;;  %v8485_v5 = vld [vmem:[#allocation8 + $0x88] sm:$0xff]  }
 0x33c   :  { %5571 = vmatprep.subr.bf16.mxu1 %v8417_v28  ;;  %7313 = vmatpush3.bf16.msra.mxu0 %v8479_v29  ;;  %v8948_v28 = vld [vmem:[#allocation10 + $0x1] ss:$4 sm:$0x7f] }
 0x33d   :  { %7314 = vmatprep.subr.bf16.mxu0 %v8482_v31  ;;  %v8488_v29 = vld [vmem:[#allocation8 + $0xd0] sm:$0xff]   ;;  %v3379_v31 = vrot.slane %v8948_v28, %v490_v49 }
 0x33f   :  { %5572 = vmatpush1.bf16.msra.mxu1 %v8415_v18  ;;  %v8492_v18 = vld [vmem:[#allocation8 + $0xd8] sm:$0xff]  }
 0x340   :  { %5573 = vmatprep.subr.bf16.mxu1 %v8420_v32  ;;  %7315 = vmatpush3.bf16.msra.mxu0 %v8483_v34 }
 0x341   :  { %7316 = vmatprep.subr.bf16.mxu0 %v8486_v36 }
 0x343   :  { %5574 = vmatpush1.bf16.msra.mxu1 %v8418_v37 }
 0x344   :  { %5584 = vmatprep.subr.bf16.mxu1 %v8423_v38  ;;  %7317 = vmatpush3.bf16.msra.mxu0 %v8487_v8 }
 0x345   :  { %7318 = vmatprep.subr.bf16.mxu0 %v8490_v9 }
 0x346   :  { %5576 = vmatmul.mubr.bf16.vlgmr.msra.gmra.mrb[32].mxu1 %v8889_v47  ;;  %v8433_v47 = vld [vmem:[#allocation7 + $0x7f0] ss:$28 sps:$4 sm:$0xff]  }
 0x347   :  { %5585 = vmatpush1.bf16.msra.mxu1 %v8421_v42  ;;  %5616 = vmatprep.mubr.bf16.mxu1 %v8911_v1  ;;  %v8436_v1 = vld [vmem:[#allocation7 + $0x828] ss:$28 sps:$4 sm:$0xff]  }
 0x348   :  { %5586 = vmatprep.subr.bf16.mxu1 %v8426_v43  ;;  %7319 = vmatpush3.bf16.msra.mxu0 %v8491_v33  ;;  %v8493_v43 = vld [vmem:[#allocation8 + $0x98] sm:$0xff]  }
 0x349   :  { %7320 = vmatprep.subr.bf16.mxu0 %v8494_v44 }
 0x34b   :  { %5587 = vmatpush1.bf16.msra.mxu1 %v8424_v45  ;;  %v8496_v45 = vld [vmem:[#allocation8 + $0xe0] sm:$0xff]  }
 0x34c   :  { %5588 = vmatprep.subr.bf16.mxu1 %v8429_v21  ;;  %7321 = vmatpush3.bf16.msra.mxu0 %v8495_v51 }
 0x34d   :  { %7350 = vmatprep.subr.bf16.mxu0 %v8505_v25 }
 0x34f   :  { %5589 = vmatpush1.bf16.msra.mxu1 %v8427_v53 }
 0x350   :  { %5590 = vmatprep.subr.bf16.mxu1 %v8432_v19  ;;  %v8497_v19 = vld [vmem:[#allocation8 + $0xa0] sm:$0xff]  }
 0x353   :  { %5591 = vmatpush1.bf16.msra.mxu1 %v8430_v54  ;;  %v8506_v54 = vld [vmem:[#allocation8 + $0x100] sm:$0xff]  }
 0x354   :  { %5592 = vmatprep.subr.bf16.mxu1 %v8435_v55 }
 0x357   :  { %5593 = vmatpush1.bf16.msra.mxu1 %v8433_v47  ;;  %v8498_v47 = vld [vmem:[#allocation8 + $0xe8] sm:$0xff]  }
 0x358   :  { %5594 = vmatprep.subr.bf16.mxu1 %v8438_v56  ;;  %v8507_v56 = vld [vmem:[#allocation8 + $0x148] sm:$0xff]  }
 0x35b   :  { %5595 = vmatpush1.bf16.msra.mxu1 %v8436_v1  ;;  %v8499_v1 = vld [vmem:[#allocation8 + $0xa8] sm:$0xff]  }
 0x35c   :  { %5596 = vmatprep.subr.bf16.mxu1 %v8441_v58  ;;  %v8508_v58 = vld [vmem:[#allocation8 + $0x108] sm:$0xff]  }
 0x35f   :  { %5597 = vmatpush1.bf16.msra.mxu1 %v8439_v59  ;;  %v3383_v59 = vrot.slane %v8948_v28, %v494_v20  ;;  %v8513_v20 = vld [vmem:[#allocation8 + $0x160] sm:$0xff]  }
 0x360   :  { %5598 = vmatprep.subr.bf16.mxu1 %v8444_v60  ;;  %v8500_v60 = vld [vmem:[#allocation8 + $0xf0] sm:$0xff]  }
 0x363   :  { %5599 = vmatpush1.bf16.msra.mxu1 %v8442_v61  ;;  %v8509_v61 = vld [vmem:[#allocation8 + $0x150] sm:$0xff]  }
 0x364   :  { %5600 = vmatprep.subr.bf16.mxu1 %v8447_v62  ;;  %v8501_v62 = vld [vmem:[#allocation8 + $0xb0] sm:$0xff]  }
 0x367   :  { %5601 = vmatpush1.bf16.msra.mxu1 %v8445_v63  ;;  %v8510_v63 = vld [vmem:[#allocation8 + $0x110] sm:$0xff]  }
 0x368   :  { %5602 = vmatprep.subr.bf16.mxu1 %v8450_v2 }
 0x36b   :  { %5603 = vmatpush1.bf16.msra.mxu1 %v8448_v52  ;;  %v8502_v52 = vld [vmem:[#allocation8 + $0xf8] sm:$0xff]  }
 0x36c   :  { %5604 = vmatprep.subr.bf16.mxu1 %v8453_v4  ;;  %v8511_v4 = vld [vmem:[#allocation8 + $0x158] sm:$0xff]  }
 0x36f   :  { %5605 = vmatpush1.bf16.msra.mxu1 %v8451_v6  ;;  %v8503_v6 = vld [vmem:[#allocation8 + $0xb8] sm:$0xff]  }
 0x370   :  { %5606 = vmatprep.subr.bf16.mxu1 %v8456_v39  ;;  %v8512_v39 = vld [vmem:[#allocation8 + $0x118] sm:$0xff]  }
 0x373   :  { %5607 = vmatpush1.bf16.msra.mxu1 %v8454_v41 }
 0x374   :  { %5608 = vmatprep.subr.bf16.mxu1 %v8459_v7  ;;  %v8504_v7 = vld [vmem:[#allocation8 + $0x180] sm:$0xff]  }
 0x377   :  { %5609 = vmatpush1.bf16.msra.mxu1 %v8457_v50 }
 0x378   :  { %5610 = vmatprep.subr.bf16.mxu1 %v8462_v23  ;;  %v8514_v23 = vld [vmem:[#allocation8 + $0x120] sm:$0xff]  }
 0x37b   :  { %5611 = vmatpush1.bf16.msra.mxu1 %v8460_v12  ;;  %v8515_v12 = vld [vmem:[#allocation8 + $0x168] sm:$0xff]  }
 0x37c   :  { %5612 = vmatprep.subr.bf16.mxu1 %v8465_v13  ;;  %v8516_v13 = vld [vmem:[#allocation8 + $0x128] sm:$0xff]  }
 0x37f   :  { %5613 = vmatpush1.bf16.msra.mxu1 %v8463_v48 }
 0x380   :  { %5614 = vmatprep.subr.bf16.mxu1 %v8468_v14 }
 0x383   :  { %5615 = vmatpush1.bf16.msra.mxu1 %v8466_v16 }
 0x384   :  { %5625 = vmatprep.subr.bf16.mxu1 %v8473_v17 }
 0x386   :  { %5617 = vmatmul.mubr.bf16.vlgmr.msra.gmra.mrb[32].mxu1 %v8913_v3  ;;  %v3375_v3 = vrot.slane %v8948_v28, %v486_v40 }
 0x387   :  { %5626 = vmatpush1.bf16.msra.mxu1 %v8471_v22  ;;  %5657 = vmatprep.mubr.bf16.mxu1 %v8672_v0  ;;  %v8489_v0 = vld [vmem:[#allocation8 + $0x90] sm:$0xff]  }
 0x388   :  { %7328 = vmatprep.subr.bf16.mxu1 %v8480_v24  ;;  %v3399_v24 = vrot.slane %v8948_v28, %v510_v57 }
 0x392   :  { %7117 = vmatmul.mubr.msk.bf16.vlgmr.msra.gmra.mrb[32].mxu1 %vm2307_vm0, %v8922_v10  ;;  %v3387_v10 = vrot.slane %v8948_v28, %v498_v11 }
 0x393   :  { %7329 = vmatpush3.bf16.msra.mxu1 %v8481_v26 }
 0x394   :  { %7330 = vmatprep.subr.bf16.mxu1 %v8484_v27 }
 0x397   :  { %7331 = vmatpush3.bf16.msra.mxu1 %v8485_v5 }
 0x398   :  { %7332 = vmatprep.subr.bf16.mxu1 %v8488_v29 }
 0x399   :  { %v5331_v32 = vpop.f32.mrb[28].mxu1  ;;  %v5495_v34 = vpop.f32.mrb[8].mxu0 }
 0x39a   :  { %v7402_v36 = vadd.f32 %v5331_v32, %v3375_v3  ;;  %v5333_v37 = vpop.f32.mrb[29].mxu1  ;;  %v5497_v38 = vpop.f32.mrb[9].mxu0  ;;  %v7404_v2 = vadd.f32 %v5495_v34, %v3383_v59 }
 0x39b   :  { %7333 = vmatpush3.bf16.msra.mxu1 %v8489_v0  ;;  %v7403_v8 = vadd.f32 %v5333_v37, %v3379_v31  ;;  %v7405_v40 = vadd.f32 %v5497_v38, %v3387_v10  ;;  %v5335_v9 = vpop.f32.mrb[30].mxu1  ;;  %v5499_v42 = vpop.f32.mrb[10].mxu0  ;;  %v8517_v0 = vld [vmem:[#allocation8 + $0x170] sm:$0xff]   ;;  %v8519_v10 = vld [vmem:[#allocation8 + $0x178] sm:$0xff]  }
 0x39c   :  { %v5826_v33 = vmax.f32 %v7402_v36, 0.0  ;;  %v5336_v44 = vpop.f32.mrb[31].mxu1  ;;  %v5500_v49 = vpop.f32.mrb[11].mxu0  ;;  %7334 = vmatprep.subr.bf16.mxu1 %v8492_v18  ;;  %v5828_v41 = vmax.f32 %v7404_v2, 0.0  ;;  %v8518_v31 = vld [vmem:[#allocation8 + $0x130] sm:$0xff]   ;;  %v8520_v18 = vld [vmem:[#allocation8 + $0x138] sm:$0xff]  }
 0x39d   :  { %v5827_v21 = vmax.f32 %v7403_v8, 0.0  ;;  %v5829_v11 = vmax.f32 %v7405_v40, 0.0  ;;  %v3391_v49 = vrot.slane %v8948_v28, %v502_v15 }
 0x39e   :  { %v5833_v55 = vpack.c.bf16 %v5826_v33, %v5826_v33  ;;  %v5835_v50 = vpack.c.bf16 %v5828_v41, %v5828_v41 }
 0x39f   :  { %v5834_v51 = vpack.c.bf16 %v5827_v21, %v5827_v21  ;;  %v5836_v53 = vpack.c.bf16 %v5829_v11, %v5829_v11  ;;  %7335 = vmatpush3.bf16.msra.mxu1 %v8493_v43 }
 0x3a0   :  { %7336 = vmatprep.subr.bf16.mxu1 %v8496_v45  ;;  %v3395_v45 = vrot.slane %v8948_v28, %v506_v46 }
 0x3a1   :  { %6272 = vmatprep.mubr.bf16.mxu0 %v5834_v51  ;;  %6312 = vmatprep.mubr.bf16.mxu1 %v5836_v53 }
 0x3a2   :  { %6273 = vmatmul.mubr.bf16.vlgmr.msra.gmra.mrb[28].mxu0 %v5833_v55 }
 0x3a3   :  { %7337 = vmatpush3.bf16.msra.mxu1 %v8497_v19  ;;  %7351 = vmatpush3.bf16.msra.mxu0 %v8506_v54 }
 0x3a4   :  { %7338 = vmatprep.subr.bf16.mxu1 %v8498_v47  ;;  %7352 = vmatprep.subr.bf16.mxu0 %v8507_v56 }
 0x3a7   :  { %7339 = vmatpush3.bf16.msra.mxu1 %v8499_v1  ;;  %7353 = vmatpush3.bf16.msra.mxu0 %v8508_v58 }
 0x3a8   :  { %7340 = vmatprep.subr.bf16.mxu1 %v8500_v60  ;;  %7354 = vmatprep.subr.bf16.mxu0 %v8509_v61 }
 0x3ab   :  { %7341 = vmatpush3.bf16.msra.mxu1 %v8501_v62  ;;  %7355 = vmatpush3.bf16.msra.mxu0 %v8510_v63 }
 0x3ac   :  { %7342 = vmatprep.subr.bf16.mxu1 %v8502_v52  ;;  %7356 = vmatprep.subr.bf16.mxu0 %v8511_v4 }
 0x3af   :  { %7343 = vmatpush3.bf16.msra.mxu1 %v8503_v6  ;;  %7357 = vmatpush3.bf16.msra.mxu0 %v8512_v39 }
 0x3b0   :  { %7386 = vmatprep.subr.bf16.mxu1 %v8673_v30  ;;  %7358 = vmatprep.subr.bf16.mxu0 %v8513_v20 }
 0x3b2   :  { %6313 = vmatmul.mubr.bf16.vlgmr.msra.gmra.mrb[36].mxu1 %v5835_v50 }
 0x3b3   :  { %7387 = vmatpush3.bf16.msra.mxu1 %v8504_v7  ;;  %7388 = vmatprep.mubr.msk.bf16.mxu1 %vm8674_vm1, %v8673_v30 }
 0x3b4   :  { %7359 = vmatpush3.bf16.msra.mxu0 %v8514_v23 }
 0x3b5   :  { %7360 = vmatprep.subr.bf16.mxu0 %v8515_v12 }
 0x3b8   :  { %7361 = vmatpush3.bf16.msra.mxu0 %v8516_v13 }
 0x3b9   :  { %v7254_v48 = vpop.f32.mrb[12].mxu0  ;;  %7362 = vmatprep.subr.bf16.mxu0 %v8517_v0 }
 0x3ba   :  { %v7255_v14 = vpop.f32.mrb[13].mxu0 }
 0x3bb   :  { %v7256_v16 = vadd.f32 %v7255_v14, %v7254_v48  ;;  %v7257_v17 = vpop.f32.mrb[14].mxu0 }
 0x3bc   :  { %v7258_v22 = vpop.f32.mrb[15].mxu0  ;;  %7363 = vmatpush3.bf16.msra.mxu0 %v8518_v31 }
 0x3bd   :  { %v5701_v27 = vadd.f32 %v7256_v16, %v3399_v24  ;;  %7364 = vmatprep.subr.bf16.mxu0 %v8519_v10 }
 0x3c0   :  { %7365 = vmatpush3.bf16.msra.mxu0 %v8520_v18 }
 0x3d9   :  { %v7276_v25 = vpop.f32.mrb[16].mxu0 }
 0x3da   :  { %v7277_v26 = vpop.f32.mrb[17].mxu0 }
 0x3db   :  { %v7278_v5 = vadd.f32 %v7277_v26, %v7276_v25  ;;  %v7279_v29 = vpop.f32.mrb[18].mxu0 }
 0x3dc   :  { %v7280_v3 = vpop.f32.mrb[19].mxu0 }
 0x3dd   :  { %v5741_v30 = vadd.f32 %v7278_v5, %v5701_v27 }
 0x3fa   :  { %v7298_v32 = vpop.f32.mrb[20].mxu0 }
 0x3fb   :  { %v7299_v34 = vpop.f32.mrb[21].mxu0 }
 0x3fc   :  { %v7300_v36 = vadd.f32 %v7299_v34, %v7298_v32  ;;  %v7301_v37 = vpop.f32.mrb[22].mxu0 }
 0x3fd   :  { %v7302_v57 = vpop.f32.mrb[23].mxu0 }
 0x3fe   :  { %v5781_v38 = vadd.f32 %v7300_v36, %v5741_v30 }
 0x402   :  { %v5820_v8 = vpop.f32.mrb[24].mxu0 }
 0x403   :  { %v5821_v40 = vadd.f32 %v5820_v8, %v5781_v38  ;;  %v7384_v9 = vpop.f32.mrb[25].mxu0 }
 0x404   :  { %v5823_v42 = vpop.f32.mrb[26].mxu0 }
 0x405   :  { %v5832_v43 = vmax.f32 %v5821_v40, 0.0  ;;  %v7385_v33 = vpop.f32.mrb[27].mxu0 }
 0x407   :  { %v5839_v44 = vpack.c.bf16 %v5832_v43, %v5832_v43 }
 0x409   :  { %7389 = vmatmul.mubr.msk.bf16.vlgmr.msra.gmra.mrb[40].mxu1 %vm2307_vm0, %v5839_v44 }
 0x465   :  { %v5659_v21 = vpop.f32.mrb[32].mxu1 }
 0x466   :  { %v7406_v11 = vadd.f32 %v5659_v21, %v3391_v49  ;;  %v5661_v51 = vpop.f32.mrb[33].mxu1 }
 0x467   :  { %v7407_v53 = vadd.f32 %v5661_v51, %v3395_v45  ;;  %v5663_v19 = vpop.f32.mrb[34].mxu1 }
 0x468   :  { %v5830_v54 = vmax.f32 %v7406_v11, 0.0  ;;  %v5664_v55 = vpop.f32.mrb[35].mxu1 }
 0x469   :  { %v5831_v47 = vmax.f32 %v7407_v53, 0.0 }
 0x46a   :  { %v5837_v1 = vpack.c.bf16 %v5830_v54, %v5830_v54 }
 0x46b   :  { %v5838_v56 = vpack.c.bf16 %v5831_v47, %v5831_v47 }
 0x46d   :  { %6352 = vmatprep.mubr.bf16.mxu0 %v5838_v56 }
 0x46e   :  { %6353 = vmatmul.mubr.bf16.vlgmr.msra.gmra.mrb[32].mxu0 %v5837_v1 }
 0x475   :  { %v7322_v58 = vpop.f32.mrb[28].mxu0 }
 0x476   :  { %v7323_v59 = vpop.f32.mrb[29].mxu0 }
 0x477   :  { %v7324_v60 = vadd.f32 %v7323_v59, %v7322_v58  ;;  %v7325_v15 = vpop.f32.mrb[30].mxu0 }
 0x478   :  { %v7326_v61 = vpop.f32.mrb[31].mxu0 }
 0x479   :  { %v6275_v28 = vadd.f32 %v7324_v60, %v7119_v35 }
 0x485   :  { %v7344_v62 = vpop.f32.mrb[36].mxu1 }
 0x486   :  { %v7345_v46 = vpop.f32.mrb[37].mxu1 }
 0x487   :  { %v7346_v63 = vadd.f32 %v7345_v46, %v7344_v62  ;;  %v7347_v2 = vpop.f32.mrb[38].mxu1 }
 0x488   :  { %v7348_v52 = vpop.f32.mrb[39].mxu1 }
 0x489   :  { %v6315_v4 = vadd.f32 %v7346_v63, %v6275_v28 }
 0x4dc   :  { %v6394_v6 = vpop.f32.mrb[40].mxu1 }
 0x4dd   :  { %v7390_v39 = vpop.f32.mrb[41].mxu1 }
 0x4de   :  { %v6397_v41 = vpop.f32.mrb[42].mxu1 }
 0x4df   :  { %v7391_v20 = vpop.f32.mrb[43].mxu1 }
 0x541   :  { %v7366_v7 = vpop.f32.mrb[32].mxu0 }
 0x542   :  { %v7367_v50 = vpop.f32.mrb[33].mxu0 }
 0x543   :  { %v7368_v23 = vadd.f32 %v7367_v50, %v7366_v7  ;;  %v7369_v12 = vpop.f32.mrb[34].mxu0 }
 0x544   :  { %v7370_v13 = vpop.f32.mrb[35].mxu0 }
 0x545   :  { %v6355_v48 = vadd.f32 %v7368_v23, %v6315_v4 }
 0x547   :  { %v6395_v14 = vadd.f32 %v6394_v6, %v6355_v48 }
 0x549   :  { %6400 = vst [vmem:[#allocation11] sm:$0xff] %v6395_v14 }
 0x54a   :  { %8644 = shalt.err (!%p8641_p2)
}
 0x54b   :  { %s8645_s3 = scalar_lea.hbm %s8992_s5, 128 }
 0x54c   :  { %p8646_p3 = scmp.ne.s32.totalorder %s8992_s5, %s8645_s3  ;;  %p8649_p4 = scmp.lt.u32.totalorder %s8645_s3, %s8992_s5 }
 0x54e   :  { %p8651_p5 = pnand %p8649_p4, %p8646_p3 }
 0x550   :  { %8654 = shalt.err (!%p8651_p5)
}
 0x551   :  { %6410 = dma.vmem_to_hbm [thread:$0]  %s6408_s29, 128, %s8992_s5, [#allocation4]  }
 0x552   :  { %8661 = dma.done.wait [#allocation4], 128  }
 0x553   :  { %8662 = vsyncadd [#allocation4], 4294967168 }
 0x554   :  { %6414 = vsyncpa [#allocation3], 1 }
 0x555   :  { %6415 = vsyncpa [#allocation6], 1 }
 0x556   :  { %6416 = vsyncpa [#allocation9], 1 }
 0x557   :  { %6417 = vsyncpa [#allocation4], 1 }

// kernel: tpu_custom_call.1
= control target key start
LH: loop header
LB: loop body
LE: loop exit
PB: predicated region body
PF: predicated region fallthrough
CT: control target
= control target key end

     0   :  { %10 = vsyncpa [#allocation3], 0  ;;  %s8987_s0 = inlined_call_operand.hbm [shape: bf16[8,784], index: 0, kind: input, shape index: {}]   ;;  %s8988_s1 = inlined_call_operand.hbm [shape: bf16[784,784], index: 1, kind: input, shape index: {}]   ;;  %s8989_s2 = inlined_call_operand.hbm [shape: bf16[784,784], index: 2, kind: input, shape index: {}]   ;;  %s8990_s3 = inlined_call_operand.hbm [shape: bf16[784,128], index: 3, kind: input, shape index: {}]   ;;  %s8991_s4 = inlined_call_operand.hbm [shape: f32[3,784], index: 4, kind: input, shape index: {}]   ;;  %s8992_s5 = inlined_call_operand.hbm [shape: f32[8,128], index: 5, kind: output, shape index: {}]  }
   0x1   :  { %11 = vsyncpa [#allocation6], 0 }
   0x2   :  { %12 = vsyncpa [#allocation9], 0 }
   0x3   :  { %13 = vsyncpa [#allocation4], 0  ;;  %s8663_s18 = smov [#allocation5]   ;;  %s8523_s22 = scalar_lea.hbm %s8988_s1, 43904 }
   0x4   :  { %s29_s19 = sshll.u32 %s8663_s18, 4  ;;  %p8524_p0 = scmp.ne.s32.totalorder %s8988_s1, %s8523_s22  ;;  %s30_s19 = int_to_ptr.vmem [resolvable:$true] %s29_s19 }
   0x5   :  { %p8527_p1 = scmp.lt.u32.totalorder %s8523_s22, %s8988_s1 }
   0x7   :  { %p8529_p2 = pnand %p8527_p1, %p8524_p0 }
   0x9   :  { %8532 = shalt.err (!%p8529_p2)
}
   0xa   :  { %s8533_s27 = scalar_lea.vmem %s30_s19, 43904  ;;  %p8538_p4 = scmp.lt.s32.totalorder %s30_s19, %s30_s19 }
   0xb   :  { %p8534_p3 = scmp.ne.s32.totalorder %s30_s19, %s8533_s27  ;;  %p8539_p5 = scmp.lt.s32.totalorder %s8533_s27, %s8533_s27 }
   0xd   :  { %p8540_p6 = por %p8539_p5, %p8538_p4 }
   0xf   :  { %p8541_p7 = pnand %p8540_p6, %p8534_p3 }
  0x11   :  { %8544 = shalt.err (!%p8541_p7)
}
  0x12   :  { %s8664_s28 = smov 448   ;;  %s8665_s29 = smov 28  }
  0x13   :  { %35 = dma.hbm_to_vmem [thread:$0]  %s8988_s1, 43904, %s30_s19, [#allocation6], %s8664_s28, %s8664_s28, %s8665_s29  }
  0x14   :  { %s8666_s7 = smov [#allocation8]   ;;  %s8545_s11 = scalar_lea.hbm %s8990_s3, 6272 }
  0x15   :  { %s53_s8 = sshll.u32 %s8666_s7, 4  ;;  %p8546_p8 = scmp.ne.s32.totalorder %s8990_s3, %s8545_s11  ;;  %s54_s8 = int_to_ptr.vmem [resolvable:$true] %s53_s8 }
  0x16   :  { %p8549_p9 = scmp.lt.u32.totalorder %s8545_s11, %s8990_s3 }
  0x18   :  { %p8551_p10 = pnand %p8549_p9, %p8546_p8 }
  0x1a   :  { %8554 = shalt.err (!%p8551_p10)
}
  0x1b   :  { %s8555_s16 = scalar_lea.vmem %s54_s8, 6272  ;;  %p8560_p12 = scmp.lt.s32.totalorder %s54_s8, %s54_s8 }
  0x1c   :  { %p8556_p11 = scmp.ne.s32.totalorder %s54_s8, %s8555_s16  ;;  %p8561_p13 = scmp.lt.s32.totalorder %s8555_s16, %s8555_s16 }
  0x1e   :  { %p8562_p0 = por %p8561_p13, %p8560_p12 }
  0x20   :  { %p8563_p1 = pnand %p8562_p0, %p8556_p11 }
  0x22   :  { %8566 = shalt.err (!%p8563_p1)
}
  0x23   :  { %s8667_s1 = smov 64   ;;  %s8668_s17 = smov 4  }
  0x24   :  { %59 = dma.hbm_to_vmem [thread:$0]  %s8990_s3, 6272, %s54_s8, [#allocation9], %s8667_s1, %s8667_s1, %s8668_s17  }
  0x25   :  { %s8669_s20 = smov [#allocation2]   ;;  %s8670_s22 = smov [#allocation7]  }
  0x26   :  { %s20_s21 = sshll.u32 %s8669_s20, 4  ;;  %s41_s23 = sshll.u32 %s8670_s22, 4  ;;  %s21_s21 = int_to_ptr.vmem [resolvable:$true] %s20_s21  ;;  %s8733_s23 = int_to_ptr.vmem [resolvable:$true] %s41_s23 }
  0x27   :  { %s8567_s26 = scalar_lea.hbm %s8987_s0, 448 }
  0x28   :  { %p8568_p2 = scmp.ne.s32.totalorder %s8987_s0, %s8567_s26  ;;  %p8571_p3 = scmp.lt.u32.totalorder %s8567_s26, %s8987_s0 }
  0x2a   :  { %p8573_p4 = pnand %p8571_p3, %p8568_p2 }
  0x2c   :  { %8576 = shalt.err (!%p8573_p4)
}
  0x2d   :  { %s8577_s3 = scalar_lea.vmem %s21_s21, 448  ;;  %p8582_p6 = scmp.lt.s32.totalorder %s21_s21, %s21_s21 }
  0x2e   :  { %p8578_p5 = scmp.ne.s32.totalorder %s21_s21, %s8577_s3  ;;  %p8583_p7 = scmp.lt.s32.totalorder %s8577_s3, %s8577_s3 }
  0x30   :  { %p8584_p8 = por %p8583_p7, %p8582_p6 }
  0x32   :  { %p8585_p9 = pnand %p8584_p8, %p8578_p5 }
  0x34   :  { %8588 = shalt.err (!%p8585_p9)
}
  0x35   :  { %23 = dma.hbm_to_vmem [thread:$0]  %s8987_s0, 448, %s21_s21, [#allocation3]  }
  0x36   :  { %s8589_s12 = scalar_lea.hbm %s8989_s2, 43904 }
  0x37   :  { %p8590_p10 = scmp.ne.s32.totalorder %s8989_s2, %s8589_s12  ;;  %p8593_p11 = scmp.lt.u32.totalorder %s8589_s12, %s8989_s2 }
  0x39   :  { %p8595_p12 = pnand %p8593_p11, %p8590_p10 }
  0x3b   :  { %8598 = shalt.err (!%p8595_p12)
}
  0x3c   :  { %s8599_s1 = scalar_lea.vmem %s8733_s23, 43904  ;;  %p8604_p0 = scmp.lt.s32.totalorder %s8733_s23, %s8733_s23 }
  0x3d   :  { %p8600_p13 = scmp.ne.s32.totalorder %s8733_s23, %s8599_s1  ;;  %p8605_p1 = scmp.lt.s32.totalorder %s8599_s1, %s8599_s1 }
  0x3f   :  { %p8606_p2 = por %p8605_p1, %p8604_p0 }
  0x41   :  { %p8607_p3 = pnand %p8606_p2, %p8600_p13 }
  0x43   :  { %8610 = shalt.err (!%p8607_p3)
}
  0x44   :  { %47 = dma.hbm_to_vmem [thread:$0]  %s8989_s2, 43904, %s8733_s23, [#allocation6], %s8664_s28, %s8664_s28, %s8665_s29  }
  0x45   :  { %s8671_s18 = smov [#allocation10]   ;;  %s8611_s22 = scalar_lea.hbm %s8991_s4, 448 }
  0x46   :  { %s66_s19 = sshll.u32 %s8671_s18, 4  ;;  %p8612_p4 = scmp.ne.s32.totalorder %s8991_s4, %s8611_s22  ;;  %s67_s19 = int_to_ptr.vmem [resolvable:$true] %s66_s19 }
  0x47   :  { %p8615_p5 = scmp.lt.u32.totalorder %s8611_s22, %s8991_s4 }
  0x49   :  { %p8617_p6 = pnand %p8615_p5, %p8612_p4 }
  0x4b   :  { %8620 = shalt.err (!%p8617_p6)
}
  0x4c   :  { %s8621_s30 = scalar_lea.vmem %s67_s19, 448  ;;  %p8626_p8 = scmp.lt.s32.totalorder %s67_s19, %s67_s19 }
  0x4d   :  { %p8622_p7 = scmp.ne.s32.totalorder %s67_s19, %s8621_s30  ;;  %p8627_p9 = scmp.lt.s32.totalorder %s8621_s30, %s8621_s30 }
  0x4f   :  { %p8628_p10 = por %p8627_p9, %p8626_p8 }
  0x51   :  { %p8629_p11 = pnand %p8628_p10, %p8622_p7 }
  0x53   :  { %8632 = shalt.err (!%p8629_p11)
}
  0x54   :  { %69 = dma.hbm_to_vmem [thread:$0]  %s8991_s4, 448, %s67_s19, [#allocation9]  }
  0x55   :  { %8655 = dma.done.wait [#allocation3], 448  }
  0x56   :  { %8656 = vsyncadd [#allocation3], 4294966848 }
  0x57   :  { %8657 = dma.done.wait [#allocation6], 87808  }
  0x58   :  { %8658 = vsyncadd [#allocation6], 4294879488 }
  0x59   :  { %8659 = dma.done.wait [#allocation9], 6720  }
  0x5a   :  { %8660 = vsyncadd [#allocation9], 4294960576  ;;  %v8672_v0 = vmov 0   ;;  %v7485_v1 = vld [vmem:[#allocation5 + $0x4] ss:$28 sps:$4 sm:$0xff]   ;;  %vm2307_vm0 = vcmask 130048  }
  0x5b   :  { %2466 = vmatprep.mubr.bf16.mxu1 %v8672_v0  ;;  %v7487_v2 = vld [vmem:[#allocation5 + $0xa84] ss:$28 sps:$4 sm:$0xff]   ;;  %2311 = vmatprep.subr.bf16.mxu0 %v7485_v1  ;;  %v7491_v5 = vld [vmem:[#allocation5 + $0x3c] ss:$28 sps:$4 sm:$0xff]   ;;  %v7495_v7 = vld [vmem:[#allocation5 + $0xc] ss:$28 sps:$4 sm:$0xff]  }
  0x5c   :  { %v7489_v3 = vld [vmem:[#allocation5] ss:$28 sps:$4 sm:$0xff]   ;;  %2434 = vmatprep.subr.bf16.mxu1 %v7487_v2  ;;  %v7493_v6 = vld [vmem:[#allocation5 + $0x8] ss:$28 sps:$4 sm:$0xff]   ;;  %v7496_v8 = vld [vmem:[#allocation5 + $0x38] ss:$28 sps:$4 sm:$0xff]  }
  0x5d   :  { %v7490_v4 = vld [vmem:[#allocation5 + $0xa80] ss:$28 sps:$4 sm:$0xff]   ;;  %2312 = vmatpush1.bf16.msra.mxu0 %v7489_v3  ;;  %v7498_v10 = vld [vmem:[#allocation5 + $0x74] ss:$28 sps:$4 sm:$0xff]   ;;  %v7504_v14 = vld [vmem:[#allocation5 + $0xac] ss:$28 sps:$4 sm:$0xff]  }
  0x5e   :  { %2435 = vmatpush1.bf16.msra.mxu1 %v7490_v4  ;;  %2313 = vmatprep.subr.bf16.mxu0 %v7491_v5  ;;  %v7497_v9 = vld [vmem:[#allocation2 + $0x18] ss:$0 sps:$4 sm:$0xff]   ;;  %v7502_v12 = vld [vmem:[#allocation5 + $0x44] ss:$28 sps:$4 sm:$0xff]   ;;  %v7503_v13 = vld [vmem:[#allocation5 + $0x70] ss:$28 sps:$4 sm:$0xff]  }
  0x5f   :  { %2475 = vmatprep.subr.bf16.mxu1 %v7495_v7  ;;  %v7500_v11 = vld [vmem:[#allocation5 + $0x40] ss:$28 sps:$4 sm:$0xff]   ;;  %v7506_v16 = vld [vmem:[#allocation5 + $0x78] ss:$28 sps:$4 sm:$0xff]   ;;  %v7509_v17 = vld [vmem:[#allocation5 + $0xa8] ss:$28 sps:$4 sm:$0xff]  }
  0x60   :  { %v7508_v15 = vld [vmem:[#allocation5 + $0x7c] ss:$28 sps:$4 sm:$0xff]   ;;  %v7510_v18 = vld [vmem:[#allocation5 + $0xe4] ss:$28 sps:$4 sm:$0xff]   ;;  %v7514_v19 = vld [vmem:[#allocation5 + $0xb4] ss:$28 sps:$4 sm:$0xff]  }
  0x61   :  { %6768 = vmatmul.mubr.msk.bf16.vlgmr.msra.gmra.mrb[0].mxu1 %vm2307_vm0, %v7497_v9  ;;  %2314 = vmatpush1.bf16.msra.mxu0 %v7496_v8  ;;  %v7512_v20 = vld [vmem:[#allocation5 + $0xb0] ss:$28 sps:$4 sm:$0xff]   ;;  %v7515_v21 = vld [vmem:[#allocation5 + $0xe0] ss:$28 sps:$4 sm:$0xff]   ;;  %v7518_v24 = vld [vmem:[#allocation5 + $0xe8] ss:$28 sps:$4 sm:$0xff]  }
  0x62   :  { %2476 = vmatpush1.bf16.msra.mxu1 %v7493_v6  ;;  %2315 = vmatprep.subr.bf16.mxu0 %v7498_v10  ;;  %v7516_v22 = vld [vmem:[#allocation5 + $0x11c] ss:$28 sps:$4 sm:$0xff]   ;;  %v7520_v23 = vld [vmem:[#allocation5 + $0xec] ss:$28 sps:$4 sm:$0xff]   ;;  %v7522_v26 = vld [vmem:[#allocation5 + $0x154] ss:$28 sps:$4 sm:$0xff]  }
  0x63   :  { %2477 = vmatprep.subr.bf16.mxu1 %v7502_v12  ;;  %v7521_v25 = vld [vmem:[#allocation5 + $0x118] ss:$28 sps:$4 sm:$0xff]   ;;  %v7526_v27 = vld [vmem:[#allocation5 + $0x124] ss:$28 sps:$4 sm:$0xff]   ;;  %v7527_v29 = vld [vmem:[#allocation5 + $0x150] ss:$28 sps:$4 sm:$0xff]  }
  0x64   :  { %v7524_v28 = vld [vmem:[#allocation5 + $0x120] ss:$28 sps:$4 sm:$0xff]   ;;  %v7528_v30 = vld [vmem:[#allocation5 + $0x18c] ss:$28 sps:$4 sm:$0xff]   ;;  %v7530_v32 = vld [vmem:[#allocation5 + $0x158] ss:$28 sps:$4 sm:$0xff]  }
  0x65   :  { %2316 = vmatpush1.bf16.msra.mxu0 %v7503_v13  ;;  %v7532_v31 = vld [vmem:[#allocation5 + $0x15c] ss:$28 sps:$4 sm:$0xff]   ;;  %v7533_v33 = vld [vmem:[#allocation5 + $0x188] ss:$28 sps:$4 sm:$0xff]   ;;  %v7538_v35 = vld [vmem:[#allocation5 + $0x194] ss:$28 sps:$4 sm:$0xff]  }
  0x66   :  { %2478 = vmatpush1.bf16.msra.mxu1 %v7500_v11  ;;  %2317 = vmatprep.subr.bf16.mxu0 %v7504_v14  ;;  %v7534_v34 = vld [vmem:[#allocation5 + $0x1c4] ss:$28 sps:$4 sm:$0xff]   ;;  %v7536_v36 = vld [vmem:[#allocation5 + $0x190] ss:$28 sps:$4 sm:$0xff]   ;;  %v7540_v38 = vld [vmem:[#allocation5 + $0x1fc] ss:$28 sps:$4 sm:$0xff]  }
  0x67   :  { %2479 = vmatprep.subr.bf16.mxu1 %v7508_v15  ;;  %v7539_v37 = vld [vmem:[#allocation5 + $0x1c0] ss:$28 sps:$4 sm:$0xff]   ;;  %v7544_v39 = vld [vmem:[#allocation5 + $0x1cc] ss:$28 sps:$4 sm:$0xff]   ;;  %v7545_v41 = vld [vmem:[#allocation5 + $0x1f8] ss:$28 sps:$4 sm:$0xff]  }
  0x68   :  { %v7542_v40 = vld [vmem:[#allocation5 + $0x1c8] ss:$28 sps:$4 sm:$0xff]   ;;  %v7546_v42 = vld [vmem:[#allocation5 + $0x234] ss:$28 sps:$4 sm:$0xff]   ;;  %v7548_v44 = vld [vmem:[#allocation5 + $0x200] ss:$28 sps:$4 sm:$0xff]  }
  0x69   :  { %2318 = vmatpush1.bf16.msra.mxu0 %v7509_v17  ;;  %v7550_v43 = vld [vmem:[#allocation5 + $0x204] ss:$28 sps:$4 sm:$0xff]   ;;  %v7551_v45 = vld [vmem:[#allocation5 + $0x230] ss:$28 sps:$4 sm:$0xff]   ;;  %v7556_v47 = vld [vmem:[#allocation5 + $0x23c] ss:$28 sps:$4 sm:$0xff]  }
  0x6a   :  { %2480 = vmatpush1.bf16.msra.mxu1 %v7506_v16  ;;  %2319 = vmatprep.subr.bf16.mxu0 %v7510_v18  ;;  %v7552_v46 = vld [vmem:[#allocation5 + $0x26c] ss:$28 sps:$4 sm:$0xff]   ;;  %v7554_v48 = vld [vmem:[#allocation5 + $0x238] ss:$28 sps:$4 sm:$0xff]   ;;  %v7558_v51 = vld [vmem:[#allocation5 + $0x2a4] ss:$28 sps:$4 sm:$0xff]  }
  0x6b   :  { %2481 = vmatprep.subr.bf16.mxu1 %v7514_v19  ;;  %v86_v49 = vld [vmem:[#allocation2] sm:$0xff]  ;;  %v7562_v53 = vld [vmem:[#allocation5 + $0x274] ss:$28 sps:$4 sm:$0xff]   ;;  %v7563_v55 = vld [vmem:[#allocation5 + $0x2a0] ss:$28 sps:$4 sm:$0xff]   ;;  %vm8674_vm1 = vmmov 0  }
  0x6c   :  { %v7557_v50 = vld [vmem:[#allocation5 + $0x268] ss:$28 sps:$4 sm:$0xff]   ;;  %v8781_v52 = vcombine.high %v86_v49, %v86_v49  ;;  %v7560_v54 = vld [vmem:[#allocation5 + $0x270] ss:$28 sps:$4 sm:$0xff]   ;;  %v7564_v56 = vld [vmem:[#allocation5 + $0x2dc] ss:$28 sps:$4 sm:$0xff]   ;;  %v8785_v8 = vcombine.low %v86_v49, %v86_v49 }
  0x6d   :  { %2320 = vmatpush1.bf16.msra.mxu0 %v7515_v21  ;;  %v7568_v57 = vld [vmem:[#allocation5 + $0x2ac] ss:$28 sps:$4 sm:$0xff]   ;;  %v7569_v59 = vld [vmem:[#allocation5 + $0x2d8] ss:$28 sps:$4 sm:$0xff]   ;;  %v7574_v61 = vld [vmem:[#allocation5 + $0x2e4] ss:$28 sps:$4 sm:$0xff]  }
  0x6e   :  { %2482 = vmatpush1.bf16.msra.mxu1 %v7512_v20  ;;  %2321 = vmatprep.subr.bf16.mxu0 %v7516_v22  ;;  %v7566_v58 = vld [vmem:[#allocation5 + $0x2a8] ss:$28 sps:$4 sm:$0xff]   ;;  %v7570_v60 = vld [vmem:[#allocation5 + $0x314] ss:$28 sps:$4 sm:$0xff]   ;;  %v7572_v62 = vld [vmem:[#allocation5 + $0x2e0] ss:$28 sps:$4 sm:$0xff]  }
  0x6f   :  { %2483 = vmatprep.subr.bf16.mxu1 %v7520_v23  ;;  %2343 = vmatprep.mubr.bf16.mxu0 %v8781_v52  ;;  %v7575_v63 = vld [vmem:[#allocation5 + $0x310] ss:$28 sps:$4 sm:$0xff]   ;;  %v7580_v2 = vld [vmem:[#allocation5 + $0x31c] ss:$28 sps:$4 sm:$0xff]   ;;  %v7581_v4 = vld [vmem:[#allocation5 + $0x348] ss:$28 sps:$4 sm:$0xff]  }
  0x70   :  { %2507 = vmatprep.mubr.bf16.mxu1 %v8781_v52  ;;  %v7576_v1 = vld [vmem:[#allocation5 + $0x34c] ss:$28 sps:$4 sm:$0xff]   ;;  %v7578_v3 = vld [vmem:[#allocation5 + $0x318] ss:$28 sps:$4 sm:$0xff]   ;;  %v7585_v5 = vld [vmem:[#allocation5 + $0x384] ss:$28 sps:$4 sm:$0xff]  }
  0x71   :  { %2322 = vmatpush1.bf16.msra.mxu0 %v7521_v25  ;;  %v7588_v6 = vld [vmem:[#allocation5 + $0x354] ss:$28 sps:$4 sm:$0xff]   ;;  %v7583_v7 = vld [vmem:[#allocation5 + $0x380] ss:$28 sps:$4 sm:$0xff]   ;;  %v7595_v11 = vld [vmem:[#allocation5 + $0x38c] ss:$28 sps:$4 sm:$0xff]  }
  0x72   :  { %2484 = vmatpush1.bf16.msra.mxu1 %v7518_v24  ;;  %2323 = vmatprep.subr.bf16.mxu0 %v7522_v26  ;;  %v7586_v9 = vld [vmem:[#allocation5 + $0x350] ss:$28 sps:$4 sm:$0xff]   ;;  %v7592_v10 = vld [vmem:[#allocation5 + $0x3bc] ss:$28 sps:$4 sm:$0xff]   ;;  %v7593_v13 = vld [vmem:[#allocation5 + $0x388] ss:$28 sps:$4 sm:$0xff]  }
  0x73   :  { %2485 = vmatprep.subr.bf16.mxu1 %v7526_v27  ;;  %v7590_v12 = vld [vmem:[#allocation5 + $0x3b8] ss:$28 sps:$4 sm:$0xff]   ;;  %v7601_v15 = vld [vmem:[#allocation5 + $0x3c4] ss:$28 sps:$4 sm:$0xff]   ;;  %v7596_v16 = vld [vmem:[#allocation5 + $0x3f0] ss:$28 sps:$4 sm:$0xff]  }
  0x74   :  { %v7598_v14 = vld [vmem:[#allocation5 + $0x3f4] ss:$28 sps:$4 sm:$0xff]   ;;  %v7599_v17 = vld [vmem:[#allocation5 + $0x3c0] ss:$28 sps:$4 sm:$0xff]   ;;  %v7604_v18 = vld [vmem:[#allocation5 + $0x42c] ss:$28 sps:$4 sm:$0xff]  }
  0x75   :  { %2324 = vmatpush1.bf16.msra.mxu0 %v7527_v29  ;;  %v7607_v19 = vld [vmem:[#allocation5 + $0x3fc] ss:$28 sps:$4 sm:$0xff]   ;;  %v7602_v20 = vld [vmem:[#allocation5 + $0x428] ss:$28 sps:$4 sm:$0xff]   ;;  %v7613_v23 = vld [vmem:[#allocation5 + $0x434] ss:$28 sps:$4 sm:$0xff]  }
  0x76   :  { %2486 = vmatpush1.bf16.msra.mxu1 %v7524_v28  ;;  %2325 = vmatprep.subr.bf16.mxu0 %v7528_v30  ;;  %v7605_v21 = vld [vmem:[#allocation5 + $0x3f8] ss:$28 sps:$4 sm:$0xff]   ;;  %v7610_v22 = vld [vmem:[#allocation5 + $0x464] ss:$28 sps:$4 sm:$0xff]   ;;  %v7611_v25 = vld [vmem:[#allocation5 + $0x430] ss:$28 sps:$4 sm:$0xff]  }
  0x77   :  { %2487 = vmatprep.subr.bf16.mxu1 %v7532_v31  ;;  %v7608_v24 = vld [vmem:[#allocation5 + $0x460] ss:$28 sps:$4 sm:$0xff]   ;;  %v7619_v27 = vld [vmem:[#allocation5 + $0x46c] ss:$28 sps:$4 sm:$0xff]   ;;  %v7614_v28 = vld [vmem:[#allocation5 + $0x498] ss:$28 sps:$4 sm:$0xff]  }
  0x78   :  { %v7616_v26 = vld [vmem:[#allocation5 + $0x49c] ss:$28 sps:$4 sm:$0xff]   ;;  %v7617_v29 = vld [vmem:[#allocation5 + $0x468] ss:$28 sps:$4 sm:$0xff]   ;;  %v7622_v30 = vld [vmem:[#allocation5 + $0x4d4] ss:$28 sps:$4 sm:$0xff]  }
  0x79   :  { %2326 = vmatpush1.bf16.msra.mxu0 %v7533_v33  ;;  %v7625_v31 = vld [vmem:[#allocation5 + $0x4a4] ss:$28 sps:$4 sm:$0xff]   ;;  %v7620_v33 = vld [vmem:[#allocation5 + $0x4d0] ss:$28 sps:$4 sm:$0xff]   ;;  %s8675_s4 = smov [#allocation11]  }
  0x7a   :  { %2488 = vmatpush1.bf16.msra.mxu1 %v7530_v32  ;;  %2327 = vmatprep.subr.bf16.mxu0 %v7534_v34  ;;  %v8789_v32 = vld [vmem:[#allocation2 + $0x8] sm:$0xff]  ;;  %v7623_v34 = vld [vmem:[#allocation5 + $0x4a0] ss:$28 sps:$4 sm:$0xff]   ;;  %s6407_s29 = sshll.u32 %s8675_s4, 4  ;;  %s6408_s29 = int_to_ptr.vmem [resolvable:$true] %s6407_s29 }
  0x7b   :  { %2489 = vmatprep.subr.bf16.mxu1 %v7538_v35  ;;  %v8793_v35 = vcombine.high %v8789_v32, %v8789_v32  ;;  %v7649_v49 = vld [vmem:[#allocation5 + $0x584] ss:$28 sps:$4 sm:$0xff]   ;;  %s8633_s23 = scalar_lea.vmem %s6408_s29, 128  ;;  %p8638_p13 = scmp.lt.s32.totalorder %s6408_s29, %s6408_s29 }
  0x7c   :  { %p8634_p12 = scmp.ne.s32.totalorder %s6408_s29, %s8633_s23  ;;  %p8639_p0 = scmp.lt.s32.totalorder %s8633_s23, %s8633_s23 }
  0x7d   :  { %2328 = vmatpush1.bf16.msra.mxu0 %v7539_v37  ;;  %v7631_v37 = vld [vmem:[#allocation5 + $0x4dc] ss:$28 sps:$4 sm:$0xff]  }
  0x7e   :  { %2490 = vmatpush1.bf16.msra.mxu1 %v7536_v36  ;;  %2329 = vmatprep.subr.bf16.mxu0 %v7540_v38  ;;  %v7628_v36 = vld [vmem:[#allocation5 + $0x50c] ss:$28 sps:$4 sm:$0xff]   ;;  %p8640_p1 = por %p8639_p0, %p8638_p13 }
  0x7f   :  { %2491 = vmatprep.subr.bf16.mxu1 %v7544_v39  ;;  %v7626_v38 = vld [vmem:[#allocation5 + $0x508] ss:$28 sps:$4 sm:$0xff]   ;;  %v7629_v39 = vld [vmem:[#allocation5 + $0x4d8] ss:$28 sps:$4 sm:$0xff]  }
  0x80   :  { %p8641_p2 = pnand %p8640_p1, %p8634_p12 }
  0x81   :  { %2330 = vmatpush1.bf16.msra.mxu0 %v7545_v41  ;;  %v7637_v41 = vld [vmem:[#allocation5 + $0x514] ss:$28 sps:$4 sm:$0xff]  }
  0x82   :  { %2492 = vmatpush1.bf16.msra.mxu1 %v7542_v40  ;;  %2331 = vmatprep.subr.bf16.mxu0 %v7546_v42  ;;  %v7634_v40 = vld [vmem:[#allocation5 + $0x544] ss:$28 sps:$4 sm:$0xff]  }
  0x83   :  { %2493 = vmatprep.subr.bf16.mxu1 %v7550_v43  ;;  %v7632_v42 = vld [vmem:[#allocation5 + $0x540] ss:$28 sps:$4 sm:$0xff]   ;;  %v7635_v43 = vld [vmem:[#allocation5 + $0x510] ss:$28 sps:$4 sm:$0xff]  }
  0x85   :  { %2332 = vmatpush1.bf16.msra.mxu0 %v7551_v45  ;;  %v7643_v45 = vld [vmem:[#allocation5 + $0x54c] ss:$28 sps:$4 sm:$0xff]  }
  0x86   :  { %2494 = vmatpush1.bf16.msra.mxu1 %v7548_v44  ;;  %2333 = vmatprep.subr.bf16.mxu0 %v7552_v46  ;;  %v7640_v44 = vld [vmem:[#allocation5 + $0x57c] ss:$28 sps:$4 sm:$0xff]  }
  0x87   :  { %2495 = vmatprep.subr.bf16.mxu1 %v7556_v47  ;;  %v7638_v46 = vld [vmem:[#allocation5 + $0x578] ss:$28 sps:$4 sm:$0xff]   ;;  %v7641_v47 = vld [vmem:[#allocation5 + $0x548] ss:$28 sps:$4 sm:$0xff]  }
  0x89   :  { %2334 = vmatpush1.bf16.msra.mxu0 %v7557_v50  ;;  %v7644_v50 = vld [vmem:[#allocation5 + $0x5b0] ss:$28 sps:$4 sm:$0xff]  }
  0x8a   :  { %2496 = vmatpush1.bf16.msra.mxu1 %v7554_v48  ;;  %2335 = vmatprep.subr.bf16.mxu0 %v7558_v51  ;;  %v7646_v48 = vld [vmem:[#allocation5 + $0x5b4] ss:$28 sps:$4 sm:$0xff]   ;;  %v7647_v51 = vld [vmem:[#allocation5 + $0x580] ss:$28 sps:$4 sm:$0xff]  }
  0x8b   :  { %2497 = vmatprep.subr.bf16.mxu1 %v7562_v53  ;;  %v7652_v53 = vld [vmem:[#allocation5 + $0x5ec] ss:$28 sps:$4 sm:$0xff]  }
  0x8d   :  { %2336 = vmatpush1.bf16.msra.mxu0 %v7563_v55  ;;  %v7650_v55 = vld [vmem:[#allocation5 + $0x5e8] ss:$28 sps:$4 sm:$0xff]  }
  0x8e   :  { %2498 = vmatpush1.bf16.msra.mxu1 %v7560_v54  ;;  %2337 = vmatprep.subr.bf16.mxu0 %v7564_v56  ;;  %v7655_v54 = vld [vmem:[#allocation5 + $0x5bc] ss:$28 sps:$4 sm:$0xff]  }
  0x8f   :  { %2499 = vmatprep.subr.bf16.mxu1 %v7568_v57  ;;  %v7653_v56 = vld [vmem:[#allocation5 + $0x5b8] ss:$28 sps:$4 sm:$0xff]   ;;  %v7658_v57 = vld [vmem:[#allocation5 + $0x624] ss:$28 sps:$4 sm:$0xff]  }
  0x91   :  { %2338 = vmatpush1.bf16.msra.mxu0 %v7569_v59  ;;  %v7656_v59 = vld [vmem:[#allocation5 + $0x620] ss:$28 sps:$4 sm:$0xff]  }
  0x92   :  { %2500 = vmatpush1.bf16.msra.mxu1 %v7566_v58  ;;  %2339 = vmatprep.subr.bf16.mxu0 %v7570_v60  ;;  %v7661_v58 = vld [vmem:[#allocation5 + $0x5f4] ss:$28 sps:$4 sm:$0xff]  }
  0x93   :  { %2501 = vmatprep.subr.bf16.mxu1 %v7574_v61  ;;  %v7659_v60 = vld [vmem:[#allocation5 + $0x5f0] ss:$28 sps:$4 sm:$0xff]   ;;  %v7664_v61 = vld [vmem:[#allocation5 + $0x65c] ss:$28 sps:$4 sm:$0xff]  }
  0x95   :  { %2340 = vmatpush1.bf16.msra.mxu0 %v7575_v63  ;;  %v7662_v63 = vld [vmem:[#allocation5 + $0x658] ss:$28 sps:$4 sm:$0xff]  }
  0x96   :  { %2502 = vmatpush1.bf16.msra.mxu1 %v7572_v62  ;;  %2341 = vmatprep.subr.bf16.mxu0 %v7576_v1  ;;  %v7667_v62 = vld [vmem:[#allocation5 + $0x62c] ss:$28 sps:$4 sm:$0xff]  }
  0x97   :  { %2503 = vmatprep.subr.bf16.mxu1 %v7580_v2  ;;  %v7665_v1 = vld [vmem:[#allocation5 + $0x628] ss:$28 sps:$4 sm:$0xff]   ;;  %v7670_v2 = vld [vmem:[#allocation5 + $0x694] ss:$28 sps:$4 sm:$0xff]  }
  0x99   :  { %2342 = vmatpush1.bf16.msra.mxu0 %v7581_v4  ;;  %v7668_v4 = vld [vmem:[#allocation5 + $0x690] ss:$28 sps:$4 sm:$0xff]  }
  0x9a   :  { %2504 = vmatpush1.bf16.msra.mxu1 %v7578_v3  ;;  %2352 = vmatprep.subr.bf16.mxu0 %v7585_v5  ;;  %v7673_v3 = vld [vmem:[#allocation5 + $0x664] ss:$28 sps:$4 sm:$0xff]  }
  0x9b   :  { %2505 = vmatprep.subr.bf16.mxu1 %v7588_v6  ;;  %v7671_v5 = vld [vmem:[#allocation5 + $0x660] ss:$28 sps:$4 sm:$0xff]   ;;  %v7676_v6 = vld [vmem:[#allocation5 + $0x6cc] ss:$28 sps:$4 sm:$0xff]  }
  0x9c   :  { %2344 = vmatmul.mubr.bf16.vlgmr.msra.gmra.mrb[0].mxu0 %v8785_v8 }
  0x9d   :  { %2353 = vmatpush1.bf16.msra.mxu0 %v7583_v7  ;;  %2384 = vmatprep.mubr.bf16.mxu0 %v8793_v35  ;;  %v7679_v7 = vld [vmem:[#allocation5 + $0x69c] ss:$28 sps:$4 sm:$0xff]  }
  0x9e   :  { %2506 = vmatpush1.bf16.msra.mxu1 %v7586_v9  ;;  %2354 = vmatprep.subr.bf16.mxu0 %v7592_v10  ;;  %v7674_v9 = vld [vmem:[#allocation5 + $0x6c8] ss:$28 sps:$4 sm:$0xff]   ;;  %v7677_v10 = vld [vmem:[#allocation5 + $0x698] ss:$28 sps:$4 sm:$0xff]  }
  0x9f   :  { %2516 = vmatprep.subr.bf16.mxu1 %v7595_v11  ;;  %v7683_v11 = vld [vmem:[#allocation5 + $0x704] ss:$28 sps:$4 sm:$0xff]  }
  0xa1   :  { %2508 = vmatmul.mubr.bf16.vlgmr.msra.gmra.mrb[4].mxu1 %v8785_v8  ;;  %2355 = vmatpush1.bf16.msra.mxu0 %v7590_v12  ;;  %v7686_v12 = vld [vmem:[#allocation5 + $0x6d4] ss:$28 sps:$4 sm:$0xff]  }
  0xa2   :  { %2517 = vmatpush1.bf16.msra.mxu1 %v7593_v13  ;;  %2356 = vmatprep.subr.bf16.mxu0 %v7598_v14  ;;  %v7681_v13 = vld [vmem:[#allocation5 + $0x700] ss:$28 sps:$4 sm:$0xff]   ;;  %v7684_v14 = vld [vmem:[#allocation5 + $0x6d0] ss:$28 sps:$4 sm:$0xff]  }
  0xa3   :  { %2518 = vmatprep.subr.bf16.mxu1 %v7601_v15  ;;  %2548 = vmatprep.mubr.bf16.mxu1 %v8793_v35  ;;  %v8799_v15 = vcombine.low %v8789_v32, %v8789_v32  ;;  %v7706_v32 = vld [vmem:[#allocation5 + $0x7e0] ss:$28 sps:$4 sm:$0xff]  }
  0xa5   :  { %2357 = vmatpush1.bf16.msra.mxu0 %v7596_v16  ;;  %v7690_v16 = vld [vmem:[#allocation5 + $0x73c] ss:$28 sps:$4 sm:$0xff]  }
  0xa6   :  { %2519 = vmatpush1.bf16.msra.mxu1 %v7599_v17  ;;  %2358 = vmatprep.subr.bf16.mxu0 %v7604_v18  ;;  %v7693_v17 = vld [vmem:[#allocation5 + $0x70c] ss:$28 sps:$4 sm:$0xff]   ;;  %v8801_v18 = vld [vmem:[#allocation2 + $0x10] sm:$0xff] }
  0xa7   :  { %2520 = vmatprep.subr.bf16.mxu1 %v7607_v19  ;;  %v8805_v19 = vcombine.high %v8801_v18, %v8801_v18 }
  0xa9   :  { %2359 = vmatpush1.bf16.msra.mxu0 %v7602_v20  ;;  %v7688_v20 = vld [vmem:[#allocation5 + $0x738] ss:$28 sps:$4 sm:$0xff]  }
  0xaa   :  { %2521 = vmatpush1.bf16.msra.mxu1 %v7605_v21  ;;  %2360 = vmatprep.subr.bf16.mxu0 %v7610_v22  ;;  %v7691_v21 = vld [vmem:[#allocation5 + $0x708] ss:$28 sps:$4 sm:$0xff]   ;;  %v7696_v22 = vld [vmem:[#allocation5 + $0x774] ss:$28 sps:$4 sm:$0xff]  }
  0xab   :  { %2522 = vmatprep.subr.bf16.mxu1 %v7613_v23  ;;  %v7699_v23 = vld [vmem:[#allocation5 + $0x744] ss:$28 sps:$4 sm:$0xff]  }
  0xad   :  { %2361 = vmatpush1.bf16.msra.mxu0 %v7608_v24  ;;  %v7694_v24 = vld [vmem:[#allocation5 + $0x770] ss:$28 sps:$4 sm:$0xff]  }
  0xae   :  { %2523 = vmatpush1.bf16.msra.mxu1 %v7611_v25  ;;  %2362 = vmatprep.subr.bf16.mxu0 %v7616_v26  ;;  %v7697_v25 = vld [vmem:[#allocation5 + $0x740] ss:$28 sps:$4 sm:$0xff]   ;;  %v7702_v26 = vld [vmem:[#allocation5 + $0x7ac] ss:$28 sps:$4 sm:$0xff]  }
  0xaf   :  { %2524 = vmatprep.subr.bf16.mxu1 %v7619_v27  ;;  %v7705_v27 = vld [vmem:[#allocation5 + $0x77c] ss:$28 sps:$4 sm:$0xff]  }
  0xb1   :  { %2363 = vmatpush1.bf16.msra.mxu0 %v7614_v28  ;;  %v7700_v28 = vld [vmem:[#allocation5 + $0x7a8] ss:$28 sps:$4 sm:$0xff]  }
  0xb2   :  { %2525 = vmatpush1.bf16.msra.mxu1 %v7617_v29  ;;  %2364 = vmatprep.subr.bf16.mxu0 %v7622_v30  ;;  %v7703_v29 = vld [vmem:[#allocation5 + $0x778] ss:$28 sps:$4 sm:$0xff]   ;;  %v7708_v30 = vld [vmem:[#allocation5 + $0x7e4] ss:$28 sps:$4 sm:$0xff]  }
  0xb3   :  { %2526 = vmatprep.subr.bf16.mxu1 %v7625_v31  ;;  %v7711_v31 = vld [vmem:[#allocation5 + $0x7b4] ss:$28 sps:$4 sm:$0xff]  }
  0xb5   :  { %2365 = vmatpush1.bf16.msra.mxu0 %v7620_v33  ;;  %v7709_v33 = vld [vmem:[#allocation5 + $0x7b0] ss:$28 sps:$4 sm:$0xff]  }
  0xb6   :  { %2527 = vmatpush1.bf16.msra.mxu1 %v7623_v34  ;;  %2366 = vmatprep.subr.bf16.mxu0 %v7628_v36  ;;  %v7714_v34 = vld [vmem:[#allocation5 + $0x81c] ss:$28 sps:$4 sm:$0xff]   ;;  %v7717_v36 = vld [vmem:[#allocation5 + $0x7ec] ss:$28 sps:$4 sm:$0xff]  }
  0xb7   :  { %2528 = vmatprep.subr.bf16.mxu1 %v7631_v37  ;;  %v7712_v37 = vld [vmem:[#allocation5 + $0x818] ss:$28 sps:$4 sm:$0xff]  }
  0xb9   :  { %2367 = vmatpush1.bf16.msra.mxu0 %v7626_v38  ;;  %v7715_v38 = vld [vmem:[#allocation5 + $0x7e8] ss:$28 sps:$4 sm:$0xff]  }
  0xba   :  { %2529 = vmatpush1.bf16.msra.mxu1 %v7629_v39  ;;  %2368 = vmatprep.subr.bf16.mxu0 %v7634_v40  ;;  %v7720_v39 = vld [vmem:[#allocation5 + $0x854] ss:$28 sps:$4 sm:$0xff]   ;;  %v7723_v40 = vld [vmem:[#allocation5 + $0x824] ss:$28 sps:$4 sm:$0xff]  }
  0xbb   :  { %2530 = vmatprep.subr.bf16.mxu1 %v7637_v41  ;;  %v7718_v41 = vld [vmem:[#allocation5 + $0x850] ss:$28 sps:$4 sm:$0xff]  }
  0xbd   :  { %2369 = vmatpush1.bf16.msra.mxu0 %v7632_v42  ;;  %v7721_v42 = vld [vmem:[#allocation5 + $0x820] ss:$28 sps:$4 sm:$0xff]  }
  0xbe   :  { %2531 = vmatpush1.bf16.msra.mxu1 %v7635_v43  ;;  %2370 = vmatprep.subr.bf16.mxu0 %v7640_v44  ;;  %v7726_v43 = vld [vmem:[#allocation5 + $0x88c] ss:$28 sps:$4 sm:$0xff]   ;;  %v7729_v44 = vld [vmem:[#allocation5 + $0x85c] ss:$28 sps:$4 sm:$0xff]  }
  0xbf   :  { %2532 = vmatprep.subr.bf16.mxu1 %v7643_v45  ;;  %v7724_v45 = vld [vmem:[#allocation5 + $0x888] ss:$28 sps:$4 sm:$0xff]  }
  0xc1   :  { %2371 = vmatpush1.bf16.msra.mxu0 %v7638_v46  ;;  %v7727_v46 = vld [vmem:[#allocation5 + $0x858] ss:$28 sps:$4 sm:$0xff]  }
  0xc2   :  { %2533 = vmatpush1.bf16.msra.mxu1 %v7641_v47  ;;  %2372 = vmatprep.subr.bf16.mxu0 %v7646_v48  ;;  %v7732_v47 = vld [vmem:[#allocation5 + $0x8c4] ss:$28 sps:$4 sm:$0xff]   ;;  %v7735_v48 = vld [vmem:[#allocation5 + $0x894] ss:$28 sps:$4 sm:$0xff]  }
  0xc3   :  { %2534 = vmatprep.subr.bf16.mxu1 %v7649_v49  ;;  %v7730_v49 = vld [vmem:[#allocation5 + $0x8c0] ss:$28 sps:$4 sm:$0xff]  }
  0xc5   :  { %2373 = vmatpush1.bf16.msra.mxu0 %v7644_v50  ;;  %v7733_v50 = vld [vmem:[#allocation5 + $0x890] ss:$28 sps:$4 sm:$0xff]  }
  0xc6   :  { %2535 = vmatpush1.bf16.msra.mxu1 %v7647_v51  ;;  %2374 = vmatprep.subr.bf16.mxu0 %v7652_v53  ;;  %v7738_v51 = vld [vmem:[#allocation5 + $0x8fc] ss:$28 sps:$4 sm:$0xff]   ;;  %v7741_v53 = vld [vmem:[#allocation5 + $0x8cc] ss:$28 sps:$4 sm:$0xff]  }
  0xc7   :  { %2536 = vmatprep.subr.bf16.mxu1 %v7655_v54  ;;  %v7736_v54 = vld [vmem:[#allocation5 + $0x8f8] ss:$28 sps:$4 sm:$0xff]  }
  0xc9   :  { %2375 = vmatpush1.bf16.msra.mxu0 %v7650_v55  ;;  %v7739_v55 = vld [vmem:[#allocation5 + $0x8c8] ss:$28 sps:$4 sm:$0xff]  }
  0xca   :  { %2537 = vmatpush1.bf16.msra.mxu1 %v7653_v56  ;;  %2376 = vmatprep.subr.bf16.mxu0 %v7658_v57  ;;  %v7744_v56 = vld [vmem:[#allocation5 + $0x934] ss:$28 sps:$4 sm:$0xff]   ;;  %v7747_v57 = vld [vmem:[#allocation5 + $0x904] ss:$28 sps:$4 sm:$0xff]  }
  0xcb   :  { %2538 = vmatprep.subr.bf16.mxu1 %v7661_v58  ;;  %v7742_v58 = vld [vmem:[#allocation5 + $0x930] ss:$28 sps:$4 sm:$0xff]  }
  0xcd   :  { %2377 = vmatpush1.bf16.msra.mxu0 %v7656_v59  ;;  %v7745_v59 = vld [vmem:[#allocation5 + $0x900] ss:$28 sps:$4 sm:$0xff]  }
  0xce   :  { %2539 = vmatpush1.bf16.msra.mxu1 %v7659_v60  ;;  %2378 = vmatprep.subr.bf16.mxu0 %v7664_v61  ;;  %v7750_v60 = vld [vmem:[#allocation5 + $0x96c] ss:$28 sps:$4 sm:$0xff]   ;;  %v7753_v61 = vld [vmem:[#allocation5 + $0x93c] ss:$28 sps:$4 sm:$0xff]  }
  0xcf   :  { %2540 = vmatprep.subr.bf16.mxu1 %v7667_v62  ;;  %v7748_v62 = vld [vmem:[#allocation5 + $0x968] ss:$28 sps:$4 sm:$0xff]  }
  0xd1   :  { %2379 = vmatpush1.bf16.msra.mxu0 %v7662_v63  ;;  %v7751_v63 = vld [vmem:[#allocation5 + $0x938] ss:$28 sps:$4 sm:$0xff]  }
  0xd2   :  { %2541 = vmatpush1.bf16.msra.mxu1 %v7665_v1  ;;  %2380 = vmatprep.subr.bf16.mxu0 %v7670_v2  ;;  %v7756_v1 = vld [vmem:[#allocation5 + $0x9a4] ss:$28 sps:$4 sm:$0xff]   ;;  %v7759_v2 = vld [vmem:[#allocation5 + $0x974] ss:$28 sps:$4 sm:$0xff]  }
  0xd3   :  { %2542 = vmatprep.subr.bf16.mxu1 %v7673_v3  ;;  %v7754_v3 = vld [vmem:[#allocation5 + $0x9a0] ss:$28 sps:$4 sm:$0xff]  }
  0xd5   :  { %2381 = vmatpush1.bf16.msra.mxu0 %v7668_v4  ;;  %v7757_v4 = vld [vmem:[#allocation5 + $0x970] ss:$28 sps:$4 sm:$0xff]  }
  0xd6   :  { %2543 = vmatpush1.bf16.msra.mxu1 %v7671_v5  ;;  %2382 = vmatprep.subr.bf16.mxu0 %v7676_v6  ;;  %v7762_v5 = vld [vmem:[#allocation5 + $0x9dc] ss:$28 sps:$4 sm:$0xff]   ;;  %v7765_v6 = vld [vmem:[#allocation5 + $0x9ac] ss:$28 sps:$4 sm:$0xff]  }
  0xd7   :  { %2544 = vmatprep.subr.bf16.mxu1 %v7679_v7  ;;  %v7760_v7 = vld [vmem:[#allocation5 + $0x9d8] ss:$28 sps:$4 sm:$0xff]  }
  0xd9   :  { %2383 = vmatpush1.bf16.msra.mxu0 %v7674_v9  ;;  %v7763_v9 = vld [vmem:[#allocation5 + $0x9a8] ss:$28 sps:$4 sm:$0xff]  }
  0xda   :  { %2545 = vmatpush1.bf16.msra.mxu1 %v7677_v10  ;;  %2393 = vmatprep.subr.bf16.mxu0 %v7683_v11  ;;  %v7768_v10 = vld [vmem:[#allocation5 + $0xa14] ss:$28 sps:$4 sm:$0xff]   ;;  %v7771_v11 = vld [vmem:[#allocation5 + $0x9e4] ss:$28 sps:$4 sm:$0xff]  }
  0xdb   :  { %2546 = vmatprep.subr.bf16.mxu1 %v7686_v12  ;;  %v7766_v12 = vld [vmem:[#allocation5 + $0xa10] ss:$28 sps:$4 sm:$0xff]  }
  0xdc   :  { %2385 = vmatmul.mubr.bf16.vlgmr.msra.gmra.mrb[0].mxu0 %v8799_v15 }
  0xdd   :  { %2394 = vmatpush1.bf16.msra.mxu0 %v7681_v13  ;;  %2425 = vmatprep.mubr.bf16.mxu0 %v8805_v19  ;;  %v7769_v13 = vld [vmem:[#allocation5 + $0x9e0] ss:$28 sps:$4 sm:$0xff]  }
  0xde   :  { %2547 = vmatpush1.bf16.msra.mxu1 %v7684_v14  ;;  %2395 = vmatprep.subr.bf16.mxu0 %v7690_v16  ;;  %v7774_v14 = vld [vmem:[#allocation5 + $0xa4c] ss:$28 sps:$4 sm:$0xff]   ;;  %v7777_v16 = vld [vmem:[#allocation5 + $0xa1c] ss:$28 sps:$4 sm:$0xff]  }
  0xdf   :  { %2557 = vmatprep.subr.bf16.mxu1 %v7693_v17  ;;  %v7772_v17 = vld [vmem:[#allocation5 + $0xa48] ss:$28 sps:$4 sm:$0xff]  }
  0xe1   :  { %2549 = vmatmul.mubr.bf16.vlgmr.msra.gmra.mrb[4].mxu1 %v8799_v15  ;;  %2396 = vmatpush1.bf16.msra.mxu0 %v7688_v20  ;;  %v7775_v20 = vld [vmem:[#allocation5 + $0xa18] ss:$28 sps:$4 sm:$0xff]  }
  0xe2   :  { %2558 = vmatpush1.bf16.msra.mxu1 %v7691_v21  ;;  %2397 = vmatprep.subr.bf16.mxu0 %v7696_v22  ;;  %v7782_v21 = vld [vmem:[#allocation5 + $0xa54] ss:$28 sps:$4 sm:$0xff]  }
  0xe3   :  { %2559 = vmatprep.subr.bf16.mxu1 %v7699_v23  ;;  %2589 = vmatprep.mubr.bf16.mxu1 %v8805_v19  ;;  %v7785_v22 = vld [vmem:[#allocation5 + $0x14] ss:$28 sps:$4 sm:$0xff]   ;;  %v8813_v23 = vcombine.low %v8801_v18, %v8801_v18  ;;  %v7789_v18 = vld [vmem:[#allocation5 + $0x80] ss:$28 sps:$4 sm:$0xff]  }
  0xe5   :  { %2398 = vmatpush1.bf16.msra.mxu0 %v7694_v24  ;;  %v7780_v24 = vld [vmem:[#allocation5 + $0xa50] ss:$28 sps:$4 sm:$0xff]  }
  0xe6   :  { %2560 = vmatpush1.bf16.msra.mxu1 %v7697_v25  ;;  %2399 = vmatprep.subr.bf16.mxu0 %v7702_v26  ;;  %v7783_v25 = vld [vmem:[#allocation5 + $0x10] ss:$28 sps:$4 sm:$0xff]  }
  0xe7   :  { %2561 = vmatprep.subr.bf16.mxu1 %v7705_v27  ;;  %v7788_v26 = vld [vmem:[#allocation5 + $0x4c] ss:$28 sps:$4 sm:$0xff]  }
  0xe8   :  { %v7794_v27 = vld [vmem:[#allocation5 + $0xa8c] ss:$28 sps:$4 sm:$0xff]  }
  0xe9   :  { %2400 = vmatpush1.bf16.msra.mxu0 %v7700_v28  ;;  %v7786_v28 = vld [vmem:[#allocation5 + $0x48] ss:$28 sps:$4 sm:$0xff]  }
  0xea   :  { %2562 = vmatpush1.bf16.msra.mxu1 %v7703_v29  ;;  %2401 = vmatprep.subr.bf16.mxu0 %v7708_v30  ;;  %v7792_v29 = vld [vmem:[#allocation5 + $0xa88] ss:$28 sps:$4 sm:$0xff]  }
  0xeb   :  { %2563 = vmatprep.subr.bf16.mxu1 %v7711_v31  ;;  %v7791_v30 = vld [vmem:[#allocation5 + $0x84] ss:$28 sps:$4 sm:$0xff]   ;;  %v7818_v31 = vld [vmem:[#allocation5 + $0xa94] ss:$28 sps:$4 sm:$0xff]  }
  0xed   :  { %2402 = vmatpush1.bf16.msra.mxu0 %v7706_v32  ;;  %v7797_v32 = vld [vmem:[#allocation5 + $0xbc] ss:$28 sps:$4 sm:$0xff]  }
  0xee   :  { %2564 = vmatpush1.bf16.msra.mxu1 %v7709_v33  ;;  %2403 = vmatprep.subr.bf16.mxu0 %v7714_v34  ;;  %v7795_v33 = vld [vmem:[#allocation5 + $0xb8] ss:$28 sps:$4 sm:$0xff]  }
  0xef   :  { %2565 = vmatprep.subr.bf16.mxu1 %v7717_v36  ;;  %v7800_v34 = vld [vmem:[#allocation5 + $0xf4] ss:$28 sps:$4 sm:$0xff]  }
  0xf0   :  { %v7798_v36 = vld [vmem:[#allocation5 + $0xf0] ss:$28 sps:$4 sm:$0xff]  }
  0xf1   :  { %2404 = vmatpush1.bf16.msra.mxu0 %v7712_v37  ;;  %v7816_v37 = vld [vmem:[#allocation5 + $0xa90] ss:$28 sps:$4 sm:$0xff]  }
  0xf2   :  { %2566 = vmatpush1.bf16.msra.mxu1 %v7715_v38  ;;  %2405 = vmatprep.subr.bf16.mxu0 %v7720_v39  ;;  %v7803_v38 = vld [vmem:[#allocation5 + $0x12c] ss:$28 sps:$4 sm:$0xff]   ;;  %v7822_v39 = vld [vmem:[#allocation5 + $0x1d8] ss:$28 sps:$4 sm:$0xff]  }
  0xf3   :  { %2567 = vmatprep.subr.bf16.mxu1 %v7723_v40  ;;  %v8819_v40 = vld [vmem:[#allocation2 + $0x18] ss:$0 sps:$4 sm:$0xff]  }
  0xf5   :  { %2406 = vmatpush1.bf16.msra.mxu0 %v7718_v41  ;;  %v7801_v41 = vld [vmem:[#allocation5 + $0x128] ss:$28 sps:$4 sm:$0xff]  }
  0xf6   :  { %2568 = vmatpush1.bf16.msra.mxu1 %v7721_v42  ;;  %2407 = vmatprep.subr.bf16.mxu0 %v7726_v43  ;;  %v7806_v42 = vld [vmem:[#allocation5 + $0x164] ss:$28 sps:$4 sm:$0xff]  }
  0xf7   :  { %2569 = vmatprep.subr.bf16.mxu1 %v7729_v44  ;;  %v7804_v43 = vld [vmem:[#allocation5 + $0x160] ss:$28 sps:$4 sm:$0xff]  }
  0xf8   :  { %v7809_v44 = vld [vmem:[#allocation5 + $0x19c] ss:$28 sps:$4 sm:$0xff]  }
  0xf9   :  { %2408 = vmatpush1.bf16.msra.mxu0 %v7724_v45  ;;  %v7823_v45 = vld [vmem:[#allocation5 + $0x18] ss:$28 sps:$4 sm:$0xff]  }
  0xfa   :  { %2570 = vmatpush1.bf16.msra.mxu1 %v7727_v46  ;;  %2409 = vmatprep.subr.bf16.mxu0 %v7732_v47  ;;  %v7827_v46 = vld [vmem:[#allocation5 + $0x210] ss:$28 sps:$4 sm:$0xff]   ;;  %v7807_v47 = vld [vmem:[#allocation5 + $0x198] ss:$28 sps:$4 sm:$0xff]  }
  0xfb   :  { %2571 = vmatprep.subr.bf16.mxu1 %v7735_v48 }
  0xfd   :  { %2410 = vmatpush1.bf16.msra.mxu0 %v7730_v49  ;;  %v7828_v49 = vld [vmem:[#allocation5 + $0x50] ss:$28 sps:$4 sm:$0xff]  }
  0xfe   :  { %2572 = vmatpush1.bf16.msra.mxu1 %v7733_v50  ;;  %2411 = vmatprep.subr.bf16.mxu0 %v7738_v51 }
  0xff   :  { %2573 = vmatprep.subr.bf16.mxu1 %v7741_v53  ;;  %v7812_v53 = vld [vmem:[#allocation5 + $0x1d4] ss:$28 sps:$4 sm:$0xff]  }
 0x101   :  { %2412 = vmatpush1.bf16.msra.mxu0 %v7736_v54  ;;  %v7832_v54 = vld [vmem:[#allocation5 + $0x248] ss:$28 sps:$4 sm:$0xff]  }
 0x102   :  { %2574 = vmatpush1.bf16.msra.mxu1 %v7739_v55  ;;  %2413 = vmatprep.subr.bf16.mxu0 %v7744_v56  ;;  %v7810_v56 = vld [vmem:[#allocation5 + $0x1d0] ss:$28 sps:$4 sm:$0xff]  }
 0x103   :  { %2575 = vmatprep.subr.bf16.mxu1 %v7747_v57  ;;  %v7815_v57 = vld [vmem:[#allocation5 + $0x20c] ss:$28 sps:$4 sm:$0xff]  }
 0x105   :  { %2414 = vmatpush1.bf16.msra.mxu0 %v7742_v58  ;;  %v7833_v58 = vld [vmem:[#allocation5 + $0x88] ss:$28 sps:$4 sm:$0xff]  }
 0x106   :  { %2576 = vmatpush1.bf16.msra.mxu1 %v7745_v59  ;;  %2415 = vmatprep.subr.bf16.mxu0 %v7750_v60  ;;  %v7837_v59 = vld [vmem:[#allocation5 + $0x280] ss:$28 sps:$4 sm:$0xff]   ;;  %v7813_v60 = vld [vmem:[#allocation5 + $0x208] ss:$28 sps:$4 sm:$0xff]  }
 0x107   :  { %2577 = vmatprep.subr.bf16.mxu1 %v7753_v61  ;;  %v7838_v61 = vld [vmem:[#allocation5 + $0xc0] ss:$28 sps:$4 sm:$0xff]  }
 0x109   :  { %2416 = vmatpush1.bf16.msra.mxu0 %v7748_v62  ;;  %v7821_v62 = vld [vmem:[#allocation5 + $0x244] ss:$28 sps:$4 sm:$0xff]  }
 0x10a   :  { %2578 = vmatpush1.bf16.msra.mxu1 %v7751_v63  ;;  %2417 = vmatprep.subr.bf16.mxu0 %v7756_v1  ;;  %v7842_v63 = vld [vmem:[#allocation5 + $0x2b8] ss:$28 sps:$4 sm:$0xff]   ;;  %v7819_v1 = vld [vmem:[#allocation5 + $0x240] ss:$28 sps:$4 sm:$0xff]  }
 0x10b   :  { %2579 = vmatprep.subr.bf16.mxu1 %v7759_v2  ;;  %v7826_v2 = vld [vmem:[#allocation5 + $0x27c] ss:$28 sps:$4 sm:$0xff]  }
 0x10d   :  { %2418 = vmatpush1.bf16.msra.mxu0 %v7754_v3  ;;  %v7847_v3 = vld [vmem:[#allocation5 + $0x2f0] ss:$28 sps:$4 sm:$0xff]  }
 0x10e   :  { %2580 = vmatpush1.bf16.msra.mxu1 %v7757_v4  ;;  %2419 = vmatprep.subr.bf16.mxu0 %v7762_v5  ;;  %v7824_v4 = vld [vmem:[#allocation5 + $0x278] ss:$28 sps:$4 sm:$0xff]  }
 0x10f   :  { %2581 = vmatprep.subr.bf16.mxu1 %v7765_v6  ;;  %v7831_v5 = vld [vmem:[#allocation5 + $0x2b4] ss:$28 sps:$4 sm:$0xff]  }
 0x110   :  { %v7848_v6 = vld [vmem:[#allocation5 + $0x130] ss:$28 sps:$4 sm:$0xff]  }
 0x111   :  { %2420 = vmatpush1.bf16.msra.mxu0 %v7760_v7  ;;  %v7852_v7 = vld [vmem:[#allocation5 + $0x328] ss:$28 sps:$4 sm:$0xff]  }
 0x112   :  { %2582 = vmatpush1.bf16.msra.mxu1 %v7763_v9  ;;  %2421 = vmatprep.subr.bf16.mxu0 %v7768_v10  ;;  %v7829_v9 = vld [vmem:[#allocation5 + $0x2b0] ss:$28 sps:$4 sm:$0xff]  }
 0x113   :  { %2583 = vmatprep.subr.bf16.mxu1 %v7771_v11  ;;  %v7836_v10 = vld [vmem:[#allocation5 + $0x2ec] ss:$28 sps:$4 sm:$0xff]  }
 0x114   :  { %v7853_v11 = vld [vmem:[#allocation5 + $0x168] ss:$28 sps:$4 sm:$0xff]  }
 0x115   :  { %2422 = vmatpush1.bf16.msra.mxu0 %v7766_v12  ;;  %v7857_v12 = vld [vmem:[#allocation5 + $0x360] ss:$28 sps:$4 sm:$0xff]  }
 0x116   :  { %2584 = vmatpush1.bf16.msra.mxu1 %v7769_v13  ;;  %2423 = vmatprep.subr.bf16.mxu0 %v7774_v14  ;;  %v7834_v13 = vld [vmem:[#allocation5 + $0x2e8] ss:$28 sps:$4 sm:$0xff]  }
 0x117   :  { %2585 = vmatprep.subr.bf16.mxu1 %v7777_v16  ;;  %v7841_v14 = vld [vmem:[#allocation5 + $0x324] ss:$28 sps:$4 sm:$0xff]  }
 0x118   :  { %v7858_v16 = vld [vmem:[#allocation5 + $0x1a0] ss:$28 sps:$4 sm:$0xff]  }
 0x119   :  { %2424 = vmatpush1.bf16.msra.mxu0 %v7772_v17  ;;  %v7862_v17 = vld [vmem:[#allocation5 + $0x558] ss:$28 sps:$4 sm:$0xff]  }
 0x11a   :  { %2586 = vmatpush1.bf16.msra.mxu1 %v7775_v20  ;;  %2639 = vmatprep.subr.bf16.mxu0 %v7785_v22  ;;  %v7839_v20 = vld [vmem:[#allocation5 + $0x320] ss:$28 sps:$4 sm:$0xff]   ;;  %v7863_v22 = vld [vmem:[#allocation5 + $0x398] ss:$28 sps:$4 sm:$0xff]  }
 0x11b   :  { %2587 = vmatprep.subr.bf16.mxu1 %v7782_v21  ;;  %v7846_v21 = vld [vmem:[#allocation5 + $0x35c] ss:$28 sps:$4 sm:$0xff]  }
 0x11c   :  { %2426 = vmatmul.mubr.bf16.vlgmr.msra.gmra.mrb[0].mxu0 %v8813_v23 }
 0x11d   :  { %2640 = vmatpush1.bf16.msra.mxu0 %v7783_v25  ;;  %2671 = vmatprep.mubr.bf16.mxu0 %v8781_v52  ;;  %v7844_v25 = vld [vmem:[#allocation5 + $0x358] ss:$28 sps:$4 sm:$0xff]  }
 0x11e   :  { %2588 = vmatpush1.bf16.msra.mxu1 %v7780_v24  ;;  %2641 = vmatprep.subr.bf16.mxu0 %v7788_v26  ;;  %v7867_v24 = vld [vmem:[#allocation5 + $0x590] ss:$28 sps:$4 sm:$0xff]  }
 0x11f   :  { %2598 = vmatprep.subr.bf16.mxu1 %v7794_v27  ;;  %v7851_v26 = vld [vmem:[#allocation5 + $0x394] ss:$28 sps:$4 sm:$0xff]  }
 0x120   :  { %v7868_v27 = vld [vmem:[#allocation5 + $0x3d0] ss:$28 sps:$4 sm:$0xff]  }
 0x121   :  { %2590 = vmatmul.mubr.bf16.vlgmr.msra.gmra.mrb[4].mxu1 %v8813_v23  ;;  %2642 = vmatpush1.bf16.msra.mxu0 %v7786_v28  ;;  %v7872_v28 = vld [vmem:[#allocation5 + $0x5c8] ss:$28 sps:$4 sm:$0xff]  }
 0x122   :  { %2599 = vmatpush1.bf16.msra.mxu1 %v7792_v29  ;;  %2643 = vmatprep.subr.bf16.mxu0 %v7791_v30  ;;  %v7849_v29 = vld [vmem:[#allocation5 + $0x390] ss:$28 sps:$4 sm:$0xff]  }
 0x123   :  { %2630 = vmatprep.mubr.bf16.mxu1 %v8672_v0  ;;  %2762 = vmatprep.subr.bf16.mxu1 %v7818_v31  ;;  %v7856_v30 = vld [vmem:[#allocation5 + $0x3cc] ss:$28 sps:$4 sm:$0xff]  }
 0x124   :  { %v7873_v31 = vld [vmem:[#allocation5 + $0x408] ss:$28 sps:$4 sm:$0xff]  }
 0x125   :  { %2644 = vmatpush1.bf16.msra.mxu0 %v7789_v18  ;;  %v7877_v18 = vld [vmem:[#allocation5 + $0x600] ss:$28 sps:$4 sm:$0xff]  }
 0x126   :  { %2645 = vmatprep.subr.bf16.mxu0 %v7797_v32  ;;  %v7854_v32 = vld [vmem:[#allocation5 + $0x3c8] ss:$28 sps:$4 sm:$0xff]  }
 0x129   :  { %2646 = vmatpush1.bf16.msra.mxu0 %v7795_v33  ;;  %v7861_v33 = vld [vmem:[#allocation5 + $0x404] ss:$28 sps:$4 sm:$0xff]  }
 0x12a   :  { %2647 = vmatprep.subr.bf16.mxu0 %v7800_v34  ;;  %v7878_v34 = vld [vmem:[#allocation5 + $0x440] ss:$28 sps:$4 sm:$0xff]  }
 0x12d   :  { %6769 = vmatmul.mubr.msk.bf16.vlgmr.msra.gmra.mrb[4].mxu1 %vm2307_vm0, %v8819_v40  ;;  %2648 = vmatpush1.bf16.msra.mxu0 %v7798_v36  ;;  %v7882_v36 = vld [vmem:[#allocation5 + $0x638] ss:$28 sps:$4 sm:$0xff]  }
 0x12e   :  { %2763 = vmatpush1.bf16.msra.mxu1 %v7816_v37  ;;  %2649 = vmatprep.subr.bf16.mxu0 %v7803_v38  ;;  %v7859_v37 = vld [vmem:[#allocation5 + $0x400] ss:$28 sps:$4 sm:$0xff]  }
 0x12f   :  { %2794 = vmatprep.mubr.bf16.mxu1 %v8672_v0  ;;  %7170 = vmatprep.subr.bf16.mxu1 %v7822_v39  ;;  %v7866_v38 = vld [vmem:[#allocation5 + $0x43c] ss:$28 sps:$4 sm:$0xff]  }
 0x130   :  { %v7883_v39 = vld [vmem:[#allocation5 + $0x478] ss:$28 sps:$4 sm:$0xff]  }
 0x131   :  { %2650 = vmatpush1.bf16.msra.mxu0 %v7801_v41  ;;  %v7887_v41 = vld [vmem:[#allocation5 + $0x670] ss:$28 sps:$4 sm:$0xff]  }
 0x132   :  { %2651 = vmatprep.subr.bf16.mxu0 %v7806_v42  ;;  %v7888_v42 = vld [vmem:[#allocation5 + $0x4b0] ss:$28 sps:$4 sm:$0xff]  }
 0x134   :  { %v8824_v48 = vpop.f32.mrb[0].mxu1 }
 0x135   :  { %6770 = vmatmul.mubr.msk.bf16.vlgmr.msra.gmra.mrb[8].mxu1 %vm2307_vm0, %v8819_v40  ;;  %v8828_v50 = vpop.f32.mrb[1].mxu1  ;;  %2652 = vmatpush1.bf16.msra.mxu0 %v7804_v43  ;;  %v7871_v43 = vld [vmem:[#allocation5 + $0x474] ss:$28 sps:$4 sm:$0xff]  }
 0x136   :  { %7171 = vmatpush3.bf16.msra.mxu1 %v7823_v45  ;;  %v2472_v51 = vpop.f32.mrb[2].mxu1  ;;  %2653 = vmatprep.subr.bf16.mxu0 %v7809_v44  ;;  %v7892_v44 = vld [vmem:[#allocation5 + $0x6a8] ss:$28 sps:$4 sm:$0xff]   ;;  %v7869_v45 = vld [vmem:[#allocation5 + $0x470] ss:$28 sps:$4 sm:$0xff]  }
 0x137   :  { %7172 = vmatprep.subr.bf16.mxu1 %v7827_v46  ;;  %v2473_v55 = vpop.f32.mrb[3].mxu1  ;;  %2835 = vmatprep.mubr.bf16.mxu1 %v8781_v52  ;;  %v7843_v52 = vld [vmem:[#allocation5 + $0xf8] ss:$28 sps:$4 sm:$0xff]   ;;  %v7876_v46 = vld [vmem:[#allocation5 + $0x4ac] ss:$28 sps:$4 sm:$0xff]  }
 0x138   :  { %v7881_v51 = vld [vmem:[#allocation5 + $0x4e4] ss:$28 sps:$4 sm:$0xff]  }
 0x139   :  { %2654 = vmatpush1.bf16.msra.mxu0 %v7807_v47  ;;  %v7897_v47 = vld [vmem:[#allocation5 + $0x6e0] ss:$28 sps:$4 sm:$0xff]  }
 0x13a   :  { %7173 = vmatpush3.bf16.msra.mxu1 %v7828_v49  ;;  %2655 = vmatprep.subr.bf16.mxu0 %v7812_v53  ;;  %v7874_v49 = vld [vmem:[#allocation5 + $0x4a8] ss:$28 sps:$4 sm:$0xff]   ;;  %v7898_v53 = vld [vmem:[#allocation5 + $0x520] ss:$28 sps:$4 sm:$0xff]  }
 0x13b   :  { %7174 = vmatprep.subr.bf16.mxu1 %v7832_v54  ;;  %v7902_v54 = vld [vmem:[#allocation5 + $0x8d8] ss:$28 sps:$4 sm:$0xff]   ;;  %v7879_v55 = vld [vmem:[#allocation5 + $0x4e0] ss:$28 sps:$4 sm:$0xff]  }
 0x13d   :  { %2656 = vmatpush1.bf16.msra.mxu0 %v7810_v56  ;;  %v7886_v56 = vld [vmem:[#allocation5 + $0x51c] ss:$28 sps:$4 sm:$0xff]  }
 0x13e   :  { %7175 = vmatpush3.bf16.msra.mxu1 %v7833_v58  ;;  %2657 = vmatprep.subr.bf16.mxu0 %v7815_v57  ;;  %v7903_v57 = vld [vmem:[#allocation5 + $0x718] ss:$28 sps:$4 sm:$0xff]   ;;  %v7907_v58 = vld [vmem:[#allocation5 + $0x910] ss:$28 sps:$4 sm:$0xff]  }
 0x13f   :  { %7176 = vmatprep.subr.bf16.mxu1 %v7837_v59  ;;  %v7884_v59 = vld [vmem:[#allocation5 + $0x518] ss:$28 sps:$4 sm:$0xff]  }
 0x141   :  { %2658 = vmatpush1.bf16.msra.mxu0 %v7813_v60  ;;  %v7891_v60 = vld [vmem:[#allocation5 + $0x554] ss:$28 sps:$4 sm:$0xff]  }
 0x142   :  { %7177 = vmatpush3.bf16.msra.mxu1 %v7838_v61  ;;  %2659 = vmatprep.subr.bf16.mxu0 %v7821_v62  ;;  %v7908_v61 = vld [vmem:[#allocation5 + $0x750] ss:$28 sps:$4 sm:$0xff]   ;;  %v7912_v62 = vld [vmem:[#allocation5 + $0x948] ss:$28 sps:$4 sm:$0xff]  }
 0x143   :  { %7178 = vmatprep.subr.bf16.mxu1 %v7842_v63  ;;  %v7889_v63 = vld [vmem:[#allocation5 + $0x550] ss:$28 sps:$4 sm:$0xff]  }
 0x145   :  { %2660 = vmatpush1.bf16.msra.mxu0 %v7819_v1  ;;  %v7913_v1 = vld [vmem:[#allocation5 + $0x788] ss:$28 sps:$4 sm:$0xff]  }
 0x146   :  { %7179 = vmatpush3.bf16.msra.mxu1 %v7843_v52  ;;  %2661 = vmatprep.subr.bf16.mxu0 %v7826_v2  ;;  %v7896_v2 = vld [vmem:[#allocation5 + $0x58c] ss:$28 sps:$4 sm:$0xff]   ;;  %v7917_v52 = vld [vmem:[#allocation5 + $0x980] ss:$28 sps:$4 sm:$0xff]  }
 0x147   :  { %7180 = vmatprep.subr.bf16.mxu1 %v7847_v3  ;;  %v7894_v3 = vld [vmem:[#allocation5 + $0x588] ss:$28 sps:$4 sm:$0xff]  }
 0x149   :  { %2662 = vmatpush1.bf16.msra.mxu0 %v7824_v4  ;;  %v7918_v4 = vld [vmem:[#allocation5 + $0x7c0] ss:$28 sps:$4 sm:$0xff]  }
 0x14a   :  { %7181 = vmatpush3.bf16.msra.mxu1 %v7848_v6  ;;  %2663 = vmatprep.subr.bf16.mxu0 %v7831_v5  ;;  %v7901_v5 = vld [vmem:[#allocation5 + $0x5c4] ss:$28 sps:$4 sm:$0xff]   ;;  %v7922_v6 = vld [vmem:[#allocation5 + $0x9b8] ss:$28 sps:$4 sm:$0xff]  }
 0x14b   :  { %7182 = vmatprep.subr.bf16.mxu1 %v7852_v7  ;;  %v7899_v7 = vld [vmem:[#allocation5 + $0x5c0] ss:$28 sps:$4 sm:$0xff]  }
 0x14d   :  { %2664 = vmatpush1.bf16.msra.mxu0 %v7829_v9  ;;  %v7906_v9 = vld [vmem:[#allocation5 + $0x5fc] ss:$28 sps:$4 sm:$0xff]  }
 0x14e   :  { %7183 = vmatpush3.bf16.msra.mxu1 %v7853_v11  ;;  %2665 = vmatprep.subr.bf16.mxu0 %v7836_v10  ;;  %v7923_v10 = vld [vmem:[#allocation5 + $0x7f8] ss:$28 sps:$4 sm:$0xff]   ;;  %v7927_v11 = vld [vmem:[#allocation5 + $0x9f0] ss:$28 sps:$4 sm:$0xff]  }
 0x14f   :  { %7184 = vmatprep.subr.bf16.mxu1 %v7857_v12  ;;  %v7904_v12 = vld [vmem:[#allocation5 + $0x5f8] ss:$28 sps:$4 sm:$0xff]  }
 0x151   :  { %2666 = vmatpush1.bf16.msra.mxu0 %v7834_v13  ;;  %v7911_v13 = vld [vmem:[#allocation5 + $0x634] ss:$28 sps:$4 sm:$0xff]  }
 0x152   :  { %7185 = vmatpush3.bf16.msra.mxu1 %v7858_v16  ;;  %2667 = vmatprep.subr.bf16.mxu0 %v7841_v14  ;;  %v7928_v14 = vld [vmem:[#allocation5 + $0x830] ss:$28 sps:$4 sm:$0xff]   ;;  %v7932_v16 = vld [vmem:[#allocation5 + $0xa28] ss:$28 sps:$4 sm:$0xff]  }
 0x153   :  { %7192 = vmatprep.subr.bf16.mxu1 %v7862_v17  ;;  %v7909_v17 = vld [vmem:[#allocation5 + $0x630] ss:$28 sps:$4 sm:$0xff]  }
 0x155   :  { %2836 = vmatmul.mubr.bf16.vlgmr.msra.gmra.mrb[12].mxu1 %v8785_v8  ;;  %2668 = vmatpush1.bf16.msra.mxu0 %v7839_v20  ;;  %v7933_v20 = vld [vmem:[#allocation5 + $0x868] ss:$28 sps:$4 sm:$0xff]  }
 0x156   :  { %7193 = vmatpush3.bf16.msra.mxu1 %v7863_v22  ;;  %2669 = vmatprep.subr.bf16.mxu0 %v7846_v21  ;;  %v7916_v21 = vld [vmem:[#allocation5 + $0x66c] ss:$28 sps:$4 sm:$0xff]   ;;  %v7937_v22 = vld [vmem:[#allocation5 + $0xa60] ss:$28 sps:$4 sm:$0xff]  }
 0x157   :  { %7194 = vmatprep.subr.bf16.mxu1 %v7867_v24  ;;  %2875 = vmatprep.mubr.bf16.mxu1 %v8793_v35  ;;  %v7914_v24 = vld [vmem:[#allocation5 + $0x668] ss:$28 sps:$4 sm:$0xff]  }
 0x159   :  { %2670 = vmatpush1.bf16.msra.mxu0 %v7844_v25  ;;  %v7921_v25 = vld [vmem:[#allocation5 + $0x6a4] ss:$28 sps:$4 sm:$0xff]  }
 0x15a   :  { %7195 = vmatpush3.bf16.msra.mxu1 %v7868_v27  ;;  %2680 = vmatprep.subr.bf16.mxu0 %v7851_v26  ;;  %v7938_v26 = vld [vmem:[#allocation5 + $0x8a0] ss:$28 sps:$4 sm:$0xff]  }
 0x15b   :  { %7196 = vmatprep.subr.bf16.mxu1 %v7872_v28  ;;  %v7919_v27 = vld [vmem:[#allocation5 + $0x6a0] ss:$28 sps:$4 sm:$0xff]  }
 0x15c   :  { %2672 = vmatmul.mubr.bf16.vlgmr.msra.gmra.mrb[4].mxu0 %v8785_v8  ;;  %v7864_v8 = vld [vmem:[#allocation5 + $0x438] ss:$28 sps:$4 sm:$0xff]  }
 0x15d   :  { %2681 = vmatpush1.bf16.msra.mxu0 %v7849_v29  ;;  %2712 = vmatprep.mubr.bf16.mxu0 %v8793_v35  ;;  %v7893_v35 = vld [vmem:[#allocation5 + $0x4e8] ss:$28 sps:$4 sm:$0xff]   ;;  %v7926_v28 = vld [vmem:[#allocation5 + $0x6dc] ss:$28 sps:$4 sm:$0xff]  }
 0x15e   :  { %7197 = vmatpush3.bf16.msra.mxu1 %v7873_v31  ;;  %2682 = vmatprep.subr.bf16.mxu0 %v7856_v30  ;;  %v7945_v29 = vld [vmem:[#allocation5 + $0xa98] ss:$28 sps:$4 sm:$0xff]   ;;  %v8673_v30 = vmov 0.0  }
 0x15f   :  { %7198 = vmatprep.subr.bf16.mxu1 %v7877_v18  ;;  %v7924_v31 = vld [vmem:[#allocation5 + $0x6d8] ss:$28 sps:$4 sm:$0xff]  }
 0x160   :  { %v7960_v18 = vld [vmem:[#allocation7 + $0x4] ss:$28 sps:$4 sm:$0xff]  }
 0x161   :  { %2683 = vmatpush1.bf16.msra.mxu0 %v7854_v32  ;;  %v7931_v32 = vld [vmem:[#allocation5 + $0x714] ss:$28 sps:$4 sm:$0xff]  }
 0x162   :  { %7199 = vmatpush3.bf16.msra.mxu1 %v7878_v34  ;;  %2684 = vmatprep.subr.bf16.mxu0 %v7861_v33  ;;  %v7929_v33 = vld [vmem:[#allocation5 + $0x710] ss:$28 sps:$4 sm:$0xff]   ;;  %v7958_v34 = vld [vmem:[#allocation7] ss:$28 sps:$4 sm:$0xff]  }
 0x163   :  { %7200 = vmatprep.subr.bf16.mxu1 %v7882_v36  ;;  %v7936_v36 = vld [vmem:[#allocation5 + $0x74c] ss:$28 sps:$4 sm:$0xff]  }
 0x165   :  { %2685 = vmatpush1.bf16.msra.mxu0 %v7859_v37  ;;  %v7966_v37 = vld [vmem:[#allocation7 + $0x3c] ss:$28 sps:$4 sm:$0xff]  }
 0x166   :  { %7201 = vmatpush3.bf16.msra.mxu1 %v7883_v39  ;;  %2686 = vmatprep.subr.bf16.mxu0 %v7866_v38  ;;  %v7934_v38 = vld [vmem:[#allocation5 + $0x748] ss:$28 sps:$4 sm:$0xff]  }
 0x167   :  { %7202 = vmatprep.subr.bf16.mxu1 %v7887_v41  ;;  %v7941_v39 = vld [vmem:[#allocation5 + $0x784] ss:$28 sps:$4 sm:$0xff]   ;;  %v7964_v41 = vld [vmem:[#allocation7 + $0x38] ss:$28 sps:$4 sm:$0xff]  }
 0x169   :  { %2687 = vmatpush1.bf16.msra.mxu0 %v7864_v8  ;;  %v7972_v8 = vld [vmem:[#allocation7 + $0x74] ss:$28 sps:$4 sm:$0xff]  }
 0x16a   :  { %7203 = vmatpush3.bf16.msra.mxu1 %v7888_v42  ;;  %2688 = vmatprep.subr.bf16.mxu0 %v7871_v43  ;;  %v7939_v42 = vld [vmem:[#allocation5 + $0x780] ss:$28 sps:$4 sm:$0xff]   ;;  %v7970_v43 = vld [vmem:[#allocation7 + $0x70] ss:$28 sps:$4 sm:$0xff]  }
 0x16b   :  { %7204 = vmatprep.subr.bf16.mxu1 %v7892_v44  ;;  %v7944_v44 = vld [vmem:[#allocation5 + $0x7bc] ss:$28 sps:$4 sm:$0xff]  }
 0x16d   :  { %2689 = vmatpush1.bf16.msra.mxu0 %v7869_v45  ;;  %v7978_v45 = vld [vmem:[#allocation7 + $0xac] ss:$28 sps:$4 sm:$0xff]  }
 0x16e   :  { %7205 = vmatpush3.bf16.msra.mxu1 %v7893_v35  ;;  %2690 = vmatprep.subr.bf16.mxu0 %v7876_v46  ;;  %v7976_v35 = vld [vmem:[#allocation7 + $0xa8] ss:$28 sps:$4 sm:$0xff]   ;;  %v7948_v46 = vld [vmem:[#allocation5 + $0x7f4] ss:$28 sps:$4 sm:$0xff]  }
 0x16f   :  { %7206 = vmatprep.subr.bf16.mxu1 %v7897_v47  ;;  %v7946_v47 = vld [vmem:[#allocation5 + $0x7f0] ss:$28 sps:$4 sm:$0xff]  }
 0x171   :  { %2691 = vmatpush1.bf16.msra.mxu0 %v7874_v49  ;;  %v7982_v49 = vld [vmem:[#allocation7 + $0xe0] ss:$28 sps:$4 sm:$0xff]  }
 0x172   :  { %7207 = vmatpush3.bf16.msra.mxu1 %v7898_v53  ;;  %2692 = vmatprep.subr.bf16.mxu0 %v7881_v51  ;;  %v7951_v51 = vld [vmem:[#allocation5 + $0x82c] ss:$28 sps:$4 sm:$0xff]   ;;  %v7990_v53 = vld [vmem:[#allocation7 + $0x11c] ss:$28 sps:$4 sm:$0xff]  }
 0x173   :  { %7214 = vmatprep.subr.bf16.mxu1 %v7902_v54  ;;  %v7988_v54 = vld [vmem:[#allocation7 + $0x118] ss:$28 sps:$4 sm:$0xff]  }
 0x175   :  { %2876 = vmatmul.mubr.bf16.vlgmr.msra.gmra.mrb[16].mxu1 %v8799_v15  ;;  %2693 = vmatpush1.bf16.msra.mxu0 %v7879_v55  ;;  %v7954_v55 = vld [vmem:[#allocation5 + $0x864] ss:$28 sps:$4 sm:$0xff]  }
 0x176   :  { %7215 = vmatpush3.bf16.msra.mxu1 %v7903_v57  ;;  %2694 = vmatprep.subr.bf16.mxu0 %v7886_v56  ;;  %v7996_v56 = vld [vmem:[#allocation7 + $0x154] ss:$28 sps:$4 sm:$0xff]   ;;  %v7952_v57 = vld [vmem:[#allocation5 + $0x860] ss:$28 sps:$4 sm:$0xff]  }
 0x177   :  { %7216 = vmatprep.subr.bf16.mxu1 %v7907_v58  ;;  %2915 = vmatprep.mubr.bf16.mxu1 %v8805_v19  ;;  %v7994_v58 = vld [vmem:[#allocation7 + $0x150] ss:$28 sps:$4 sm:$0xff]  }
 0x179   :  { %2695 = vmatpush1.bf16.msra.mxu0 %v7884_v59  ;;  %v7957_v59 = vld [vmem:[#allocation5 + $0x89c] ss:$28 sps:$4 sm:$0xff]  }
 0x17a   :  { %7217 = vmatpush3.bf16.msra.mxu1 %v7908_v61  ;;  %2696 = vmatprep.subr.bf16.mxu0 %v7891_v60  ;;  %v8002_v60 = vld [vmem:[#allocation7 + $0x18c] ss:$28 sps:$4 sm:$0xff]   ;;  %v7955_v61 = vld [vmem:[#allocation5 + $0x898] ss:$28 sps:$4 sm:$0xff]  }
 0x17b   :  { %7218 = vmatprep.subr.bf16.mxu1 %v7912_v62  ;;  %v8000_v62 = vld [vmem:[#allocation7 + $0x188] ss:$28 sps:$4 sm:$0xff]  }
 0x17d   :  { %2697 = vmatpush1.bf16.msra.mxu0 %v7889_v63  ;;  %v7963_v63 = vld [vmem:[#allocation5 + $0x8d4] ss:$28 sps:$4 sm:$0xff]  }
 0x17e   :  { %7219 = vmatpush3.bf16.msra.mxu1 %v7913_v1  ;;  %2698 = vmatprep.subr.bf16.mxu0 %v7896_v2  ;;  %v8008_v1 = vld [vmem:[#allocation7 + $0x1c4] ss:$28 sps:$4 sm:$0xff]   ;;  %v7961_v2 = vld [vmem:[#allocation5 + $0x8d0] ss:$28 sps:$4 sm:$0xff]  }
 0x17f   :  { %7220 = vmatprep.subr.bf16.mxu1 %v7917_v52  ;;  %v8006_v52 = vld [vmem:[#allocation7 + $0x1c0] ss:$28 sps:$4 sm:$0xff]  }
 0x181   :  { %2699 = vmatpush1.bf16.msra.mxu0 %v7894_v3  ;;  %v7969_v3 = vld [vmem:[#allocation5 + $0x90c] ss:$28 sps:$4 sm:$0xff]  }
 0x182   :  { %7221 = vmatpush3.bf16.msra.mxu1 %v7918_v4  ;;  %2700 = vmatprep.subr.bf16.mxu0 %v7901_v5  ;;  %v8014_v4 = vld [vmem:[#allocation7 + $0x1fc] ss:$28 sps:$4 sm:$0xff]   ;;  %v7967_v5 = vld [vmem:[#allocation5 + $0x908] ss:$28 sps:$4 sm:$0xff]  }
 0x183   :  { %7222 = vmatprep.subr.bf16.mxu1 %v7922_v6  ;;  %v7975_v6 = vld [vmem:[#allocation5 + $0x944] ss:$28 sps:$4 sm:$0xff]  }
 0x185   :  { %2701 = vmatpush1.bf16.msra.mxu0 %v7899_v7  ;;  %v8012_v7 = vld [vmem:[#allocation7 + $0x1f8] ss:$28 sps:$4 sm:$0xff]  }
 0x186   :  { %7223 = vmatpush3.bf16.msra.mxu1 %v7923_v10  ;;  %2702 = vmatprep.subr.bf16.mxu0 %v7906_v9  ;;  %v8020_v9 = vld [vmem:[#allocation7 + $0x234] ss:$28 sps:$4 sm:$0xff]   ;;  %v7973_v10 = vld [vmem:[#allocation5 + $0x940] ss:$28 sps:$4 sm:$0xff]  }
 0x187   :  { %7224 = vmatprep.subr.bf16.mxu1 %v7927_v11  ;;  %v7981_v11 = vld [vmem:[#allocation5 + $0x97c] ss:$28 sps:$4 sm:$0xff]  }
 0x189   :  { %2703 = vmatpush1.bf16.msra.mxu0 %v7904_v12  ;;  %v8018_v12 = vld [vmem:[#allocation7 + $0x230] ss:$28 sps:$4 sm:$0xff]  }
 0x18a   :  { %7225 = vmatpush3.bf16.msra.mxu1 %v7928_v14  ;;  %2704 = vmatprep.subr.bf16.mxu0 %v7911_v13  ;;  %v8026_v13 = vld [vmem:[#allocation7 + $0x26c] ss:$28 sps:$4 sm:$0xff]   ;;  %v7979_v14 = vld [vmem:[#allocation5 + $0x978] ss:$28 sps:$4 sm:$0xff]  }
 0x18b   :  { %7226 = vmatprep.subr.bf16.mxu1 %v7932_v16  ;;  %v7987_v16 = vld [vmem:[#allocation5 + $0x9b4] ss:$28 sps:$4 sm:$0xff]  }
 0x18d   :  { %2705 = vmatpush1.bf16.msra.mxu0 %v7909_v17  ;;  %v8024_v17 = vld [vmem:[#allocation7 + $0x268] ss:$28 sps:$4 sm:$0xff]  }
 0x18e   :  { %7227 = vmatpush3.bf16.msra.mxu1 %v7933_v20  ;;  %2706 = vmatprep.subr.bf16.mxu0 %v7916_v21  ;;  %v8032_v20 = vld [vmem:[#allocation7 + $0x2a4] ss:$28 sps:$4 sm:$0xff]   ;;  %v7985_v21 = vld [vmem:[#allocation5 + $0x9b0] ss:$28 sps:$4 sm:$0xff]  }
 0x18f   :  { %7228 = vmatprep.subr.bf16.mxu1 %v7937_v22  ;;  %v7993_v22 = vld [vmem:[#allocation5 + $0x9ec] ss:$28 sps:$4 sm:$0xff]  }
 0x191   :  { %2707 = vmatpush1.bf16.msra.mxu0 %v7914_v24  ;;  %v8030_v24 = vld [vmem:[#allocation7 + $0x2a0] ss:$28 sps:$4 sm:$0xff]  }
 0x192   :  { %7229 = vmatpush3.bf16.msra.mxu1 %v7938_v26  ;;  %2708 = vmatprep.subr.bf16.mxu0 %v7921_v25  ;;  %v8038_v25 = vld [vmem:[#allocation7 + $0x2dc] ss:$28 sps:$4 sm:$0xff]   ;;  %v7991_v26 = vld [vmem:[#allocation5 + $0x9e8] ss:$28 sps:$4 sm:$0xff]  }
 0x193   :  { %7374 = vmatprep.subr.bf16.mxu1 %v8673_v30 }
 0x195   :  { %2916 = vmatmul.mubr.bf16.vlgmr.msra.gmra.mrb[20].mxu1 %v8813_v23  ;;  %2709 = vmatpush1.bf16.msra.mxu0 %v7919_v27  ;;  %v7999_v27 = vld [vmem:[#allocation5 + $0xa24] ss:$28 sps:$4 sm:$0xff]  }
 0x196   :  { %7375 = vmatpush3.bf16.msra.mxu1 %v7945_v29  ;;  %2710 = vmatprep.subr.bf16.mxu0 %v7926_v28  ;;  %v8036_v28 = vld [vmem:[#allocation7 + $0x2d8] ss:$28 sps:$4 sm:$0xff]  }
 0x197   :  { %7376 = vmatprep.mubr.msk.bf16.mxu1 %vm8674_vm1, %v8673_v30  ;;  %5174 = vmatprep.subr.bf16.mxu1 %v7960_v18  ;;  %v8044_v29 = vld [vmem:[#allocation7 + $0x314] ss:$28 sps:$4 sm:$0xff]   ;;  %v8005_v18 = vld [vmem:[#allocation5 + $0xa5c] ss:$28 sps:$4 sm:$0xff]  }
 0x199   :  { %2711 = vmatpush1.bf16.msra.mxu0 %v7924_v31  ;;  %v7997_v31 = vld [vmem:[#allocation5 + $0xa20] ss:$28 sps:$4 sm:$0xff]  }
 0x19a   :  { %2721 = vmatprep.subr.bf16.mxu0 %v7931_v32  ;;  %v8042_v32 = vld [vmem:[#allocation7 + $0x310] ss:$28 sps:$4 sm:$0xff]  }
 0x19c   :  { %2713 = vmatmul.mubr.bf16.vlgmr.msra.gmra.mrb[4].mxu0 %v8799_v15  ;;  %v7942_v15 = vld [vmem:[#allocation5 + $0x7b8] ss:$28 sps:$4 sm:$0xff]  }
 0x19d   :  { %7377 = vmatmul.mubr.msk.bf16.vlgmr.msra.gmra.mrb[24].mxu1 %vm2307_vm0, %v8819_v40  ;;  %2722 = vmatpush1.bf16.msra.mxu0 %v7929_v33  ;;  %v7984_v40 = vld [vmem:[#allocation7 + $0xe4] ss:$28 sps:$4 sm:$0xff]   ;;  %v8050_v33 = vld [vmem:[#allocation7 + $0x34c] ss:$28 sps:$4 sm:$0xff]  }
 0x19e   :  { %5175 = vmatpush1.bf16.msra.mxu1 %v7958_v34  ;;  %2723 = vmatprep.subr.bf16.mxu0 %v7936_v36  ;;  %v8003_v34 = vld [vmem:[#allocation5 + $0xa58] ss:$28 sps:$4 sm:$0xff]   ;;  %v8011_v36 = vld [vmem:[#allocation7 + $0xc] ss:$28 sps:$4 sm:$0xff]  }
 0x19f   :  { %5176 = vmatprep.subr.bf16.mxu1 %v7966_v37  ;;  %2753 = vmatprep.mubr.bf16.mxu0 %v8805_v19  ;;  %v7949_v19 = vld [vmem:[#allocation5 + $0x828] ss:$28 sps:$4 sm:$0xff]   ;;  %v8048_v37 = vld [vmem:[#allocation7 + $0x348] ss:$28 sps:$4 sm:$0xff]  }
 0x1a1   :  { %2724 = vmatpush1.bf16.msra.mxu0 %v7934_v38  ;;  %v8056_v38 = vld [vmem:[#allocation7 + $0x384] ss:$28 sps:$4 sm:$0xff]  }
 0x1a2   :  { %5177 = vmatpush1.bf16.msra.mxu1 %v7964_v41  ;;  %2725 = vmatprep.subr.bf16.mxu0 %v7941_v39  ;;  %v8009_v39 = vld [vmem:[#allocation7 + $0x8] ss:$28 sps:$4 sm:$0xff]  }
 0x1a3   :  { %5178 = vmatprep.subr.bf16.mxu1 %v7972_v8  ;;  %v8017_v41 = vld [vmem:[#allocation7 + $0x44] ss:$28 sps:$4 sm:$0xff]  }
 0x1a4   :  { %v8015_v8 = vld [vmem:[#allocation7 + $0x40] ss:$28 sps:$4 sm:$0xff]  }
 0x1a5   :  { %2726 = vmatpush1.bf16.msra.mxu0 %v7939_v42  ;;  %v8023_v42 = vld [vmem:[#allocation7 + $0x7c] ss:$28 sps:$4 sm:$0xff]  }
 0x1a6   :  { %5179 = vmatpush1.bf16.msra.mxu1 %v7970_v43  ;;  %2727 = vmatprep.subr.bf16.mxu0 %v7944_v44  ;;  %v8021_v43 = vld [vmem:[#allocation7 + $0x78] ss:$28 sps:$4 sm:$0xff]   ;;  %v484_v44 = vlaneseq }
 0x1a7   :  { %5180 = vmatprep.subr.bf16.mxu1 %v7978_v45  ;;  %v8029_v45 = vld [vmem:[#allocation7 + $0xb4] ss:$28 sps:$4 sm:$0xff]  }
 0x1a9   :  { %2728 = vmatpush1.bf16.msra.mxu0 %v7942_v15  ;;  %v8027_v15 = vld [vmem:[#allocation7 + $0xb0] ss:$28 sps:$4 sm:$0xff]  }
 0x1aa   :  { %5181 = vmatpush1.bf16.msra.mxu1 %v7976_v35  ;;  %2729 = vmatprep.subr.bf16.mxu0 %v7948_v46  ;;  %v8846_v35 = vshrl.u32 %v484_v44, 7  ;;  %v8035_v46 = vld [vmem:[#allocation7 + $0xec] ss:$28 sps:$4 sm:$0xff]   ;;  %v8089_v44 = vld [vmem:[#allocation7 + $0x2e4] ss:$28 sps:$4 sm:$0xff]  }
 0x1ab   :  { %5182 = vmatprep.subr.bf16.mxu1 %v7984_v40 }
 0x1ac   :  { %v486_v40 = vsub.s32 0, %v8846_v35 }
 0x1ad   :  { %2730 = vmatpush1.bf16.msra.mxu0 %v7946_v47  ;;  %v8033_v47 = vld [vmem:[#allocation7 + $0xe8] ss:$28 sps:$4 sm:$0xff]  }
 0x1ae   :  { %5183 = vmatpush1.bf16.msra.mxu1 %v7982_v49  ;;  %2731 = vmatprep.subr.bf16.mxu0 %v7951_v51  ;;  %v490_v49 = vsub.s32 1, %v8846_v35  ;;  %v8041_v51 = vld [vmem:[#allocation7 + $0x124] ss:$28 sps:$4 sm:$0xff]  }
 0x1af   :  { %5184 = vmatprep.subr.bf16.mxu1 %v7990_v53  ;;  %v8039_v53 = vld [vmem:[#allocation7 + $0x120] ss:$28 sps:$4 sm:$0xff]  }
 0x1b1   :  { %2732 = vmatpush1.bf16.msra.mxu0 %v7949_v19 }
 0x1b2   :  { %5185 = vmatpush1.bf16.msra.mxu1 %v7988_v54  ;;  %2733 = vmatprep.subr.bf16.mxu0 %v7954_v55  ;;  %v8047_v54 = vld [vmem:[#allocation7 + $0x15c] ss:$28 sps:$4 sm:$0xff]  }
 0x1b3   :  { %5186 = vmatprep.subr.bf16.mxu1 %v7996_v56 }
 0x1b5   :  { %2734 = vmatpush1.bf16.msra.mxu0 %v7952_v57  ;;  %v8045_v57 = vld [vmem:[#allocation7 + $0x158] ss:$28 sps:$4 sm:$0xff]  }
 0x1b6   :  { %5187 = vmatpush1.bf16.msra.mxu1 %v7994_v58  ;;  %2735 = vmatprep.subr.bf16.mxu0 %v7957_v59 }
 0x1b7   :  { %5188 = vmatprep.subr.bf16.mxu1 %v8002_v60  ;;  %v8053_v60 = vld [vmem:[#allocation7 + $0x194] ss:$28 sps:$4 sm:$0xff]  }
 0x1b9   :  { %2736 = vmatpush1.bf16.msra.mxu0 %v7955_v61 }
 0x1ba   :  { %5189 = vmatpush1.bf16.msra.mxu1 %v8000_v62  ;;  %2737 = vmatprep.subr.bf16.mxu0 %v7963_v63 }
 0x1bb   :  { %5190 = vmatprep.subr.bf16.mxu1 %v8008_v1 }
 0x1bd   :  { %2738 = vmatpush1.bf16.msra.mxu0 %v7961_v2 }
 0x1be   :  { %5191 = vmatpush1.bf16.msra.mxu1 %v8006_v52  ;;  %2739 = vmatprep.subr.bf16.mxu0 %v7969_v3 }
 0x1bf   :  { %5192 = vmatprep.subr.bf16.mxu1 %v8014_v4  ;;  %v8051_v4 = vld [vmem:[#allocation7 + $0x190] ss:$28 sps:$4 sm:$0xff]  }
 0x1c1   :  { %2740 = vmatpush1.bf16.msra.mxu0 %v7967_v5 }
 0x1c2   :  { %5193 = vmatpush1.bf16.msra.mxu1 %v8012_v7  ;;  %2741 = vmatprep.subr.bf16.mxu0 %v7975_v6  ;;  %v8054_v6 = vld [vmem:[#allocation7 + $0x380] ss:$28 sps:$4 sm:$0xff]   ;;  %v8059_v7 = vld [vmem:[#allocation7 + $0x1cc] ss:$28 sps:$4 sm:$0xff]  }
 0x1c3   :  { %5194 = vmatprep.subr.bf16.mxu1 %v8020_v9 }
 0x1c5   :  { %2742 = vmatpush1.bf16.msra.mxu0 %v7973_v10  ;;  %v8062_v10 = vld [vmem:[#allocation7 + $0x3bc] ss:$28 sps:$4 sm:$0xff]  }
 0x1c6   :  { %5195 = vmatpush1.bf16.msra.mxu1 %v8018_v12  ;;  %2743 = vmatprep.subr.bf16.mxu0 %v7981_v11  ;;  %v498_v11 = vsub.s32 3, %v8846_v35  ;;  %v8060_v12 = vld [vmem:[#allocation7 + $0x3b8] ss:$28 sps:$4 sm:$0xff]  }
 0x1c7   :  { %5196 = vmatprep.subr.bf16.mxu1 %v8026_v13  ;;  %v8068_v13 = vld [vmem:[#allocation7 + $0x3f4] ss:$28 sps:$4 sm:$0xff]  }
 0x1c9   :  { %2744 = vmatpush1.bf16.msra.mxu0 %v7979_v14 }
 0x1ca   :  { %5197 = vmatpush1.bf16.msra.mxu1 %v8024_v17  ;;  %2745 = vmatprep.subr.bf16.mxu0 %v7987_v16  ;;  %v8063_v16 = vld [vmem:[#allocation7 + $0x200] ss:$28 sps:$4 sm:$0xff]   ;;  %v8066_v17 = vld [vmem:[#allocation7 + $0x3f0] ss:$28 sps:$4 sm:$0xff]  }
 0x1cb   :  { %5198 = vmatprep.subr.bf16.mxu1 %v8032_v20  ;;  %v8071_v20 = vld [vmem:[#allocation7 + $0x23c] ss:$28 sps:$4 sm:$0xff]  }
 0x1cd   :  { %2746 = vmatpush1.bf16.msra.mxu0 %v7985_v21 }
 0x1ce   :  { %5199 = vmatpush1.bf16.msra.mxu1 %v8030_v24  ;;  %2747 = vmatprep.subr.bf16.mxu0 %v7993_v22  ;;  %v8074_v22 = vld [vmem:[#allocation7 + $0x42c] ss:$28 sps:$4 sm:$0xff]  }
 0x1cf   :  { %5200 = vmatprep.subr.bf16.mxu1 %v8038_v25 }
 0x1d1   :  { %2748 = vmatpush1.bf16.msra.mxu0 %v7991_v26 }
 0x1d2   :  { %5201 = vmatpush1.bf16.msra.mxu1 %v8036_v28  ;;  %2749 = vmatprep.subr.bf16.mxu0 %v7999_v27  ;;  %v8069_v27 = vld [vmem:[#allocation7 + $0x238] ss:$28 sps:$4 sm:$0xff]   ;;  %v8072_v28 = vld [vmem:[#allocation7 + $0x428] ss:$28 sps:$4 sm:$0xff]  }
 0x1d3   :  { %5202 = vmatprep.subr.bf16.mxu1 %v8044_v29 }
 0x1d5   :  { %2750 = vmatpush1.bf16.msra.mxu0 %v7997_v31  ;;  %v8077_v31 = vld [vmem:[#allocation7 + $0x274] ss:$28 sps:$4 sm:$0xff]  }
 0x1d6   :  { %5203 = vmatpush1.bf16.msra.mxu1 %v8042_v32  ;;  %2751 = vmatprep.subr.bf16.mxu0 %v8005_v18  ;;  %v8080_v18 = vld [vmem:[#allocation7 + $0x464] ss:$28 sps:$4 sm:$0xff]  }
 0x1d7   :  { %5204 = vmatprep.subr.bf16.mxu1 %v8050_v33 }
 0x1d9   :  { %2752 = vmatpush1.bf16.msra.mxu0 %v8003_v34  ;;  %v8075_v34 = vld [vmem:[#allocation7 + $0x270] ss:$28 sps:$4 sm:$0xff]  }
 0x1da   :  { %5205 = vmatpush1.bf16.msra.mxu1 %v8048_v37  ;;  %5338 = vmatprep.subr.bf16.mxu0 %v8011_v36  ;;  %v8078_v36 = vld [vmem:[#allocation7 + $0x460] ss:$28 sps:$4 sm:$0xff]   ;;  %v8083_v37 = vld [vmem:[#allocation7 + $0x2ac] ss:$28 sps:$4 sm:$0xff]  }
 0x1db   :  { %5215 = vmatprep.subr.bf16.mxu1 %v8056_v38  ;;  %v8086_v38 = vld [vmem:[#allocation7 + $0x49c] ss:$28 sps:$4 sm:$0xff]  }
 0x1dc   :  { %2754 = vmatmul.mubr.bf16.vlgmr.msra.gmra.mrb[4].mxu0 %v8813_v23  ;;  %v8849_v23 = vld [vmem:[#allocation10] ss:$4 sm:$0x7f] }
 0x1dd   :  { %5339 = vmatpush1.bf16.msra.mxu0 %v8009_v39  ;;  %v487_v19 = vrot.slane %v8849_v23, %v486_v40  ;;  %v491_v55 = vrot.slane %v8849_v23, %v490_v49  ;;  %v499_v14 = vrot.slane %v8849_v23, %v498_v11 }
 0x1de   :  { %5340 = vmatprep.subr.bf16.mxu0 %v8017_v41 }
 0x1e1   :  { %5341 = vmatpush1.bf16.msra.mxu0 %v8015_v8  ;;  %v8081_v8 = vld [vmem:[#allocation7 + $0x2a8] ss:$28 sps:$4 sm:$0xff]  }
 0x1e2   :  { %5342 = vmatprep.subr.bf16.mxu0 %v8023_v42  ;;  %v8084_v42 = vld [vmem:[#allocation7 + $0x498] ss:$28 sps:$4 sm:$0xff]  }
 0x1e5   :  { %5343 = vmatpush1.bf16.msra.mxu0 %v8021_v43 }
 0x1e6   :  { %5344 = vmatprep.subr.bf16.mxu0 %v8029_v45  ;;  %v8092_v45 = vld [vmem:[#allocation7 + $0x4d4] ss:$28 sps:$4 sm:$0xff]  }
 0x1e9   :  { %5345 = vmatpush1.bf16.msra.mxu0 %v8027_v15 }
 0x1ea   :  { %5346 = vmatprep.subr.bf16.mxu0 %v8035_v46  ;;  %v8087_v46 = vld [vmem:[#allocation7 + $0x2e0] ss:$28 sps:$4 sm:$0xff]  }
 0x1ed   :  { %5347 = vmatpush1.bf16.msra.mxu0 %v8033_v47  ;;  %v8090_v47 = vld [vmem:[#allocation7 + $0x4d0] ss:$28 sps:$4 sm:$0xff]  }
 0x1ee   :  { %5348 = vmatprep.subr.bf16.mxu0 %v8041_v51  ;;  %v8095_v51 = vld [vmem:[#allocation7 + $0x31c] ss:$28 sps:$4 sm:$0xff]  }
 0x1ef   :  { %v2427_v56 = vpop.f32.mrb[0].mxu0 }
 0x1f0   :  { %v7392_v58 = vadd.f32 %v2427_v56, %v487_v19  ;;  %v2429_v59 = vpop.f32.mrb[1].mxu0  ;;  %v8093_v19 = vld [vmem:[#allocation7 + $0x318] ss:$28 sps:$4 sm:$0xff]   ;;  %v8104_v56 = vld [vmem:[#allocation7 + $0x544] ss:$28 sps:$4 sm:$0xff]  }
 0x1f1   :  { %v7394_v61 = vadd.f32 %v2429_v59, %v491_v55  ;;  %v2431_v62 = vpop.f32.mrb[2].mxu0  ;;  %5349 = vmatpush1.bf16.msra.mxu0 %v8039_v53  ;;  %v8098_v53 = vld [vmem:[#allocation7 + $0x50c] ss:$28 sps:$4 sm:$0xff]   ;;  %v8102_v59 = vld [vmem:[#allocation7 + $0x540] ss:$28 sps:$4 sm:$0xff]  }
 0x1f2   :  { %v7393_v63 = vadd.f32 %v7392_v58, %v8824_v48  ;;  %v2432_v1 = vpop.f32.mrb[3].mxu0  ;;  %5350 = vmatprep.subr.bf16.mxu0 %v8047_v54  ;;  %v8057_v48 = vld [vmem:[#allocation7 + $0x1c8] ss:$28 sps:$4 sm:$0xff]   ;;  %v8101_v54 = vld [vmem:[#allocation7 + $0x354] ss:$28 sps:$4 sm:$0xff]  }
 0x1f3   :  { %v7395_v2 = vadd.f32 %v7394_v61, %v8828_v50  ;;  %v8065_v50 = vld [vmem:[#allocation7 + $0x204] ss:$28 sps:$4 sm:$0xff]   ;;  %v8107_v58 = vld [vmem:[#allocation7 + $0x38c] ss:$28 sps:$4 sm:$0xff]   ;;  %v8116_v1 = vld [vmem:[#allocation7 + $0x5b4] ss:$28 sps:$4 sm:$0xff]  }
 0x1f4   :  { %v2963_v52 = vmax.f32 %v7393_v63, 0.0  ;;  %v8096_v55 = vld [vmem:[#allocation7 + $0x508] ss:$28 sps:$4 sm:$0xff]   ;;  %v8108_v63 = vld [vmem:[#allocation7 + $0x578] ss:$28 sps:$4 sm:$0xff]  }
 0x1f5   :  { %v2964_v3 = vmax.f32 %v7395_v2, 0.0  ;;  %5351 = vmatpush1.bf16.msra.mxu0 %v8045_v57  ;;  %v8099_v57 = vld [vmem:[#allocation7 + $0x350] ss:$28 sps:$4 sm:$0xff]   ;;  %v8105_v61 = vld [vmem:[#allocation7 + $0x388] ss:$28 sps:$4 sm:$0xff]  }
 0x1f6   :  { %5352 = vmatprep.subr.bf16.mxu0 %v8053_v60  ;;  %v8862_v9 = vpack.c.bf16 %v2963_v52, %v2963_v52  ;;  %v8110_v60 = vld [vmem:[#allocation7 + $0x57c] ss:$28 sps:$4 sm:$0xff]   ;;  %v8113_v62 = vld [vmem:[#allocation7 + $0x3c4] ss:$28 sps:$4 sm:$0xff]  }
 0x1f7   :  { %v8860_v5 = vpack.c.bf16 %v2964_v3, %v2964_v3  ;;  %v8111_v2 = vld [vmem:[#allocation7 + $0x3c0] ss:$28 sps:$4 sm:$0xff]   ;;  %v8114_v3 = vld [vmem:[#allocation7 + $0x5b0] ss:$28 sps:$4 sm:$0xff]  }
 0x1f8   :  { %v8119_v52 = vld [vmem:[#allocation7 + $0x3fc] ss:$28 sps:$4 sm:$0xff]  }
 0x1f9   :  { %5206 = vmatprep.mubr.bf16.mxu1 %v8860_v5  ;;  %5353 = vmatpush1.bf16.msra.mxu0 %v8051_v4  ;;  %v8122_v4 = vld [vmem:[#allocation7 + $0x5ec] ss:$28 sps:$4 sm:$0xff]  }
 0x1fa   :  { %5370 = vmatprep.mubr.bf16.mxu0 %v8860_v5  ;;  %5207 = vmatmul.mubr.bf16.vlgmr.msra.gmra.mrb[28].mxu1 %v8862_v9 }
 0x1fb   :  { %5216 = vmatpush1.bf16.msra.mxu1 %v8054_v6  ;;  %5354 = vmatprep.subr.bf16.mxu0 %v8059_v7  ;;  %v8117_v6 = vld [vmem:[#allocation7 + $0x3f8] ss:$28 sps:$4 sm:$0xff]  }
 0x1fc   :  { %5217 = vmatprep.subr.bf16.mxu1 %v8062_v10  ;;  %v8125_v7 = vld [vmem:[#allocation7 + $0x434] ss:$28 sps:$4 sm:$0xff]   ;;  %v8120_v10 = vld [vmem:[#allocation7 + $0x5e8] ss:$28 sps:$4 sm:$0xff]  }
 0x1fd   :  { %5355 = vmatpush1.bf16.msra.mxu0 %v8057_v48  ;;  %v8128_v48 = vld [vmem:[#allocation7 + $0x624] ss:$28 sps:$4 sm:$0xff]  }
 0x1fe   :  { %5356 = vmatprep.subr.bf16.mxu0 %v8065_v50  ;;  %v8123_v50 = vld [vmem:[#allocation7 + $0x430] ss:$28 sps:$4 sm:$0xff]  }
 0x1ff   :  { %5218 = vmatpush1.bf16.msra.mxu1 %v8060_v12  ;;  %v8131_v12 = vld [vmem:[#allocation7 + $0x46c] ss:$28 sps:$4 sm:$0xff]  }
 0x200   :  { %v8871_v21 = vpop.f32.mrb[4].mxu1  ;;  %5219 = vmatprep.subr.bf16.mxu1 %v8068_v13  ;;  %v8126_v13 = vld [vmem:[#allocation7 + $0x620] ss:$28 sps:$4 sm:$0xff]  }
 0x201   :  { %v2634_v24 = vpop.f32.mrb[5].mxu1  ;;  %5357 = vmatpush1.bf16.msra.mxu0 %v8063_v16  ;;  %v8129_v16 = vld [vmem:[#allocation7 + $0x468] ss:$28 sps:$4 sm:$0xff]  }
 0x202   :  { %v7397_v25 = vadd.f32 %v2634_v24, %v499_v14  ;;  %v2636_v26 = vpop.f32.mrb[6].mxu1  ;;  %5358 = vmatprep.subr.bf16.mxu0 %v8071_v20  ;;  %v8134_v14 = vld [vmem:[#allocation7 + $0x65c] ss:$28 sps:$4 sm:$0xff]   ;;  %v494_v20 = vsub.s32 2, %v8846_v35 }
 0x203   :  { %v2637_v29 = vpop.f32.mrb[7].mxu1  ;;  %5220 = vmatpush1.bf16.msra.mxu1 %v8066_v17 }
 0x204   :  { %v2966_v32 = vmax.f32 %v7397_v25, 0.0  ;;  %5221 = vmatprep.subr.bf16.mxu1 %v8074_v22  ;;  %v8137_v22 = vld [vmem:[#allocation7 + $0x4a4] ss:$28 sps:$4 sm:$0xff]   ;;  %v8132_v25 = vld [vmem:[#allocation7 + $0x658] ss:$28 sps:$4 sm:$0xff]  }
 0x205   :  { %5359 = vmatpush1.bf16.msra.mxu0 %v8069_v27 }
 0x206   :  { %v8873_v33 = vpack.c.bf16 %v2966_v32, %v2966_v32  ;;  %5360 = vmatprep.subr.bf16.mxu0 %v8077_v31  ;;  %v8135_v31 = vld [vmem:[#allocation7 + $0x4a0] ss:$28 sps:$4 sm:$0xff]  }
 0x207   :  { %5222 = vmatpush1.bf16.msra.mxu1 %v8072_v28  ;;  %v8140_v28 = vld [vmem:[#allocation7 + $0x694] ss:$28 sps:$4 sm:$0xff]   ;;  %v8143_v32 = vld [vmem:[#allocation7 + $0x4dc] ss:$28 sps:$4 sm:$0xff]  }
 0x208   :  { %5247 = vmatprep.mubr.bf16.mxu1 %v8873_v33  ;;  %v8876_v39 = vpop.f32.mrb[8].mxu1  ;;  %5223 = vmatprep.subr.bf16.mxu1 %v8080_v18  ;;  %v495_v18 = vrot.slane %v8849_v23, %v494_v20 }
 0x209   :  { %v8878_v41 = vpop.f32.mrb[9].mxu1  ;;  %5361 = vmatpush1.bf16.msra.mxu0 %v8075_v34  ;;  %v8138_v34 = vld [vmem:[#allocation7 + $0x690] ss:$28 sps:$4 sm:$0xff]  }
 0x20a   :  { %v2800_v43 = vpop.f32.mrb[10].mxu1  ;;  %5362 = vmatprep.subr.bf16.mxu0 %v8083_v37  ;;  %v7396_v37 = vadd.f32 %v8871_v21, %v495_v18  ;;  %v8182_v21 = vld [vmem:[#allocation7 + $0x73c] ss:$28 sps:$4 sm:$0xff]   ;;  %v8171_v18 = vld [vmem:[#allocation7 + $0x6d0] ss:$28 sps:$4 sm:$0xff]  }
 0x20b   :  { %v2801_v15 = vpop.f32.mrb[11].mxu1  ;;  %5224 = vmatpush1.bf16.msra.mxu1 %v8078_v36  ;;  %v8146_v36 = vld [vmem:[#allocation7 + $0x6cc] ss:$28 sps:$4 sm:$0xff]  }
 0x20c   :  { %5225 = vmatprep.subr.bf16.mxu1 %v8086_v38  ;;  %v8141_v38 = vld [vmem:[#allocation7 + $0x4d8] ss:$28 sps:$4 sm:$0xff]   ;;  %v2965_v43 = vmax.f32 %v7396_v37, 0.0  ;;  %v8152_v15 = vld [vmem:[#allocation7 + $0x54c] ss:$28 sps:$4 sm:$0xff]  }
 0x20d   :  { %5363 = vmatpush1.bf16.msra.mxu0 %v8081_v8  ;;  %v8144_v8 = vld [vmem:[#allocation7 + $0x6c8] ss:$28 sps:$4 sm:$0xff]  }
 0x20e   :  { %5364 = vmatprep.subr.bf16.mxu0 %v8089_v44  ;;  %v8176_v44 = vld [vmem:[#allocation7 + $0x704] ss:$28 sps:$4 sm:$0xff]  }
 0x20f   :  { %5226 = vmatpush1.bf16.msra.mxu1 %v8084_v42  ;;  %v8149_v42 = vld [vmem:[#allocation7 + $0x514] ss:$28 sps:$4 sm:$0xff]   ;;  %v8177_v37 = vld [vmem:[#allocation7 + $0x708] ss:$28 sps:$4 sm:$0xff]  }
 0x210   :  { %5227 = vmatprep.subr.bf16.mxu1 %v8092_v45  ;;  %v8147_v45 = vld [vmem:[#allocation7 + $0x510] ss:$28 sps:$4 sm:$0xff]  }
 0x211   :  { %5365 = vmatpush1.bf16.msra.mxu0 %v8087_v46  ;;  %v8174_v46 = vld [vmem:[#allocation7 + $0x700] ss:$28 sps:$4 sm:$0xff]  }
 0x212   :  { %5366 = vmatprep.subr.bf16.mxu0 %v8095_v51  ;;  %v8150_v51 = vld [vmem:[#allocation7 + $0x548] ss:$28 sps:$4 sm:$0xff]  }
 0x213   :  { %5228 = vmatpush1.bf16.msra.mxu1 %v8090_v47  ;;  %v8889_v47 = vpack.c.bf16 %v2965_v43, %v2965_v43  ;;  %v8183_v43 = vld [vmem:[#allocation7 + $0x740] ss:$28 sps:$4 sm:$0xff]  }
 0x214   :  { %5229 = vmatprep.subr.bf16.mxu1 %v8098_v53  ;;  %v8155_v53 = vld [vmem:[#allocation7 + $0x584] ss:$28 sps:$4 sm:$0xff]  }
 0x215   :  { %5367 = vmatpush1.bf16.msra.mxu0 %v8093_v19  ;;  %v8180_v19 = vld [vmem:[#allocation7 + $0x738] ss:$28 sps:$4 sm:$0xff]  }
 0x216   :  { %5368 = vmatprep.subr.bf16.mxu0 %v8101_v54  ;;  %v8188_v54 = vld [vmem:[#allocation7 + $0x774] ss:$28 sps:$4 sm:$0xff]  }
 0x217   :  { %5230 = vmatpush1.bf16.msra.mxu1 %v8096_v55  ;;  %v8153_v55 = vld [vmem:[#allocation7 + $0x580] ss:$28 sps:$4 sm:$0xff]  }
 0x218   :  { %5231 = vmatprep.subr.bf16.mxu1 %v8104_v56  ;;  %v8158_v56 = vld [vmem:[#allocation7 + $0x5bc] ss:$28 sps:$4 sm:$0xff]  }
 0x219   :  { %5369 = vmatpush1.bf16.msra.mxu0 %v8099_v57  ;;  %v510_v57 = vsub.s32 6, %v8846_v35 }
 0x21a   :  { %5379 = vmatprep.subr.bf16.mxu0 %v8107_v58  ;;  %v8186_v58 = vld [vmem:[#allocation7 + $0x770] ss:$28 sps:$4 sm:$0xff]  }
 0x21b   :  { %5232 = vmatpush1.bf16.msra.mxu1 %v8102_v59  ;;  %v8194_v59 = vld [vmem:[#allocation7 + $0x7ac] ss:$28 sps:$4 sm:$0xff]  }
 0x21c   :  { %5371 = vmatmul.mubr.bf16.vlgmr.msra.gmra.mrb[8].mxu0 %v8862_v9  ;;  %5233 = vmatprep.subr.bf16.mxu1 %v8110_v60  ;;  %v8156_v60 = vld [vmem:[#allocation7 + $0x5b8] ss:$28 sps:$4 sm:$0xff]  }
 0x21d   :  { %5380 = vmatpush1.bf16.msra.mxu0 %v8105_v61  ;;  %5411 = vmatprep.mubr.bf16.mxu0 %v8873_v33  ;;  %v8161_v61 = vld [vmem:[#allocation7 + $0x5f4] ss:$28 sps:$4 sm:$0xff]  }
 0x21e   :  { %5381 = vmatprep.subr.bf16.mxu0 %v8113_v62  ;;  %v511_v62 = vrot.slane %v8849_v23, %v510_v57 }
 0x21f   :  { %5234 = vmatpush1.bf16.msra.mxu1 %v8108_v63  ;;  %v8192_v63 = vld [vmem:[#allocation7 + $0x7a8] ss:$28 sps:$4 sm:$0xff]  }
 0x220   :  { %5235 = vmatprep.subr.bf16.mxu1 %v8116_v1  ;;  %v8200_v1 = vld [vmem:[#allocation7 + $0x7e4] ss:$28 sps:$4 sm:$0xff]  }
 0x221   :  { %5382 = vmatpush1.bf16.msra.mxu0 %v8111_v2  ;;  %v8159_v2 = vld [vmem:[#allocation7 + $0x5f0] ss:$28 sps:$4 sm:$0xff]  }
 0x222   :  { %5383 = vmatprep.subr.bf16.mxu0 %v8119_v52  ;;  %v8164_v52 = vld [vmem:[#allocation7 + $0x62c] ss:$28 sps:$4 sm:$0xff]  }
 0x223   :  { %5236 = vmatpush1.bf16.msra.mxu1 %v8114_v3 }
 0x224   :  { %5237 = vmatprep.subr.bf16.mxu1 %v8122_v4 }
 0x225   :  { %5384 = vmatpush1.bf16.msra.mxu0 %v8117_v6  ;;  %v8198_v6 = vld [vmem:[#allocation7 + $0x7e0] ss:$28 sps:$4 sm:$0xff]  }
 0x226   :  { %5385 = vmatprep.subr.bf16.mxu0 %v8125_v7 }
 0x227   :  { %5238 = vmatpush1.bf16.msra.mxu1 %v8120_v10  ;;  %v8206_v10 = vld [vmem:[#allocation7 + $0x81c] ss:$28 sps:$4 sm:$0xff]  }
 0x228   :  { %v7186_v17 = vpop.f32.mrb[12].mxu1  ;;  %5239 = vmatprep.subr.bf16.mxu1 %v8128_v48  ;;  %v8162_v48 = vld [vmem:[#allocation7 + $0x628] ss:$28 sps:$4 sm:$0xff]  }
 0x229   :  { %v7187_v24 = vpop.f32.mrb[13].mxu1  ;;  %5386 = vmatpush1.bf16.msra.mxu0 %v8123_v50 }
 0x22a   :  { %v8883_v26 = vadd.f32 %v7187_v24, %v7186_v17  ;;  %v7189_v27 = vpop.f32.mrb[14].mxu1  ;;  %5387 = vmatprep.subr.bf16.mxu0 %v8131_v12  ;;  %v8167_v12 = vld [vmem:[#allocation7 + $0x664] ss:$28 sps:$4 sm:$0xff]   ;;  %v8212_v17 = vld [vmem:[#allocation7 + $0x854] ss:$28 sps:$4 sm:$0xff]  }
 0x22b   :  { %v7190_v29 = vpop.f32.mrb[15].mxu1  ;;  %5240 = vmatpush1.bf16.msra.mxu1 %v8126_v13  ;;  %v8170_v24 = vld [vmem:[#allocation7 + $0x69c] ss:$28 sps:$4 sm:$0xff]  }
 0x22c   :  { %5241 = vmatprep.subr.bf16.mxu1 %v8134_v14  ;;  %v2838_v3 = vadd.f32 %v8883_v26, %v511_v62  ;;  %v8218_v26 = vld [vmem:[#allocation7 + $0x88c] ss:$28 sps:$4 sm:$0xff]   ;;  %v8168_v27 = vld [vmem:[#allocation7 + $0x698] ss:$28 sps:$4 sm:$0xff]  }
 0x22d   :  { %5388 = vmatpush1.bf16.msra.mxu0 %v8129_v16  ;;  %v8204_v16 = vld [vmem:[#allocation7 + $0x818] ss:$28 sps:$4 sm:$0xff]   ;;  %v8216_v29 = vld [vmem:[#allocation7 + $0x888] ss:$28 sps:$4 sm:$0xff]  }
 0x22e   :  { %5389 = vmatprep.subr.bf16.mxu0 %v8137_v22  ;;  %v8165_v22 = vld [vmem:[#allocation7 + $0x660] ss:$28 sps:$4 sm:$0xff]   ;;  %v8201_v62 = vld [vmem:[#allocation7 + $0x7e8] ss:$28 sps:$4 sm:$0xff]  }
 0x22f   :  { %5242 = vmatpush1.bf16.msra.mxu1 %v8132_v25  ;;  %v8210_v25 = vld [vmem:[#allocation7 + $0x850] ss:$28 sps:$4 sm:$0xff]  }
 0x230   :  { %5243 = vmatprep.subr.bf16.mxu1 %v8140_v28  ;;  %v8173_v28 = vld [vmem:[#allocation7 + $0x6d4] ss:$28 sps:$4 sm:$0xff]  }
 0x231   :  { %5390 = vmatpush1.bf16.msra.mxu0 %v8135_v31  ;;  %v8224_v31 = vld [vmem:[#allocation7 + $0x8c4] ss:$28 sps:$4 sm:$0xff]  }
 0x232   :  { %5391 = vmatprep.subr.bf16.mxu0 %v8143_v32  ;;  %v8179_v32 = vld [vmem:[#allocation7 + $0x70c] ss:$28 sps:$4 sm:$0xff]  }
 0x233   :  { %5244 = vmatpush1.bf16.msra.mxu1 %v8138_v34  ;;  %v8222_v34 = vld [vmem:[#allocation7 + $0x8c0] ss:$28 sps:$4 sm:$0xff]  }
 0x234   :  { %5245 = vmatprep.subr.bf16.mxu1 %v8146_v36  ;;  %v8230_v36 = vld [vmem:[#allocation7 + $0x8fc] ss:$28 sps:$4 sm:$0xff]  }
 0x235   :  { %5392 = vmatpush1.bf16.msra.mxu0 %v8141_v38  ;;  %v8185_v38 = vld [vmem:[#allocation7 + $0x744] ss:$28 sps:$4 sm:$0xff]  }
 0x236   :  { %5393 = vmatprep.subr.bf16.mxu0 %v8149_v42  ;;  %v8236_v42 = vld [vmem:[#allocation7 + $0x934] ss:$28 sps:$4 sm:$0xff]  }
 0x237   :  { %5246 = vmatpush1.bf16.msra.mxu1 %v8144_v8  ;;  %v8228_v8 = vld [vmem:[#allocation7 + $0x8f8] ss:$28 sps:$4 sm:$0xff]  }
 0x238   :  { %5256 = vmatprep.subr.bf16.mxu1 %v8176_v44  ;;  %v8191_v44 = vld [vmem:[#allocation7 + $0x77c] ss:$28 sps:$4 sm:$0xff]  }
 0x239   :  { %5394 = vmatpush1.bf16.msra.mxu0 %v8147_v45  ;;  %v8234_v45 = vld [vmem:[#allocation7 + $0x930] ss:$28 sps:$4 sm:$0xff]  }
 0x23a   :  { %5248 = vmatmul.mubr.bf16.vlgmr.msra.gmra.mrb[28].mxu1 %v8889_v47  ;;  %5395 = vmatprep.subr.bf16.mxu0 %v8152_v15  ;;  %v8242_v15 = vld [vmem:[#allocation7 + $0x96c] ss:$28 sps:$4 sm:$0xff]  }
 0x23b   :  { %5257 = vmatpush1.bf16.msra.mxu1 %v8174_v46  ;;  %v8189_v46 = vld [vmem:[#allocation7 + $0x778] ss:$28 sps:$4 sm:$0xff]  }
 0x23c   :  { %5258 = vmatprep.subr.bf16.mxu1 %v8182_v21  ;;  %v8197_v21 = vld [vmem:[#allocation7 + $0x7b4] ss:$28 sps:$4 sm:$0xff]  }
 0x23d   :  { %5396 = vmatpush1.bf16.msra.mxu0 %v8150_v51  ;;  %v8240_v51 = vld [vmem:[#allocation7 + $0x968] ss:$28 sps:$4 sm:$0xff]  }
 0x23e   :  { %5397 = vmatprep.subr.bf16.mxu0 %v8155_v53  ;;  %v8248_v53 = vld [vmem:[#allocation7 + $0x9a4] ss:$28 sps:$4 sm:$0xff]  }
 0x23f   :  { %5259 = vmatpush1.bf16.msra.mxu1 %v8180_v19  ;;  %v8195_v19 = vld [vmem:[#allocation7 + $0x7b0] ss:$28 sps:$4 sm:$0xff]  }
 0x240   :  { %5260 = vmatprep.subr.bf16.mxu1 %v8188_v54  ;;  %v8203_v54 = vld [vmem:[#allocation7 + $0x7ec] ss:$28 sps:$4 sm:$0xff]  }
 0x241   :  { %5398 = vmatpush1.bf16.msra.mxu0 %v8153_v55 }
 0x242   :  { %5399 = vmatprep.subr.bf16.mxu0 %v8158_v56  ;;  %v8246_v56 = vld [vmem:[#allocation7 + $0x9a0] ss:$28 sps:$4 sm:$0xff]  }
 0x243   :  { %5261 = vmatpush1.bf16.msra.mxu1 %v8186_v58 }
 0x244   :  { %5262 = vmatprep.subr.bf16.mxu1 %v8194_v59  ;;  %v8254_v59 = vld [vmem:[#allocation7 + $0x9dc] ss:$28 sps:$4 sm:$0xff]  }
 0x245   :  { %5400 = vmatpush1.bf16.msra.mxu0 %v8156_v60 }
 0x246   :  { %5401 = vmatprep.subr.bf16.mxu0 %v8161_v61 }
 0x247   :  { %5263 = vmatpush1.bf16.msra.mxu1 %v8192_v63 }
 0x248   :  { %v7208_v4 = vpop.f32.mrb[16].mxu1  ;;  %5264 = vmatprep.subr.bf16.mxu1 %v8200_v1  ;;  %v8209_v1 = vld [vmem:[#allocation7 + $0x824] ss:$28 sps:$4 sm:$0xff]  }
 0x249   :  { %v7209_v7 = vpop.f32.mrb[17].mxu1  ;;  %5402 = vmatpush1.bf16.msra.mxu0 %v8159_v2 }
 0x24a   :  { %v7210_v50 = vadd.f32 %v7209_v7, %v7208_v4  ;;  %v7211_v23 = vpop.f32.mrb[18].mxu1  ;;  %5403 = vmatprep.subr.bf16.mxu0 %v8164_v52  ;;  %v8252_v52 = vld [vmem:[#allocation7 + $0x9d8] ss:$28 sps:$4 sm:$0xff]   ;;  %v8207_v4 = vld [vmem:[#allocation7 + $0x820] ss:$28 sps:$4 sm:$0xff]  }
 0x24b   :  { %v7212_v13 = vpop.f32.mrb[19].mxu1  ;;  %5265 = vmatpush1.bf16.msra.mxu1 %v8198_v6  ;;  %v8215_v6 = vld [vmem:[#allocation7 + $0x85c] ss:$28 sps:$4 sm:$0xff]  }
 0x24c   :  { %v8897_v14 = vadd.f32 %v7210_v50, %v2838_v3  ;;  %5266 = vmatprep.subr.bf16.mxu1 %v8206_v10  ;;  %v8260_v3 = vld [vmem:[#allocation7 + $0xa14] ss:$28 sps:$4 sm:$0xff]   ;;  %v8266_v50 = vld [vmem:[#allocation7 + $0xa4c] ss:$28 sps:$4 sm:$0xff]  }
 0x24d   :  { %5404 = vmatpush1.bf16.msra.mxu0 %v8162_v48  ;;  %v8258_v10 = vld [vmem:[#allocation7 + $0xa10] ss:$28 sps:$4 sm:$0xff]  }
 0x24e   :  { %5405 = vmatprep.subr.bf16.mxu0 %v8167_v12  ;;  %v8213_v12 = vld [vmem:[#allocation7 + $0x858] ss:$28 sps:$4 sm:$0xff]  }
 0x24f   :  { %5267 = vmatpush1.bf16.msra.mxu1 %v8204_v16 }
 0x250   :  { %5268 = vmatprep.subr.bf16.mxu1 %v8212_v17  ;;  %v8264_v17 = vld [vmem:[#allocation7 + $0xa48] ss:$28 sps:$4 sm:$0xff]  }
 0x251   :  { %5406 = vmatpush1.bf16.msra.mxu0 %v8165_v22  ;;  %v8272_v22 = vld [vmem:[#allocation7 + $0xa84] ss:$28 sps:$4 sm:$0xff]  }
 0x252   :  { %5407 = vmatprep.subr.bf16.mxu0 %v8170_v24  ;;  %v8219_v24 = vld [vmem:[#allocation7 + $0x890] ss:$28 sps:$4 sm:$0xff]  }
 0x253   :  { %5269 = vmatpush1.bf16.msra.mxu1 %v8210_v25  ;;  %v8227_v25 = vld [vmem:[#allocation7 + $0x8cc] ss:$28 sps:$4 sm:$0xff]  }
 0x254   :  { %5270 = vmatprep.subr.bf16.mxu1 %v8218_v26  ;;  %v8225_v26 = vld [vmem:[#allocation7 + $0x8c8] ss:$28 sps:$4 sm:$0xff]  }
 0x255   :  { %5408 = vmatpush1.bf16.msra.mxu0 %v8168_v27  ;;  %v8233_v27 = vld [vmem:[#allocation7 + $0x904] ss:$28 sps:$4 sm:$0xff]  }
 0x256   :  { %5409 = vmatprep.subr.bf16.mxu0 %v8173_v28  ;;  %v8231_v28 = vld [vmem:[#allocation7 + $0x900] ss:$28 sps:$4 sm:$0xff]  }
 0x257   :  { %5271 = vmatpush1.bf16.msra.mxu1 %v8216_v29  ;;  %v8239_v29 = vld [vmem:[#allocation7 + $0x93c] ss:$28 sps:$4 sm:$0xff]  }
 0x258   :  { %5272 = vmatprep.subr.bf16.mxu1 %v8224_v31  ;;  %v8237_v31 = vld [vmem:[#allocation7 + $0x938] ss:$28 sps:$4 sm:$0xff]  }
 0x259   :  { %5410 = vmatpush1.bf16.msra.mxu0 %v8171_v18  ;;  %v8245_v18 = vld [vmem:[#allocation7 + $0x974] ss:$28 sps:$4 sm:$0xff]  }
 0x25a   :  { %5420 = vmatprep.subr.bf16.mxu0 %v8179_v32  ;;  %v8243_v32 = vld [vmem:[#allocation7 + $0x970] ss:$28 sps:$4 sm:$0xff]  }
 0x25b   :  { %5273 = vmatpush1.bf16.msra.mxu1 %v8222_v34  ;;  %v8251_v34 = vld [vmem:[#allocation7 + $0x9ac] ss:$28 sps:$4 sm:$0xff]  }
 0x25c   :  { %5412 = vmatmul.mubr.bf16.vlgmr.msra.gmra.mrb[8].mxu0 %v8889_v47  ;;  %5274 = vmatprep.subr.bf16.mxu1 %v8230_v36  ;;  %v8249_v36 = vld [vmem:[#allocation7 + $0x9a8] ss:$28 sps:$4 sm:$0xff]  }
 0x25d   :  { %5421 = vmatpush1.bf16.msra.mxu0 %v8177_v37  ;;  %v8257_v37 = vld [vmem:[#allocation7 + $0x9e4] ss:$28 sps:$4 sm:$0xff]  }
 0x25e   :  { %5422 = vmatprep.subr.bf16.mxu0 %v8185_v38  ;;  %v8255_v38 = vld [vmem:[#allocation7 + $0x9e0] ss:$28 sps:$4 sm:$0xff]  }
 0x25f   :  { %5275 = vmatpush1.bf16.msra.mxu1 %v8228_v8  ;;  %v8263_v8 = vld [vmem:[#allocation7 + $0xa1c] ss:$28 sps:$4 sm:$0xff]  }
 0x260   :  { %5276 = vmatprep.subr.bf16.mxu1 %v8236_v42  ;;  %v8261_v42 = vld [vmem:[#allocation7 + $0xa18] ss:$28 sps:$4 sm:$0xff]  }
 0x261   :  { %5423 = vmatpush1.bf16.msra.mxu0 %v8183_v43  ;;  %v8269_v43 = vld [vmem:[#allocation7 + $0xa54] ss:$28 sps:$4 sm:$0xff]  }
 0x262   :  { %5424 = vmatprep.subr.bf16.mxu0 %v8191_v44  ;;  %v8267_v44 = vld [vmem:[#allocation7 + $0xa50] ss:$28 sps:$4 sm:$0xff]  }
 0x263   :  { %5277 = vmatpush1.bf16.msra.mxu1 %v8234_v45  ;;  %v8275_v45 = vld [vmem:[#allocation7 + $0xa8c] ss:$28 sps:$4 sm:$0xff]  }
 0x264   :  { %5278 = vmatprep.subr.bf16.mxu1 %v8242_v15  ;;  %v502_v15 = vsub.s32 4, %v8846_v35 }
 0x265   :  { %5425 = vmatpush1.bf16.msra.mxu0 %v8189_v46  ;;  %v506_v46 = vsub.s32 5, %v8846_v35  ;;  %v7119_v35 = vld [vmem:[#allocation10 + $0x2] ss:$0 sm:$0xff] }
 0x266   :  { %5426 = vmatprep.subr.bf16.mxu0 %v8197_v21  ;;  %v8522_v21 = vld [vmem:[#allocation10] ss:$4 sm:$0x7f] }
 0x267   :  { %5279 = vmatpush1.bf16.msra.mxu1 %v8240_v51  ;;  %v503_v51 = vrot.slane %v8522_v21, %v502_v15 }
 0x268   :  { %v7230_v55 = vpop.f32.mrb[20].mxu1  ;;  %5280 = vmatprep.subr.bf16.mxu1 %v8248_v53  ;;  %v507_v53 = vrot.slane %v8522_v21, %v506_v46  ;;  %v8318_v21 = vld [vmem:[#allocation7 + $0x1d4] ss:$28 sps:$4 sm:$0xff]  }
 0x269   :  { %v7231_v58 = vpop.f32.mrb[21].mxu1  ;;  %5427 = vmatpush1.bf16.msra.mxu0 %v8195_v19 }
 0x26a   :  { %v7232_v60 = vadd.f32 %v7231_v58, %v7230_v55  ;;  %v7233_v61 = vpop.f32.mrb[22].mxu1  ;;  %5428 = vmatprep.subr.bf16.mxu0 %v8203_v54 }
 0x26b   :  { %v7234_v63 = vpop.f32.mrb[23].mxu1  ;;  %5281 = vmatpush1.bf16.msra.mxu1 %v8246_v56 }
 0x26c   :  { %v2918_v2 = vadd.f32 %v7232_v60, %v8897_v14  ;;  %5282 = vmatprep.subr.bf16.mxu1 %v8254_v59  ;;  %v8221_v14 = vld [vmem:[#allocation7 + $0x894] ss:$28 sps:$4 sm:$0xff]  }
 0x26d   :  { %5429 = vmatpush1.bf16.msra.mxu0 %v8201_v62 }
 0x26e   :  { %5430 = vmatprep.subr.bf16.mxu0 %v8209_v1 }
 0x26f   :  { %5283 = vmatpush1.bf16.msra.mxu1 %v8252_v52  ;;  %v8273_v52 = vld [vmem:[#allocation7 + $0xa88] ss:$28 sps:$4 sm:$0xff]  }
 0x270   :  { %v2957_v7 = vpop.f32.mrb[24].mxu1  ;;  %5284 = vmatprep.subr.bf16.mxu1 %v8260_v3 }
 0x271   :  { %v8901_v48 = vadd.f32 %v2957_v7, %v2918_v2  ;;  %v7378_v23 = vpop.f32.mrb[25].mxu1  ;;  %5431 = vmatpush1.bf16.msra.mxu0 %v8207_v4  ;;  %v8270_v2 = vld [vmem:[#allocation7 + $0xa80] ss:$28 sps:$4 sm:$0xff]   ;;  %v8278_v4 = vld [vmem:[#allocation7 + $0x14] ss:$28 sps:$4 sm:$0xff]  }
 0x272   :  { %v2960_v13 = vpop.f32.mrb[26].mxu1  ;;  %5432 = vmatprep.subr.bf16.mxu0 %v8215_v6  ;;  %v8279_v6 = vld [vmem:[#allocation7 + $0x1d8] ss:$28 sps:$4 sm:$0xff]   ;;  %v8284_v23 = vld [vmem:[#allocation7 + $0x210] ss:$28 sps:$4 sm:$0xff]  }
 0x273   :  { %v7379_v16 = vpop.f32.mrb[27].mxu1  ;;  %5285 = vmatpush1.bf16.msra.mxu1 %v8258_v10  ;;  %v8280_v7 = vld [vmem:[#allocation7 + $0x18] ss:$28 sps:$4 sm:$0xff]   ;;  %v8285_v13 = vld [vmem:[#allocation7 + $0x50] ss:$28 sps:$4 sm:$0xff]  }
 0x274   :  { %5286 = vmatprep.subr.bf16.mxu1 %v8266_v50  ;;  %v8283_v50 = vld [vmem:[#allocation7 + $0x4c] ss:$28 sps:$4 sm:$0xff]   ;;  %v8286_v16 = vld [vmem:[#allocation7 + $0x80] ss:$28 sps:$4 sm:$0xff]  }
 0x275   :  { %5433 = vmatpush1.bf16.msra.mxu0 %v8213_v12  ;;  %v8281_v12 = vld [vmem:[#allocation7 + $0x48] ss:$28 sps:$4 sm:$0xff]  }
 0x276   :  { %5434 = vmatprep.subr.bf16.mxu0 %v8221_v14  ;;  %v8289_v14 = vld [vmem:[#allocation7 + $0x248] ss:$28 sps:$4 sm:$0xff]  }
 0x277   :  { %5287 = vmatpush1.bf16.msra.mxu1 %v8264_v17  ;;  %v8290_v17 = vld [vmem:[#allocation7 + $0x88] ss:$28 sps:$4 sm:$0xff]  }
 0x278   :  { %5297 = vmatprep.subr.bf16.mxu1 %v8272_v22  ;;  %v8293_v22 = vld [vmem:[#allocation7 + $0xbc] ss:$28 sps:$4 sm:$0xff]  }
 0x279   :  { %5435 = vmatpush1.bf16.msra.mxu0 %v8219_v24  ;;  %v8294_v24 = vld [vmem:[#allocation7 + $0x280] ss:$28 sps:$4 sm:$0xff]  }
 0x27a   :  { %5436 = vmatprep.subr.bf16.mxu0 %v8227_v25  ;;  %v8291_v25 = vld [vmem:[#allocation7 + $0xb8] ss:$28 sps:$4 sm:$0xff]  }
 0x27d   :  { %5437 = vmatpush1.bf16.msra.mxu0 %v8225_v26  ;;  %v8295_v26 = vld [vmem:[#allocation7 + $0xc0] ss:$28 sps:$4 sm:$0xff]  }
 0x27e   :  { %5438 = vmatprep.subr.bf16.mxu0 %v8233_v27  ;;  %v8298_v27 = vld [vmem:[#allocation7 + $0xf4] ss:$28 sps:$4 sm:$0xff]  }
 0x281   :  { %5439 = vmatpush1.bf16.msra.mxu0 %v8231_v28  ;;  %v8296_v28 = vld [vmem:[#allocation7 + $0xf0] ss:$28 sps:$4 sm:$0xff]  }
 0x282   :  { %5440 = vmatprep.subr.bf16.mxu0 %v8239_v29  ;;  %v8300_v29 = vld [vmem:[#allocation7 + $0xf8] ss:$28 sps:$4 sm:$0xff]  }
 0x285   :  { %5441 = vmatpush1.bf16.msra.mxu0 %v8237_v31  ;;  %v8303_v31 = vld [vmem:[#allocation7 + $0x12c] ss:$28 sps:$4 sm:$0xff]  }
 0x286   :  { %5442 = vmatprep.subr.bf16.mxu0 %v8245_v18  ;;  %v8304_v18 = vld [vmem:[#allocation7 + $0x2f0] ss:$28 sps:$4 sm:$0xff]  }
 0x289   :  { %5443 = vmatpush1.bf16.msra.mxu0 %v8243_v32  ;;  %v8301_v32 = vld [vmem:[#allocation7 + $0x128] ss:$28 sps:$4 sm:$0xff]  }
 0x28a   :  { %5444 = vmatprep.subr.bf16.mxu0 %v8251_v34  ;;  %v8305_v34 = vld [vmem:[#allocation7 + $0x130] ss:$28 sps:$4 sm:$0xff]  }
 0x28d   :  { %5445 = vmatpush1.bf16.msra.mxu0 %v8249_v36  ;;  %v8308_v36 = vld [vmem:[#allocation7 + $0x164] ss:$28 sps:$4 sm:$0xff]  }
 0x28e   :  { %5446 = vmatprep.subr.bf16.mxu0 %v8257_v37  ;;  %v8309_v37 = vld [vmem:[#allocation7 + $0x328] ss:$28 sps:$4 sm:$0xff]  }
 0x291   :  { %5447 = vmatpush1.bf16.msra.mxu0 %v8255_v38  ;;  %v8306_v38 = vld [vmem:[#allocation7 + $0x160] ss:$28 sps:$4 sm:$0xff]  }
 0x292   :  { %5448 = vmatprep.subr.bf16.mxu0 %v8263_v8  ;;  %v8310_v8 = vld [vmem:[#allocation7 + $0x168] ss:$28 sps:$4 sm:$0xff]  }
 0x295   :  { %5449 = vmatpush1.bf16.msra.mxu0 %v8261_v42  ;;  %v8313_v42 = vld [vmem:[#allocation7 + $0x19c] ss:$28 sps:$4 sm:$0xff]  }
 0x296   :  { %5450 = vmatprep.subr.bf16.mxu0 %v8269_v43  ;;  %v8314_v43 = vld [vmem:[#allocation7 + $0x360] ss:$28 sps:$4 sm:$0xff]  }
 0x299   :  { %5451 = vmatpush1.bf16.msra.mxu0 %v8267_v44  ;;  %v8311_v44 = vld [vmem:[#allocation7 + $0x198] ss:$28 sps:$4 sm:$0xff]  }
 0x29a   :  { %5461 = vmatprep.subr.bf16.mxu0 %v8275_v45  ;;  %v8315_v45 = vld [vmem:[#allocation7 + $0x1a0] ss:$28 sps:$4 sm:$0xff]  }
 0x2af   :  { %v2755_v19 = vpop.f32.mrb[4].mxu0 }
 0x2b0   :  { %v7398_v54 = vadd.f32 %v2755_v19, %v503_v51  ;;  %v2757_v55 = vpop.f32.mrb[5].mxu0  ;;  %v8319_v51 = vld [vmem:[#allocation7 + $0x558] ss:$28 sps:$4 sm:$0xff]  }
 0x2b1   :  { %v7400_v56 = vadd.f32 %v2757_v55, %v507_v53  ;;  %v2759_v58 = vpop.f32.mrb[6].mxu0  ;;  %v8316_v53 = vld [vmem:[#allocation7 + $0x1d0] ss:$28 sps:$4 sm:$0xff]   ;;  %v8320_v19 = vld [vmem:[#allocation7 + $0x398] ss:$28 sps:$4 sm:$0xff]  }
 0x2b2   :  { %v7399_v59 = vadd.f32 %v7398_v54, %v8876_v39  ;;  %v2760_v60 = vpop.f32.mrb[7].mxu0  ;;  %v2969_v39 = vmax.f32 %v8901_v48, 0.0  ;;  %v8288_v48 = vld [vmem:[#allocation7 + $0x84] ss:$28 sps:$4 sm:$0xff]   ;;  %v8323_v54 = vld [vmem:[#allocation7 + $0x20c] ss:$28 sps:$4 sm:$0xff]  }
 0x2b3   :  { %v7401_v61 = vadd.f32 %v7400_v56, %v8878_v41  ;;  %v8276_v41 = vld [vmem:[#allocation7 + $0x10] ss:$28 sps:$4 sm:$0xff]   ;;  %v8321_v56 = vld [vmem:[#allocation7 + $0x208] ss:$28 sps:$4 sm:$0xff]  }
 0x2b4   :  { %v2967_v62 = vmax.f32 %v7399_v59, 0.0  ;;  %v8922_v10 = vpack.c.bf16 %v2969_v39, %v2969_v39  ;;  %v8324_v55 = vld [vmem:[#allocation7 + $0x590] ss:$28 sps:$4 sm:$0xff]   ;;  %v8328_v59 = vld [vmem:[#allocation7 + $0x244] ss:$28 sps:$4 sm:$0xff]  }
 0x2b5   :  { %v2968_v63 = vmax.f32 %v7401_v61, 0.0  ;;  %v8325_v58 = vld [vmem:[#allocation7 + $0x3d0] ss:$28 sps:$4 sm:$0xff]   ;;  %v8329_v60 = vld [vmem:[#allocation7 + $0x5c8] ss:$28 sps:$4 sm:$0xff]  }
 0x2b6   :  { %v8913_v3 = vpack.c.bf16 %v2967_v62, %v2967_v62  ;;  %v8326_v61 = vld [vmem:[#allocation7 + $0x240] ss:$28 sps:$4 sm:$0xff]   ;;  %v8330_v62 = vld [vmem:[#allocation7 + $0x408] ss:$28 sps:$4 sm:$0xff]   ;;  %v8339_v39 = vld [vmem:[#allocation7 + $0x638] ss:$28 sps:$4 sm:$0xff]  }
 0x2b7   :  { %v8911_v1 = vpack.c.bf16 %v2968_v63, %v2968_v63  ;;  %v8333_v63 = vld [vmem:[#allocation7 + $0x27c] ss:$28 sps:$4 sm:$0xff]  }
 0x2b9   :  { %5288 = vmatprep.mubr.bf16.mxu1 %v8911_v1  ;;  %5452 = vmatprep.mubr.bf16.mxu0 %v8911_v1 }
 0x2ba   :  { %5289 = vmatmul.mubr.bf16.vlgmr.msra.gmra.mrb[28].mxu1 %v8913_v3  ;;  %5453 = vmatmul.mubr.bf16.vlgmr.msra.gmra.mrb[8].mxu0 %v8913_v3 }
 0x2bb   :  { %5298 = vmatpush1.bf16.msra.mxu1 %v8270_v2  ;;  %5462 = vmatpush1.bf16.msra.mxu0 %v8273_v52  ;;  %v8334_v2 = vld [vmem:[#allocation7 + $0x600] ss:$28 sps:$4 sm:$0xff]   ;;  %v8331_v52 = vld [vmem:[#allocation7 + $0x278] ss:$28 sps:$4 sm:$0xff]  }
 0x2bc   :  { %5329 = vmatprep.mubr.bf16.mxu1 %v8672_v0  ;;  %5493 = vmatprep.mubr.bf16.mxu0 %v8672_v0 }
 0x2bd   :  { %5502 = vmatprep.subr.bf16.mxu1 %v8278_v4  ;;  %7238 = vmatprep.subr.bf16.mxu0 %v8279_v6  ;;  %v8335_v4 = vld [vmem:[#allocation7 + $0x440] ss:$28 sps:$4 sm:$0xff]   ;;  %v8338_v6 = vld [vmem:[#allocation7 + $0x2b4] ss:$28 sps:$4 sm:$0xff]  }
 0x2c6   :  { %7115 = vmatmul.mubr.msk.bf16.vlgmr.msra.gmra.mrb[28].mxu1 %vm2307_vm0, %v8922_v10  ;;  %7116 = vmatmul.mubr.msk.bf16.vlgmr.msra.gmra.mrb[8].mxu0 %vm2307_vm0, %v8922_v10 }
 0x2c7   :  { %5503 = vmatpush1.bf16.msra.mxu1 %v8276_v41  ;;  %7239 = vmatpush3.bf16.msra.mxu0 %v8280_v7  ;;  %v8336_v41 = vld [vmem:[#allocation7 + $0x2b0] ss:$28 sps:$4 sm:$0xff]   ;;  %v8340_v7 = vld [vmem:[#allocation7 + $0x478] ss:$28 sps:$4 sm:$0xff]  }
 0x2c8   :  { %5534 = vmatprep.mubr.bf16.mxu1 %v8860_v5  ;;  %5698 = vmatprep.mubr.bf16.mxu0 %v8860_v5  ;;  %v8299_v5 = vld [vmem:[#allocation7 + $0x2b8] ss:$28 sps:$4 sm:$0xff]  }
 0x2c9   :  { %5504 = vmatprep.subr.bf16.mxu1 %v8283_v50  ;;  %7240 = vmatprep.subr.bf16.mxu0 %v8284_v23  ;;  %v8343_v50 = vld [vmem:[#allocation7 + $0x2ec] ss:$28 sps:$4 sm:$0xff]  }
 0x2ca   :  { %v8344_v23 = vld [vmem:[#allocation7 + $0x670] ss:$28 sps:$4 sm:$0xff]  }
 0x2cb   :  { %5505 = vmatpush1.bf16.msra.mxu1 %v8281_v12  ;;  %7241 = vmatpush3.bf16.msra.mxu0 %v8285_v13  ;;  %v8341_v12 = vld [vmem:[#allocation7 + $0x2e8] ss:$28 sps:$4 sm:$0xff]   ;;  %v8345_v13 = vld [vmem:[#allocation7 + $0x4b0] ss:$28 sps:$4 sm:$0xff]  }
 0x2cc   :  { %5506 = vmatprep.subr.bf16.mxu1 %v8288_v48  ;;  %7242 = vmatprep.subr.bf16.mxu0 %v8289_v14  ;;  %v8348_v48 = vld [vmem:[#allocation7 + $0x324] ss:$28 sps:$4 sm:$0xff]  }
 0x2cd   :  { %v8349_v14 = vld [vmem:[#allocation7 + $0x6a8] ss:$28 sps:$4 sm:$0xff]  }
 0x2cf   :  { %5507 = vmatpush1.bf16.msra.mxu1 %v8286_v16  ;;  %7243 = vmatpush3.bf16.msra.mxu0 %v8290_v17  ;;  %v8346_v16 = vld [vmem:[#allocation7 + $0x320] ss:$28 sps:$4 sm:$0xff]   ;;  %v8350_v17 = vld [vmem:[#allocation7 + $0x4e8] ss:$28 sps:$4 sm:$0xff]  }
 0x2d0   :  { %5508 = vmatprep.subr.bf16.mxu1 %v8293_v22  ;;  %7244 = vmatprep.subr.bf16.mxu0 %v8294_v24  ;;  %v8353_v22 = vld [vmem:[#allocation7 + $0x35c] ss:$28 sps:$4 sm:$0xff]  }
 0x2d1   :  { %v8354_v24 = vld [vmem:[#allocation7 + $0x6e0] ss:$28 sps:$4 sm:$0xff]  }
 0x2d3   :  { %5509 = vmatpush1.bf16.msra.mxu1 %v8291_v25  ;;  %7245 = vmatpush3.bf16.msra.mxu0 %v8295_v26  ;;  %v8351_v25 = vld [vmem:[#allocation7 + $0x358] ss:$28 sps:$4 sm:$0xff]   ;;  %v8355_v26 = vld [vmem:[#allocation7 + $0x520] ss:$28 sps:$4 sm:$0xff]  }
 0x2d4   :  { %5510 = vmatprep.subr.bf16.mxu1 %v8298_v27  ;;  %7246 = vmatprep.subr.bf16.mxu0 %v8299_v5  ;;  %v8358_v27 = vld [vmem:[#allocation7 + $0x394] ss:$28 sps:$4 sm:$0xff]  }
 0x2d5   :  { %v8359_v5 = vld [vmem:[#allocation7 + $0x8d8] ss:$28 sps:$4 sm:$0xff]  }
 0x2d7   :  { %5511 = vmatpush1.bf16.msra.mxu1 %v8296_v28  ;;  %7247 = vmatpush3.bf16.msra.mxu0 %v8300_v29  ;;  %v8356_v28 = vld [vmem:[#allocation7 + $0x390] ss:$28 sps:$4 sm:$0xff]   ;;  %v8360_v29 = vld [vmem:[#allocation7 + $0x718] ss:$28 sps:$4 sm:$0xff]  }
 0x2d8   :  { %5512 = vmatprep.subr.bf16.mxu1 %v8303_v31  ;;  %7248 = vmatprep.subr.bf16.mxu0 %v8304_v18  ;;  %v8363_v31 = vld [vmem:[#allocation7 + $0x3cc] ss:$28 sps:$4 sm:$0xff]  }
 0x2d9   :  { %v8364_v18 = vld [vmem:[#allocation7 + $0x910] ss:$28 sps:$4 sm:$0xff]  }
 0x2db   :  { %5513 = vmatpush1.bf16.msra.mxu1 %v8301_v32  ;;  %7249 = vmatpush3.bf16.msra.mxu0 %v8305_v34  ;;  %v8361_v32 = vld [vmem:[#allocation7 + $0x3c8] ss:$28 sps:$4 sm:$0xff]   ;;  %v8365_v34 = vld [vmem:[#allocation7 + $0x750] ss:$28 sps:$4 sm:$0xff]  }
 0x2dc   :  { %5514 = vmatprep.subr.bf16.mxu1 %v8308_v36  ;;  %7250 = vmatprep.subr.bf16.mxu0 %v8309_v37  ;;  %v8368_v36 = vld [vmem:[#allocation7 + $0x404] ss:$28 sps:$4 sm:$0xff]  }
 0x2dd   :  { %v8369_v37 = vld [vmem:[#allocation7 + $0x948] ss:$28 sps:$4 sm:$0xff]  }
 0x2df   :  { %5515 = vmatpush1.bf16.msra.mxu1 %v8306_v38  ;;  %7251 = vmatpush3.bf16.msra.mxu0 %v8310_v8  ;;  %v8366_v38 = vld [vmem:[#allocation7 + $0x400] ss:$28 sps:$4 sm:$0xff]   ;;  %v8370_v8 = vld [vmem:[#allocation7 + $0x788] ss:$28 sps:$4 sm:$0xff]  }
 0x2e0   :  { %5516 = vmatprep.subr.bf16.mxu1 %v8313_v42  ;;  %7252 = vmatprep.subr.bf16.mxu0 %v8314_v43  ;;  %v8374_v42 = vld [vmem:[#allocation7 + $0x980] ss:$28 sps:$4 sm:$0xff]   ;;  %v8371_v43 = vld [vmem:[#allocation7 + $0x438] ss:$28 sps:$4 sm:$0xff]  }
 0x2e3   :  { %5517 = vmatpush1.bf16.msra.mxu1 %v8311_v44  ;;  %7253 = vmatpush3.bf16.msra.mxu0 %v8315_v45  ;;  %v8378_v44 = vld [vmem:[#allocation7 + $0x474] ss:$28 sps:$4 sm:$0xff]  }
 0x2e4   :  { %5518 = vmatprep.subr.bf16.mxu1 %v8318_v21  ;;  %7260 = vmatprep.subr.bf16.mxu0 %v8319_v51  ;;  %v8379_v45 = vld [vmem:[#allocation7 + $0x9b8] ss:$28 sps:$4 sm:$0xff]   ;;  %v8376_v21 = vld [vmem:[#allocation7 + $0x470] ss:$28 sps:$4 sm:$0xff]  }
 0x2e5   :  { %v8380_v51 = vld [vmem:[#allocation7 + $0x7f8] ss:$28 sps:$4 sm:$0xff]  }
 0x2e6   :  { %5699 = vmatmul.mubr.bf16.vlgmr.msra.gmra.mrb[12].mxu0 %v8862_v9 }
 0x2e7   :  { %5519 = vmatpush1.bf16.msra.mxu1 %v8316_v53  ;;  %7261 = vmatpush3.bf16.msra.mxu0 %v8320_v19  ;;  %v8383_v53 = vld [vmem:[#allocation7 + $0x4ac] ss:$28 sps:$4 sm:$0xff]  }
 0x2e8   :  { %5738 = vmatprep.mubr.bf16.mxu0 %v8873_v33  ;;  %5520 = vmatprep.subr.bf16.mxu1 %v8323_v54  ;;  %v8384_v19 = vld [vmem:[#allocation7 + $0x9f0] ss:$28 sps:$4 sm:$0xff]   ;;  %v8381_v54 = vld [vmem:[#allocation7 + $0x4a8] ss:$28 sps:$4 sm:$0xff]  }
 0x2e9   :  { %7262 = vmatprep.subr.bf16.mxu0 %v8324_v55  ;;  %v8385_v55 = vld [vmem:[#allocation7 + $0x830] ss:$28 sps:$4 sm:$0xff]  }
 0x2eb   :  { %5521 = vmatpush1.bf16.msra.mxu1 %v8321_v56  ;;  %7263 = vmatpush3.bf16.msra.mxu0 %v8325_v58  ;;  %v8388_v56 = vld [vmem:[#allocation7 + $0x4e4] ss:$28 sps:$4 sm:$0xff]  }
 0x2ec   :  { %5522 = vmatprep.subr.bf16.mxu1 %v8328_v59  ;;  %7264 = vmatprep.subr.bf16.mxu0 %v8329_v60  ;;  %v8389_v58 = vld [vmem:[#allocation7 + $0xa28] ss:$28 sps:$4 sm:$0xff]   ;;  %v8386_v59 = vld [vmem:[#allocation7 + $0x4e0] ss:$28 sps:$4 sm:$0xff]  }
 0x2ed   :  { %v8390_v60 = vld [vmem:[#allocation7 + $0x868] ss:$28 sps:$4 sm:$0xff]  }
 0x2ef   :  { %5523 = vmatpush1.bf16.msra.mxu1 %v8326_v61  ;;  %7265 = vmatpush3.bf16.msra.mxu0 %v8330_v62  ;;  %v8393_v61 = vld [vmem:[#allocation7 + $0x51c] ss:$28 sps:$4 sm:$0xff]  }
 0x2f0   :  { %5524 = vmatprep.subr.bf16.mxu1 %v8333_v63  ;;  %7266 = vmatprep.subr.bf16.mxu0 %v8334_v2  ;;  %v8394_v62 = vld [vmem:[#allocation7 + $0xa60] ss:$28 sps:$4 sm:$0xff]   ;;  %v8391_v63 = vld [vmem:[#allocation7 + $0x518] ss:$28 sps:$4 sm:$0xff]  }
 0x2f1   :  { %v8395_v2 = vld [vmem:[#allocation7 + $0x8a0] ss:$28 sps:$4 sm:$0xff]  }
 0x2f3   :  { %5525 = vmatpush1.bf16.msra.mxu1 %v8331_v52  ;;  %7267 = vmatpush3.bf16.msra.mxu0 %v8335_v4  ;;  %v8398_v52 = vld [vmem:[#allocation7 + $0x554] ss:$28 sps:$4 sm:$0xff]  }
 0x2f4   :  { %5526 = vmatprep.subr.bf16.mxu1 %v8338_v6  ;;  %7268 = vmatprep.subr.bf16.mxu0 %v8339_v39  ;;  %v8396_v4 = vld [vmem:[#allocation7 + $0x550] ss:$28 sps:$4 sm:$0xff]   ;;  %v8402_v39 = vld [vmem:[#allocation7 + $0xa98] ss:$28 sps:$4 sm:$0xff]  }
 0x2f5   :  { %v8401_v6 = vld [vmem:[#allocation7 + $0x58c] ss:$28 sps:$4 sm:$0xff]  }
 0x2f7   :  { %5527 = vmatpush1.bf16.msra.mxu1 %v8336_v41  ;;  %7269 = vmatpush3.bf16.msra.mxu0 %v8340_v7  ;;  %v8469_v41 = vld [vmem:[#allocation8 + $0x40] sm:$0xff]   ;;  %v8399_v7 = vld [vmem:[#allocation7 + $0x588] ss:$28 sps:$4 sm:$0xff]  }
 0x2f8   :  { %5528 = vmatprep.subr.bf16.mxu1 %v8343_v50  ;;  %7270 = vmatprep.subr.bf16.mxu0 %v8344_v23  ;;  %v8405_v50 = vld [vmem:[#allocation7 + $0x5c4] ss:$28 sps:$4 sm:$0xff]  }
 0x2f9   :  { %v8403_v23 = vld [vmem:[#allocation7 + $0x5c0] ss:$28 sps:$4 sm:$0xff]  }
 0x2fb   :  { %5529 = vmatpush1.bf16.msra.mxu1 %v8341_v12  ;;  %7271 = vmatpush3.bf16.msra.mxu0 %v8345_v13  ;;  %v8408_v12 = vld [vmem:[#allocation7 + $0x5fc] ss:$28 sps:$4 sm:$0xff]  }
 0x2fc   :  { %5530 = vmatprep.subr.bf16.mxu1 %v8348_v48  ;;  %7272 = vmatprep.subr.bf16.mxu0 %v8349_v14  ;;  %v8470_v13 = vld [vmem:[#allocation8] sm:$0xff]   ;;  %v8474_v48 = vld [vmem:[#allocation8 + $0x48] sm:$0xff]  }
 0x2fd   :  { %v8406_v14 = vld [vmem:[#allocation7 + $0x5f8] ss:$28 sps:$4 sm:$0xff]  }
 0x2ff   :  { %5531 = vmatpush1.bf16.msra.mxu1 %v8346_v16  ;;  %7273 = vmatpush3.bf16.msra.mxu0 %v8350_v17  ;;  %v8411_v16 = vld [vmem:[#allocation7 + $0x634] ss:$28 sps:$4 sm:$0xff]   ;;  %v8475_v17 = vld [vmem:[#allocation8 + $0x8] sm:$0xff]  }
 0x300   :  { %5532 = vmatprep.subr.bf16.mxu1 %v8353_v22  ;;  %7274 = vmatprep.subr.bf16.mxu0 %v8354_v24  ;;  %v8476_v22 = vld [vmem:[#allocation8 + $0x50] sm:$0xff]  }
 0x301   :  { %v8409_v24 = vld [vmem:[#allocation7 + $0x630] ss:$28 sps:$4 sm:$0xff]  }
 0x303   :  { %5533 = vmatpush1.bf16.msra.mxu1 %v8351_v25  ;;  %7275 = vmatpush3.bf16.msra.mxu0 %v8355_v26  ;;  %v8414_v25 = vld [vmem:[#allocation7 + $0x66c] ss:$28 sps:$4 sm:$0xff]  }
 0x304   :  { %5543 = vmatprep.subr.bf16.mxu1 %v8358_v27  ;;  %7282 = vmatprep.subr.bf16.mxu0 %v8359_v5  ;;  %v8477_v26 = vld [vmem:[#allocation8 + $0x10] sm:$0xff]   ;;  %v8478_v27 = vld [vmem:[#allocation8 + $0x58] sm:$0xff]  }
 0x305   :  { %v8412_v5 = vld [vmem:[#allocation7 + $0x668] ss:$28 sps:$4 sm:$0xff]  }
 0x306   :  { %5535 = vmatmul.mubr.bf16.vlgmr.msra.gmra.mrb[32].mxu1 %v8862_v9  ;;  %5739 = vmatmul.mubr.bf16.vlgmr.msra.gmra.mrb[16].mxu0 %v8889_v47  ;;  %v8373_v9 = vld [vmem:[#allocation7 + $0x43c] ss:$28 sps:$4 sm:$0xff]  }
 0x307   :  { %5544 = vmatpush1.bf16.msra.mxu1 %v8356_v28  ;;  %5575 = vmatprep.mubr.bf16.mxu1 %v8873_v33  ;;  %v8375_v33 = vld [vmem:[#allocation7 + $0x7c0] ss:$28 sps:$4 sm:$0xff]  }
 0x308   :  { %7283 = vmatpush3.bf16.msra.mxu0 %v8360_v29  ;;  %5778 = vmatprep.mubr.bf16.mxu0 %v8911_v1  ;;  %v8417_v28 = vld [vmem:[#allocation7 + $0x6a4] ss:$28 sps:$4 sm:$0xff]   ;;  %v8479_v29 = vld [vmem:[#allocation8 + $0x18] sm:$0xff]  }
 0x309   :  { %5545 = vmatprep.subr.bf16.mxu1 %v8363_v31  ;;  %7284 = vmatprep.subr.bf16.mxu0 %v8364_v18  ;;  %v8482_v31 = vld [vmem:[#allocation8 + $0x60] sm:$0xff]  }
 0x30a   :  { %v8415_v18 = vld [vmem:[#allocation7 + $0x6a0] ss:$28 sps:$4 sm:$0xff]  }
 0x30b   :  { %5546 = vmatpush1.bf16.msra.mxu1 %v8361_v32  ;;  %v8420_v32 = vld [vmem:[#allocation7 + $0x6dc] ss:$28 sps:$4 sm:$0xff]  }
 0x30c   :  { %7285 = vmatpush3.bf16.msra.mxu0 %v8365_v34  ;;  %5547 = vmatprep.subr.bf16.mxu1 %v8368_v36  ;;  %v8483_v34 = vld [vmem:[#allocation8 + $0x20] sm:$0xff]   ;;  %v8486_v36 = vld [vmem:[#allocation8 + $0x68] sm:$0xff]  }
 0x30d   :  { %7286 = vmatprep.subr.bf16.mxu0 %v8369_v37  ;;  %v8418_v37 = vld [vmem:[#allocation7 + $0x6d8] ss:$28 sps:$4 sm:$0xff]  }
 0x30f   :  { %5548 = vmatpush1.bf16.msra.mxu1 %v8366_v38  ;;  %v8423_v38 = vld [vmem:[#allocation7 + $0x714] ss:$28 sps:$4 sm:$0xff]  }
 0x310   :  { %7287 = vmatpush3.bf16.msra.mxu0 %v8370_v8  ;;  %5549 = vmatprep.subr.bf16.mxu1 %v8373_v9  ;;  %v8487_v8 = vld [vmem:[#allocation8 + $0x28] sm:$0xff]   ;;  %v8490_v9 = vld [vmem:[#allocation8 + $0x70] sm:$0xff]  }
 0x311   :  { %7288 = vmatprep.subr.bf16.mxu0 %v8374_v42  ;;  %v8421_v42 = vld [vmem:[#allocation7 + $0x710] ss:$28 sps:$4 sm:$0xff]  }
 0x313   :  { %5550 = vmatpush1.bf16.msra.mxu1 %v8371_v43  ;;  %v8426_v43 = vld [vmem:[#allocation7 + $0x74c] ss:$28 sps:$4 sm:$0xff]  }
 0x314   :  { %7289 = vmatpush3.bf16.msra.mxu0 %v8375_v33  ;;  %5551 = vmatprep.subr.bf16.mxu1 %v8378_v44  ;;  %v8491_v33 = vld [vmem:[#allocation8 + $0x30] sm:$0xff]   ;;  %v8494_v44 = vld [vmem:[#allocation8 + $0x78] sm:$0xff]  }
 0x315   :  { %7290 = vmatprep.subr.bf16.mxu0 %v8379_v45  ;;  %v8424_v45 = vld [vmem:[#allocation7 + $0x748] ss:$28 sps:$4 sm:$0xff]  }
 0x317   :  { %5552 = vmatpush1.bf16.msra.mxu1 %v8376_v21  ;;  %v8429_v21 = vld [vmem:[#allocation7 + $0x784] ss:$28 sps:$4 sm:$0xff]  }
 0x318   :  { %7291 = vmatpush3.bf16.msra.mxu0 %v8380_v51  ;;  %5553 = vmatprep.subr.bf16.mxu1 %v8383_v53  ;;  %v8495_v51 = vld [vmem:[#allocation8 + $0x38] sm:$0xff]   ;;  %v8427_v53 = vld [vmem:[#allocation7 + $0x780] ss:$28 sps:$4 sm:$0xff]  }
 0x319   :  { %7292 = vmatprep.subr.bf16.mxu0 %v8384_v19  ;;  %v8432_v19 = vld [vmem:[#allocation7 + $0x7bc] ss:$28 sps:$4 sm:$0xff]  }
 0x31b   :  { %5554 = vmatpush1.bf16.msra.mxu1 %v8381_v54  ;;  %v8430_v54 = vld [vmem:[#allocation7 + $0x7b8] ss:$28 sps:$4 sm:$0xff]  }
 0x31c   :  { %7293 = vmatpush3.bf16.msra.mxu0 %v8385_v55  ;;  %5555 = vmatprep.subr.bf16.mxu1 %v8388_v56  ;;  %v8435_v55 = vld [vmem:[#allocation7 + $0x7f4] ss:$28 sps:$4 sm:$0xff]   ;;  %v8438_v56 = vld [vmem:[#allocation7 + $0x82c] ss:$28 sps:$4 sm:$0xff]  }
 0x31d   :  { %7294 = vmatprep.subr.bf16.mxu0 %v8389_v58  ;;  %v8441_v58 = vld [vmem:[#allocation7 + $0x864] ss:$28 sps:$4 sm:$0xff]  }
 0x31f   :  { %5556 = vmatpush1.bf16.msra.mxu1 %v8386_v59  ;;  %v8439_v59 = vld [vmem:[#allocation7 + $0x860] ss:$28 sps:$4 sm:$0xff]  }
 0x320   :  { %7295 = vmatpush3.bf16.msra.mxu0 %v8390_v60  ;;  %5557 = vmatprep.subr.bf16.mxu1 %v8393_v61  ;;  %v8444_v60 = vld [vmem:[#allocation7 + $0x89c] ss:$28 sps:$4 sm:$0xff]  }
 0x321   :  { %7296 = vmatprep.subr.bf16.mxu0 %v8394_v62  ;;  %v8442_v61 = vld [vmem:[#allocation7 + $0x898] ss:$28 sps:$4 sm:$0xff]  }
 0x322   :  { %v8447_v62 = vld [vmem:[#allocation7 + $0x8d4] ss:$28 sps:$4 sm:$0xff]  }
 0x323   :  { %5558 = vmatpush1.bf16.msra.mxu1 %v8391_v63  ;;  %v8445_v63 = vld [vmem:[#allocation7 + $0x8d0] ss:$28 sps:$4 sm:$0xff]  }
 0x324   :  { %7297 = vmatpush3.bf16.msra.mxu0 %v8395_v2  ;;  %5559 = vmatprep.subr.bf16.mxu1 %v8398_v52  ;;  %v8450_v2 = vld [vmem:[#allocation7 + $0x90c] ss:$28 sps:$4 sm:$0xff]  }
 0x325   :  { %7380 = vmatprep.subr.bf16.mxu0 %v8673_v30  ;;  %v8448_v52 = vld [vmem:[#allocation7 + $0x908] ss:$28 sps:$4 sm:$0xff]  }
 0x327   :  { %5779 = vmatmul.mubr.bf16.vlgmr.msra.gmra.mrb[20].mxu0 %v8913_v3  ;;  %5560 = vmatpush1.bf16.msra.mxu1 %v8396_v4  ;;  %v8453_v4 = vld [vmem:[#allocation7 + $0x944] ss:$28 sps:$4 sm:$0xff]  }
 0x328   :  { %5561 = vmatprep.subr.bf16.mxu1 %v8401_v6  ;;  %7381 = vmatpush3.bf16.msra.mxu0 %v8402_v39  ;;  %v8451_v6 = vld [vmem:[#allocation7 + $0x940] ss:$28 sps:$4 sm:$0xff]  }
 0x329   :  { %7382 = vmatprep.mubr.msk.bf16.mxu0 %vm8674_vm1, %v8673_v30  ;;  %7306 = vmatprep.subr.bf16.mxu0 %v8469_v41  ;;  %v8456_v39 = vld [vmem:[#allocation7 + $0x97c] ss:$28 sps:$4 sm:$0xff]  }
 0x32a   :  { %v8454_v41 = vld [vmem:[#allocation7 + $0x978] ss:$28 sps:$4 sm:$0xff]  }
 0x32b   :  { %5562 = vmatpush1.bf16.msra.mxu1 %v8399_v7  ;;  %v8459_v7 = vld [vmem:[#allocation7 + $0x9b4] ss:$28 sps:$4 sm:$0xff]  }
 0x32c   :  { %5563 = vmatprep.subr.bf16.mxu1 %v8405_v50  ;;  %v8457_v50 = vld [vmem:[#allocation7 + $0x9b0] ss:$28 sps:$4 sm:$0xff]  }
 0x32f   :  { %7383 = vmatmul.mubr.msk.bf16.vlgmr.msra.gmra.mrb[24].mxu0 %vm2307_vm0, %v8922_v10  ;;  %5564 = vmatpush1.bf16.msra.mxu1 %v8403_v23  ;;  %v8462_v23 = vld [vmem:[#allocation7 + $0x9ec] ss:$28 sps:$4 sm:$0xff]  }
 0x330   :  { %5565 = vmatprep.subr.bf16.mxu1 %v8408_v12  ;;  %7307 = vmatpush3.bf16.msra.mxu0 %v8470_v13  ;;  %v8460_v12 = vld [vmem:[#allocation7 + $0x9e8] ss:$28 sps:$4 sm:$0xff]  }
 0x331   :  { %7308 = vmatprep.subr.bf16.mxu0 %v8474_v48  ;;  %v8465_v13 = vld [vmem:[#allocation7 + $0xa24] ss:$28 sps:$4 sm:$0xff]  }
 0x332   :  { %v8463_v48 = vld [vmem:[#allocation7 + $0xa20] ss:$28 sps:$4 sm:$0xff]  }
 0x333   :  { %5566 = vmatpush1.bf16.msra.mxu1 %v8406_v14  ;;  %v8468_v14 = vld [vmem:[#allocation7 + $0xa5c] ss:$28 sps:$4 sm:$0xff]  }
 0x334   :  { %5567 = vmatprep.subr.bf16.mxu1 %v8411_v16  ;;  %7309 = vmatpush3.bf16.msra.mxu0 %v8475_v17  ;;  %v8466_v16 = vld [vmem:[#allocation7 + $0xa58] ss:$28 sps:$4 sm:$0xff]  }
 0x335   :  { %7310 = vmatprep.subr.bf16.mxu0 %v8476_v22  ;;  %v8473_v17 = vld [vmem:[#allocation7 + $0xa94] ss:$28 sps:$4 sm:$0xff]  }
 0x336   :  { %v8471_v22 = vld [vmem:[#allocation7 + $0xa90] ss:$28 sps:$4 sm:$0xff]  }
 0x337   :  { %5568 = vmatpush1.bf16.msra.mxu1 %v8409_v24  ;;  %v8480_v24 = vld [vmem:[#allocation8 + $0xc0] sm:$0xff]  }
 0x338   :  { %5569 = vmatprep.subr.bf16.mxu1 %v8414_v25  ;;  %7311 = vmatpush3.bf16.msra.mxu0 %v8477_v26  ;;  %v8505_v25 = vld [vmem:[#allocation8 + $0x140] sm:$0xff]  }
 0x339   :  { %7312 = vmatprep.subr.bf16.mxu0 %v8478_v27  ;;  %v8481_v26 = vld [vmem:[#allocation8 + $0x80] sm:$0xff]   ;;  %v8484_v27 = vld [vmem:[#allocation8 + $0xc8] sm:$0xff]  }
 0x33b   :  { %5570 = vmatpush1.bf16.msra.mxu1 %v8412_v5  ;;  %v8485_v5 = vld [vmem:[#allocation8 + $0x88] sm:$0xff]  }
 0x33c   :  { %5571 = vmatprep.subr.bf16.mxu1 %v8417_v28  ;;  %7313 = vmatpush3.bf16.msra.mxu0 %v8479_v29  ;;  %v8948_v28 = vld [vmem:[#allocation10 + $0x1] ss:$4 sm:$0x7f] }
 0x33d   :  { %7314 = vmatprep.subr.bf16.mxu0 %v8482_v31  ;;  %v8488_v29 = vld [vmem:[#allocation8 + $0xd0] sm:$0xff]   ;;  %v3379_v31 = vrot.slane %v8948_v28, %v490_v49 }
 0x33f   :  { %5572 = vmatpush1.bf16.msra.mxu1 %v8415_v18  ;;  %v8492_v18 = vld [vmem:[#allocation8 + $0xd8] sm:$0xff]  }
 0x340   :  { %5573 = vmatprep.subr.bf16.mxu1 %v8420_v32  ;;  %7315 = vmatpush3.bf16.msra.mxu0 %v8483_v34 }
 0x341   :  { %7316 = vmatprep.subr.bf16.mxu0 %v8486_v36 }
 0x343   :  { %5574 = vmatpush1.bf16.msra.mxu1 %v8418_v37 }
 0x344   :  { %5584 = vmatprep.subr.bf16.mxu1 %v8423_v38  ;;  %7317 = vmatpush3.bf16.msra.mxu0 %v8487_v8 }
 0x345   :  { %7318 = vmatprep.subr.bf16.mxu0 %v8490_v9 }
 0x346   :  { %5576 = vmatmul.mubr.bf16.vlgmr.msra.gmra.mrb[32].mxu1 %v8889_v47  ;;  %v8433_v47 = vld [vmem:[#allocation7 + $0x7f0] ss:$28 sps:$4 sm:$0xff]  }
 0x347   :  { %5585 = vmatpush1.bf16.msra.mxu1 %v8421_v42  ;;  %5616 = vmatprep.mubr.bf16.mxu1 %v8911_v1  ;;  %v8436_v1 = vld [vmem:[#allocation7 + $0x828] ss:$28 sps:$4 sm:$0xff]  }
 0x348   :  { %5586 = vmatprep.subr.bf16.mxu1 %v8426_v43  ;;  %7319 = vmatpush3.bf16.msra.mxu0 %v8491_v33  ;;  %v8493_v43 = vld [vmem:[#allocation8 + $0x98] sm:$0xff]  }
 0x349   :  { %7320 = vmatprep.subr.bf16.mxu0 %v8494_v44 }
 0x34b   :  { %5587 = vmatpush1.bf16.msra.mxu1 %v8424_v45  ;;  %v8496_v45 = vld [vmem:[#allocation8 + $0xe0] sm:$0xff]  }
 0x34c   :  { %5588 = vmatprep.subr.bf16.mxu1 %v8429_v21  ;;  %7321 = vmatpush3.bf16.msra.mxu0 %v8495_v51 }
 0x34d   :  { %7350 = vmatprep.subr.bf16.mxu0 %v8505_v25 }
 0x34f   :  { %5589 = vmatpush1.bf16.msra.mxu1 %v8427_v53 }
 0x350   :  { %5590 = vmatprep.subr.bf16.mxu1 %v8432_v19  ;;  %v8497_v19 = vld [vmem:[#allocation8 + $0xa0] sm:$0xff]  }
 0x353   :  { %5591 = vmatpush1.bf16.msra.mxu1 %v8430_v54  ;;  %v8506_v54 = vld [vmem:[#allocation8 + $0x100] sm:$0xff]  }
 0x354   :  { %5592 = vmatprep.subr.bf16.mxu1 %v8435_v55 }
 0x357   :  { %5593 = vmatpush1.bf16.msra.mxu1 %v8433_v47  ;;  %v8498_v47 = vld [vmem:[#allocation8 + $0xe8] sm:$0xff]  }
 0x358   :  { %5594 = vmatprep.subr.bf16.mxu1 %v8438_v56  ;;  %v8507_v56 = vld [vmem:[#allocation8 + $0x148] sm:$0xff]  }
 0x35b   :  { %5595 = vmatpush1.bf16.msra.mxu1 %v8436_v1  ;;  %v8499_v1 = vld [vmem:[#allocation8 + $0xa8] sm:$0xff]  }
 0x35c   :  { %5596 = vmatprep.subr.bf16.mxu1 %v8441_v58  ;;  %v8508_v58 = vld [vmem:[#allocation8 + $0x108] sm:$0xff]  }
 0x35f   :  { %5597 = vmatpush1.bf16.msra.mxu1 %v8439_v59  ;;  %v3383_v59 = vrot.slane %v8948_v28, %v494_v20  ;;  %v8513_v20 = vld [vmem:[#allocation8 + $0x160] sm:$0xff]  }
 0x360   :  { %5598 = vmatprep.subr.bf16.mxu1 %v8444_v60  ;;  %v8500_v60 = vld [vmem:[#allocation8 + $0xf0] sm:$0xff]  }
 0x363   :  { %5599 = vmatpush1.bf16.msra.mxu1 %v8442_v61  ;;  %v8509_v61 = vld [vmem:[#allocation8 + $0x150] sm:$0xff]  }
 0x364   :  { %5600 = vmatprep.subr.bf16.mxu1 %v8447_v62  ;;  %v8501_v62 = vld [vmem:[#allocation8 + $0xb0] sm:$0xff]  }
 0x367   :  { %5601 = vmatpush1.bf16.msra.mxu1 %v8445_v63  ;;  %v8510_v63 = vld [vmem:[#allocation8 + $0x110] sm:$0xff]  }
 0x368   :  { %5602 = vmatprep.subr.bf16.mxu1 %v8450_v2 }
 0x36b   :  { %5603 = vmatpush1.bf16.msra.mxu1 %v8448_v52  ;;  %v8502_v52 = vld [vmem:[#allocation8 + $0xf8] sm:$0xff]  }
 0x36c   :  { %5604 = vmatprep.subr.bf16.mxu1 %v8453_v4  ;;  %v8511_v4 = vld [vmem:[#allocation8 + $0x158] sm:$0xff]  }
 0x36f   :  { %5605 = vmatpush1.bf16.msra.mxu1 %v8451_v6  ;;  %v8503_v6 = vld [vmem:[#allocation8 + $0xb8] sm:$0xff]  }
 0x370   :  { %5606 = vmatprep.subr.bf16.mxu1 %v8456_v39  ;;  %v8512_v39 = vld [vmem:[#allocation8 + $0x118] sm:$0xff]  }
 0x373   :  { %5607 = vmatpush1.bf16.msra.mxu1 %v8454_v41 }
 0x374   :  { %5608 = vmatprep.subr.bf16.mxu1 %v8459_v7  ;;  %v8504_v7 = vld [vmem:[#allocation8 + $0x180] sm:$0xff]  }
 0x377   :  { %5609 = vmatpush1.bf16.msra.mxu1 %v8457_v50 }
 0x378   :  { %5610 = vmatprep.subr.bf16.mxu1 %v8462_v23  ;;  %v8514_v23 = vld [vmem:[#allocation8 + $0x120] sm:$0xff]  }
 0x37b   :  { %5611 = vmatpush1.bf16.msra.mxu1 %v8460_v12  ;;  %v8515_v12 = vld [vmem:[#allocation8 + $0x168] sm:$0xff]  }
 0x37c   :  { %5612 = vmatprep.subr.bf16.mxu1 %v8465_v13  ;;  %v8516_v13 = vld [vmem:[#allocation8 + $0x128] sm:$0xff]  }
 0x37f   :  { %5613 = vmatpush1.bf16.msra.mxu1 %v8463_v48 }
 0x380   :  { %5614 = vmatprep.subr.bf16.mxu1 %v8468_v14 }
 0x383   :  { %5615 = vmatpush1.bf16.msra.mxu1 %v8466_v16 }
 0x384   :  { %5625 = vmatprep.subr.bf16.mxu1 %v8473_v17 }
 0x386   :  { %5617 = vmatmul.mubr.bf16.vlgmr.msra.gmra.mrb[32].mxu1 %v8913_v3  ;;  %v3375_v3 = vrot.slane %v8948_v28, %v486_v40 }
 0x387   :  { %5626 = vmatpush1.bf16.msra.mxu1 %v8471_v22  ;;  %5657 = vmatprep.mubr.bf16.mxu1 %v8672_v0  ;;  %v8489_v0 = vld [vmem:[#allocation8 + $0x90] sm:$0xff]  }
 0x388   :  { %7328 = vmatprep.subr.bf16.mxu1 %v8480_v24  ;;  %v3399_v24 = vrot.slane %v8948_v28, %v510_v57 }
 0x392   :  { %7117 = vmatmul.mubr.msk.bf16.vlgmr.msra.gmra.mrb[32].mxu1 %vm2307_vm0, %v8922_v10  ;;  %v3387_v10 = vrot.slane %v8948_v28, %v498_v11 }
 0x393   :  { %7329 = vmatpush3.bf16.msra.mxu1 %v8481_v26 }
 0x394   :  { %7330 = vmatprep.subr.bf16.mxu1 %v8484_v27 }
 0x397   :  { %7331 = vmatpush3.bf16.msra.mxu1 %v8485_v5 }
 0x398   :  { %7332 = vmatprep.subr.bf16.mxu1 %v8488_v29 }
 0x399   :  { %v5331_v32 = vpop.f32.mrb[28].mxu1  ;;  %v5495_v34 = vpop.f32.mrb[8].mxu0 }
 0x39a   :  { %v7402_v36 = vadd.f32 %v5331_v32, %v3375_v3  ;;  %v5333_v37 = vpop.f32.mrb[29].mxu1  ;;  %v5497_v38 = vpop.f32.mrb[9].mxu0  ;;  %v7404_v2 = vadd.f32 %v5495_v34, %v3383_v59 }
 0x39b   :  { %7333 = vmatpush3.bf16.msra.mxu1 %v8489_v0  ;;  %v7403_v8 = vadd.f32 %v5333_v37, %v3379_v31  ;;  %v7405_v40 = vadd.f32 %v5497_v38, %v3387_v10  ;;  %v5335_v9 = vpop.f32.mrb[30].mxu1  ;;  %v5499_v42 = vpop.f32.mrb[10].mxu0  ;;  %v8517_v0 = vld [vmem:[#allocation8 + $0x170] sm:$0xff]   ;;  %v8519_v10 = vld [vmem:[#allocation8 + $0x178] sm:$0xff]  }
 0x39c   :  { %v5826_v33 = vmax.f32 %v7402_v36, 0.0  ;;  %v5336_v44 = vpop.f32.mrb[31].mxu1  ;;  %v5500_v49 = vpop.f32.mrb[11].mxu0  ;;  %7334 = vmatprep.subr.bf16.mxu1 %v8492_v18  ;;  %v5828_v41 = vmax.f32 %v7404_v2, 0.0  ;;  %v8518_v31 = vld [vmem:[#allocation8 + $0x130] sm:$0xff]   ;;  %v8520_v18 = vld [vmem:[#allocation8 + $0x138] sm:$0xff]  }
 0x39d   :  { %v5827_v21 = vmax.f32 %v7403_v8, 0.0  ;;  %v5829_v11 = vmax.f32 %v7405_v40, 0.0  ;;  %v3391_v49 = vrot.slane %v8948_v28, %v502_v15 }
 0x39e   :  { %v5833_v55 = vpack.c.bf16 %v5826_v33, %v5826_v33  ;;  %v5835_v50 = vpack.c.bf16 %v5828_v41, %v5828_v41 }
 0x39f   :  { %v5834_v51 = vpack.c.bf16 %v5827_v21, %v5827_v21  ;;  %v5836_v53 = vpack.c.bf16 %v5829_v11, %v5829_v11  ;;  %7335 = vmatpush3.bf16.msra.mxu1 %v8493_v43 }
 0x3a0   :  { %7336 = vmatprep.subr.bf16.mxu1 %v8496_v45  ;;  %v3395_v45 = vrot.slane %v8948_v28, %v506_v46 }
 0x3a1   :  { %6272 = vmatprep.mubr.bf16.mxu0 %v5834_v51  ;;  %6312 = vmatprep.mubr.bf16.mxu1 %v5836_v53 }
 0x3a2   :  { %6273 = vmatmul.mubr.bf16.vlgmr.msra.gmra.mrb[28].mxu0 %v5833_v55 }
 0x3a3   :  { %7337 = vmatpush3.bf16.msra.mxu1 %v8497_v19  ;;  %7351 = vmatpush3.bf16.msra.mxu0 %v8506_v54 }
 0x3a4   :  { %7338 = vmatprep.subr.bf16.mxu1 %v8498_v47  ;;  %7352 = vmatprep.subr.bf16.mxu0 %v8507_v56 }
 0x3a7   :  { %7339 = vmatpush3.bf16.msra.mxu1 %v8499_v1  ;;  %7353 = vmatpush3.bf16.msra.mxu0 %v8508_v58 }
 0x3a8   :  { %7340 = vmatprep.subr.bf16.mxu1 %v8500_v60  ;;  %7354 = vmatprep.subr.bf16.mxu0 %v8509_v61 }
 0x3ab   :  { %7341 = vmatpush3.bf16.msra.mxu1 %v8501_v62  ;;  %7355 = vmatpush3.bf16.msra.mxu0 %v8510_v63 }
 0x3ac   :  { %7342 = vmatprep.subr.bf16.mxu1 %v8502_v52  ;;  %7356 = vmatprep.subr.bf16.mxu0 %v8511_v4 }
 0x3af   :  { %7343 = vmatpush3.bf16.msra.mxu1 %v8503_v6  ;;  %7357 = vmatpush3.bf16.msra.mxu0 %v8512_v39 }
 0x3b0   :  { %7386 = vmatprep.subr.bf16.mxu1 %v8673_v30  ;;  %7358 = vmatprep.subr.bf16.mxu0 %v8513_v20 }
 0x3b2   :  { %6313 = vmatmul.mubr.bf16.vlgmr.msra.gmra.mrb[36].mxu1 %v5835_v50 }
 0x3b3   :  { %7387 = vmatpush3.bf16.msra.mxu1 %v8504_v7  ;;  %7388 = vmatprep.mubr.msk.bf16.mxu1 %vm8674_vm1, %v8673_v30 }
 0x3b4   :  { %7359 = vmatpush3.bf16.msra.mxu0 %v8514_v23 }
 0x3b5   :  { %7360 = vmatprep.subr.bf16.mxu0 %v8515_v12 }
 0x3b8   :  { %7361 = vmatpush3.bf16.msra.mxu0 %v8516_v13 }
 0x3b9   :  { %v7254_v48 = vpop.f32.mrb[12].mxu0  ;;  %7362 = vmatprep.subr.bf16.mxu0 %v8517_v0 }
 0x3ba   :  { %v7255_v14 = vpop.f32.mrb[13].mxu0 }
 0x3bb   :  { %v7256_v16 = vadd.f32 %v7255_v14, %v7254_v48  ;;  %v7257_v17 = vpop.f32.mrb[14].mxu0 }
 0x3bc   :  { %v7258_v22 = vpop.f32.mrb[15].mxu0  ;;  %7363 = vmatpush3.bf16.msra.mxu0 %v8518_v31 }
 0x3bd   :  { %v5701_v27 = vadd.f32 %v7256_v16, %v3399_v24  ;;  %7364 = vmatprep.subr.bf16.mxu0 %v8519_v10 }
 0x3c0   :  { %7365 = vmatpush3.bf16.msra.mxu0 %v8520_v18 }
 0x3d9   :  { %v7276_v25 = vpop.f32.mrb[16].mxu0 }
 0x3da   :  { %v7277_v26 = vpop.f32.mrb[17].mxu0 }
 0x3db   :  { %v7278_v5 = vadd.f32 %v7277_v26, %v7276_v25  ;;  %v7279_v29 = vpop.f32.mrb[18].mxu0 }
 0x3dc   :  { %v7280_v3 = vpop.f32.mrb[19].mxu0 }
 0x3dd   :  { %v5741_v30 = vadd.f32 %v7278_v5, %v5701_v27 }
 0x3fa   :  { %v7298_v32 = vpop.f32.mrb[20].mxu0 }
 0x3fb   :  { %v7299_v34 = vpop.f32.mrb[21].mxu0 }
 0x3fc   :  { %v7300_v36 = vadd.f32 %v7299_v34, %v7298_v32  ;;  %v7301_v37 = vpop.f32.mrb[22].mxu0 }
 0x3fd   :  { %v7302_v57 = vpop.f32.mrb[23].mxu0 }
 0x3fe   :  { %v5781_v38 = vadd.f32 %v7300_v36, %v5741_v30 }
 0x402   :  { %v5820_v8 = vpop.f32.mrb[24].mxu0 }
 0x403   :  { %v5821_v40 = vadd.f32 %v5820_v8, %v5781_v38  ;;  %v7384_v9 = vpop.f32.mrb[25].mxu0 }
 0x404   :  { %v5823_v42 = vpop.f32.mrb[26].mxu0 }
 0x405   :  { %v5832_v43 = vmax.f32 %v5821_v40, 0.0  ;;  %v7385_v33 = vpop.f32.mrb[27].mxu0 }
 0x407   :  { %v5839_v44 = vpack.c.bf16 %v5832_v43, %v5832_v43 }
 0x409   :  { %7389 = vmatmul.mubr.msk.bf16.vlgmr.msra.gmra.mrb[40].mxu1 %vm2307_vm0, %v5839_v44 }
 0x465   :  { %v5659_v21 = vpop.f32.mrb[32].mxu1 }
 0x466   :  { %v7406_v11 = vadd.f32 %v5659_v21, %v3391_v49  ;;  %v5661_v51 = vpop.f32.mrb[33].mxu1 }
 0x467   :  { %v7407_v53 = vadd.f32 %v5661_v51, %v3395_v45  ;;  %v5663_v19 = vpop.f32.mrb[34].mxu1 }
 0x468   :  { %v5830_v54 = vmax.f32 %v7406_v11, 0.0  ;;  %v5664_v55 = vpop.f32.mrb[35].mxu1 }
 0x469   :  { %v5831_v47 = vmax.f32 %v7407_v53, 0.0 }
 0x46a   :  { %v5837_v1 = vpack.c.bf16 %v5830_v54, %v5830_v54 }
 0x46b   :  { %v5838_v56 = vpack.c.bf16 %v5831_v47, %v5831_v47 }
 0x46d   :  { %6352 = vmatprep.mubr.bf16.mxu0 %v5838_v56 }
 0x46e   :  { %6353 = vmatmul.mubr.bf16.vlgmr.msra.gmra.mrb[32].mxu0 %v5837_v1 }
 0x475   :  { %v7322_v58 = vpop.f32.mrb[28].mxu0 }
 0x476   :  { %v7323_v59 = vpop.f32.mrb[29].mxu0 }
 0x477   :  { %v7324_v60 = vadd.f32 %v7323_v59, %v7322_v58  ;;  %v7325_v15 = vpop.f32.mrb[30].mxu0 }
 0x478   :  { %v7326_v61 = vpop.f32.mrb[31].mxu0 }
 0x479   :  { %v6275_v28 = vadd.f32 %v7324_v60, %v7119_v35 }
 0x485   :  { %v7344_v62 = vpop.f32.mrb[36].mxu1 }
 0x486   :  { %v7345_v46 = vpop.f32.mrb[37].mxu1 }
 0x487   :  { %v7346_v63 = vadd.f32 %v7345_v46, %v7344_v62  ;;  %v7347_v2 = vpop.f32.mrb[38].mxu1 }
 0x488   :  { %v7348_v52 = vpop.f32.mrb[39].mxu1 }
 0x489   :  { %v6315_v4 = vadd.f32 %v7346_v63, %v6275_v28 }
 0x4dc   :  { %v6394_v6 = vpop.f32.mrb[40].mxu1 }
 0x4dd   :  { %v7390_v39 = vpop.f32.mrb[41].mxu1 }
 0x4de   :  { %v6397_v41 = vpop.f32.mrb[42].mxu1 }
 0x4df   :  { %v7391_v20 = vpop.f32.mrb[43].mxu1 }
 0x541   :  { %v7366_v7 = vpop.f32.mrb[32].mxu0 }
 0x542   :  { %v7367_v50 = vpop.f32.mrb[33].mxu0 }
 0x543   :  { %v7368_v23 = vadd.f32 %v7367_v50, %v7366_v7  ;;  %v7369_v12 = vpop.f32.mrb[34].mxu0 }
 0x544   :  { %v7370_v13 = vpop.f32.mrb[35].mxu0 }
 0x545   :  { %v6355_v48 = vadd.f32 %v7368_v23, %v6315_v4 }
 0x547   :  { %v6395_v14 = vadd.f32 %v6394_v6, %v6355_v48 }
 0x549   :  { %6400 = vst [vmem:[#allocation11] sm:$0xff] %v6395_v14 }
 0x54a   :  { %8644 = shalt.err (!%p8641_p2)
}
 0x54b   :  { %s8645_s3 = scalar_lea.hbm %s8992_s5, 128 }
 0x54c   :  { %p8646_p3 = scmp.ne.s32.totalorder %s8992_s5, %s8645_s3  ;;  %p8649_p4 = scmp.lt.u32.totalorder %s8645_s3, %s8992_s5 }
 0x54e   :  { %p8651_p5 = pnand %p8649_p4, %p8646_p3 }
 0x550   :  { %8654 = shalt.err (!%p8651_p5)
}
 0x551   :  { %6410 = dma.vmem_to_hbm [thread:$0]  %s6408_s29, 128, %s8992_s5, [#allocation4]  }
 0x552   :  { %8661 = dma.done.wait [#allocation4], 128  }
 0x553   :  { %8662 = vsyncadd [#allocation4], 4294967168 }
 0x554   :  { %6414 = vsyncpa [#allocation3], 1 }
 0x555   :  { %6415 = vsyncpa [#allocation6], 1 }
 0x556   :  { %6416 = vsyncpa [#allocation9], 1 }
 0x557   :  { %6417 = vsyncpa [#allocation4], 1 }

</bundles_post_ra>
